<compile_context>
chip_gen: v6e
topology: v6e:2x2x1
jax: 0.10.0
libtpu: 0.0.40
codegen_flags: <defaults>
</compile_context>

<pallas_src>
import numpy as np
import jax
import jax.numpy as jnp
from jax.experimental import pallas as pl
from jax.experimental.pallas import tpu as pltpu

C1, C2, C3 = 8, 16, 32          # conv output channels (fixed by the module)


# --------------------------------------------------------------------------- geometry
def _geom(depth, image_dim):
    """Derived sizes.  Activations live as (d*Hp + h, w*C): rows = (d, h) with a 2-row
    halo per d-plane (Hp = H + 2); lanes = (w, channel).  Sx = conv-output rows actually
    computed ((D-1)*Hp + H); Px = rows of the (d,h)-zero-padded input buffer."""
    D1, H1, W1 = depth, image_dim, image_dim
    D2, H2, W2 = D1 // 2, H1 // 2, W1 // 2
    D3, H3, W3 = D2 // 2, H2 // 2, W2 // 2
    D4, H4, W4 = D3 // 2, H3 // 2, W3 // 2
    Hp1, Hp2, Hp3 = H1 + 2, H2 + 2, H3 + 2
    return dict(
        D1=D1, H1=H1, W1=W1, Hp1=Hp1, S1=(D1 - 1) * Hp1 + H1, P1=(D1 + 2) * Hp1,
        D2=D2, H2=H2, W2=W2, Hp2=Hp2, S2=(D2 - 1) * Hp2 + H2, P2=(D2 + 2) * Hp2,
        D3=D3, H3=H3, W3=W3, Hp3=Hp3, S3=(D3 - 1) * Hp3 + H3, P3=(D3 + 2) * Hp3,
        D4=D4, H4=H4, W4=W4,
    )


def _elems_per_step(n):
    """Batch a few elements per grid step, but keep >= 2 'parallel' steps when possible
    so both TensorCores of a v7x chip get work."""
    for nb in (4, 3, 2):
        if n % nb == 0 and n // nb >= 2:
            return nb
    return 1


# --------------------------------------------------------------------------- weight prep
def _block_conv_weight(w27, w_dim, cin, cout):
    """(27, cin, cout) taps (index kd*9 + kh*3 + kw) -> (9, W*cin, W*cout) block-banded
    matrices.  M[kd*3+kh, wi*cin+ci, wo*cout+co] = w[kd,kh,wi-wo+1,ci,co], zero outside
    the band / outside [0, W) -> this folds the kw taps and the W zero padding into a
    single lane-dense MXU matmul per (kd, kh)."""
    k = w27.reshape(3, 3, 3, cin, cout).astype(jnp.float32)
    P = np.zeros((3, w_dim, w_dim), np.float32)
    for kw in range(3):
        for wo in range(w_dim):
            wi = wo + kw - 1
            if 0 <= wi < w_dim:
                P[kw, wi, wo] = 1.0
    M = jnp.einsum("xab,dhxcf->dhacbf", jnp.asarray(P), k)
    return M.reshape(9, w_dim * cin, w_dim * cout)


def _pool_select(w_in, c):
    """0/1 matrices (2, w_in*c, (w_in//2)*c).  y = max(x @ S[0], x @ S[1]) is the w-pair
    max + lane compaction of MaxPool3d's W reduction (exact: multiplies by 1.0)."""
    w_out = w_in // 2
    S = np.zeros((2, w_in * c, w_out * c), np.float32)
    for k in range(2):
        for wo in range(w_out):
            for cc in range(c):
                S[k, (2 * wo + k) * c + cc, wo * c + cc] = 1.0
    return jnp.asarray(S)


# --------------------------------------------------------------------------- kernel
def _build_kernel(g, nb):
    W1, Hp1, S1 = g["W1"], g["Hp1"], g["S1"]
    D2, H2, W2, Hp2, S2, P2 = g["D2"], g["H2"], g["W2"], g["Hp2"], g["S2"], g["P2"]
    D3, H3, W3, Hp3, S3, P3 = g["D3"], g["H3"], g["W3"], g["Hp3"], g["S3"], g["P3"]
    D4, H4 = g["D4"], g["H4"]
    f32 = jnp.float32

    def conv_taps(read, m_ref):
        """Sum of 9 shifted block matmuls, accumulated in registers."""
        acc = None
        for kd in range(3):
            for kh in range(3):
                part = jnp.dot(read(kd, kh), m_ref[kd * 3 + kh],
                               preferred_element_type=f32)
                acc = part if acc is None else acc + part
        return acc

    def pool_rows(src_ref, base, hp_src, h_out, sel_ref):
        """(d,h) 2x2 max via 4 full-lane stride-2 row loads, then w-pair max + lane
        compaction via two selection matmuls."""
        r = None
        for i in range(2):
            for j in range(2):
                v = src_ref[pl.ds(base + i * hp_src + j, h_out, stride=2), :]
                r = v if r is None else jnp.maximum(r, v)
        return jnp.maximum(jnp.dot(r, sel_ref[0], preferred_element_type=f32),
                           jnp.dot(r, sel_ref[1], preferred_element_type=f32))

    def kernel(x_ref, m1_ref, b1_ref, m2_ref, b2_ref, m3_ref, b3_ref,
               sel1_ref, sel2_ref, sel3_ref, fc1w_ref, fc1b_ref, fc2w_ref, fc2b_ref,
               o_ref,
               conv1_scr, pad2_scr, conv2_scr, pad3_scr, conv3_scr):
        # Halo rows must stay zero; interior rows are fully rewritten for every element.
        pad2_scr[...] = jnp.zeros_like(pad2_scr)
        pad3_scr[...] = jnp.zeros_like(pad3_scr)

        for n in range(nb):                                  # elements in this grid step
            # ---- conv1 + ReLU : rows (d*Hp1 + h), lanes (w*C1 + c) -------------------
            acc = conv_taps(lambda kd, kh: x_ref[n, pl.ds(kd * Hp1 + kh, S1), :], m1_ref)
            conv1_scr[...] = jnp.maximum(acc + b1_ref[...], 0.0)

            # ---- pool1 -> interior of conv2's (d,h)-padded input ---------------------
            for d2 in range(D2):
                p = pool_rows(conv1_scr, 2 * d2 * Hp1, Hp1, H2, sel1_ref)   # (H2, W2*C1)
                pad2_scr[pl.ds((d2 + 1) * Hp2 + 1, H2), :] = p

            # ---- conv2 + ReLU ---------------------------------------------------------
            acc = conv_taps(lambda kd, kh: pad2_scr[pl.ds(kd * Hp2 + kh, S2), :], m2_ref)
            conv2_scr[...] = jnp.maximum(acc + b2_ref[...], 0.0)

            # ---- pool2 -> interior of conv3's padded input -----------------------------
            for d3 in range(D3):
                p = pool_rows(conv2_scr, 2 * d3 * Hp2, Hp2, H3, sel2_ref)   # (H3, W3*C2)
                pad3_scr[pl.ds((d3 + 1) * Hp3 + 1, H3), :] = p

            # ---- conv3 + ReLU ---------------------------------------------------------
            acc = conv_taps(lambda kd, kh: pad3_scr[pl.ds(kd * Hp3 + kh, S3), :], m3_ref)
            conv3_scr[...] = jnp.maximum(acc + b3_ref[...], 0.0)

            # ---- pool3 + fc1 + ReLU + fc2 ----------------------------------------------
            h_pre = fc1b_ref[...]                                           # (1, E)
            for d4 in range(D4):
                p = pool_rows(conv3_scr, 2 * d4 * Hp3, Hp3, H4, sel3_ref)   # (H4, W4*C3)
                for h4 in range(H4):
                    r = d4 * H4 + h4
                    h_pre = h_pre + jnp.dot(p[h4:h4 + 1, :], fc1w_ref[r],
                                            preferred_element_type=f32)
            h1 = jnp.maximum(h_pre, 0.0)
            o_ref[n] = jnp.dot(h1, fc2w_ref[...],
                               preferred_element_type=f32) + fc2b_ref[...]

    scratch_shapes = [
        pltpu.VMEM((S1, W1 * C1), jnp.float32),   # conv1 out  (142, 128) @ default config
        pltpu.VMEM((P2, W2 * C1), jnp.float32),   # (d,h)-padded conv2 input
        pltpu.VMEM((S2, W2 * C2), jnp.float32),   # conv2 out
        pltpu.VMEM((P3, W3 * C2), jnp.float32),   # (d,h)-padded conv3 input
        pltpu.VMEM((S3, W3 * C3), jnp.float32),   # conv3 out
    ]
    return kernel, scratch_shapes


# --------------------------------------------------------------------------- forward
def image_encoder_forward(x, params):
    """x: (N, depth, image_dim, image_dim)  (== PyTorch input before unsqueeze(1))."""
    x = x.astype(jnp.float32)
    N, D1, H1, W1 = x.shape
    assert H1 == W1 and D1 % 8 == 0 and H1 % 8 == 0
    E = params["fc2_w"].shape[0]
    g = _geom(D1, H1)
    NB = _elems_per_step(N)
    kernel, scratch_shapes = _build_kernel(g, NB)

    W2, W3, W4, D4, H4 = g["W2"], g["W3"], g["W4"], g["D4"], g["H4"]

    # (d,h)-only zero padding of the raw input; the w padding lives in the block weights.
    xpad = jnp.pad(x, ((0, 0), (1, 1), (1, 1), (0, 0))).reshape(N, g["P1"], W1)

    # Trace-time weight re-layouts (tiny XLA ops).
    m1 = _block_conv_weight(params["w1"], W1, 1, C1)
    m2 = _block_conv_weight(params["w2"], W2, C1, C2)
    m3 = _block_conv_weight(params["w3"], W3, C2, C3)
    b1 = jnp.tile(params["b1"], W1).reshape(1, W1 * C1)
    b2 = jnp.tile(params["b2"], W2).reshape(1, W2 * C2)
    b3 = jnp.tile(params["b3"], W3).reshape(1, W3 * C3)
    sel1, sel2, sel3 = _pool_select(W1, C1), _pool_select(W2, C2), _pool_select(W3, C3)
    # fc1 weight: PyTorch flatten order (c, d, h, w) -> kernel order (d*H4+h, w*C3+c, E).
    fc1w = (params["fc1_w"].reshape(C3, D4, H4, W4, E)
            .transpose(1, 2, 3, 0, 4).reshape(D4 * H4, W4 * C3, E))
    fc1b = params["fc1_b"].reshape(1, E)
    fc2w = params["fc2_w"]
    fc2b = params["fc2_b"].reshape(1, E)

    def _full(a):
        nd = a.ndim
        return pl.BlockSpec(a.shape, lambda i: (0,) * nd)

    out = pl.pallas_call(
        kernel,
        out_shape=jax.ShapeDtypeStruct((N, 1, E), jnp.float32),
        grid=(N // NB,),
        in_specs=[
            pl.BlockSpec((NB, g["P1"], W1), lambda i: (i, 0, 0)),   # padded raw input
            _full(m1), _full(b1), _full(m2), _full(b2), _full(m3), _full(b3),
            _full(sel1), _full(sel2), _full(sel3),
            _full(fc1w), _full(fc1b), _full(fc2w), _full(fc2b),
        ],
        out_specs=pl.BlockSpec((NB, 1, E), lambda i: (i, 0, 0)),
        scratch_shapes=scratch_shapes,
        compiler_params=pltpu.CompilerParams(dimension_semantics=("parallel",)),
    )(xpad, m1, b1, m2, b2, m3, b3, sel1, sel2, sel3, fc1w, fc1b, fc2w, fc2b)
    return out[:, 0, :]


# --------------------------------------------------------------------------- pure-JAX ref
def reference_forward(x, params):
    x = x[..., None].astype(jnp.float32)

    def conv(x, w27, b):
        cin, cout = w27.shape[1], w27.shape[2]
        w = w27.reshape(3, 3, 3, cin, cout)                    # DHWIO
        y = jax.lax.conv_general_dilated(
            x, w, window_strides=(1, 1, 1), padding="SAME",
            dimension_numbers=("NDHWC", "DHWIO", "NDHWC"))
        return jax.nn.relu(y + b)

    def pool(x):
        n, d, h, w, c = x.shape
        return x.reshape(n, d // 2, 2, h // 2, 2, w // 2, 2, c).max(axis=(2, 4, 6))

    x = pool(conv(x, params["w1"], params["b1"]))
    x = pool(conv(x, params["w2"], params["b2"]))
    x = pool(conv(x, params["w3"], params["b3"]))
    n = x.shape[0]
    flat = jnp.transpose(x, (0, 4, 1, 2, 3)).reshape(n, -1)    # PyTorch NCDHW flatten
    h = jax.nn.relu(flat @ params["fc1_w"] + params["fc1_b"])
    return h @ params["fc2_w"] + params["fc2_b"]


def init_params(key, depth, image_dim, embed_dim):
    flat_dim = 32 * (depth // 8) * (image_dim // 8) * (image_dim // 8)
    ks = jax.random.split(key, 10)

    def conv_w(k, cin, cout):
        return (jax.random.normal(k, (27, cin, cout), jnp.float32)
                / jnp.sqrt(27.0 * cin))

    return {
        "w1": conv_w(ks[0], 1, 8),   "b1": 0.01 * jax.random.normal(ks[1], (8,), jnp.float32),
        "w2": conv_w(ks[2], 8, 16),  "b2": 0.01 * jax.random.normal(ks[3], (16,), jnp.float32),
        "w3": conv_w(ks[4], 16, 32), "b3": 0.01 * jax.random.normal(ks[5], (32,), jnp.float32),
        "fc1_w": jax.random.normal(ks[6], (flat_dim, embed_dim), jnp.float32) / jnp.sqrt(flat_dim),
        "fc1_b": 0.01 * jax.random.normal(ks[7], (embed_dim,), jnp.float32),
        "fc2_w": jax.random.normal(ks[8], (embed_dim, embed_dim), jnp.float32) / jnp.sqrt(embed_dim),
        "fc2_b": 0.01 * jax.random.normal(ks[9], (embed_dim,), jnp.float32),
    }


if __name__ == "__main__":
    # config: n_mri_channels (depth) = 8, mri_image_dim = 16, embed_dim = 32, batch = 4
    # (batch=4 -> 2 elements per grid step, 2 "parallel" grid steps)
    batch, depth, image_dim, embed_dim = 4, 8, 16, 32

    key = jax.random.PRNGKey(0)
    kx, kp = jax.random.split(key)
    x = jax.random.normal(kx, (batch, depth, image_dim, image_dim), jnp.float32)
    params = init_params(kp, depth, image_dim, embed_dim)

    fwd = jax.jit(image_encoder_forward)
    out = jax.block_until_ready(fwd(x, params))
    assert out.shape == (batch, embed_dim), out.shape

    ref = jax.block_until_ready(reference_forward(x, params))
    err = float(jnp.max(jnp.abs(out - ref)))
    assert jnp.allclose(out, ref, rtol=1e-3, atol=1e-3), f"max |err| = {err}"

    print("KERNEL_OK")
</pallas_src>

<mosaic_0001>
module attributes {stable_mosaic.version = 11 : i64} {
  func.func @kernel(%arg0: i32, %arg1: memref<2x180x16xf32, #tpu.memory_space<vmem>>, %arg2: memref<9x16x128xf32, #tpu.memory_space<vmem>>, %arg3: memref<1x128xf32, #tpu.memory_space<vmem>>, %arg4: memref<9x64x128xf32, #tpu.memory_space<vmem>>, %arg5: memref<1x128xf32, #tpu.memory_space<vmem>>, %arg6: memref<9x64x128xf32, #tpu.memory_space<vmem>>, %arg7: memref<1x128xf32, #tpu.memory_space<vmem>>, %arg8: memref<2x128x64xf32, #tpu.memory_space<vmem>>, %arg9: memref<2x128x64xf32, #tpu.memory_space<vmem>>, %arg10: memref<2x128x64xf32, #tpu.memory_space<vmem>>, %arg11: memref<2x64x32xf32, #tpu.memory_space<vmem>>, %arg12: memref<1x32xf32, #tpu.memory_space<vmem>>, %arg13: memref<32x32xf32, #tpu.memory_space<vmem>>, %arg14: memref<1x32xf32, #tpu.memory_space<vmem>>, %arg15: memref<2x1x32xf32, #tpu.memory_space<vmem>>, %arg16: memref<142x128xf32, #tpu.memory_space<vmem>>, %arg17: memref<60x64xf32, #tpu.memory_space<vmem>>, %arg18: memref<38x128xf32, #tpu.memory_space<vmem>>, %arg19: memref<24x64xf32, #tpu.memory_space<vmem>>, %arg20: memref<10x128xf32, #tpu.memory_space<vmem>>) attributes {dimension_semantics = [#tpu.dimension_semantics<parallel>], iteration_bounds = array<i64: 2>, scalar_prefetch = 0 : i64, scratch_operands = 5 : i64, tpu.core_type = #tpu.core_type<tc>, window_params = [{transform_indices = @transform_0, window_bounds = array<i64: 2, 180, 16>}, {pipeline_mode = #tpu.pipeline_mode<synchronous>, transform_indices = @transform_1, window_bounds = array<i64: 9, 16, 128>}, {pipeline_mode = #tpu.pipeline_mode<synchronous>, transform_indices = @transform_2, window_bounds = array<i64: 1, 128>}, {pipeline_mode = #tpu.pipeline_mode<synchronous>, transform_indices = @transform_3, window_bounds = array<i64: 9, 64, 128>}, {pipeline_mode = #tpu.pipeline_mode<synchronous>, transform_indices = @transform_4, window_bounds = array<i64: 1, 128>}, {pipeline_mode = #tpu.pipeline_mode<synchronous>, transform_indices = @transform_5, window_bounds = array<i64: 9, 64, 128>}, {pipeline_mode = #tpu.pipeline_mode<synchronous>, transform_indices = @transform_6, window_bounds = array<i64: 1, 128>}, {pipeline_mode = #tpu.pipeline_mode<synchronous>, transform_indices = @transform_7, window_bounds = array<i64: 2, 128, 64>}, {pipeline_mode = #tpu.pipeline_mode<synchronous>, transform_indices = @transform_8, window_bounds = array<i64: 2, 128, 64>}, {pipeline_mode = #tpu.pipeline_mode<synchronous>, transform_indices = @transform_9, window_bounds = array<i64: 2, 128, 64>}, {pipeline_mode = #tpu.pipeline_mode<synchronous>, transform_indices = @transform_10, window_bounds = array<i64: 2, 64, 32>}, {pipeline_mode = #tpu.pipeline_mode<synchronous>, transform_indices = @transform_11, window_bounds = array<i64: 1, 32>}, {pipeline_mode = #tpu.pipeline_mode<synchronous>, transform_indices = @transform_12, window_bounds = array<i64: 32, 32>}, {pipeline_mode = #tpu.pipeline_mode<synchronous>, transform_indices = @transform_13, window_bounds = array<i64: 1, 32>}, {transform_indices = @transform_14, window_bounds = array<i64: 2, 1, 32>}]} {
    %cst = arith.constant 0.000000e+00 : f32
    %0 = vector.broadcast %cst : f32 to vector<60x64xf32>
    %c0 = arith.constant 0 : index
    %c0_0 = arith.constant 0 : index
    %1 = vector.load %arg17[%c0, %c0_0] : memref<60x64xf32, #tpu.memory_space<vmem>>, vector<60x64xf32>
    tpu.vector_store %arg17[%c0, %c0_0], %0 {strides = array<i32>} : memref<60x64xf32, #tpu.memory_space<vmem>>, vector<60x64xf32>,
    %cst_1 = arith.constant 0.000000e+00 : f32
    %2 = vector.broadcast %cst_1 : f32 to vector<24x64xf32>
    %c0_2 = arith.constant 0 : index
    %c0_3 = arith.constant 0 : index
    %3 = vector.load %arg19[%c0_2, %c0_3] : memref<24x64xf32, #tpu.memory_space<vmem>>, vector<24x64xf32>
    tpu.vector_store %arg19[%c0_2, %c0_3], %2 {strides = array<i32>} : memref<24x64xf32, #tpu.memory_space<vmem>>, vector<24x64xf32>,
    %c0_4 = arith.constant 0 : index
    %c0_5 = arith.constant 0 : index
    %c0_6 = arith.constant 0 : index
    %4 = vector.load %arg1[%c0_4, %c0_5, %c0_6] : memref<2x180x16xf32, #tpu.memory_space<vmem>>, vector<1x142x16xf32>
    %5 = vector.shape_cast %4 : vector<1x142x16xf32> to vector<142x16xf32>
    %c0_7 = arith.constant 0 : index
    %c0_8 = arith.constant 0 : index
    %c0_9 = arith.constant 0 : index
    %6 = vector.load %arg2[%c0_7, %c0_8, %c0_9] : memref<9x16x128xf32, #tpu.memory_space<vmem>>, vector<1x16x128xf32>
    %7 = vector.shape_cast %6 : vector<1x16x128xf32> to vector<16x128xf32>
    %cst_10 = arith.constant dense<0.000000e+00> : vector<142x128xf32>
    %8 = tpu.matmul %5, %7, %cst_10 {dimension_numbers = #tpu.dot_dimension_numbers<[1], [0], [0], [1], [0, 0, 1, 1], [], []>} : vector<142x16xf32>, vector<16x128xf32>, vector<142x128xf32> -> vector<142x128xf32>
    %c0_11 = arith.constant 0 : index
    %c1 = arith.constant 1 : index
    %c0_12 = arith.constant 0 : index
    %9 = vector.load %arg1[%c0_11, %c1, %c0_12] : memref<2x180x16xf32, #tpu.memory_space<vmem>>, vector<1x142x16xf32>
    %10 = vector.shape_cast %9 : vector<1x142x16xf32> to vector<142x16xf32>
    %c1_13 = arith.constant 1 : index
    %c0_14 = arith.constant 0 : index
    %c0_15 = arith.constant 0 : index
    %11 = vector.load %arg2[%c1_13, %c0_14, %c0_15] : memref<9x16x128xf32, #tpu.memory_space<vmem>>, vector<1x16x128xf32>
    %12 = vector.shape_cast %11 : vector<1x16x128xf32> to vector<16x128xf32>
    %cst_16 = arith.constant dense<0.000000e+00> : vector<142x128xf32>
    %13 = tpu.matmul %10, %12, %cst_16 {dimension_numbers = #tpu.dot_dimension_numbers<[1], [0], [0], [1], [0, 0, 1, 1], [], []>} : vector<142x16xf32>, vector<16x128xf32>, vector<142x128xf32> -> vector<142x128xf32>
    %14 = arith.addf %8, %13 : vector<142x128xf32>
    %c0_17 = arith.constant 0 : index
    %c2 = arith.constant 2 : index
    %c0_18 = arith.constant 0 : index
    %15 = vector.load %arg1[%c0_17, %c2, %c0_18] : memref<2x180x16xf32, #tpu.memory_space<vmem>>, vector<1x142x16xf32>
    %16 = vector.shape_cast %15 : vector<1x142x16xf32> to vector<142x16xf32>
    %c2_19 = arith.constant 2 : index
    %c0_20 = arith.constant 0 : index
    %c0_21 = arith.constant 0 : index
    %17 = vector.load %arg2[%c2_19, %c0_20, %c0_21] : memref<9x16x128xf32, #tpu.memory_space<vmem>>, vector<1x16x128xf32>
    %18 = vector.shape_cast %17 : vector<1x16x128xf32> to vector<16x128xf32>
    %cst_22 = arith.constant dense<0.000000e+00> : vector<142x128xf32>
    %19 = tpu.matmul %16, %18, %cst_22 {dimension_numbers = #tpu.dot_dimension_numbers<[1], [0], [0], [1], [0, 0, 1, 1], [], []>} : vector<142x16xf32>, vector<16x128xf32>, vector<142x128xf32> -> vector<142x128xf32>
    %20 = arith.addf %14, %19 : vector<142x128xf32>
    %c0_23 = arith.constant 0 : index
    %c18 = arith.constant 18 : index
    %c0_24 = arith.constant 0 : index
    %21 = vector.load %arg1[%c0_23, %c18, %c0_24] : memref<2x180x16xf32, #tpu.memory_space<vmem>>, vector<1x142x16xf32>
    %22 = vector.shape_cast %21 : vector<1x142x16xf32> to vector<142x16xf32>
    %c3 = arith.constant 3 : index
    %c0_25 = arith.constant 0 : index
    %c0_26 = arith.constant 0 : index
    %23 = vector.load %arg2[%c3, %c0_25, %c0_26] : memref<9x16x128xf32, #tpu.memory_space<vmem>>, vector<1x16x128xf32>
    %24 = vector.shape_cast %23 : vector<1x16x128xf32> to vector<16x128xf32>
    %cst_27 = arith.constant dense<0.000000e+00> : vector<142x128xf32>
    %25 = tpu.matmul %22, %24, %cst_27 {dimension_numbers = #tpu.dot_dimension_numbers<[1], [0], [0], [1], [0, 0, 1, 1], [], []>} : vector<142x16xf32>, vector<16x128xf32>, vector<142x128xf32> -> vector<142x128xf32>
    %26 = arith.addf %20, %25 : vector<142x128xf32>
    %c0_28 = arith.constant 0 : index
    %c19 = arith.constant 19 : index
    %c0_29 = arith.constant 0 : index
    %27 = vector.load %arg1[%c0_28, %c19, %c0_29] : memref<2x180x16xf32, #tpu.memory_space<vmem>>, vector<1x142x16xf32>
    %28 = vector.shape_cast %27 : vector<1x142x16xf32> to vector<142x16xf32>
    %c4 = arith.constant 4 : index
    %c0_30 = arith.constant 0 : index
    %c0_31 = arith.constant 0 : index
    %29 = vector.load %arg2[%c4, %c0_30, %c0_31] : memref<9x16x128xf32, #tpu.memory_space<vmem>>, vector<1x16x128xf32>
    %30 = vector.shape_cast %29 : vector<1x16x128xf32> to vector<16x128xf32>
    %cst_32 = arith.constant dense<0.000000e+00> : vector<142x128xf32>
    %31 = tpu.matmul %28, %30, %cst_32 {dimension_numbers = #tpu.dot_dimension_numbers<[1], [0], [0], [1], [0, 0, 1, 1], [], []>} : vector<142x16xf32>, vector<16x128xf32>, vector<142x128xf32> -> vector<142x128xf32>
    %32 = arith.addf %26, %31 : vector<142x128xf32>
    %c0_33 = arith.constant 0 : index
    %c20 = arith.constant 20 : index
    %c0_34 = arith.constant 0 : index
    %33 = vector.load %arg1[%c0_33, %c20, %c0_34] : memref<2x180x16xf32, #tpu.memory_space<vmem>>, vector<1x142x16xf32>
    %34 = vector.shape_cast %33 : vector<1x142x16xf32> to vector<142x16xf32>
    %c5 = arith.constant 5 : index
    %c0_35 = arith.constant 0 : index
    %c0_36 = arith.constant 0 : index
    %35 = vector.load %arg2[%c5, %c0_35, %c0_36] : memref<9x16x128xf32, #tpu.memory_space<vmem>>, vector<1x16x128xf32>
    %36 = vector.shape_cast %35 : vector<1x16x128xf32> to vector<16x128xf32>
    %cst_37 = arith.constant dense<0.000000e+00> : vector<142x128xf32>
    %37 = tpu.matmul %34, %36, %cst_37 {dimension_numbers = #tpu.dot_dimension_numbers<[1], [0], [0], [1], [0, 0, 1, 1], [], []>} : vector<142x16xf32>, vector<16x128xf32>, vector<142x128xf32> -> vector<142x128xf32>
    %38 = arith.addf %32, %37 : vector<142x128xf32>
    %c0_38 = arith.constant 0 : index
    %c36 = arith.constant 36 : index
    %c0_39 = arith.constant 0 : index
    %39 = vector.load %arg1[%c0_38, %c36, %c0_39] : memref<2x180x16xf32, #tpu.memory_space<vmem>>, vector<1x142x16xf32>
    %40 = vector.shape_cast %39 : vector<1x142x16xf32> to vector<142x16xf32>
    %c6 = arith.constant 6 : index
    %c0_40 = arith.constant 0 : index
    %c0_41 = arith.constant 0 : index
    %41 = vector.load %arg2[%c6, %c0_40, %c0_41] : memref<9x16x128xf32, #tpu.memory_space<vmem>>, vector<1x16x128xf32>
    %42 = vector.shape_cast %41 : vector<1x16x128xf32> to vector<16x128xf32>
    %cst_42 = arith.constant dense<0.000000e+00> : vector<142x128xf32>
    %43 = tpu.matmul %40, %42, %cst_42 {dimension_numbers = #tpu.dot_dimension_numbers<[1], [0], [0], [1], [0, 0, 1, 1], [], []>} : vector<142x16xf32>, vector<16x128xf32>, vector<142x128xf32> -> vector<142x128xf32>
    %44 = arith.addf %38, %43 : vector<142x128xf32>
    %c0_43 = arith.constant 0 : index
    %c37 = arith.constant 37 : index
    %c0_44 = arith.constant 0 : index
    %45 = vector.load %arg1[%c0_43, %c37, %c0_44] : memref<2x180x16xf32, #tpu.memory_space<vmem>>, vector<1x142x16xf32>
    %46 = vector.shape_cast %45 : vector<1x142x16xf32> to vector<142x16xf32>
    %c7 = arith.constant 7 : index
    %c0_45 = arith.constant 0 : index
    %c0_46 = arith.constant 0 : index
    %47 = vector.load %arg2[%c7, %c0_45, %c0_46] : memref<9x16x128xf32, #tpu.memory_space<vmem>>, vector<1x16x128xf32>
    %48 = vector.shape_cast %47 : vector<1x16x128xf32> to vector<16x128xf32>
    %cst_47 = arith.constant dense<0.000000e+00> : vector<142x128xf32>
    %49 = tpu.matmul %46, %48, %cst_47 {dimension_numbers = #tpu.dot_dimension_numbers<[1], [0], [0], [1], [0, 0, 1, 1], [], []>} : vector<142x16xf32>, vector<16x128xf32>, vector<142x128xf32> -> vector<142x128xf32>
    %50 = arith.addf %44, %49 : vector<142x128xf32>
    %c0_48 = arith.constant 0 : index
    %c38 = arith.constant 38 : index
    %c0_49 = arith.constant 0 : index
    %51 = vector.load %arg1[%c0_48, %c38, %c0_49] : memref<2x180x16xf32, #tpu.memory_space<vmem>>, vector<1x142x16xf32>
    %52 = vector.shape_cast %51 : vector<1x142x16xf32> to vector<142x16xf32>
    %c8 = arith.constant 8 : index
    %c0_50 = arith.constant 0 : index
    %c0_51 = arith.constant 0 : index
    %53 = vector.load %arg2[%c8, %c0_50, %c0_51] : memref<9x16x128xf32, #tpu.memory_space<vmem>>, vector<1x16x128xf32>
    %54 = vector.shape_cast %53 : vector<1x16x128xf32> to vector<16x128xf32>
    %cst_52 = arith.constant dense<0.000000e+00> : vector<142x128xf32>
    %55 = tpu.matmul %52, %54, %cst_52 {dimension_numbers = #tpu.dot_dimension_numbers<[1], [0], [0], [1], [0, 0, 1, 1], [], []>} : vector<142x16xf32>, vector<16x128xf32>, vector<142x128xf32> -> vector<142x128xf32>
    %56 = arith.addf %50, %55 : vector<142x128xf32>
    %c0_53 = arith.constant 0 : index
    %c0_54 = arith.constant 0 : index
    %57 = vector.load %arg3[%c0_53, %c0_54] : memref<1x128xf32, #tpu.memory_space<vmem>>, vector<1x128xf32>
    %58 = vector.broadcast %57 : vector<1x128xf32> to vector<142x128xf32>
    %59 = arith.addf %56, %58 : vector<142x128xf32>
    %cst_55 = arith.constant 0.000000e+00 : f32
    %60 = vector.broadcast %cst_55 : f32 to vector<142x128xf32>
    %61 = arith.maximumf %59, %60 : vector<142x128xf32>
    %c0_56 = arith.constant 0 : index
    %c0_57 = arith.constant 0 : index
    %62 = vector.load %arg16[%c0_56, %c0_57] : memref<142x128xf32, #tpu.memory_space<vmem>>, vector<142x128xf32>
    tpu.vector_store %arg16[%c0_56, %c0_57], %61 {strides = array<i32>} : memref<142x128xf32, #tpu.memory_space<vmem>>, vector<142x128xf32>,
    %c0_58 = arith.constant 0 : index
    %c0_59 = arith.constant 0 : index
    %63 = tpu.strided_load %arg16[%c0_58, %c0_59] {strides = array<i32: 2, 1>} : memref<142x128xf32, #tpu.memory_space<vmem>>, vector<8x128xf32>
    %c1_60 = arith.constant 1 : index
    %c0_61 = arith.constant 0 : index
    %64 = tpu.strided_load %arg16[%c1_60, %c0_61] {strides = array<i32: 2, 1>} : memref<142x128xf32, #tpu.memory_space<vmem>>, vector<8x128xf32>
    %65 = arith.maximumf %63, %64 : vector<8x128xf32>
    %c18_62 = arith.constant 18 : index
    %c0_63 = arith.constant 0 : index
    %66 = tpu.strided_load %arg16[%c18_62, %c0_63] {strides = array<i32: 2, 1>} : memref<142x128xf32, #tpu.memory_space<vmem>>, vector<8x128xf32>
    %67 = arith.maximumf %65, %66 : vector<8x128xf32>
    %c19_64 = arith.constant 19 : index
    %c0_65 = arith.constant 0 : index
    %68 = tpu.strided_load %arg16[%c19_64, %c0_65] {strides = array<i32: 2, 1>} : memref<142x128xf32, #tpu.memory_space<vmem>>, vector<8x128xf32>
    %69 = arith.maximumf %67, %68 : vector<8x128xf32>
    %c0_66 = arith.constant 0 : index
    %c0_67 = arith.constant 0 : index
    %c0_68 = arith.constant 0 : index
    %70 = vector.load %arg8[%c0_66, %c0_67, %c0_68] : memref<2x128x64xf32, #tpu.memory_space<vmem>>, vector<1x128x64xf32>
    %71 = vector.shape_cast %70 : vector<1x128x64xf32> to vector<128x64xf32>
    %cst_69 = arith.constant dense<0.000000e+00> : vector<8x64xf32>
    %72 = tpu.matmul %69, %71, %cst_69 {dimension_numbers = #tpu.dot_dimension_numbers<[1], [0], [0], [1], [0, 0, 1, 1], [], []>} : vector<8x128xf32>, vector<128x64xf32>, vector<8x64xf32> -> vector<8x64xf32>
    %c1_70 = arith.constant 1 : index
    %c0_71 = arith.constant 0 : index
    %c0_72 = arith.constant 0 : index
    %73 = vector.load %arg8[%c1_70, %c0_71, %c0_72] : memref<2x128x64xf32, #tpu.memory_space<vmem>>, vector<1x128x64xf32>
    %74 = vector.shape_cast %73 : vector<1x128x64xf32> to vector<128x64xf32>
    %cst_73 = arith.constant dense<0.000000e+00> : vector<8x64xf32>
    %75 = tpu.matmul %69, %74, %cst_73 {dimension_numbers = #tpu.dot_dimension_numbers<[1], [0], [0], [1], [0, 0, 1, 1], [], []>} : vector<8x128xf32>, vector<128x64xf32>, vector<8x64xf32> -> vector<8x64xf32>
    %76 = arith.maximumf %72, %75 : vector<8x64xf32>
    %c11 = arith.constant 11 : index
    %c0_74 = arith.constant 0 : index
    %77 = vector.load %arg17[%c11, %c0_74] : memref<60x64xf32, #tpu.memory_space<vmem>>, vector<8x64xf32>
    tpu.vector_store %arg17[%c11, %c0_74], %76 {strides = array<i32>} : memref<60x64xf32, #tpu.memory_space<vmem>>, vector<8x64xf32>,
    %c36_75 = arith.constant 36 : index
    %c0_76 = arith.constant 0 : index
    %78 = tpu.strided_load %arg16[%c36_75, %c0_76] {strides = array<i32: 2, 1>} : memref<142x128xf32, #tpu.memory_space<vmem>>, vector<8x128xf32>
    %c37_77 = arith.constant 37 : index
    %c0_78 = arith.constant 0 : index
    %79 = tpu.strided_load %arg16[%c37_77, %c0_78] {strides = array<i32: 2, 1>} : memref<142x128xf32, #tpu.memory_space<vmem>>, vector<8x128xf32>
    %80 = arith.maximumf %78, %79 : vector<8x128xf32>
    %c54 = arith.constant 54 : index
    %c0_79 = arith.constant 0 : index
    %81 = tpu.strided_load %arg16[%c54, %c0_79] {strides = array<i32: 2, 1>} : memref<142x128xf32, #tpu.memory_space<vmem>>, vector<8x128xf32>
    %82 = arith.maximumf %80, %81 : vector<8x128xf32>
    %c55 = arith.constant 55 : index
    %c0_80 = arith.constant 0 : index
    %83 = tpu.strided_load %arg16[%c55, %c0_80] {strides = array<i32: 2, 1>} : memref<142x128xf32, #tpu.memory_space<vmem>>, vector<8x128xf32>
    %84 = arith.maximumf %82, %83 : vector<8x128xf32>
    %c0_81 = arith.constant 0 : index
    %c0_82 = arith.constant 0 : index
    %c0_83 = arith.constant 0 : index
    %85 = vector.load %arg8[%c0_81, %c0_82, %c0_83] : memref<2x128x64xf32, #tpu.memory_space<vmem>>, vector<1x128x64xf32>
    %86 = vector.shape_cast %85 : vector<1x128x64xf32> to vector<128x64xf32>
    %cst_84 = arith.constant dense<0.000000e+00> : vector<8x64xf32>
    %87 = tpu.matmul %84, %86, %cst_84 {dimension_numbers = #tpu.dot_dimension_numbers<[1], [0], [0], [1], [0, 0, 1, 1], [], []>} : vector<8x128xf32>, vector<128x64xf32>, vector<8x64xf32> -> vector<8x64xf32>
    %c1_85 = arith.constant 1 : index
    %c0_86 = arith.constant 0 : index
    %c0_87 = arith.constant 0 : index
    %88 = vector.load %arg8[%c1_85, %c0_86, %c0_87] : memref<2x128x64xf32, #tpu.memory_space<vmem>>, vector<1x128x64xf32>
    %89 = vector.shape_cast %88 : vector<1x128x64xf32> to vector<128x64xf32>
    %cst_88 = arith.constant dense<0.000000e+00> : vector<8x64xf32>
    %90 = tpu.matmul %84, %89, %cst_88 {dimension_numbers = #tpu.dot_dimension_numbers<[1], [0], [0], [1], [0, 0, 1, 1], [], []>} : vector<8x128xf32>, vector<128x64xf32>, vector<8x64xf32> -> vector<8x64xf32>
    %91 = arith.maximumf %87, %90 : vector<8x64xf32>
    %c21 = arith.constant 21 : index
    %c0_89 = arith.constant 0 : index
    %92 = vector.load %arg17[%c21, %c0_89] : memref<60x64xf32, #tpu.memory_space<vmem>>, vector<8x64xf32>
    tpu.vector_store %arg17[%c21, %c0_89], %91 {strides = array<i32>} : memref<60x64xf32, #tpu.memory_space<vmem>>, vector<8x64xf32>,
    %c72 = arith.constant 72 : index
    %c0_90 = arith.constant 0 : index
    %93 = tpu.strided_load %arg16[%c72, %c0_90] {strides = array<i32: 2, 1>} : memref<142x128xf32, #tpu.memory_space<vmem>>, vector<8x128xf32>
    %c73 = arith.constant 73 : index
    %c0_91 = arith.constant 0 : index
    %94 = tpu.strided_load %arg16[%c73, %c0_91] {strides = array<i32: 2, 1>} : memref<142x128xf32, #tpu.memory_space<vmem>>, vector<8x128xf32>
    %95 = arith.maximumf %93, %94 : vector<8x128xf32>
    %c90 = arith.constant 90 : index
    %c0_92 = arith.constant 0 : index
    %96 = tpu.strided_load %arg16[%c90, %c0_92] {strides = array<i32: 2, 1>} : memref<142x128xf32, #tpu.memory_space<vmem>>, vector<8x128xf32>
    %97 = arith.maximumf %95, %96 : vector<8x128xf32>
    %c91 = arith.constant 91 : index
    %c0_93 = arith.constant 0 : index
    %98 = tpu.strided_load %arg16[%c91, %c0_93] {strides = array<i32: 2, 1>} : memref<142x128xf32, #tpu.memory_space<vmem>>, vector<8x128xf32>
    %99 = arith.maximumf %97, %98 : vector<8x128xf32>
    %c0_94 = arith.constant 0 : index
    %c0_95 = arith.constant 0 : index
    %c0_96 = arith.constant 0 : index
    %100 = vector.load %arg8[%c0_94, %c0_95, %c0_96] : memref<2x128x64xf32, #tpu.memory_space<vmem>>, vector<1x128x64xf32>
    %101 = vector.shape_cast %100 : vector<1x128x64xf32> to vector<128x64xf32>
    %cst_97 = arith.constant dense<0.000000e+00> : vector<8x64xf32>
    %102 = tpu.matmul %99, %101, %cst_97 {dimension_numbers = #tpu.dot_dimension_numbers<[1], [0], [0], [1], [0, 0, 1, 1], [], []>} : vector<8x128xf32>, vector<128x64xf32>, vector<8x64xf32> -> vector<8x64xf32>
    %c1_98 = arith.constant 1 : index
    %c0_99 = arith.constant 0 : index
    %c0_100 = arith.constant 0 : index
    %103 = vector.load %arg8[%c1_98, %c0_99, %c0_100] : memref<2x128x64xf32, #tpu.memory_space<vmem>>, vector<1x128x64xf32>
    %104 = vector.shape_cast %103 : vector<1x128x64xf32> to vector<128x64xf32>
    %cst_101 = arith.constant dense<0.000000e+00> : vector<8x64xf32>
    %105 = tpu.matmul %99, %104, %cst_101 {dimension_numbers = #tpu.dot_dimension_numbers<[1], [0], [0], [1], [0, 0, 1, 1], [], []>} : vector<8x128xf32>, vector<128x64xf32>, vector<8x64xf32> -> vector<8x64xf32>
    %106 = arith.maximumf %102, %105 : vector<8x64xf32>
    %c31 = arith.constant 31 : index
    %c0_102 = arith.constant 0 : index
    %107 = vector.load %arg17[%c31, %c0_102] : memref<60x64xf32, #tpu.memory_space<vmem>>, vector<8x64xf32>
    tpu.vector_store %arg17[%c31, %c0_102], %106 {strides = array<i32>} : memref<60x64xf32, #tpu.memory_space<vmem>>, vector<8x64xf32>,
    %c108 = arith.constant 108 : index
    %c0_103 = arith.constant 0 : index
    %108 = tpu.strided_load %arg16[%c108, %c0_103] {strides = array<i32: 2, 1>} : memref<142x128xf32, #tpu.memory_space<vmem>>, vector<8x128xf32>
    %c109 = arith.constant 109 : index
    %c0_104 = arith.constant 0 : index
    %109 = tpu.strided_load %arg16[%c109, %c0_104] {strides = array<i32: 2, 1>} : memref<142x128xf32, #tpu.memory_space<vmem>>, vector<8x128xf32>
    %110 = arith.maximumf %108, %109 : vector<8x128xf32>
    %c126 = arith.constant 126 : index
    %c0_105 = arith.constant 0 : index
    %111 = tpu.strided_load %arg16[%c126, %c0_105] {strides = array<i32: 2, 1>} : memref<142x128xf32, #tpu.memory_space<vmem>>, vector<8x128xf32>
    %112 = arith.maximumf %110, %111 : vector<8x128xf32>
    %c127 = arith.constant 127 : index
    %c0_106 = arith.constant 0 : index
    %113 = tpu.strided_load %arg16[%c127, %c0_106] {strides = array<i32: 2, 1>} : memref<142x128xf32, #tpu.memory_space<vmem>>, vector<8x128xf32>
    %114 = arith.maximumf %112, %113 : vector<8x128xf32>
    %c0_107 = arith.constant 0 : index
    %c0_108 = arith.constant 0 : index
    %c0_109 = arith.constant 0 : index
    %115 = vector.load %arg8[%c0_107, %c0_108, %c0_109] : memref<2x128x64xf32, #tpu.memory_space<vmem>>, vector<1x128x64xf32>
    %116 = vector.shape_cast %115 : vector<1x128x64xf32> to vector<128x64xf32>
    %cst_110 = arith.constant dense<0.000000e+00> : vector<8x64xf32>
    %117 = tpu.matmul %114, %116, %cst_110 {dimension_numbers = #tpu.dot_dimension_numbers<[1], [0], [0], [1], [0, 0, 1, 1], [], []>} : vector<8x128xf32>, vector<128x64xf32>, vector<8x64xf32> -> vector<8x64xf32>
    %c1_111 = arith.constant 1 : index
    %c0_112 = arith.constant 0 : index
    %c0_113 = arith.constant 0 : index
    %118 = vector.load %arg8[%c1_111, %c0_112, %c0_113] : memref<2x128x64xf32, #tpu.memory_space<vmem>>, vector<1x128x64xf32>
    %119 = vector.shape_cast %118 : vector<1x128x64xf32> to vector<128x64xf32>
    %cst_114 = arith.constant dense<0.000000e+00> : vector<8x64xf32>
    %120 = tpu.matmul %114, %119, %cst_114 {dimension_numbers = #tpu.dot_dimension_numbers<[1], [0], [0], [1], [0, 0, 1, 1], [], []>} : vector<8x128xf32>, vector<128x64xf32>, vector<8x64xf32> -> vector<8x64xf32>
    %121 = arith.maximumf %117, %120 : vector<8x64xf32>
    %c41 = arith.constant 41 : index
    %c0_115 = arith.constant 0 : index
    %122 = vector.load %arg17[%c41, %c0_115] : memref<60x64xf32, #tpu.memory_space<vmem>>, vector<8x64xf32>
    tpu.vector_store %arg17[%c41, %c0_115], %121 {strides = array<i32>} : memref<60x64xf32, #tpu.memory_space<vmem>>, vector<8x64xf32>,
    %c0_116 = arith.constant 0 : index
    %c0_117 = arith.constant 0 : index
    %123 = vector.load %arg17[%c0_116, %c0_117] : memref<60x64xf32, #tpu.memory_space<vmem>>, vector<38x64xf32>
    %c0_118 = arith.constant 0 : index
    %c0_119 = arith.constant 0 : index
    %c0_120 = arith.constant 0 : index
    %124 = vector.load %arg4[%c0_118, %c0_119, %c0_120] : memref<9x64x128xf32, #tpu.memory_space<vmem>>, vector<1x64x128xf32>
    %125 = vector.shape_cast %124 : vector<1x64x128xf32> to vector<64x128xf32>
    %cst_121 = arith.constant dense<0.000000e+00> : vector<38x128xf32>
    %126 = tpu.matmul %123, %125, %cst_121 {dimension_numbers = #tpu.dot_dimension_numbers<[1], [0], [0], [1], [0, 0, 1, 1], [], []>} : vector<38x64xf32>, vector<64x128xf32>, vector<38x128xf32> -> vector<38x128xf32>
    %c1_122 = arith.constant 1 : index
    %c0_123 = arith.constant 0 : index
    %127 = vector.load %arg17[%c1_122, %c0_123] : memref<60x64xf32, #tpu.memory_space<vmem>>, vector<38x64xf32>
    %c1_124 = arith.constant 1 : index
    %c0_125 = arith.constant 0 : index
    %c0_126 = arith.constant 0 : index
    %128 = vector.load %arg4[%c1_124, %c0_125, %c0_126] : memref<9x64x128xf32, #tpu.memory_space<vmem>>, vector<1x64x128xf32>
    %129 = vector.shape_cast %128 : vector<1x64x128xf32> to vector<64x128xf32>
    %cst_127 = arith.constant dense<0.000000e+00> : vector<38x128xf32>
    %130 = tpu.matmul %127, %129, %cst_127 {dimension_numbers = #tpu.dot_dimension_numbers<[1], [0], [0], [1], [0, 0, 1, 1], [], []>} : vector<38x64xf32>, vector<64x128xf32>, vector<38x128xf32> -> vector<38x128xf32>
    %131 = arith.addf %126, %130 : vector<38x128xf32>
    %c2_128 = arith.constant 2 : index
    %c0_129 = arith.constant 0 : index
    %132 = vector.load %arg17[%c2_128, %c0_129] : memref<60x64xf32, #tpu.memory_space<vmem>>, vector<38x64xf32>
    %c2_130 = arith.constant 2 : index
    %c0_131 = arith.constant 0 : index
    %c0_132 = arith.constant 0 : index
    %133 = vector.load %arg4[%c2_130, %c0_131, %c0_132] : memref<9x64x128xf32, #tpu.memory_space<vmem>>, vector<1x64x128xf32>
    %134 = vector.shape_cast %133 : vector<1x64x128xf32> to vector<64x128xf32>
    %cst_133 = arith.constant dense<0.000000e+00> : vector<38x128xf32>
    %135 = tpu.matmul %132, %134, %cst_133 {dimension_numbers = #tpu.dot_dimension_numbers<[1], [0], [0], [1], [0, 0, 1, 1], [], []>} : vector<38x64xf32>, vector<64x128xf32>, vector<38x128xf32> -> vector<38x128xf32>
    %136 = arith.addf %131, %135 : vector<38x128xf32>
    %c10 = arith.constant 10 : index
    %c0_134 = arith.constant 0 : index
    %137 = vector.load %arg17[%c10, %c0_134] : memref<60x64xf32, #tpu.memory_space<vmem>>, vector<38x64xf32>
    %c3_135 = arith.constant 3 : index
    %c0_136 = arith.constant 0 : index
    %c0_137 = arith.constant 0 : index
    %138 = vector.load %arg4[%c3_135, %c0_136, %c0_137] : memref<9x64x128xf32, #tpu.memory_space<vmem>>, vector<1x64x128xf32>
    %139 = vector.shape_cast %138 : vector<1x64x128xf32> to vector<64x128xf32>
    %cst_138 = arith.constant dense<0.000000e+00> : vector<38x128xf32>
    %140 = tpu.matmul %137, %139, %cst_138 {dimension_numbers = #tpu.dot_dimension_numbers<[1], [0], [0], [1], [0, 0, 1, 1], [], []>} : vector<38x64xf32>, vector<64x128xf32>, vector<38x128xf32> -> vector<38x128xf32>
    %141 = arith.addf %136, %140 : vector<38x128xf32>
    %c11_139 = arith.constant 11 : index
    %c0_140 = arith.constant 0 : index
    %142 = vector.load %arg17[%c11_139, %c0_140] : memref<60x64xf32, #tpu.memory_space<vmem>>, vector<38x64xf32>
    %c4_141 = arith.constant 4 : index
    %c0_142 = arith.constant 0 : index
    %c0_143 = arith.constant 0 : index
    %143 = vector.load %arg4[%c4_141, %c0_142, %c0_143] : memref<9x64x128xf32, #tpu.memory_space<vmem>>, vector<1x64x128xf32>
    %144 = vector.shape_cast %143 : vector<1x64x128xf32> to vector<64x128xf32>
    %cst_144 = arith.constant dense<0.000000e+00> : vector<38x128xf32>
    %145 = tpu.matmul %142, %144, %cst_144 {dimension_numbers = #tpu.dot_dimension_numbers<[1], [0], [0], [1], [0, 0, 1, 1], [], []>} : vector<38x64xf32>, vector<64x128xf32>, vector<38x128xf32> -> vector<38x128xf32>
    %146 = arith.addf %141, %145 : vector<38x128xf32>
    %c12 = arith.constant 12 : index
    %c0_145 = arith.constant 0 : index
    %147 = vector.load %arg17[%c12, %c0_145] : memref<60x64xf32, #tpu.memory_space<vmem>>, vector<38x64xf32>
    %c5_146 = arith.constant 5 : index
    %c0_147 = arith.constant 0 : index
    %c0_148 = arith.constant 0 : index
    %148 = vector.load %arg4[%c5_146, %c0_147, %c0_148] : memref<9x64x128xf32, #tpu.memory_space<vmem>>, vector<1x64x128xf32>
    %149 = vector.shape_cast %148 : vector<1x64x128xf32> to vector<64x128xf32>
    %cst_149 = arith.constant dense<0.000000e+00> : vector<38x128xf32>
    %150 = tpu.matmul %147, %149, %cst_149 {dimension_numbers = #tpu.dot_dimension_numbers<[1], [0], [0], [1], [0, 0, 1, 1], [], []>} : vector<38x64xf32>, vector<64x128xf32>, vector<38x128xf32> -> vector<38x128xf32>
    %151 = arith.addf %146, %150 : vector<38x128xf32>
    %c20_150 = arith.constant 20 : index
    %c0_151 = arith.constant 0 : index
    %152 = vector.load %arg17[%c20_150, %c0_151] : memref<60x64xf32, #tpu.memory_space<vmem>>, vector<38x64xf32>
    %c6_152 = arith.constant 6 : index
    %c0_153 = arith.constant 0 : index
    %c0_154 = arith.constant 0 : index
    %153 = vector.load %arg4[%c6_152, %c0_153, %c0_154] : memref<9x64x128xf32, #tpu.memory_space<vmem>>, vector<1x64x128xf32>
    %154 = vector.shape_cast %153 : vector<1x64x128xf32> to vector<64x128xf32>
    %cst_155 = arith.constant dense<0.000000e+00> : vector<38x128xf32>
    %155 = tpu.matmul %152, %154, %cst_155 {dimension_numbers = #tpu.dot_dimension_numbers<[1], [0], [0], [1], [0, 0, 1, 1], [], []>} : vector<38x64xf32>, vector<64x128xf32>, vector<38x128xf32> -> vector<38x128xf32>
    %156 = arith.addf %151, %155 : vector<38x128xf32>
    %c21_156 = arith.constant 21 : index
    %c0_157 = arith.constant 0 : index
    %157 = vector.load %arg17[%c21_156, %c0_157] : memref<60x64xf32, #tpu.memory_space<vmem>>, vector<38x64xf32>
    %c7_158 = arith.constant 7 : index
    %c0_159 = arith.constant 0 : index
    %c0_160 = arith.constant 0 : index
    %158 = vector.load %arg4[%c7_158, %c0_159, %c0_160] : memref<9x64x128xf32, #tpu.memory_space<vmem>>, vector<1x64x128xf32>
    %159 = vector.shape_cast %158 : vector<1x64x128xf32> to vector<64x128xf32>
    %cst_161 = arith.constant dense<0.000000e+00> : vector<38x128xf32>
    %160 = tpu.matmul %157, %159, %cst_161 {dimension_numbers = #tpu.dot_dimension_numbers<[1], [0], [0], [1], [0, 0, 1, 1], [], []>} : vector<38x64xf32>, vector<64x128xf32>, vector<38x128xf32> -> vector<38x128xf32>
    %161 = arith.addf %156, %160 : vector<38x128xf32>
    %c22 = arith.constant 22 : index
    %c0_162 = arith.constant 0 : index
    %162 = vector.load %arg17[%c22, %c0_162] : memref<60x64xf32, #tpu.memory_space<vmem>>, vector<38x64xf32>
    %c8_163 = arith.constant 8 : index
    %c0_164 = arith.constant 0 : index
    %c0_165 = arith.constant 0 : index
    %163 = vector.load %arg4[%c8_163, %c0_164, %c0_165] : memref<9x64x128xf32, #tpu.memory_space<vmem>>, vector<1x64x128xf32>
    %164 = vector.shape_cast %163 : vector<1x64x128xf32> to vector<64x128xf32>
    %cst_166 = arith.constant dense<0.000000e+00> : vector<38x128xf32>
    %165 = tpu.matmul %162, %164, %cst_166 {dimension_numbers = #tpu.dot_dimension_numbers<[1], [0], [0], [1], [0, 0, 1, 1], [], []>} : vector<38x64xf32>, vector<64x128xf32>, vector<38x128xf32> -> vector<38x128xf32>
    %166 = arith.addf %161, %165 : vector<38x128xf32>
    %c0_167 = arith.constant 0 : index
    %c0_168 = arith.constant 0 : index
    %167 = vector.load %arg5[%c0_167, %c0_168] : memref<1x128xf32, #tpu.memory_space<vmem>>, vector<1x128xf32>
    %168 = vector.broadcast %167 : vector<1x128xf32> to vector<38x128xf32>
    %169 = arith.addf %166, %168 : vector<38x128xf32>
    %cst_169 = arith.constant 0.000000e+00 : f32
    %170 = vector.broadcast %cst_169 : f32 to vector<38x128xf32>
    %171 = arith.maximumf %169, %170 : vector<38x128xf32>
    %c0_170 = arith.constant 0 : index
    %c0_171 = arith.constant 0 : index
    %172 = vector.load %arg18[%c0_170, %c0_171] : memref<38x128xf32, #tpu.memory_space<vmem>>, vector<38x128xf32>
    tpu.vector_store %arg18[%c0_170, %c0_171], %171 {strides = array<i32>} : memref<38x128xf32, #tpu.memory_space<vmem>>, vector<38x128xf32>,
    %c0_172 = arith.constant 0 : index
    %c0_173 = arith.constant 0 : index
    %173 = tpu.strided_load %arg18[%c0_172, %c0_173] {strides = array<i32: 2, 1>} : memref<38x128xf32, #tpu.memory_space<vmem>>, vector<4x128xf32>
    %c1_174 = arith.constant 1 : index
    %c0_175 = arith.constant 0 : index
    %174 = tpu.strided_load %arg18[%c1_174, %c0_175] {strides = array<i32: 2, 1>} : memref<38x128xf32, #tpu.memory_space<vmem>>, vector<4x128xf32>
    %175 = arith.maximumf %173, %174 : vector<4x128xf32>
    %c10_176 = arith.constant 10 : index
    %c0_177 = arith.constant 0 : index
    %176 = tpu.strided_load %arg18[%c10_176, %c0_177] {strides = array<i32: 2, 1>} : memref<38x128xf32, #tpu.memory_space<vmem>>, vector<4x128xf32>
    %177 = arith.maximumf %175, %176 : vector<4x128xf32>
    %c11_178 = arith.constant 11 : index
    %c0_179 = arith.constant 0 : index
    %178 = tpu.strided_load %arg18[%c11_178, %c0_179] {strides = array<i32: 2, 1>} : memref<38x128xf32, #tpu.memory_space<vmem>>, vector<4x128xf32>
    %179 = arith.maximumf %177, %178 : vector<4x128xf32>
    %c0_180 = arith.constant 0 : index
    %c0_181 = arith.constant 0 : index
    %c0_182 = arith.constant 0 : index
    %180 = vector.load %arg9[%c0_180, %c0_181, %c0_182] : memref<2x128x64xf32, #tpu.memory_space<vmem>>, vector<1x128x64xf32>
    %181 = vector.shape_cast %180 : vector<1x128x64xf32> to vector<128x64xf32>
    %cst_183 = arith.constant dense<0.000000e+00> : vector<4x64xf32>
    %182 = tpu.matmul %179, %181, %cst_183 {dimension_numbers = #tpu.dot_dimension_numbers<[1], [0], [0], [1], [0, 0, 1, 1], [], []>} : vector<4x128xf32>, vector<128x64xf32>, vector<4x64xf32> -> vector<4x64xf32>
    %c1_184 = arith.constant 1 : index
    %c0_185 = arith.constant 0 : index
    %c0_186 = arith.constant 0 : index
    %183 = vector.load %arg9[%c1_184, %c0_185, %c0_186] : memref<2x128x64xf32, #tpu.memory_space<vmem>>, vector<1x128x64xf32>
    %184 = vector.shape_cast %183 : vector<1x128x64xf32> to vector<128x64xf32>
    %cst_187 = arith.constant dense<0.000000e+00> : vector<4x64xf32>
    %185 = tpu.matmul %179, %184, %cst_187 {dimension_numbers = #tpu.dot_dimension_numbers<[1], [0], [0], [1], [0, 0, 1, 1], [], []>} : vector<4x128xf32>, vector<128x64xf32>, vector<4x64xf32> -> vector<4x64xf32>
    %186 = arith.maximumf %182, %185 : vector<4x64xf32>
    %c7_188 = arith.constant 7 : index
    %c0_189 = arith.constant 0 : index
    %187 = vector.load %arg19[%c7_188, %c0_189] : memref<24x64xf32, #tpu.memory_space<vmem>>, vector<4x64xf32>
    tpu.vector_store %arg19[%c7_188, %c0_189], %186 {strides = array<i32>} : memref<24x64xf32, #tpu.memory_space<vmem>>, vector<4x64xf32>,
    %c20_190 = arith.constant 20 : index
    %c0_191 = arith.constant 0 : index
    %188 = tpu.strided_load %arg18[%c20_190, %c0_191] {strides = array<i32: 2, 1>} : memref<38x128xf32, #tpu.memory_space<vmem>>, vector<4x128xf32>
    %c21_192 = arith.constant 21 : index
    %c0_193 = arith.constant 0 : index
    %189 = tpu.strided_load %arg18[%c21_192, %c0_193] {strides = array<i32: 2, 1>} : memref<38x128xf32, #tpu.memory_space<vmem>>, vector<4x128xf32>
    %190 = arith.maximumf %188, %189 : vector<4x128xf32>
    %c30 = arith.constant 30 : index
    %c0_194 = arith.constant 0 : index
    %191 = tpu.strided_load %arg18[%c30, %c0_194] {strides = array<i32: 2, 1>} : memref<38x128xf32, #tpu.memory_space<vmem>>, vector<4x128xf32>
    %192 = arith.maximumf %190, %191 : vector<4x128xf32>
    %c31_195 = arith.constant 31 : index
    %c0_196 = arith.constant 0 : index
    %193 = tpu.strided_load %arg18[%c31_195, %c0_196] {strides = array<i32: 2, 1>} : memref<38x128xf32, #tpu.memory_space<vmem>>, vector<4x128xf32>
    %194 = arith.maximumf %192, %193 : vector<4x128xf32>
    %c0_197 = arith.constant 0 : index
    %c0_198 = arith.constant 0 : index
    %c0_199 = arith.constant 0 : index
    %195 = vector.load %arg9[%c0_197, %c0_198, %c0_199] : memref<2x128x64xf32, #tpu.memory_space<vmem>>, vector<1x128x64xf32>
    %196 = vector.shape_cast %195 : vector<1x128x64xf32> to vector<128x64xf32>
    %cst_200 = arith.constant dense<0.000000e+00> : vector<4x64xf32>
    %197 = tpu.matmul %194, %196, %cst_200 {dimension_numbers = #tpu.dot_dimension_numbers<[1], [0], [0], [1], [0, 0, 1, 1], [], []>} : vector<4x128xf32>, vector<128x64xf32>, vector<4x64xf32> -> vector<4x64xf32>
    %c1_201 = arith.constant 1 : index
    %c0_202 = arith.constant 0 : index
    %c0_203 = arith.constant 0 : index
    %198 = vector.load %arg9[%c1_201, %c0_202, %c0_203] : memref<2x128x64xf32, #tpu.memory_space<vmem>>, vector<1x128x64xf32>
    %199 = vector.shape_cast %198 : vector<1x128x64xf32> to vector<128x64xf32>
    %cst_204 = arith.constant dense<0.000000e+00> : vector<4x64xf32>
    %200 = tpu.matmul %194, %199, %cst_204 {dimension_numbers = #tpu.dot_dimension_numbers<[1], [0], [0], [1], [0, 0, 1, 1], [], []>} : vector<4x128xf32>, vector<128x64xf32>, vector<4x64xf32> -> vector<4x64xf32>
    %201 = arith.maximumf %197, %200 : vector<4x64xf32>
    %c13 = arith.constant 13 : index
    %c0_205 = arith.constant 0 : index
    %202 = vector.load %arg19[%c13, %c0_205] : memref<24x64xf32, #tpu.memory_space<vmem>>, vector<4x64xf32>
    tpu.vector_store %arg19[%c13, %c0_205], %201 {strides = array<i32>} : memref<24x64xf32, #tpu.memory_space<vmem>>, vector<4x64xf32>,
    %c0_206 = arith.constant 0 : index
    %c0_207 = arith.constant 0 : index
    %203 = vector.load %arg19[%c0_206, %c0_207] : memref<24x64xf32, #tpu.memory_space<vmem>>, vector<10x64xf32>
    %c0_208 = arith.constant 0 : index
    %c0_209 = arith.constant 0 : index
    %c0_210 = arith.constant 0 : index
    %204 = vector.load %arg6[%c0_208, %c0_209, %c0_210] : memref<9x64x128xf32, #tpu.memory_space<vmem>>, vector<1x64x128xf32>
    %205 = vector.shape_cast %204 : vector<1x64x128xf32> to vector<64x128xf32>
    %cst_211 = arith.constant dense<0.000000e+00> : vector<10x128xf32>
    %206 = tpu.matmul %203, %205, %cst_211 {dimension_numbers = #tpu.dot_dimension_numbers<[1], [0], [0], [1], [0, 0, 1, 1], [], []>} : vector<10x64xf32>, vector<64x128xf32>, vector<10x128xf32> -> vector<10x128xf32>
    %c1_212 = arith.constant 1 : index
    %c0_213 = arith.constant 0 : index
    %207 = vector.load %arg19[%c1_212, %c0_213] : memref<24x64xf32, #tpu.memory_space<vmem>>, vector<10x64xf32>
    %c1_214 = arith.constant 1 : index
    %c0_215 = arith.constant 0 : index
    %c0_216 = arith.constant 0 : index
    %208 = vector.load %arg6[%c1_214, %c0_215, %c0_216] : memref<9x64x128xf32, #tpu.memory_space<vmem>>, vector<1x64x128xf32>
    %209 = vector.shape_cast %208 : vector<1x64x128xf32> to vector<64x128xf32>
    %cst_217 = arith.constant dense<0.000000e+00> : vector<10x128xf32>
    %210 = tpu.matmul %207, %209, %cst_217 {dimension_numbers = #tpu.dot_dimension_numbers<[1], [0], [0], [1], [0, 0, 1, 1], [], []>} : vector<10x64xf32>, vector<64x128xf32>, vector<10x128xf32> -> vector<10x128xf32>
    %211 = arith.addf %206, %210 : vector<10x128xf32>
    %c2_218 = arith.constant 2 : index
    %c0_219 = arith.constant 0 : index
    %212 = vector.load %arg19[%c2_218, %c0_219] : memref<24x64xf32, #tpu.memory_space<vmem>>, vector<10x64xf32>
    %c2_220 = arith.constant 2 : index
    %c0_221 = arith.constant 0 : index
    %c0_222 = arith.constant 0 : index
    %213 = vector.load %arg6[%c2_220, %c0_221, %c0_222] : memref<9x64x128xf32, #tpu.memory_space<vmem>>, vector<1x64x128xf32>
    %214 = vector.shape_cast %213 : vector<1x64x128xf32> to vector<64x128xf32>
    %cst_223 = arith.constant dense<0.000000e+00> : vector<10x128xf32>
    %215 = tpu.matmul %212, %214, %cst_223 {dimension_numbers = #tpu.dot_dimension_numbers<[1], [0], [0], [1], [0, 0, 1, 1], [], []>} : vector<10x64xf32>, vector<64x128xf32>, vector<10x128xf32> -> vector<10x128xf32>
    %216 = arith.addf %211, %215 : vector<10x128xf32>
    %c6_224 = arith.constant 6 : index
    %c0_225 = arith.constant 0 : index
    %217 = vector.load %arg19[%c6_224, %c0_225] : memref<24x64xf32, #tpu.memory_space<vmem>>, vector<10x64xf32>
    %c3_226 = arith.constant 3 : index
    %c0_227 = arith.constant 0 : index
    %c0_228 = arith.constant 0 : index
    %218 = vector.load %arg6[%c3_226, %c0_227, %c0_228] : memref<9x64x128xf32, #tpu.memory_space<vmem>>, vector<1x64x128xf32>
    %219 = vector.shape_cast %218 : vector<1x64x128xf32> to vector<64x128xf32>
    %cst_229 = arith.constant dense<0.000000e+00> : vector<10x128xf32>
    %220 = tpu.matmul %217, %219, %cst_229 {dimension_numbers = #tpu.dot_dimension_numbers<[1], [0], [0], [1], [0, 0, 1, 1], [], []>} : vector<10x64xf32>, vector<64x128xf32>, vector<10x128xf32> -> vector<10x128xf32>
    %221 = arith.addf %216, %220 : vector<10x128xf32>
    %c7_230 = arith.constant 7 : index
    %c0_231 = arith.constant 0 : index
    %222 = vector.load %arg19[%c7_230, %c0_231] : memref<24x64xf32, #tpu.memory_space<vmem>>, vector<10x64xf32>
    %c4_232 = arith.constant 4 : index
    %c0_233 = arith.constant 0 : index
    %c0_234 = arith.constant 0 : index
    %223 = vector.load %arg6[%c4_232, %c0_233, %c0_234] : memref<9x64x128xf32, #tpu.memory_space<vmem>>, vector<1x64x128xf32>
    %224 = vector.shape_cast %223 : vector<1x64x128xf32> to vector<64x128xf32>
    %cst_235 = arith.constant dense<0.000000e+00> : vector<10x128xf32>
    %225 = tpu.matmul %222, %224, %cst_235 {dimension_numbers = #tpu.dot_dimension_numbers<[1], [0], [0], [1], [0, 0, 1, 1], [], []>} : vector<10x64xf32>, vector<64x128xf32>, vector<10x128xf32> -> vector<10x128xf32>
    %226 = arith.addf %221, %225 : vector<10x128xf32>
    %c8_236 = arith.constant 8 : index
    %c0_237 = arith.constant 0 : index
    %227 = vector.load %arg19[%c8_236, %c0_237] : memref<24x64xf32, #tpu.memory_space<vmem>>, vector<10x64xf32>
    %c5_238 = arith.constant 5 : index
    %c0_239 = arith.constant 0 : index
    %c0_240 = arith.constant 0 : index
    %228 = vector.load %arg6[%c5_238, %c0_239, %c0_240] : memref<9x64x128xf32, #tpu.memory_space<vmem>>, vector<1x64x128xf32>
    %229 = vector.shape_cast %228 : vector<1x64x128xf32> to vector<64x128xf32>
    %cst_241 = arith.constant dense<0.000000e+00> : vector<10x128xf32>
    %230 = tpu.matmul %227, %229, %cst_241 {dimension_numbers = #tpu.dot_dimension_numbers<[1], [0], [0], [1], [0, 0, 1, 1], [], []>} : vector<10x64xf32>, vector<64x128xf32>, vector<10x128xf32> -> vector<10x128xf32>
    %231 = arith.addf %226, %230 : vector<10x128xf32>
    %c12_242 = arith.constant 12 : index
    %c0_243 = arith.constant 0 : index
    %232 = vector.load %arg19[%c12_242, %c0_243] : memref<24x64xf32, #tpu.memory_space<vmem>>, vector<10x64xf32>
    %c6_244 = arith.constant 6 : index
    %c0_245 = arith.constant 0 : index
    %c0_246 = arith.constant 0 : index
    %233 = vector.load %arg6[%c6_244, %c0_245, %c0_246] : memref<9x64x128xf32, #tpu.memory_space<vmem>>, vector<1x64x128xf32>
    %234 = vector.shape_cast %233 : vector<1x64x128xf32> to vector<64x128xf32>
    %cst_247 = arith.constant dense<0.000000e+00> : vector<10x128xf32>
    %235 = tpu.matmul %232, %234, %cst_247 {dimension_numbers = #tpu.dot_dimension_numbers<[1], [0], [0], [1], [0, 0, 1, 1], [], []>} : vector<10x64xf32>, vector<64x128xf32>, vector<10x128xf32> -> vector<10x128xf32>
    %236 = arith.addf %231, %235 : vector<10x128xf32>
    %c13_248 = arith.constant 13 : index
    %c0_249 = arith.constant 0 : index
    %237 = vector.load %arg19[%c13_248, %c0_249] : memref<24x64xf32, #tpu.memory_space<vmem>>, vector<10x64xf32>
    %c7_250 = arith.constant 7 : index
    %c0_251 = arith.constant 0 : index
    %c0_252 = arith.constant 0 : index
    %238 = vector.load %arg6[%c7_250, %c0_251, %c0_252] : memref<9x64x128xf32, #tpu.memory_space<vmem>>, vector<1x64x128xf32>
    %239 = vector.shape_cast %238 : vector<1x64x128xf32> to vector<64x128xf32>
    %cst_253 = arith.constant dense<0.000000e+00> : vector<10x128xf32>
    %240 = tpu.matmul %237, %239, %cst_253 {dimension_numbers = #tpu.dot_dimension_numbers<[1], [0], [0], [1], [0, 0, 1, 1], [], []>} : vector<10x64xf32>, vector<64x128xf32>, vector<10x128xf32> -> vector<10x128xf32>
    %241 = arith.addf %236, %240 : vector<10x128xf32>
    %c14 = arith.constant 14 : index
    %c0_254 = arith.constant 0 : index
    %242 = vector.load %arg19[%c14, %c0_254] : memref<24x64xf32, #tpu.memory_space<vmem>>, vector<10x64xf32>
    %c8_255 = arith.constant 8 : index
    %c0_256 = arith.constant 0 : index
    %c0_257 = arith.constant 0 : index
    %243 = vector.load %arg6[%c8_255, %c0_256, %c0_257] : memref<9x64x128xf32, #tpu.memory_space<vmem>>, vector<1x64x128xf32>
    %244 = vector.shape_cast %243 : vector<1x64x128xf32> to vector<64x128xf32>
    %cst_258 = arith.constant dense<0.000000e+00> : vector<10x128xf32>
    %245 = tpu.matmul %242, %244, %cst_258 {dimension_numbers = #tpu.dot_dimension_numbers<[1], [0], [0], [1], [0, 0, 1, 1], [], []>} : vector<10x64xf32>, vector<64x128xf32>, vector<10x128xf32> -> vector<10x128xf32>
    %246 = arith.addf %241, %245 : vector<10x128xf32>
    %c0_259 = arith.constant 0 : index
    %c0_260 = arith.constant 0 : index
    %247 = vector.load %arg7[%c0_259, %c0_260] : memref<1x128xf32, #tpu.memory_space<vmem>>, vector<1x128xf32>
    %248 = vector.broadcast %247 : vector<1x128xf32> to vector<10x128xf32>
    %249 = arith.addf %246, %248 : vector<10x128xf32>
    %cst_261 = arith.constant 0.000000e+00 : f32
    %250 = vector.broadcast %cst_261 : f32 to vector<10x128xf32>
    %251 = arith.maximumf %249, %250 : vector<10x128xf32>
    %c0_262 = arith.constant 0 : index
    %c0_263 = arith.constant 0 : index
    %252 = vector.load %arg20[%c0_262, %c0_263] : memref<10x128xf32, #tpu.memory_space<vmem>>, vector<10x128xf32>
    tpu.vector_store %arg20[%c0_262, %c0_263], %251 {strides = array<i32>} : memref<10x128xf32, #tpu.memory_space<vmem>>, vector<10x128xf32>,
    %c0_264 = arith.constant 0 : index
    %c0_265 = arith.constant 0 : index
    %253 = vector.load %arg12[%c0_264, %c0_265] : memref<1x32xf32, #tpu.memory_space<vmem>>, vector<1x32xf32>
    %c0_266 = arith.constant 0 : index
    %c0_267 = arith.constant 0 : index
    %254 = tpu.strided_load %arg20[%c0_266, %c0_267] {strides = array<i32: 2, 1>} : memref<10x128xf32, #tpu.memory_space<vmem>>, vector<2x128xf32>
    %c1_268 = arith.constant 1 : index
    %c0_269 = arith.constant 0 : index
    %255 = tpu.strided_load %arg20[%c1_268, %c0_269] {strides = array<i32: 2, 1>} : memref<10x128xf32, #tpu.memory_space<vmem>>, vector<2x128xf32>
    %256 = arith.maximumf %254, %255 : vector<2x128xf32>
    %c6_270 = arith.constant 6 : index
    %c0_271 = arith.constant 0 : index
    %257 = tpu.strided_load %arg20[%c6_270, %c0_271] {strides = array<i32: 2, 1>} : memref<10x128xf32, #tpu.memory_space<vmem>>, vector<2x128xf32>
    %258 = arith.maximumf %256, %257 : vector<2x128xf32>
    %c7_272 = arith.constant 7 : index
    %c0_273 = arith.constant 0 : index
    %259 = tpu.strided_load %arg20[%c7_272, %c0_273] {strides = array<i32: 2, 1>} : memref<10x128xf32, #tpu.memory_space<vmem>>, vector<2x128xf32>
    %260 = arith.maximumf %258, %259 : vector<2x128xf32>
    %c0_274 = arith.constant 0 : index
    %c0_275 = arith.constant 0 : index
    %c0_276 = arith.constant 0 : index
    %261 = vector.load %arg10[%c0_274, %c0_275, %c0_276] : memref<2x128x64xf32, #tpu.memory_space<vmem>>, vector<1x128x64xf32>
    %262 = vector.shape_cast %261 : vector<1x128x64xf32> to vector<128x64xf32>
    %cst_277 = arith.constant dense<0.000000e+00> : vector<2x64xf32>
    %263 = tpu.matmul %260, %262, %cst_277 {dimension_numbers = #tpu.dot_dimension_numbers<[1], [0], [0], [1], [0, 0, 1, 1], [], []>} : vector<2x128xf32>, vector<128x64xf32>, vector<2x64xf32> -> vector<2x64xf32>
    %c1_278 = arith.constant 1 : index
    %c0_279 = arith.constant 0 : index
    %c0_280 = arith.constant 0 : index
    %264 = vector.load %arg10[%c1_278, %c0_279, %c0_280] : memref<2x128x64xf32, #tpu.memory_space<vmem>>, vector<1x128x64xf32>
    %265 = vector.shape_cast %264 : vector<1x128x64xf32> to vector<128x64xf32>
    %cst_281 = arith.constant dense<0.000000e+00> : vector<2x64xf32>
    %266 = tpu.matmul %260, %265, %cst_281 {dimension_numbers = #tpu.dot_dimension_numbers<[1], [0], [0], [1], [0, 0, 1, 1], [], []>} : vector<2x128xf32>, vector<128x64xf32>, vector<2x64xf32> -> vector<2x64xf32>
    %267 = arith.maximumf %263, %266 : vector<2x64xf32>
    %268 = vector.extract_strided_slice %267 {offsets = [0, 0], sizes = [1, 64], strides = [1, 1]} : vector<2x64xf32> to vector<1x64xf32>
    %c0_282 = arith.constant 0 : index
    %c0_283 = arith.constant 0 : index
    %c0_284 = arith.constant 0 : index
    %269 = vector.load %arg11[%c0_282, %c0_283, %c0_284] : memref<2x64x32xf32, #tpu.memory_space<vmem>>, vector<1x64x32xf32>
    %270 = vector.shape_cast %269 : vector<1x64x32xf32> to vector<64x32xf32>
    %cst_285 = arith.constant dense<0.000000e+00> : vector<1x32xf32>
    %271 = tpu.matmul %268, %270, %cst_285 {dimension_numbers = #tpu.dot_dimension_numbers<[1], [0], [0], [1], [0, 0, 1, 1], [], []>} : vector<1x64xf32>, vector<64x32xf32>, vector<1x32xf32> -> vector<1x32xf32>
    %272 = arith.addf %253, %271 : vector<1x32xf32>
    %273 = vector.extract_strided_slice %267 {offsets = [1, 0], sizes = [1, 64], strides = [1, 1]} : vector<2x64xf32> to vector<1x64xf32>
    %c1_286 = arith.constant 1 : index
    %c0_287 = arith.constant 0 : index
    %c0_288 = arith.constant 0 : index
    %274 = vector.load %arg11[%c1_286, %c0_287, %c0_288] : memref<2x64x32xf32, #tpu.memory_space<vmem>>, vector<1x64x32xf32>
    %275 = vector.shape_cast %274 : vector<1x64x32xf32> to vector<64x32xf32>
    %cst_289 = arith.constant dense<0.000000e+00> : vector<1x32xf32>
    %276 = tpu.matmul %273, %275, %cst_289 {dimension_numbers = #tpu.dot_dimension_numbers<[1], [0], [0], [1], [0, 0, 1, 1], [], []>} : vector<1x64xf32>, vector<64x32xf32>, vector<1x32xf32> -> vector<1x32xf32>
    %277 = arith.addf %272, %276 : vector<1x32xf32>
    %cst_290 = arith.constant 0.000000e+00 : f32
    %278 = vector.broadcast %cst_290 : f32 to vector<1x32xf32>
    %279 = arith.maximumf %277, %278 : vector<1x32xf32>
    %c0_291 = arith.constant 0 : index
    %c0_292 = arith.constant 0 : index
    %280 = vector.load %arg13[%c0_291, %c0_292] : memref<32x32xf32, #tpu.memory_space<vmem>>, vector<32x32xf32>
    %cst_293 = arith.constant dense<0.000000e+00> : vector<1x32xf32>
    %281 = tpu.matmul %279, %280, %cst_293 {dimension_numbers = #tpu.dot_dimension_numbers<[1], [0], [0], [1], [0, 0, 1, 1], [], []>} : vector<1x32xf32>, vector<32x32xf32>, vector<1x32xf32> -> vector<1x32xf32>
    %c0_294 = arith.constant 0 : index
    %c0_295 = arith.constant 0 : index
    %282 = vector.load %arg14[%c0_294, %c0_295] : memref<1x32xf32, #tpu.memory_space<vmem>>, vector<1x32xf32>
    %283 = arith.addf %281, %282 : vector<1x32xf32>
    %c0_296 = arith.constant 0 : index
    %c0_297 = arith.constant 0 : index
    %c0_298 = arith.constant 0 : index
    %284 = vector.load %arg15[%c0_296, %c0_297, %c0_298] : memref<2x1x32xf32, #tpu.memory_space<vmem>>, vector<1x1x32xf32>
    %285 = vector.shape_cast %284 : vector<1x1x32xf32> to vector<1x32xf32>
    %286 = vector.shape_cast %283 : vector<1x32xf32> to vector<1x1x32xf32>
    tpu.vector_store %arg15[%c0_296, %c0_297, %c0_298], %286 {strides = array<i32>} : memref<2x1x32xf32, #tpu.memory_space<vmem>>, vector<1x1x32xf32>,
    %c1_299 = arith.constant 1 : index
    %c0_300 = arith.constant 0 : index
    %c0_301 = arith.constant 0 : index
    %287 = vector.load %arg1[%c1_299, %c0_300, %c0_301] : memref<2x180x16xf32, #tpu.memory_space<vmem>>, vector<1x142x16xf32>
    %288 = vector.shape_cast %287 : vector<1x142x16xf32> to vector<142x16xf32>
    %c0_302 = arith.constant 0 : index
    %c0_303 = arith.constant 0 : index
    %c0_304 = arith.constant 0 : index
    %289 = vector.load %arg2[%c0_302, %c0_303, %c0_304] : memref<9x16x128xf32, #tpu.memory_space<vmem>>, vector<1x16x128xf32>
    %290 = vector.shape_cast %289 : vector<1x16x128xf32> to vector<16x128xf32>
    %cst_305 = arith.constant dense<0.000000e+00> : vector<142x128xf32>
    %291 = tpu.matmul %288, %290, %cst_305 {dimension_numbers = #tpu.dot_dimension_numbers<[1], [0], [0], [1], [0, 0, 1, 1], [], []>} : vector<142x16xf32>, vector<16x128xf32>, vector<142x128xf32> -> vector<142x128xf32>
    %c1_306 = arith.constant 1 : index
    %c1_307 = arith.constant 1 : index
    %c0_308 = arith.constant 0 : index
    %292 = vector.load %arg1[%c1_306, %c1_307, %c0_308] : memref<2x180x16xf32, #tpu.memory_space<vmem>>, vector<1x142x16xf32>
    %293 = vector.shape_cast %292 : vector<1x142x16xf32> to vector<142x16xf32>
    %c1_309 = arith.constant 1 : index
    %c0_310 = arith.constant 0 : index
    %c0_311 = arith.constant 0 : index
    %294 = vector.load %arg2[%c1_309, %c0_310, %c0_311] : memref<9x16x128xf32, #tpu.memory_space<vmem>>, vector<1x16x128xf32>
    %295 = vector.shape_cast %294 : vector<1x16x128xf32> to vector<16x128xf32>
    %cst_312 = arith.constant dense<0.000000e+00> : vector<142x128xf32>
    %296 = tpu.matmul %293, %295, %cst_312 {dimension_numbers = #tpu.dot_dimension_numbers<[1], [0], [0], [1], [0, 0, 1, 1], [], []>} : vector<142x16xf32>, vector<16x128xf32>, vector<142x128xf32> -> vector<142x128xf32>
    %297 = arith.addf %291, %296 : vector<142x128xf32>
    %c1_313 = arith.constant 1 : index
    %c2_314 = arith.constant 2 : index
    %c0_315 = arith.constant 0 : index
    %298 = vector.load %arg1[%c1_313, %c2_314, %c0_315] : memref<2x180x16xf32, #tpu.memory_space<vmem>>, vector<1x142x16xf32>
    %299 = vector.shape_cast %298 : vector<1x142x16xf32> to vector<142x16xf32>
    %c2_316 = arith.constant 2 : index
    %c0_317 = arith.constant 0 : index
    %c0_318 = arith.constant 0 : index
    %300 = vector.load %arg2[%c2_316, %c0_317, %c0_318] : memref<9x16x128xf32, #tpu.memory_space<vmem>>, vector<1x16x128xf32>
    %301 = vector.shape_cast %300 : vector<1x16x128xf32> to vector<16x128xf32>
    %cst_319 = arith.constant dense<0.000000e+00> : vector<142x128xf32>
    %302 = tpu.matmul %299, %301, %cst_319 {dimension_numbers = #tpu.dot_dimension_numbers<[1], [0], [0], [1], [0, 0, 1, 1], [], []>} : vector<142x16xf32>, vector<16x128xf32>, vector<142x128xf32> -> vector<142x128xf32>
    %303 = arith.addf %297, %302 : vector<142x128xf32>
    %c1_320 = arith.constant 1 : index
    %c18_321 = arith.constant 18 : index
    %c0_322 = arith.constant 0 : index
    %304 = vector.load %arg1[%c1_320, %c18_321, %c0_322] : memref<2x180x16xf32, #tpu.memory_space<vmem>>, vector<1x142x16xf32>
    %305 = vector.shape_cast %304 : vector<1x142x16xf32> to vector<142x16xf32>
    %c3_323 = arith.constant 3 : index
    %c0_324 = arith.constant 0 : index
    %c0_325 = arith.constant 0 : index
    %306 = vector.load %arg2[%c3_323, %c0_324, %c0_325] : memref<9x16x128xf32, #tpu.memory_space<vmem>>, vector<1x16x128xf32>
    %307 = vector.shape_cast %306 : vector<1x16x128xf32> to vector<16x128xf32>
    %cst_326 = arith.constant dense<0.000000e+00> : vector<142x128xf32>
    %308 = tpu.matmul %305, %307, %cst_326 {dimension_numbers = #tpu.dot_dimension_numbers<[1], [0], [0], [1], [0, 0, 1, 1], [], []>} : vector<142x16xf32>, vector<16x128xf32>, vector<142x128xf32> -> vector<142x128xf32>
    %309 = arith.addf %303, %308 : vector<142x128xf32>
    %c1_327 = arith.constant 1 : index
    %c19_328 = arith.constant 19 : index
    %c0_329 = arith.constant 0 : index
    %310 = vector.load %arg1[%c1_327, %c19_328, %c0_329] : memref<2x180x16xf32, #tpu.memory_space<vmem>>, vector<1x142x16xf32>
    %311 = vector.shape_cast %310 : vector<1x142x16xf32> to vector<142x16xf32>
    %c4_330 = arith.constant 4 : index
    %c0_331 = arith.constant 0 : index
    %c0_332 = arith.constant 0 : index
    %312 = vector.load %arg2[%c4_330, %c0_331, %c0_332] : memref<9x16x128xf32, #tpu.memory_space<vmem>>, vector<1x16x128xf32>
    %313 = vector.shape_cast %312 : vector<1x16x128xf32> to vector<16x128xf32>
    %cst_333 = arith.constant dense<0.000000e+00> : vector<142x128xf32>
    %314 = tpu.matmul %311, %313, %cst_333 {dimension_numbers = #tpu.dot_dimension_numbers<[1], [0], [0], [1], [0, 0, 1, 1], [], []>} : vector<142x16xf32>, vector<16x128xf32>, vector<142x128xf32> -> vector<142x128xf32>
    %315 = arith.addf %309, %314 : vector<142x128xf32>
    %c1_334 = arith.constant 1 : index
    %c20_335 = arith.constant 20 : index
    %c0_336 = arith.constant 0 : index
    %316 = vector.load %arg1[%c1_334, %c20_335, %c0_336] : memref<2x180x16xf32, #tpu.memory_space<vmem>>, vector<1x142x16xf32>
    %317 = vector.shape_cast %316 : vector<1x142x16xf32> to vector<142x16xf32>
    %c5_337 = arith.constant 5 : index
    %c0_338 = arith.constant 0 : index
    %c0_339 = arith.constant 0 : index
    %318 = vector.load %arg2[%c5_337, %c0_338, %c0_339] : memref<9x16x128xf32, #tpu.memory_space<vmem>>, vector<1x16x128xf32>
    %319 = vector.shape_cast %318 : vector<1x16x128xf32> to vector<16x128xf32>
    %cst_340 = arith.constant dense<0.000000e+00> : vector<142x128xf32>
    %320 = tpu.matmul %317, %319, %cst_340 {dimension_numbers = #tpu.dot_dimension_numbers<[1], [0], [0], [1], [0, 0, 1, 1], [], []>} : vector<142x16xf32>, vector<16x128xf32>, vector<142x128xf32> -> vector<142x128xf32>
    %321 = arith.addf %315, %320 : vector<142x128xf32>
    %c1_341 = arith.constant 1 : index
    %c36_342 = arith.constant 36 : index
    %c0_343 = arith.constant 0 : index
    %322 = vector.load %arg1[%c1_341, %c36_342, %c0_343] : memref<2x180x16xf32, #tpu.memory_space<vmem>>, vector<1x142x16xf32>
    %323 = vector.shape_cast %322 : vector<1x142x16xf32> to vector<142x16xf32>
    %c6_344 = arith.constant 6 : index
    %c0_345 = arith.constant 0 : index
    %c0_346 = arith.constant 0 : index
    %324 = vector.load %arg2[%c6_344, %c0_345, %c0_346] : memref<9x16x128xf32, #tpu.memory_space<vmem>>, vector<1x16x128xf32>
    %325 = vector.shape_cast %324 : vector<1x16x128xf32> to vector<16x128xf32>
    %cst_347 = arith.constant dense<0.000000e+00> : vector<142x128xf32>
    %326 = tpu.matmul %323, %325, %cst_347 {dimension_numbers = #tpu.dot_dimension_numbers<[1], [0], [0], [1], [0, 0, 1, 1], [], []>} : vector<142x16xf32>, vector<16x128xf32>, vector<142x128xf32> -> vector<142x128xf32>
    %327 = arith.addf %321, %326 : vector<142x128xf32>
    %c1_348 = arith.constant 1 : index
    %c37_349 = arith.constant 37 : index
    %c0_350 = arith.constant 0 : index
    %328 = vector.load %arg1[%c1_348, %c37_349, %c0_350] : memref<2x180x16xf32, #tpu.memory_space<vmem>>, vector<1x142x16xf32>
    %329 = vector.shape_cast %328 : vector<1x142x16xf32> to vector<142x16xf32>
    %c7_351 = arith.constant 7 : index
    %c0_352 = arith.constant 0 : index
    %c0_353 = arith.constant 0 : index
    %330 = vector.load %arg2[%c7_351, %c0_352, %c0_353] : memref<9x16x128xf32, #tpu.memory_space<vmem>>, vector<1x16x128xf32>
    %331 = vector.shape_cast %330 : vector<1x16x128xf32> to vector<16x128xf32>
    %cst_354 = arith.constant dense<0.000000e+00> : vector<142x128xf32>
    %332 = tpu.matmul %329, %331, %cst_354 {dimension_numbers = #tpu.dot_dimension_numbers<[1], [0], [0], [1], [0, 0, 1, 1], [], []>} : vector<142x16xf32>, vector<16x128xf32>, vector<142x128xf32> -> vector<142x128xf32>
    %333 = arith.addf %327, %332 : vector<142x128xf32>
    %c1_355 = arith.constant 1 : index
    %c38_356 = arith.constant 38 : index
    %c0_357 = arith.constant 0 : index
    %334 = vector.load %arg1[%c1_355, %c38_356, %c0_357] : memref<2x180x16xf32, #tpu.memory_space<vmem>>, vector<1x142x16xf32>
    %335 = vector.shape_cast %334 : vector<1x142x16xf32> to vector<142x16xf32>
    %c8_358 = arith.constant 8 : index
    %c0_359 = arith.constant 0 : index
    %c0_360 = arith.constant 0 : index
    %336 = vector.load %arg2[%c8_358, %c0_359, %c0_360] : memref<9x16x128xf32, #tpu.memory_space<vmem>>, vector<1x16x128xf32>
    %337 = vector.shape_cast %336 : vector<1x16x128xf32> to vector<16x128xf32>
    %cst_361 = arith.constant dense<0.000000e+00> : vector<142x128xf32>
    %338 = tpu.matmul %335, %337, %cst_361 {dimension_numbers = #tpu.dot_dimension_numbers<[1], [0], [0], [1], [0, 0, 1, 1], [], []>} : vector<142x16xf32>, vector<16x128xf32>, vector<142x128xf32> -> vector<142x128xf32>
    %339 = arith.addf %333, %338 : vector<142x128xf32>
    %c0_362 = arith.constant 0 : index
    %c0_363 = arith.constant 0 : index
    %340 = vector.load %arg3[%c0_362, %c0_363] : memref<1x128xf32, #tpu.memory_space<vmem>>, vector<1x128xf32>
    %341 = vector.broadcast %340 : vector<1x128xf32> to vector<142x128xf32>
    %342 = arith.addf %339, %341 : vector<142x128xf32>
    %cst_364 = arith.constant 0.000000e+00 : f32
    %343 = vector.broadcast %cst_364 : f32 to vector<142x128xf32>
    %344 = arith.maximumf %342, %343 : vector<142x128xf32>
    %c0_365 = arith.constant 0 : index
    %c0_366 = arith.constant 0 : index
    %345 = vector.load %arg16[%c0_365, %c0_366] : memref<142x128xf32, #tpu.memory_space<vmem>>, vector<142x128xf32>
    tpu.vector_store %arg16[%c0_365, %c0_366], %344 {strides = array<i32>} : memref<142x128xf32, #tpu.memory_space<vmem>>, vector<142x128xf32>,
    %c0_367 = arith.constant 0 : index
    %c0_368 = arith.constant 0 : index
    %346 = tpu.strided_load %arg16[%c0_367, %c0_368] {strides = array<i32: 2, 1>} : memref<142x128xf32, #tpu.memory_space<vmem>>, vector<8x128xf32>
    %c1_369 = arith.constant 1 : index
    %c0_370 = arith.constant 0 : index
    %347 = tpu.strided_load %arg16[%c1_369, %c0_370] {strides = array<i32: 2, 1>} : memref<142x128xf32, #tpu.memory_space<vmem>>, vector<8x128xf32>
    %348 = arith.maximumf %346, %347 : vector<8x128xf32>
    %c18_371 = arith.constant 18 : index
    %c0_372 = arith.constant 0 : index
    %349 = tpu.strided_load %arg16[%c18_371, %c0_372] {strides = array<i32: 2, 1>} : memref<142x128xf32, #tpu.memory_space<vmem>>, vector<8x128xf32>
    %350 = arith.maximumf %348, %349 : vector<8x128xf32>
    %c19_373 = arith.constant 19 : index
    %c0_374 = arith.constant 0 : index
    %351 = tpu.strided_load %arg16[%c19_373, %c0_374] {strides = array<i32: 2, 1>} : memref<142x128xf32, #tpu.memory_space<vmem>>, vector<8x128xf32>
    %352 = arith.maximumf %350, %351 : vector<8x128xf32>
    %c0_375 = arith.constant 0 : index
    %c0_376 = arith.constant 0 : index
    %c0_377 = arith.constant 0 : index
    %353 = vector.load %arg8[%c0_375, %c0_376, %c0_377] : memref<2x128x64xf32, #tpu.memory_space<vmem>>, vector<1x128x64xf32>
    %354 = vector.shape_cast %353 : vector<1x128x64xf32> to vector<128x64xf32>
    %cst_378 = arith.constant dense<0.000000e+00> : vector<8x64xf32>
    %355 = tpu.matmul %352, %354, %cst_378 {dimension_numbers = #tpu.dot_dimension_numbers<[1], [0], [0], [1], [0, 0, 1, 1], [], []>} : vector<8x128xf32>, vector<128x64xf32>, vector<8x64xf32> -> vector<8x64xf32>
    %c1_379 = arith.constant 1 : index
    %c0_380 = arith.constant 0 : index
    %c0_381 = arith.constant 0 : index
    %356 = vector.load %arg8[%c1_379, %c0_380, %c0_381] : memref<2x128x64xf32, #tpu.memory_space<vmem>>, vector<1x128x64xf32>
    %357 = vector.shape_cast %356 : vector<1x128x64xf32> to vector<128x64xf32>
    %cst_382 = arith.constant dense<0.000000e+00> : vector<8x64xf32>
    %358 = tpu.matmul %352, %357, %cst_382 {dimension_numbers = #tpu.dot_dimension_numbers<[1], [0], [0], [1], [0, 0, 1, 1], [], []>} : vector<8x128xf32>, vector<128x64xf32>, vector<8x64xf32> -> vector<8x64xf32>
    %359 = arith.maximumf %355, %358 : vector<8x64xf32>
    %c11_383 = arith.constant 11 : index
    %c0_384 = arith.constant 0 : index
    %360 = vector.load %arg17[%c11_383, %c0_384] : memref<60x64xf32, #tpu.memory_space<vmem>>, vector<8x64xf32>
    tpu.vector_store %arg17[%c11_383, %c0_384], %359 {strides = array<i32>} : memref<60x64xf32, #tpu.memory_space<vmem>>, vector<8x64xf32>,
    %c36_385 = arith.constant 36 : index
    %c0_386 = arith.constant 0 : index
    %361 = tpu.strided_load %arg16[%c36_385, %c0_386] {strides = array<i32: 2, 1>} : memref<142x128xf32, #tpu.memory_space<vmem>>, vector<8x128xf32>
    %c37_387 = arith.constant 37 : index
    %c0_388 = arith.constant 0 : index
    %362 = tpu.strided_load %arg16[%c37_387, %c0_388] {strides = array<i32: 2, 1>} : memref<142x128xf32, #tpu.memory_space<vmem>>, vector<8x128xf32>
    %363 = arith.maximumf %361, %362 : vector<8x128xf32>
    %c54_389 = arith.constant 54 : index
    %c0_390 = arith.constant 0 : index
    %364 = tpu.strided_load %arg16[%c54_389, %c0_390] {strides = array<i32: 2, 1>} : memref<142x128xf32, #tpu.memory_space<vmem>>, vector<8x128xf32>
    %365 = arith.maximumf %363, %364 : vector<8x128xf32>
    %c55_391 = arith.constant 55 : index
    %c0_392 = arith.constant 0 : index
    %366 = tpu.strided_load %arg16[%c55_391, %c0_392] {strides = array<i32: 2, 1>} : memref<142x128xf32, #tpu.memory_space<vmem>>, vector<8x128xf32>
    %367 = arith.maximumf %365, %366 : vector<8x128xf32>
    %c0_393 = arith.constant 0 : index
    %c0_394 = arith.constant 0 : index
    %c0_395 = arith.constant 0 : index
    %368 = vector.load %arg8[%c0_393, %c0_394, %c0_395] : memref<2x128x64xf32, #tpu.memory_space<vmem>>, vector<1x128x64xf32>
    %369 = vector.shape_cast %368 : vector<1x128x64xf32> to vector<128x64xf32>
    %cst_396 = arith.constant dense<0.000000e+00> : vector<8x64xf32>
    %370 = tpu.matmul %367, %369, %cst_396 {dimension_numbers = #tpu.dot_dimension_numbers<[1], [0], [0], [1], [0, 0, 1, 1], [], []>} : vector<8x128xf32>, vector<128x64xf32>, vector<8x64xf32> -> vector<8x64xf32>
    %c1_397 = arith.constant 1 : index
    %c0_398 = arith.constant 0 : index
    %c0_399 = arith.constant 0 : index
    %371 = vector.load %arg8[%c1_397, %c0_398, %c0_399] : memref<2x128x64xf32, #tpu.memory_space<vmem>>, vector<1x128x64xf32>
    %372 = vector.shape_cast %371 : vector<1x128x64xf32> to vector<128x64xf32>
    %cst_400 = arith.constant dense<0.000000e+00> : vector<8x64xf32>
    %373 = tpu.matmul %367, %372, %cst_400 {dimension_numbers = #tpu.dot_dimension_numbers<[1], [0], [0], [1], [0, 0, 1, 1], [], []>} : vector<8x128xf32>, vector<128x64xf32>, vector<8x64xf32> -> vector<8x64xf32>
    %374 = arith.maximumf %370, %373 : vector<8x64xf32>
    %c21_401 = arith.constant 21 : index
    %c0_402 = arith.constant 0 : index
    %375 = vector.load %arg17[%c21_401, %c0_402] : memref<60x64xf32, #tpu.memory_space<vmem>>, vector<8x64xf32>
    tpu.vector_store %arg17[%c21_401, %c0_402], %374 {strides = array<i32>} : memref<60x64xf32, #tpu.memory_space<vmem>>, vector<8x64xf32>,
    %c72_403 = arith.constant 72 : index
    %c0_404 = arith.constant 0 : index
    %376 = tpu.strided_load %arg16[%c72_403, %c0_404] {strides = array<i32: 2, 1>} : memref<142x128xf32, #tpu.memory_space<vmem>>, vector<8x128xf32>
    %c73_405 = arith.constant 73 : index
    %c0_406 = arith.constant 0 : index
    %377 = tpu.strided_load %arg16[%c73_405, %c0_406] {strides = array<i32: 2, 1>} : memref<142x128xf32, #tpu.memory_space<vmem>>, vector<8x128xf32>
    %378 = arith.maximumf %376, %377 : vector<8x128xf32>
    %c90_407 = arith.constant 90 : index
    %c0_408 = arith.constant 0 : index
    %379 = tpu.strided_load %arg16[%c90_407, %c0_408] {strides = array<i32: 2, 1>} : memref<142x128xf32, #tpu.memory_space<vmem>>, vector<8x128xf32>
    %380 = arith.maximumf %378, %379 : vector<8x128xf32>
    %c91_409 = arith.constant 91 : index
    %c0_410 = arith.constant 0 : index
    %381 = tpu.strided_load %arg16[%c91_409, %c0_410] {strides = array<i32: 2, 1>} : memref<142x128xf32, #tpu.memory_space<vmem>>, vector<8x128xf32>
    %382 = arith.maximumf %380, %381 : vector<8x128xf32>
    %c0_411 = arith.constant 0 : index
    %c0_412 = arith.constant 0 : index
    %c0_413 = arith.constant 0 : index
    %383 = vector.load %arg8[%c0_411, %c0_412, %c0_413] : memref<2x128x64xf32, #tpu.memory_space<vmem>>, vector<1x128x64xf32>
    %384 = vector.shape_cast %383 : vector<1x128x64xf32> to vector<128x64xf32>
    %cst_414 = arith.constant dense<0.000000e+00> : vector<8x64xf32>
    %385 = tpu.matmul %382, %384, %cst_414 {dimension_numbers = #tpu.dot_dimension_numbers<[1], [0], [0], [1], [0, 0, 1, 1], [], []>} : vector<8x128xf32>, vector<128x64xf32>, vector<8x64xf32> -> vector<8x64xf32>
    %c1_415 = arith.constant 1 : index
    %c0_416 = arith.constant 0 : index
    %c0_417 = arith.constant 0 : index
    %386 = vector.load %arg8[%c1_415, %c0_416, %c0_417] : memref<2x128x64xf32, #tpu.memory_space<vmem>>, vector<1x128x64xf32>
    %387 = vector.shape_cast %386 : vector<1x128x64xf32> to vector<128x64xf32>
    %cst_418 = arith.constant dense<0.000000e+00> : vector<8x64xf32>
    %388 = tpu.matmul %382, %387, %cst_418 {dimension_numbers = #tpu.dot_dimension_numbers<[1], [0], [0], [1], [0, 0, 1, 1], [], []>} : vector<8x128xf32>, vector<128x64xf32>, vector<8x64xf32> -> vector<8x64xf32>
    %389 = arith.maximumf %385, %388 : vector<8x64xf32>
    %c31_419 = arith.constant 31 : index
    %c0_420 = arith.constant 0 : index
    %390 = vector.load %arg17[%c31_419, %c0_420] : memref<60x64xf32, #tpu.memory_space<vmem>>, vector<8x64xf32>
    tpu.vector_store %arg17[%c31_419, %c0_420], %389 {strides = array<i32>} : memref<60x64xf32, #tpu.memory_space<vmem>>, vector<8x64xf32>,
    %c108_421 = arith.constant 108 : index
    %c0_422 = arith.constant 0 : index
    %391 = tpu.strided_load %arg16[%c108_421, %c0_422] {strides = array<i32: 2, 1>} : memref<142x128xf32, #tpu.memory_space<vmem>>, vector<8x128xf32>
    %c109_423 = arith.constant 109 : index
    %c0_424 = arith.constant 0 : index
    %392 = tpu.strided_load %arg16[%c109_423, %c0_424] {strides = array<i32: 2, 1>} : memref<142x128xf32, #tpu.memory_space<vmem>>, vector<8x128xf32>
    %393 = arith.maximumf %391, %392 : vector<8x128xf32>
    %c126_425 = arith.constant 126 : index
    %c0_426 = arith.constant 0 : index
    %394 = tpu.strided_load %arg16[%c126_425, %c0_426] {strides = array<i32: 2, 1>} : memref<142x128xf32, #tpu.memory_space<vmem>>, vector<8x128xf32>
    %395 = arith.maximumf %393, %394 : vector<8x128xf32>
    %c127_427 = arith.constant 127 : index
    %c0_428 = arith.constant 0 : index
    %396 = tpu.strided_load %arg16[%c127_427, %c0_428] {strides = array<i32: 2, 1>} : memref<142x128xf32, #tpu.memory_space<vmem>>, vector<8x128xf32>
    %397 = arith.maximumf %395, %396 : vector<8x128xf32>
    %c0_429 = arith.constant 0 : index
    %c0_430 = arith.constant 0 : index
    %c0_431 = arith.constant 0 : index
    %398 = vector.load %arg8[%c0_429, %c0_430, %c0_431] : memref<2x128x64xf32, #tpu.memory_space<vmem>>, vector<1x128x64xf32>
    %399 = vector.shape_cast %398 : vector<1x128x64xf32> to vector<128x64xf32>
    %cst_432 = arith.constant dense<0.000000e+00> : vector<8x64xf32>
    %400 = tpu.matmul %397, %399, %cst_432 {dimension_numbers = #tpu.dot_dimension_numbers<[1], [0], [0], [1], [0, 0, 1, 1], [], []>} : vector<8x128xf32>, vector<128x64xf32>, vector<8x64xf32> -> vector<8x64xf32>
    %c1_433 = arith.constant 1 : index
    %c0_434 = arith.constant 0 : index
    %c0_435 = arith.constant 0 : index
    %401 = vector.load %arg8[%c1_433, %c0_434, %c0_435] : memref<2x128x64xf32, #tpu.memory_space<vmem>>, vector<1x128x64xf32>
    %402 = vector.shape_cast %401 : vector<1x128x64xf32> to vector<128x64xf32>
    %cst_436 = arith.constant dense<0.000000e+00> : vector<8x64xf32>
    %403 = tpu.matmul %397, %402, %cst_436 {dimension_numbers = #tpu.dot_dimension_numbers<[1], [0], [0], [1], [0, 0, 1, 1], [], []>} : vector<8x128xf32>, vector<128x64xf32>, vector<8x64xf32> -> vector<8x64xf32>
    %404 = arith.maximumf %400, %403 : vector<8x64xf32>
    %c41_437 = arith.constant 41 : index
    %c0_438 = arith.constant 0 : index
    %405 = vector.load %arg17[%c41_437, %c0_438] : memref<60x64xf32, #tpu.memory_space<vmem>>, vector<8x64xf32>
    tpu.vector_store %arg17[%c41_437, %c0_438], %404 {strides = array<i32>} : memref<60x64xf32, #tpu.memory_space<vmem>>, vector<8x64xf32>,
    %c0_439 = arith.constant 0 : index
    %c0_440 = arith.constant 0 : index
    %406 = vector.load %arg17[%c0_439, %c0_440] : memref<60x64xf32, #tpu.memory_space<vmem>>, vector<38x64xf32>
    %c0_441 = arith.constant 0 : index
    %c0_442 = arith.constant 0 : index
    %c0_443 = arith.constant 0 : index
    %407 = vector.load %arg4[%c0_441, %c0_442, %c0_443] : memref<9x64x128xf32, #tpu.memory_space<vmem>>, vector<1x64x128xf32>
    %408 = vector.shape_cast %407 : vector<1x64x128xf32> to vector<64x128xf32>
    %cst_444 = arith.constant dense<0.000000e+00> : vector<38x128xf32>
    %409 = tpu.matmul %406, %408, %cst_444 {dimension_numbers = #tpu.dot_dimension_numbers<[1], [0], [0], [1], [0, 0, 1, 1], [], []>} : vector<38x64xf32>, vector<64x128xf32>, vector<38x128xf32> -> vector<38x128xf32>
    %c1_445 = arith.constant 1 : index
    %c0_446 = arith.constant 0 : index
    %410 = vector.load %arg17[%c1_445, %c0_446] : memref<60x64xf32, #tpu.memory_space<vmem>>, vector<38x64xf32>
    %c1_447 = arith.constant 1 : index
    %c0_448 = arith.constant 0 : index
    %c0_449 = arith.constant 0 : index
    %411 = vector.load %arg4[%c1_447, %c0_448, %c0_449] : memref<9x64x128xf32, #tpu.memory_space<vmem>>, vector<1x64x128xf32>
    %412 = vector.shape_cast %411 : vector<1x64x128xf32> to vector<64x128xf32>
    %cst_450 = arith.constant dense<0.000000e+00> : vector<38x128xf32>
    %413 = tpu.matmul %410, %412, %cst_450 {dimension_numbers = #tpu.dot_dimension_numbers<[1], [0], [0], [1], [0, 0, 1, 1], [], []>} : vector<38x64xf32>, vector<64x128xf32>, vector<38x128xf32> -> vector<38x128xf32>
    %414 = arith.addf %409, %413 : vector<38x128xf32>
    %c2_451 = arith.constant 2 : index
    %c0_452 = arith.constant 0 : index
    %415 = vector.load %arg17[%c2_451, %c0_452] : memref<60x64xf32, #tpu.memory_space<vmem>>, vector<38x64xf32>
    %c2_453 = arith.constant 2 : index
    %c0_454 = arith.constant 0 : index
    %c0_455 = arith.constant 0 : index
    %416 = vector.load %arg4[%c2_453, %c0_454, %c0_455] : memref<9x64x128xf32, #tpu.memory_space<vmem>>, vector<1x64x128xf32>
    %417 = vector.shape_cast %416 : vector<1x64x128xf32> to vector<64x128xf32>
    %cst_456 = arith.constant dense<0.000000e+00> : vector<38x128xf32>
    %418 = tpu.matmul %415, %417, %cst_456 {dimension_numbers = #tpu.dot_dimension_numbers<[1], [0], [0], [1], [0, 0, 1, 1], [], []>} : vector<38x64xf32>, vector<64x128xf32>, vector<38x128xf32> -> vector<38x128xf32>
    %419 = arith.addf %414, %418 : vector<38x128xf32>
    %c10_457 = arith.constant 10 : index
    %c0_458 = arith.constant 0 : index
    %420 = vector.load %arg17[%c10_457, %c0_458] : memref<60x64xf32, #tpu.memory_space<vmem>>, vector<38x64xf32>
    %c3_459 = arith.constant 3 : index
    %c0_460 = arith.constant 0 : index
    %c0_461 = arith.constant 0 : index
    %421 = vector.load %arg4[%c3_459, %c0_460, %c0_461] : memref<9x64x128xf32, #tpu.memory_space<vmem>>, vector<1x64x128xf32>
    %422 = vector.shape_cast %421 : vector<1x64x128xf32> to vector<64x128xf32>
    %cst_462 = arith.constant dense<0.000000e+00> : vector<38x128xf32>
    %423 = tpu.matmul %420, %422, %cst_462 {dimension_numbers = #tpu.dot_dimension_numbers<[1], [0], [0], [1], [0, 0, 1, 1], [], []>} : vector<38x64xf32>, vector<64x128xf32>, vector<38x128xf32> -> vector<38x128xf32>
    %424 = arith.addf %419, %423 : vector<38x128xf32>
    %c11_463 = arith.constant 11 : index
    %c0_464 = arith.constant 0 : index
    %425 = vector.load %arg17[%c11_463, %c0_464] : memref<60x64xf32, #tpu.memory_space<vmem>>, vector<38x64xf32>
    %c4_465 = arith.constant 4 : index
    %c0_466 = arith.constant 0 : index
    %c0_467 = arith.constant 0 : index
    %426 = vector.load %arg4[%c4_465, %c0_466, %c0_467] : memref<9x64x128xf32, #tpu.memory_space<vmem>>, vector<1x64x128xf32>
    %427 = vector.shape_cast %426 : vector<1x64x128xf32> to vector<64x128xf32>
    %cst_468 = arith.constant dense<0.000000e+00> : vector<38x128xf32>
    %428 = tpu.matmul %425, %427, %cst_468 {dimension_numbers = #tpu.dot_dimension_numbers<[1], [0], [0], [1], [0, 0, 1, 1], [], []>} : vector<38x64xf32>, vector<64x128xf32>, vector<38x128xf32> -> vector<38x128xf32>
    %429 = arith.addf %424, %428 : vector<38x128xf32>
    %c12_469 = arith.constant 12 : index
    %c0_470 = arith.constant 0 : index
    %430 = vector.load %arg17[%c12_469, %c0_470] : memref<60x64xf32, #tpu.memory_space<vmem>>, vector<38x64xf32>
    %c5_471 = arith.constant 5 : index
    %c0_472 = arith.constant 0 : index
    %c0_473 = arith.constant 0 : index
    %431 = vector.load %arg4[%c5_471, %c0_472, %c0_473] : memref<9x64x128xf32, #tpu.memory_space<vmem>>, vector<1x64x128xf32>
    %432 = vector.shape_cast %431 : vector<1x64x128xf32> to vector<64x128xf32>
    %cst_474 = arith.constant dense<0.000000e+00> : vector<38x128xf32>
    %433 = tpu.matmul %430, %432, %cst_474 {dimension_numbers = #tpu.dot_dimension_numbers<[1], [0], [0], [1], [0, 0, 1, 1], [], []>} : vector<38x64xf32>, vector<64x128xf32>, vector<38x128xf32> -> vector<38x128xf32>
    %434 = arith.addf %429, %433 : vector<38x128xf32>
    %c20_475 = arith.constant 20 : index
    %c0_476 = arith.constant 0 : index
    %435 = vector.load %arg17[%c20_475, %c0_476] : memref<60x64xf32, #tpu.memory_space<vmem>>, vector<38x64xf32>
    %c6_477 = arith.constant 6 : index
    %c0_478 = arith.constant 0 : index
    %c0_479 = arith.constant 0 : index
    %436 = vector.load %arg4[%c6_477, %c0_478, %c0_479] : memref<9x64x128xf32, #tpu.memory_space<vmem>>, vector<1x64x128xf32>
    %437 = vector.shape_cast %436 : vector<1x64x128xf32> to vector<64x128xf32>
    %cst_480 = arith.constant dense<0.000000e+00> : vector<38x128xf32>
    %438 = tpu.matmul %435, %437, %cst_480 {dimension_numbers = #tpu.dot_dimension_numbers<[1], [0], [0], [1], [0, 0, 1, 1], [], []>} : vector<38x64xf32>, vector<64x128xf32>, vector<38x128xf32> -> vector<38x128xf32>
    %439 = arith.addf %434, %438 : vector<38x128xf32>
    %c21_481 = arith.constant 21 : index
    %c0_482 = arith.constant 0 : index
    %440 = vector.load %arg17[%c21_481, %c0_482] : memref<60x64xf32, #tpu.memory_space<vmem>>, vector<38x64xf32>
    %c7_483 = arith.constant 7 : index
    %c0_484 = arith.constant 0 : index
    %c0_485 = arith.constant 0 : index
    %441 = vector.load %arg4[%c7_483, %c0_484, %c0_485] : memref<9x64x128xf32, #tpu.memory_space<vmem>>, vector<1x64x128xf32>
    %442 = vector.shape_cast %441 : vector<1x64x128xf32> to vector<64x128xf32>
    %cst_486 = arith.constant dense<0.000000e+00> : vector<38x128xf32>
    %443 = tpu.matmul %440, %442, %cst_486 {dimension_numbers = #tpu.dot_dimension_numbers<[1], [0], [0], [1], [0, 0, 1, 1], [], []>} : vector<38x64xf32>, vector<64x128xf32>, vector<38x128xf32> -> vector<38x128xf32>
    %444 = arith.addf %439, %443 : vector<38x128xf32>
    %c22_487 = arith.constant 22 : index
    %c0_488 = arith.constant 0 : index
    %445 = vector.load %arg17[%c22_487, %c0_488] : memref<60x64xf32, #tpu.memory_space<vmem>>, vector<38x64xf32>
    %c8_489 = arith.constant 8 : index
    %c0_490 = arith.constant 0 : index
    %c0_491 = arith.constant 0 : index
    %446 = vector.load %arg4[%c8_489, %c0_490, %c0_491] : memref<9x64x128xf32, #tpu.memory_space<vmem>>, vector<1x64x128xf32>
    %447 = vector.shape_cast %446 : vector<1x64x128xf32> to vector<64x128xf32>
    %cst_492 = arith.constant dense<0.000000e+00> : vector<38x128xf32>
    %448 = tpu.matmul %445, %447, %cst_492 {dimension_numbers = #tpu.dot_dimension_numbers<[1], [0], [0], [1], [0, 0, 1, 1], [], []>} : vector<38x64xf32>, vector<64x128xf32>, vector<38x128xf32> -> vector<38x128xf32>
    %449 = arith.addf %444, %448 : vector<38x128xf32>
    %c0_493 = arith.constant 0 : index
    %c0_494 = arith.constant 0 : index
    %450 = vector.load %arg5[%c0_493, %c0_494] : memref<1x128xf32, #tpu.memory_space<vmem>>, vector<1x128xf32>
    %451 = vector.broadcast %450 : vector<1x128xf32> to vector<38x128xf32>
    %452 = arith.addf %449, %451 : vector<38x128xf32>
    %cst_495 = arith.constant 0.000000e+00 : f32
    %453 = vector.broadcast %cst_495 : f32 to vector<38x128xf32>
    %454 = arith.maximumf %452, %453 : vector<38x128xf32>
    %c0_496 = arith.constant 0 : index
    %c0_497 = arith.constant 0 : index
    %455 = vector.load %arg18[%c0_496, %c0_497] : memref<38x128xf32, #tpu.memory_space<vmem>>, vector<38x128xf32>
    tpu.vector_store %arg18[%c0_496, %c0_497], %454 {strides = array<i32>} : memref<38x128xf32, #tpu.memory_space<vmem>>, vector<38x128xf32>,
    %c0_498 = arith.constant 0 : index
    %c0_499 = arith.constant 0 : index
    %456 = tpu.strided_load %arg18[%c0_498, %c0_499] {strides = array<i32: 2, 1>} : memref<38x128xf32, #tpu.memory_space<vmem>>, vector<4x128xf32>
    %c1_500 = arith.constant 1 : index
    %c0_501 = arith.constant 0 : index
    %457 = tpu.strided_load %arg18[%c1_500, %c0_501] {strides = array<i32: 2, 1>} : memref<38x128xf32, #tpu.memory_space<vmem>>, vector<4x128xf32>
    %458 = arith.maximumf %456, %457 : vector<4x128xf32>
    %c10_502 = arith.constant 10 : index
    %c0_503 = arith.constant 0 : index
    %459 = tpu.strided_load %arg18[%c10_502, %c0_503] {strides = array<i32: 2, 1>} : memref<38x128xf32, #tpu.memory_space<vmem>>, vector<4x128xf32>
    %460 = arith.maximumf %458, %459 : vector<4x128xf32>
    %c11_504 = arith.constant 11 : index
    %c0_505 = arith.constant 0 : index
    %461 = tpu.strided_load %arg18[%c11_504, %c0_505] {strides = array<i32: 2, 1>} : memref<38x128xf32, #tpu.memory_space<vmem>>, vector<4x128xf32>
    %462 = arith.maximumf %460, %461 : vector<4x128xf32>
    %c0_506 = arith.constant 0 : index
    %c0_507 = arith.constant 0 : index
    %c0_508 = arith.constant 0 : index
    %463 = vector.load %arg9[%c0_506, %c0_507, %c0_508] : memref<2x128x64xf32, #tpu.memory_space<vmem>>, vector<1x128x64xf32>
    %464 = vector.shape_cast %463 : vector<1x128x64xf32> to vector<128x64xf32>
    %cst_509 = arith.constant dense<0.000000e+00> : vector<4x64xf32>
    %465 = tpu.matmul %462, %464, %cst_509 {dimension_numbers = #tpu.dot_dimension_numbers<[1], [0], [0], [1], [0, 0, 1, 1], [], []>} : vector<4x128xf32>, vector<128x64xf32>, vector<4x64xf32> -> vector<4x64xf32>
    %c1_510 = arith.constant 1 : index
    %c0_511 = arith.constant 0 : index
    %c0_512 = arith.constant 0 : index
    %466 = vector.load %arg9[%c1_510, %c0_511, %c0_512] : memref<2x128x64xf32, #tpu.memory_space<vmem>>, vector<1x128x64xf32>
    %467 = vector.shape_cast %466 : vector<1x128x64xf32> to vector<128x64xf32>
    %cst_513 = arith.constant dense<0.000000e+00> : vector<4x64xf32>
    %468 = tpu.matmul %462, %467, %cst_513 {dimension_numbers = #tpu.dot_dimension_numbers<[1], [0], [0], [1], [0, 0, 1, 1], [], []>} : vector<4x128xf32>, vector<128x64xf32>, vector<4x64xf32> -> vector<4x64xf32>
    %469 = arith.maximumf %465, %468 : vector<4x64xf32>
    %c7_514 = arith.constant 7 : index
    %c0_515 = arith.constant 0 : index
    %470 = vector.load %arg19[%c7_514, %c0_515] : memref<24x64xf32, #tpu.memory_space<vmem>>, vector<4x64xf32>
    tpu.vector_store %arg19[%c7_514, %c0_515], %469 {strides = array<i32>} : memref<24x64xf32, #tpu.memory_space<vmem>>, vector<4x64xf32>,
    %c20_516 = arith.constant 20 : index
    %c0_517 = arith.constant 0 : index
    %471 = tpu.strided_load %arg18[%c20_516, %c0_517] {strides = array<i32: 2, 1>} : memref<38x128xf32, #tpu.memory_space<vmem>>, vector<4x128xf32>
    %c21_518 = arith.constant 21 : index
    %c0_519 = arith.constant 0 : index
    %472 = tpu.strided_load %arg18[%c21_518, %c0_519] {strides = array<i32: 2, 1>} : memref<38x128xf32, #tpu.memory_space<vmem>>, vector<4x128xf32>
    %473 = arith.maximumf %471, %472 : vector<4x128xf32>
    %c30_520 = arith.constant 30 : index
    %c0_521 = arith.constant 0 : index
    %474 = tpu.strided_load %arg18[%c30_520, %c0_521] {strides = array<i32: 2, 1>} : memref<38x128xf32, #tpu.memory_space<vmem>>, vector<4x128xf32>
    %475 = arith.maximumf %473, %474 : vector<4x128xf32>
    %c31_522 = arith.constant 31 : index
    %c0_523 = arith.constant 0 : index
    %476 = tpu.strided_load %arg18[%c31_522, %c0_523] {strides = array<i32: 2, 1>} : memref<38x128xf32, #tpu.memory_space<vmem>>, vector<4x128xf32>
    %477 = arith.maximumf %475, %476 : vector<4x128xf32>
    %c0_524 = arith.constant 0 : index
    %c0_525 = arith.constant 0 : index
    %c0_526 = arith.constant 0 : index
    %478 = vector.load %arg9[%c0_524, %c0_525, %c0_526] : memref<2x128x64xf32, #tpu.memory_space<vmem>>, vector<1x128x64xf32>
    %479 = vector.shape_cast %478 : vector<1x128x64xf32> to vector<128x64xf32>
    %cst_527 = arith.constant dense<0.000000e+00> : vector<4x64xf32>
    %480 = tpu.matmul %477, %479, %cst_527 {dimension_numbers = #tpu.dot_dimension_numbers<[1], [0], [0], [1], [0, 0, 1, 1], [], []>} : vector<4x128xf32>, vector<128x64xf32>, vector<4x64xf32> -> vector<4x64xf32>
    %c1_528 = arith.constant 1 : index
    %c0_529 = arith.constant 0 : index
    %c0_530 = arith.constant 0 : index
    %481 = vector.load %arg9[%c1_528, %c0_529, %c0_530] : memref<2x128x64xf32, #tpu.memory_space<vmem>>, vector<1x128x64xf32>
    %482 = vector.shape_cast %481 : vector<1x128x64xf32> to vector<128x64xf32>
    %cst_531 = arith.constant dense<0.000000e+00> : vector<4x64xf32>
    %483 = tpu.matmul %477, %482, %cst_531 {dimension_numbers = #tpu.dot_dimension_numbers<[1], [0], [0], [1], [0, 0, 1, 1], [], []>} : vector<4x128xf32>, vector<128x64xf32>, vector<4x64xf32> -> vector<4x64xf32>
    %484 = arith.maximumf %480, %483 : vector<4x64xf32>
    %c13_532 = arith.constant 13 : index
    %c0_533 = arith.constant 0 : index
    %485 = vector.load %arg19[%c13_532, %c0_533] : memref<24x64xf32, #tpu.memory_space<vmem>>, vector<4x64xf32>
    tpu.vector_store %arg19[%c13_532, %c0_533], %484 {strides = array<i32>} : memref<24x64xf32, #tpu.memory_space<vmem>>, vector<4x64xf32>,
    %c0_534 = arith.constant 0 : index
    %c0_535 = arith.constant 0 : index
    %486 = vector.load %arg19[%c0_534, %c0_535] : memref<24x64xf32, #tpu.memory_space<vmem>>, vector<10x64xf32>
    %c0_536 = arith.constant 0 : index
    %c0_537 = arith.constant 0 : index
    %c0_538 = arith.constant 0 : index
    %487 = vector.load %arg6[%c0_536, %c0_537, %c0_538] : memref<9x64x128xf32, #tpu.memory_space<vmem>>, vector<1x64x128xf32>
    %488 = vector.shape_cast %487 : vector<1x64x128xf32> to vector<64x128xf32>
    %cst_539 = arith.constant dense<0.000000e+00> : vector<10x128xf32>
    %489 = tpu.matmul %486, %488, %cst_539 {dimension_numbers = #tpu.dot_dimension_numbers<[1], [0], [0], [1], [0, 0, 1, 1], [], []>} : vector<10x64xf32>, vector<64x128xf32>, vector<10x128xf32> -> vector<10x128xf32>
    %c1_540 = arith.constant 1 : index
    %c0_541 = arith.constant 0 : index
    %490 = vector.load %arg19[%c1_540, %c0_541] : memref<24x64xf32, #tpu.memory_space<vmem>>, vector<10x64xf32>
    %c1_542 = arith.constant 1 : index
    %c0_543 = arith.constant 0 : index
    %c0_544 = arith.constant 0 : index
    %491 = vector.load %arg6[%c1_542, %c0_543, %c0_544] : memref<9x64x128xf32, #tpu.memory_space<vmem>>, vector<1x64x128xf32>
    %492 = vector.shape_cast %491 : vector<1x64x128xf32> to vector<64x128xf32>
    %cst_545 = arith.constant dense<0.000000e+00> : vector<10x128xf32>
    %493 = tpu.matmul %490, %492, %cst_545 {dimension_numbers = #tpu.dot_dimension_numbers<[1], [0], [0], [1], [0, 0, 1, 1], [], []>} : vector<10x64xf32>, vector<64x128xf32>, vector<10x128xf32> -> vector<10x128xf32>
    %494 = arith.addf %489, %493 : vector<10x128xf32>
    %c2_546 = arith.constant 2 : index
    %c0_547 = arith.constant 0 : index
    %495 = vector.load %arg19[%c2_546, %c0_547] : memref<24x64xf32, #tpu.memory_space<vmem>>, vector<10x64xf32>
    %c2_548 = arith.constant 2 : index
    %c0_549 = arith.constant 0 : index
    %c0_550 = arith.constant 0 : index
    %496 = vector.load %arg6[%c2_548, %c0_549, %c0_550] : memref<9x64x128xf32, #tpu.memory_space<vmem>>, vector<1x64x128xf32>
    %497 = vector.shape_cast %496 : vector<1x64x128xf32> to vector<64x128xf32>
    %cst_551 = arith.constant dense<0.000000e+00> : vector<10x128xf32>
    %498 = tpu.matmul %495, %497, %cst_551 {dimension_numbers = #tpu.dot_dimension_numbers<[1], [0], [0], [1], [0, 0, 1, 1], [], []>} : vector<10x64xf32>, vector<64x128xf32>, vector<10x128xf32> -> vector<10x128xf32>
    %499 = arith.addf %494, %498 : vector<10x128xf32>
    %c6_552 = arith.constant 6 : index
    %c0_553 = arith.constant 0 : index
    %500 = vector.load %arg19[%c6_552, %c0_553] : memref<24x64xf32, #tpu.memory_space<vmem>>, vector<10x64xf32>
    %c3_554 = arith.constant 3 : index
    %c0_555 = arith.constant 0 : index
    %c0_556 = arith.constant 0 : index
    %501 = vector.load %arg6[%c3_554, %c0_555, %c0_556] : memref<9x64x128xf32, #tpu.memory_space<vmem>>, vector<1x64x128xf32>
    %502 = vector.shape_cast %501 : vector<1x64x128xf32> to vector<64x128xf32>
    %cst_557 = arith.constant dense<0.000000e+00> : vector<10x128xf32>
    %503 = tpu.matmul %500, %502, %cst_557 {dimension_numbers = #tpu.dot_dimension_numbers<[1], [0], [0], [1], [0, 0, 1, 1], [], []>} : vector<10x64xf32>, vector<64x128xf32>, vector<10x128xf32> -> vector<10x128xf32>
    %504 = arith.addf %499, %503 : vector<10x128xf32>
    %c7_558 = arith.constant 7 : index
    %c0_559 = arith.constant 0 : index
    %505 = vector.load %arg19[%c7_558, %c0_559] : memref<24x64xf32, #tpu.memory_space<vmem>>, vector<10x64xf32>
    %c4_560 = arith.constant 4 : index
    %c0_561 = arith.constant 0 : index
    %c0_562 = arith.constant 0 : index
    %506 = vector.load %arg6[%c4_560, %c0_561, %c0_562] : memref<9x64x128xf32, #tpu.memory_space<vmem>>, vector<1x64x128xf32>
    %507 = vector.shape_cast %506 : vector<1x64x128xf32> to vector<64x128xf32>
    %cst_563 = arith.constant dense<0.000000e+00> : vector<10x128xf32>
    %508 = tpu.matmul %505, %507, %cst_563 {dimension_numbers = #tpu.dot_dimension_numbers<[1], [0], [0], [1], [0, 0, 1, 1], [], []>} : vector<10x64xf32>, vector<64x128xf32>, vector<10x128xf32> -> vector<10x128xf32>
    %509 = arith.addf %504, %508 : vector<10x128xf32>
    %c8_564 = arith.constant 8 : index
    %c0_565 = arith.constant 0 : index
    %510 = vector.load %arg19[%c8_564, %c0_565] : memref<24x64xf32, #tpu.memory_space<vmem>>, vector<10x64xf32>
    %c5_566 = arith.constant 5 : index
    %c0_567 = arith.constant 0 : index
    %c0_568 = arith.constant 0 : index
    %511 = vector.load %arg6[%c5_566, %c0_567, %c0_568] : memref<9x64x128xf32, #tpu.memory_space<vmem>>, vector<1x64x128xf32>
    %512 = vector.shape_cast %511 : vector<1x64x128xf32> to vector<64x128xf32>
    %cst_569 = arith.constant dense<0.000000e+00> : vector<10x128xf32>
    %513 = tpu.matmul %510, %512, %cst_569 {dimension_numbers = #tpu.dot_dimension_numbers<[1], [0], [0], [1], [0, 0, 1, 1], [], []>} : vector<10x64xf32>, vector<64x128xf32>, vector<10x128xf32> -> vector<10x128xf32>
    %514 = arith.addf %509, %513 : vector<10x128xf32>
    %c12_570 = arith.constant 12 : index
    %c0_571 = arith.constant 0 : index
    %515 = vector.load %arg19[%c12_570, %c0_571] : memref<24x64xf32, #tpu.memory_space<vmem>>, vector<10x64xf32>
    %c6_572 = arith.constant 6 : index
    %c0_573 = arith.constant 0 : index
    %c0_574 = arith.constant 0 : index
    %516 = vector.load %arg6[%c6_572, %c0_573, %c0_574] : memref<9x64x128xf32, #tpu.memory_space<vmem>>, vector<1x64x128xf32>
    %517 = vector.shape_cast %516 : vector<1x64x128xf32> to vector<64x128xf32>
    %cst_575 = arith.constant dense<0.000000e+00> : vector<10x128xf32>
    %518 = tpu.matmul %515, %517, %cst_575 {dimension_numbers = #tpu.dot_dimension_numbers<[1], [0], [0], [1], [0, 0, 1, 1], [], []>} : vector<10x64xf32>, vector<64x128xf32>, vector<10x128xf32> -> vector<10x128xf32>
    %519 = arith.addf %514, %518 : vector<10x128xf32>
    %c13_576 = arith.constant 13 : index
    %c0_577 = arith.constant 0 : index
    %520 = vector.load %arg19[%c13_576, %c0_577] : memref<24x64xf32, #tpu.memory_space<vmem>>, vector<10x64xf32>
    %c7_578 = arith.constant 7 : index
    %c0_579 = arith.constant 0 : index
    %c0_580 = arith.constant 0 : index
    %521 = vector.load %arg6[%c7_578, %c0_579, %c0_580] : memref<9x64x128xf32, #tpu.memory_space<vmem>>, vector<1x64x128xf32>
    %522 = vector.shape_cast %521 : vector<1x64x128xf32> to vector<64x128xf32>
    %cst_581 = arith.constant dense<0.000000e+00> : vector<10x128xf32>
    %523 = tpu.matmul %520, %522, %cst_581 {dimension_numbers = #tpu.dot_dimension_numbers<[1], [0], [0], [1], [0, 0, 1, 1], [], []>} : vector<10x64xf32>, vector<64x128xf32>, vector<10x128xf32> -> vector<10x128xf32>
    %524 = arith.addf %519, %523 : vector<10x128xf32>
    %c14_582 = arith.constant 14 : index
    %c0_583 = arith.constant 0 : index
    %525 = vector.load %arg19[%c14_582, %c0_583] : memref<24x64xf32, #tpu.memory_space<vmem>>, vector<10x64xf32>
    %c8_584 = arith.constant 8 : index
    %c0_585 = arith.constant 0 : index
    %c0_586 = arith.constant 0 : index
    %526 = vector.load %arg6[%c8_584, %c0_585, %c0_586] : memref<9x64x128xf32, #tpu.memory_space<vmem>>, vector<1x64x128xf32>
    %527 = vector.shape_cast %526 : vector<1x64x128xf32> to vector<64x128xf32>
    %cst_587 = arith.constant dense<0.000000e+00> : vector<10x128xf32>
    %528 = tpu.matmul %525, %527, %cst_587 {dimension_numbers = #tpu.dot_dimension_numbers<[1], [0], [0], [1], [0, 0, 1, 1], [], []>} : vector<10x64xf32>, vector<64x128xf32>, vector<10x128xf32> -> vector<10x128xf32>
    %529 = arith.addf %524, %528 : vector<10x128xf32>
    %c0_588 = arith.constant 0 : index
    %c0_589 = arith.constant 0 : index
    %530 = vector.load %arg7[%c0_588, %c0_589] : memref<1x128xf32, #tpu.memory_space<vmem>>, vector<1x128xf32>
    %531 = vector.broadcast %530 : vector<1x128xf32> to vector<10x128xf32>
    %532 = arith.addf %529, %531 : vector<10x128xf32>
    %cst_590 = arith.constant 0.000000e+00 : f32
    %533 = vector.broadcast %cst_590 : f32 to vector<10x128xf32>
    %534 = arith.maximumf %532, %533 : vector<10x128xf32>
    %c0_591 = arith.constant 0 : index
    %c0_592 = arith.constant 0 : index
    %535 = vector.load %arg20[%c0_591, %c0_592] : memref<10x128xf32, #tpu.memory_space<vmem>>, vector<10x128xf32>
    tpu.vector_store %arg20[%c0_591, %c0_592], %534 {strides = array<i32>} : memref<10x128xf32, #tpu.memory_space<vmem>>, vector<10x128xf32>,
    %c0_593 = arith.constant 0 : index
    %c0_594 = arith.constant 0 : index
    %536 = vector.load %arg12[%c0_593, %c0_594] : memref<1x32xf32, #tpu.memory_space<vmem>>, vector<1x32xf32>
    %c0_595 = arith.constant 0 : index
    %c0_596 = arith.constant 0 : index
    %537 = tpu.strided_load %arg20[%c0_595, %c0_596] {strides = array<i32: 2, 1>} : memref<10x128xf32, #tpu.memory_space<vmem>>, vector<2x128xf32>
    %c1_597 = arith.constant 1 : index
    %c0_598 = arith.constant 0 : index
    %538 = tpu.strided_load %arg20[%c1_597, %c0_598] {strides = array<i32: 2, 1>} : memref<10x128xf32, #tpu.memory_space<vmem>>, vector<2x128xf32>
    %539 = arith.maximumf %537, %538 : vector<2x128xf32>
    %c6_599 = arith.constant 6 : index
    %c0_600 = arith.constant 0 : index
    %540 = tpu.strided_load %arg20[%c6_599, %c0_600] {strides = array<i32: 2, 1>} : memref<10x128xf32, #tpu.memory_space<vmem>>, vector<2x128xf32>
    %541 = arith.maximumf %539, %540 : vector<2x128xf32>
    %c7_601 = arith.constant 7 : index
    %c0_602 = arith.constant 0 : index
    %542 = tpu.strided_load %arg20[%c7_601, %c0_602] {strides = array<i32: 2, 1>} : memref<10x128xf32, #tpu.memory_space<vmem>>, vector<2x128xf32>
    %543 = arith.maximumf %541, %542 : vector<2x128xf32>
    %c0_603 = arith.constant 0 : index
    %c0_604 = arith.constant 0 : index
    %c0_605 = arith.constant 0 : index
    %544 = vector.load %arg10[%c0_603, %c0_604, %c0_605] : memref<2x128x64xf32, #tpu.memory_space<vmem>>, vector<1x128x64xf32>
    %545 = vector.shape_cast %544 : vector<1x128x64xf32> to vector<128x64xf32>
    %cst_606 = arith.constant dense<0.000000e+00> : vector<2x64xf32>
    %546 = tpu.matmul %543, %545, %cst_606 {dimension_numbers = #tpu.dot_dimension_numbers<[1], [0], [0], [1], [0, 0, 1, 1], [], []>} : vector<2x128xf32>, vector<128x64xf32>, vector<2x64xf32> -> vector<2x64xf32>
    %c1_607 = arith.constant 1 : index
    %c0_608 = arith.constant 0 : index
    %c0_609 = arith.constant 0 : index
    %547 = vector.load %arg10[%c1_607, %c0_608, %c0_609] : memref<2x128x64xf32, #tpu.memory_space<vmem>>, vector<1x128x64xf32>
    %548 = vector.shape_cast %547 : vector<1x128x64xf32> to vector<128x64xf32>
    %cst_610 = arith.constant dense<0.000000e+00> : vector<2x64xf32>
    %549 = tpu.matmul %543, %548, %cst_610 {dimension_numbers = #tpu.dot_dimension_numbers<[1], [0], [0], [1], [0, 0, 1, 1], [], []>} : vector<2x128xf32>, vector<128x64xf32>, vector<2x64xf32> -> vector<2x64xf32>
    %550 = arith.maximumf %546, %549 : vector<2x64xf32>
    %551 = vector.extract_strided_slice %550 {offsets = [0, 0], sizes = [1, 64], strides = [1, 1]} : vector<2x64xf32> to vector<1x64xf32>
    %c0_611 = arith.constant 0 : index
    %c0_612 = arith.constant 0 : index
    %c0_613 = arith.constant 0 : index
    %552 = vector.load %arg11[%c0_611, %c0_612, %c0_613] : memref<2x64x32xf32, #tpu.memory_space<vmem>>, vector<1x64x32xf32>
    %553 = vector.shape_cast %552 : vector<1x64x32xf32> to vector<64x32xf32>
    %cst_614 = arith.constant dense<0.000000e+00> : vector<1x32xf32>
    %554 = tpu.matmul %551, %553, %cst_614 {dimension_numbers = #tpu.dot_dimension_numbers<[1], [0], [0], [1], [0, 0, 1, 1], [], []>} : vector<1x64xf32>, vector<64x32xf32>, vector<1x32xf32> -> vector<1x32xf32>
    %555 = arith.addf %536, %554 : vector<1x32xf32>
    %556 = vector.extract_strided_slice %550 {offsets = [1, 0], sizes = [1, 64], strides = [1, 1]} : vector<2x64xf32> to vector<1x64xf32>
    %c1_615 = arith.constant 1 : index
    %c0_616 = arith.constant 0 : index
    %c0_617 = arith.constant 0 : index
    %557 = vector.load %arg11[%c1_615, %c0_616, %c0_617] : memref<2x64x32xf32, #tpu.memory_space<vmem>>, vector<1x64x32xf32>
    %558 = vector.shape_cast %557 : vector<1x64x32xf32> to vector<64x32xf32>
    %cst_618 = arith.constant dense<0.000000e+00> : vector<1x32xf32>
    %559 = tpu.matmul %556, %558, %cst_618 {dimension_numbers = #tpu.dot_dimension_numbers<[1], [0], [0], [1], [0, 0, 1, 1], [], []>} : vector<1x64xf32>, vector<64x32xf32>, vector<1x32xf32> -> vector<1x32xf32>
    %560 = arith.addf %555, %559 : vector<1x32xf32>
    %cst_619 = arith.constant 0.000000e+00 : f32
    %561 = vector.broadcast %cst_619 : f32 to vector<1x32xf32>
    %562 = arith.maximumf %560, %561 : vector<1x32xf32>
    %c0_620 = arith.constant 0 : index
    %c0_621 = arith.constant 0 : index
    %563 = vector.load %arg13[%c0_620, %c0_621] : memref<32x32xf32, #tpu.memory_space<vmem>>, vector<32x32xf32>
    %cst_622 = arith.constant dense<0.000000e+00> : vector<1x32xf32>
    %564 = tpu.matmul %562, %563, %cst_622 {dimension_numbers = #tpu.dot_dimension_numbers<[1], [0], [0], [1], [0, 0, 1, 1], [], []>} : vector<1x32xf32>, vector<32x32xf32>, vector<1x32xf32> -> vector<1x32xf32>
    %c0_623 = arith.constant 0 : index
    %c0_624 = arith.constant 0 : index
    %565 = vector.load %arg14[%c0_623, %c0_624] : memref<1x32xf32, #tpu.memory_space<vmem>>, vector<1x32xf32>
    %566 = arith.addf %564, %565 : vector<1x32xf32>
    %c1_625 = arith.constant 1 : index
    %c0_626 = arith.constant 0 : index
    %c0_627 = arith.constant 0 : index
    %567 = vector.load %arg15[%c1_625, %c0_626, %c0_627] : memref<2x1x32xf32, #tpu.memory_space<vmem>>, vector<1x1x32xf32>
    %568 = vector.shape_cast %567 : vector<1x1x32xf32> to vector<1x32xf32>
    %569 = vector.shape_cast %566 : vector<1x32xf32> to vector<1x1x32xf32>
    tpu.vector_store %arg15[%c1_625, %c0_626, %c0_627], %569 {strides = array<i32>} : memref<2x1x32xf32, #tpu.memory_space<vmem>>, vector<1x1x32xf32>,
    return
  }
  func.func @transform_0(%arg0: i32) -> (i32, i32, i32) {
    %c0_i32 = arith.constant 0 : i32
    %c0_i32_0 = arith.constant 0 : i32
    %c0_i32_1 = arith.constant 0 : i32
    return %arg0, %c0_i32, %c0_i32_0 : i32, i32, i32
  }
  func.func @transform_1(%arg0: i32) -> (i32, i32, i32) {
    %c0_i32 = arith.constant 0 : i32
    %c0_i32_0 = arith.constant 0 : i32
    %c0_i32_1 = arith.constant 0 : i32
    %c0_i32_2 = arith.constant 0 : i32
    return %c0_i32, %c0_i32_0, %c0_i32_1 : i32, i32, i32
  }
  func.func @transform_2(%arg0: i32) -> (i32, i32) {
    %c0_i32 = arith.constant 0 : i32
    %c0_i32_0 = arith.constant 0 : i32
    %c0_i32_1 = arith.constant 0 : i32
    return %c0_i32, %c0_i32_0 : i32, i32
  }
  func.func @transform_3(%arg0: i32) -> (i32, i32, i32) {
    %c0_i32 = arith.constant 0 : i32
    %c0_i32_0 = arith.constant 0 : i32
    %c0_i32_1 = arith.constant 0 : i32
    %c0_i32_2 = arith.constant 0 : i32
    return %c0_i32, %c0_i32_0, %c0_i32_1 : i32, i32, i32
  }
  func.func @transform_4(%arg0: i32) -> (i32, i32) {
    %c0_i32 = arith.constant 0 : i32
    %c0_i32_0 = arith.constant 0 : i32
    %c0_i32_1 = arith.constant 0 : i32
    return %c0_i32, %c0_i32_0 : i32, i32
  }
  func.func @transform_5(%arg0: i32) -> (i32, i32, i32) {
    %c0_i32 = arith.constant 0 : i32
    %c0_i32_0 = arith.constant 0 : i32
    %c0_i32_1 = arith.constant 0 : i32
    %c0_i32_2 = arith.constant 0 : i32
    return %c0_i32, %c0_i32_0, %c0_i32_1 : i32, i32, i32
  }
  func.func @transform_6(%arg0: i32) -> (i32, i32) {
    %c0_i32 = arith.constant 0 : i32
    %c0_i32_0 = arith.constant 0 : i32
    %c0_i32_1 = arith.constant 0 : i32
    return %c0_i32, %c0_i32_0 : i32, i32
  }
  func.func @transform_7(%arg0: i32) -> (i32, i32, i32) {
    %c0_i32 = arith.constant 0 : i32
    %c0_i32_0 = arith.constant 0 : i32
    %c0_i32_1 = arith.constant 0 : i32
    %c0_i32_2 = arith.constant 0 : i32
    return %c0_i32, %c0_i32_0, %c0_i32_1 : i32, i32, i32
  }
  func.func @transform_8(%arg0: i32) -> (i32, i32, i32) {
    %c0_i32 = arith.constant 0 : i32
    %c0_i32_0 = arith.constant 0 : i32
    %c0_i32_1 = arith.constant 0 : i32
    %c0_i32_2 = arith.constant 0 : i32
    return %c0_i32, %c0_i32_0, %c0_i32_1 : i32, i32, i32
  }
  func.func @transform_9(%arg0: i32) -> (i32, i32, i32) {
    %c0_i32 = arith.constant 0 : i32
    %c0_i32_0 = arith.constant 0 : i32
    %c0_i32_1 = arith.constant 0 : i32
    %c0_i32_2 = arith.constant 0 : i32
    return %c0_i32, %c0_i32_0, %c0_i32_1 : i32, i32, i32
  }
  func.func @transform_10(%arg0: i32) -> (i32, i32, i32) {
    %c0_i32 = arith.constant 0 : i32
    %c0_i32_0 = arith.constant 0 : i32
    %c0_i32_1 = arith.constant 0 : i32
    %c0_i32_2 = arith.constant 0 : i32
    return %c0_i32, %c0_i32_0, %c0_i32_1 : i32, i32, i32
  }
  func.func @transform_11(%arg0: i32) -> (i32, i32) {
    %c0_i32 = arith.constant 0 : i32
    %c0_i32_0 = arith.constant 0 : i32
    %c0_i32_1 = arith.constant 0 : i32
    return %c0_i32, %c0_i32_0 : i32, i32
  }
  func.func @transform_12(%arg0: i32) -> (i32, i32) {
    %c0_i32 = arith.constant 0 : i32
    %c0_i32_0 = arith.constant 0 : i32
    %c0_i32_1 = arith.constant 0 : i32
    return %c0_i32, %c0_i32_0 : i32, i32
  }
  func.func @transform_13(%arg0: i32) -> (i32, i32) {
    %c0_i32 = arith.constant 0 : i32
    %c0_i32_0 = arith.constant 0 : i32
    %c0_i32_1 = arith.constant 0 : i32
    return %c0_i32, %c0_i32_0 : i32, i32
  }
  func.func @transform_14(%arg0: i32) -> (i32, i32, i32) {
    %c0_i32 = arith.constant 0 : i32
    %c0_i32_0 = arith.constant 0 : i32
    %c0_i32_1 = arith.constant 0 : i32
    return %arg0, %c0_i32, %c0_i32_0 : i32, i32, i32
  }
}

</mosaic_0001>

<bundles_post_ra>
// kernel: tile.18
= control target key start
LH: loop header
LB: loop body
LE: loop exit
PB: predicated region body
PF: predicated region fallthrough
CT: control target
= control target key end

     0   :  { %s28_s0 = inlined_call_operand.vmem [shape: f32[8], index: 0, kind: input, shape index: {}]   ;;  %s29_s1 = inlined_call_operand.vmem [shape: f32[16,8], index: 1, kind: output, shape index: {}]  }
   0x1   :  { %v4_v0 = vld [vmem:[%s28_s0] ss:$0 sm:$0xff] }
   0x2   :  { %5 = vst [vmem:[%s29_s1] sm:$0xff] %v4_v0  ;;  %8 = vst [vmem:[%s29_s1 + $0x8] sm:$0xff] %v4_v0 }

// kernel: tile.19
= control target key start
LH: loop header
LB: loop body
LE: loop exit
PB: predicated region body
PF: predicated region fallthrough
CT: control target
= control target key end

     0   :  { %s133_s10 = smov 120   ;;  %s134_s11 = smov 104   ;;  %vm3_vm0 = vcmask 64512   ;;  %vm9_vm1 = vcmask 1048512   ;;  %vm15_vm2 = vcmask 982912   ;;  %vm21_vm3 = vcmask 917312   ;;  %s209_s0 = inlined_call_operand.vmem [shape: f32[16,8], index: 0, kind: input, shape index: {}]   ;;  %s210_s1 = inlined_call_operand.vmem [shape: f32[1,128], index: 1, kind: output, shape index: {}]  }
   0x1   :  { %v103_v0 = vld [vmem:[%s209_s0 + $0xf] sm:$0x1]   ;;  %v105_v1 = vld [vmem:[%s209_s0 + $0xd] sm:$0x1]   ;;  %v104_v2 = vld [vmem:[%s209_s0 + $0xe] sm:$0x1]  }
   0x2   :  { %7 = vrot.lane.b32.xlu0 %v103_v0, %s133_s10  ;;  %19 = vrot.lane.b32.xlu1 %v105_v1, %s134_s11  ;;  %v106_v3 = vld [vmem:[%s209_s0 + $0xc] sm:$0x1]   ;;  %s135_s16 = smov 112   ;;  %s136_s17 = smov 96   ;;  %v107_v4 = vld [vmem:[%s209_s0 + $0xb] sm:$0x1]  }
   0x3   :  { %v108_v5 = vld [vmem:[%s209_s0 + $0xa] sm:$0x1]   ;;  %v2_v6 = vld [vmem:[%s209_s0] sm:$0x1]   ;;  %s137_s24 = smov 88   ;;  %s138_s25 = smov 80  }
   0x4   :  { %4 = vst.msk [vmem:[#allocation0] sm:$0x1] %vm3_vm0, %v2_v6   ;;  %v109_v7 = vld [vmem:[%s209_s0 + $0x9] sm:$0x1]   ;;  %v110_v8 = vld [vmem:[%s209_s0 + $0x8] sm:$0x1]  }
   0x5   :  { %s139_s30 = smov 72   ;;  %s140_s2 = smov 64   ;;  %v111_v9 = vld [vmem:[%s209_s0 + $0x7] sm:$0x1]   ;;  %v112_v10 = vld [vmem:[%s209_s0 + $0x6] sm:$0x1]  }
   0x6   :  { %13 = vrot.lane.b32.xlu0 %v104_v2, %s135_s16  ;;  %25 = vrot.lane.b32.xlu1 %v106_v3, %s136_s17  ;;  %s141_s7 = smov 56   ;;  %s142_s8 = smov 48   ;;  %v113_v11 = vld [vmem:[%s209_s0 + $0x5] sm:$0x1]   ;;  %v114_v12 = vld [vmem:[%s209_s0 + $0x4] sm:$0x1]  }
   0x7   :  { %s143_s13 = smov 40   ;;  %s144_s14 = smov 32   ;;  %v115_v13 = vld [vmem:[%s209_s0 + $0x3] sm:$0x1]   ;;  %v116_v14 = vld [vmem:[%s209_s0 + $0x2] sm:$0x1]  }
   0x8   :  { %s145_s19 = smov 24   ;;  %s146_s20 = smov 16   ;;  %v117_v15 = vld [vmem:[%s209_s0 + $0x1] sm:$0x1]   ;;  %vm27_vm4 = vcmask 851712   ;;  %vm33_vm5 = vcmask 786112  }
   0x9   :  { %s147_s0 = smov 8   ;;  %vm39_vm6 = vcmask 720512   ;;  %vm45_vm7 = vcmask 654912   ;;  %vm51_vm8 = vcmask 589312   ;;  %vm57_vm9 = vcmask 523712  }
   0xa   :  { %31 = vrot.lane.b32.xlu0 %v107_v4, %s137_s24  ;;  %37 = vrot.lane.b32.xlu1 %v108_v5, %s138_s25  ;;  %vm63_vm10 = vcmask 458112   ;;  %vm69_vm11 = vcmask 392512   ;;  %vm75_vm12 = vcmask 326912   ;;  %vm81_vm13 = vcmask 261312  }
   0xb   :  { %vm87_vm14 = vcmask 195712   ;;  %vm93_vm15 = vcmask 130112  }
   0xe   :  { %43 = vrot.lane.b32.xlu0 %v109_v7, %s139_s30  ;;  %49 = vrot.lane.b32.xlu1 %v110_v8, %s140_s2 }
  0x12   :  { %55 = vrot.lane.b32.xlu0 %v111_v9, %s141_s7  ;;  %61 = vrot.lane.b32.xlu1 %v112_v10, %s142_s8 }
  0x16   :  { %67 = vrot.lane.b32.xlu0 %v113_v11, %s143_s13  ;;  %73 = vrot.lane.b32.xlu1 %v114_v12, %s144_s14 }
  0x1a   :  { %79 = vrot.lane.b32.xlu0 %v115_v13, %s145_s19  ;;  %85 = vrot.lane.b32.xlu1 %v116_v14, %s146_s20 }
  0x1e   :  { %91 = vrot.lane.b32.xlu0 %v117_v15, %s147_s0 }
  0x74   :  { %v8_v16 = vpop.permute.xlu0 %7   ;;  %v20_v17 = vpop.permute.xlu1 %19  }
  0x75   :  { %10 = vst.msk [vmem:[#allocation0] sm:$0x1] %vm9_vm1, %v8_v16  }
  0x78   :  { %v14_v18 = vpop.permute.xlu0 %13   ;;  %v26_v19 = vpop.permute.xlu1 %25  }
  0x79   :  { %16 = vst.msk [vmem:[#allocation0] sm:$0x1] %vm15_vm2, %v14_v18  }
  0x7a   :  { %22 = vst.msk [vmem:[#allocation0] sm:$0x1] %vm21_vm3, %v20_v17  }
  0x7b   :  { %28 = vst.msk [vmem:[#allocation0] sm:$0x1] %vm27_vm4, %v26_v19  }
  0x7c   :  { %v32_v20 = vpop.permute.xlu0 %31   ;;  %v38_v21 = vpop.permute.xlu1 %37  }
  0x7d   :  { %34 = vst.msk [vmem:[#allocation0] sm:$0x1] %vm33_vm5, %v32_v20  }
  0x7e   :  { %40 = vst.msk [vmem:[#allocation0] sm:$0x1] %vm39_vm6, %v38_v21  }
  0x80   :  { %v44_v22 = vpop.permute.xlu0 %43   ;;  %v50_v23 = vpop.permute.xlu1 %49  }
  0x81   :  { %46 = vst.msk [vmem:[#allocation0] sm:$0x1] %vm45_vm7, %v44_v22  }
  0x82   :  { %52 = vst.msk [vmem:[#allocation0] sm:$0x1] %vm51_vm8, %v50_v23  }
  0x84   :  { %v56_v24 = vpop.permute.xlu0 %55   ;;  %v62_v25 = vpop.permute.xlu1 %61  }
  0x85   :  { %58 = vst.msk [vmem:[#allocation0] sm:$0x1] %vm57_vm9, %v56_v24  }
  0x86   :  { %64 = vst.msk [vmem:[#allocation0] sm:$0x1] %vm63_vm10, %v62_v25  }
  0x88   :  { %v68_v26 = vpop.permute.xlu0 %67   ;;  %v74_v27 = vpop.permute.xlu1 %73  }
  0x89   :  { %70 = vst.msk [vmem:[#allocation0] sm:$0x1] %vm69_vm11, %v68_v26  }
  0x8a   :  { %76 = vst.msk [vmem:[#allocation0] sm:$0x1] %vm75_vm12, %v74_v27  }
  0x8c   :  { %v80_v28 = vpop.permute.xlu0 %79   ;;  %v86_v29 = vpop.permute.xlu1 %85  }
  0x8d   :  { %82 = vst.msk [vmem:[#allocation0] sm:$0x1] %vm81_vm13, %v80_v28  }
  0x8e   :  { %88 = vst.msk [vmem:[#allocation0] sm:$0x1] %vm87_vm14, %v86_v29  }
  0x90   :  { %v92_v30 = vpop.permute.xlu0 %91  }
  0x91   :  { %94 = vst.msk [vmem:[#allocation0] sm:$0x1] %vm93_vm15, %v92_v30  }
  0x98   :  { %v99_v31 = vld [vmem:[#allocation0] sm:$0x1] }
  0x99   :  { %102 = vst [vmem:[%s210_s1] sm:$0x1] %v99_v31 }

// kernel: tile.23
= control target key start
LH: loop header
LB: loop body
LE: loop exit
PB: predicated region body
PF: predicated region fallthrough
CT: control target
= control target key end

     0   :  { %s22_s0 = inlined_call_operand.vmem [shape: f32[16], index: 0, kind: input, shape index: {}]   ;;  %s23_s1 = inlined_call_operand.vmem [shape: f32[8,16], index: 1, kind: output, shape index: {}]  }
   0x1   :  { %v4_v0 = vld [vmem:[%s22_s0] ss:$0 sm:$0xff] }
   0x2   :  { %5 = vst [vmem:[%s23_s1] sm:$0xff] %v4_v0 }

// kernel: tile.24
= control target key start
LH: loop header
LB: loop body
LE: loop exit
PB: predicated region body
PF: predicated region fallthrough
CT: control target
= control target key end

     0   :  { %s69_s10 = smov 112   ;;  %s70_s11 = smov 80   ;;  %vm3_vm0 = vcmask 130048   ;;  %vm9_vm1 = vcmask 1048448   ;;  %vm15_vm2 = vcmask 917248   ;;  %vm21_vm3 = vcmask 786048   ;;  %s113_s0 = inlined_call_operand.vmem [shape: f32[8,16], index: 0, kind: input, shape index: {}]   ;;  %s114_s1 = inlined_call_operand.vmem [shape: f32[1,128], index: 1, kind: output, shape index: {}]  }
   0x1   :  { %v55_v0 = vld [vmem:[%s113_s0 + $0x7] sm:$0x1]   ;;  %v57_v1 = vld [vmem:[%s113_s0 + $0x5] sm:$0x1]   ;;  %v56_v2 = vld [vmem:[%s113_s0 + $0x6] sm:$0x1]  }
   0x2   :  { %7 = vrot.lane.b32.xlu0 %v55_v0, %s69_s10  ;;  %19 = vrot.lane.b32.xlu1 %v57_v1, %s70_s11  ;;  %v58_v3 = vld [vmem:[%s113_s0 + $0x4] sm:$0x1]   ;;  %v2_v4 = vld [vmem:[%s113_s0] sm:$0x1]   ;;  %s71_s18 = smov 96   ;;  %s72_s19 = smov 64  }
   0x3   :  { %4 = vst.msk [vmem:[#allocation0] sm:$0x1] %vm3_vm0, %v2_v4   ;;  %v59_v5 = vld [vmem:[%s113_s0 + $0x3] sm:$0x1]   ;;  %v60_v6 = vld [vmem:[%s113_s0 + $0x2] sm:$0x1]  }
   0x4   :  { %s73_s24 = smov 48   ;;  %s74_s25 = smov 32   ;;  %v61_v7 = vld [vmem:[%s113_s0 + $0x1] sm:$0x1]   ;;  %vm27_vm4 = vcmask 654848   ;;  %vm33_vm5 = vcmask 523648  }
   0x5   :  { %s75_s0 = smov 16   ;;  %vm39_vm6 = vcmask 392448   ;;  %vm45_vm7 = vcmask 261248  }
   0x6   :  { %13 = vrot.lane.b32.xlu0 %v56_v2, %s71_s18  ;;  %25 = vrot.lane.b32.xlu1 %v58_v3, %s72_s19 }
   0xa   :  { %31 = vrot.lane.b32.xlu0 %v59_v5, %s73_s24  ;;  %37 = vrot.lane.b32.xlu1 %v60_v6, %s74_s25 }
   0xe   :  { %43 = vrot.lane.b32.xlu0 %v61_v7, %s75_s0 }
  0x74   :  { %v8_v8 = vpop.permute.xlu0 %7   ;;  %v20_v9 = vpop.permute.xlu1 %19  }
  0x75   :  { %10 = vst.msk [vmem:[#allocation0] sm:$0x1] %vm9_vm1, %v8_v8  }
  0x78   :  { %v14_v10 = vpop.permute.xlu0 %13   ;;  %v26_v11 = vpop.permute.xlu1 %25  }
  0x79   :  { %16 = vst.msk [vmem:[#allocation0] sm:$0x1] %vm15_vm2, %v14_v10  }
  0x7a   :  { %22 = vst.msk [vmem:[#allocation0] sm:$0x1] %vm21_vm3, %v20_v9  }
  0x7b   :  { %28 = vst.msk [vmem:[#allocation0] sm:$0x1] %vm27_vm4, %v26_v11  }
  0x7c   :  { %v32_v12 = vpop.permute.xlu0 %31   ;;  %v38_v13 = vpop.permute.xlu1 %37  }
  0x7d   :  { %34 = vst.msk [vmem:[#allocation0] sm:$0x1] %vm33_vm5, %v32_v12  }
  0x7e   :  { %40 = vst.msk [vmem:[#allocation0] sm:$0x1] %vm39_vm6, %v38_v13  }
  0x80   :  { %v44_v14 = vpop.permute.xlu0 %43  }
  0x81   :  { %46 = vst.msk [vmem:[#allocation0] sm:$0x1] %vm45_vm7, %v44_v14  }
  0x88   :  { %v51_v15 = vld [vmem:[#allocation0] sm:$0x1] }
  0x89   :  { %54 = vst [vmem:[%s114_s1] sm:$0x1] %v51_v15 }

// kernel: tile.28
= control target key start
LH: loop header
LB: loop body
LE: loop exit
PB: predicated region body
PF: predicated region fallthrough
CT: control target
= control target key end

     0   :  { %s22_s0 = inlined_call_operand.vmem [shape: f32[32], index: 0, kind: input, shape index: {}]   ;;  %s23_s1 = inlined_call_operand.vmem [shape: f32[4,32], index: 1, kind: output, shape index: {}]  }
   0x1   :  { %v4_v0 = vld [vmem:[%s22_s0] ss:$0 sm:$0xff] }
   0x2   :  { %5 = vst [vmem:[%s23_s1] sm:$0xf] %v4_v0 }

// kernel: tile.29
= control target key start
LH: loop header
LB: loop body
LE: loop exit
PB: predicated region body
PF: predicated region fallthrough
CT: control target
= control target key end

     0   :  { %vm8_vm0 = vcmask 261120   ;;  %s40_s8 = smov 32   ;;  %s41_s9 = smov 64   ;;  %vm14_vm1 = vcmask 1048320   ;;  %vm20_vm2 = vcmask 785920   ;;  %vm26_vm3 = vcmask 523520   ;;  %s58_s0 = inlined_call_operand.vmem [shape: f32[4,32], index: 0, kind: input, shape index: {}]   ;;  %s59_s1 = inlined_call_operand.vmem [shape: f32[1,128], index: 1, kind: output, shape index: {}]  }
   0x1   :  { %v5_v0 = vld [vmem:[%s58_s0] sm:$0xf]  ;;  %s39_s0 = smov 96  }
   0x2   :  { %6 = vst [vmem:[#allocation1] sm:$0xf] %v5_v0 }
   0x9   :  { %v11_v1 = vld [vmem:[#allocation1 + $0x3] sm:$0x1]   ;;  %v23_v2 = vld [vmem:[#allocation1 + $0x1] sm:$0x1]   ;;  %v7_v3 = vld [vmem:[#allocation1] sm:$0x1]  }
   0xa   :  { %12 = vrot.lane.b32.xlu0 %v11_v1, %s39_s0  ;;  %24 = vrot.lane.b32.xlu1 %v23_v2, %s40_s8  ;;  %v17_v4 = vld [vmem:[#allocation1 + $0x2] sm:$0x1]   ;;  %9 = vst.msk [vmem:[#allocation0] sm:$0x1] %vm8_vm0, %v7_v3  }
   0xe   :  { %18 = vrot.lane.b32.xlu0 %v17_v4, %s41_s9 }
  0x7c   :  { %v13_v5 = vpop.permute.xlu0 %12   ;;  %v25_v6 = vpop.permute.xlu1 %24  }
  0x7d   :  { %15 = vst.msk [vmem:[#allocation0] sm:$0x1] %vm14_vm1, %v13_v5  }
  0x80   :  { %v19_v7 = vpop.permute.xlu0 %18  }
  0x81   :  { %21 = vst.msk [vmem:[#allocation0] sm:$0x1] %vm20_vm2, %v19_v7  }
  0x82   :  { %27 = vst.msk [vmem:[#allocation0] sm:$0x1] %vm26_vm3, %v25_v6  }
  0x89   :  { %v32_v8 = vld [vmem:[#allocation0] sm:$0x1] }
  0x8a   :  { %35 = vst [vmem:[%s59_s1] sm:$0x1] %v32_v8 }

// kernel: image_encoder_forward.1
= control target key start
LH: loop header
LB: loop body
LE: loop exit
PB: predicated region body
PF: predicated region fallthrough
CT: control target
= control target key end

     0   :  { %s22368_s0 = inlined_call_operand.vmem [shape: f32[4,180,16], index: 0, kind: input, shape index: {}]   ;;  %s22369_s1 = inlined_call_operand.vmem [shape: f32[9,16,128], index: 1, kind: input, shape index: {}]   ;;  %s22370_s2 = inlined_call_operand.vmem [shape: f32[1,128], index: 2, kind: input, shape index: {}]   ;;  %s22371_s3 = inlined_call_operand.vmem [shape: f32[9,64,128], index: 3, kind: input, shape index: {}]   ;;  %s22372_s4 = inlined_call_operand.vmem [shape: f32[1,128], index: 4, kind: input, shape index: {}]   ;;  %s22373_s5 = inlined_call_operand.vmem [shape: f32[9,64,128], index: 5, kind: input, shape index: {}]   ;;  %s22374_s6 = inlined_call_operand.vmem [shape: f32[1,128], index: 6, kind: input, shape index: {}]   ;;  %s22375_s7 = inlined_call_operand.vmem [shape: f32[2,128,64], index: 7, kind: input, shape index: {}]   ;;  %s22376_s8 = inlined_call_operand.vmem [shape: f32[2,128,64], index: 8, kind: input, shape index: {}]   ;;  %s22377_s9 = inlined_call_operand.vmem [shape: f32[2,128,64], index: 9, kind: input, shape index: {}]   ;;  %s22378_s10 = inlined_call_operand.vmem [shape: f32[2,64,32], index: 10, kind: input, shape index: {}]   ;;  %s22379_s11 = inlined_call_operand.vmem [shape: f32[1,32], index: 11, kind: input, shape index: {}]   ;;  %s22380_s12 = inlined_call_operand.vmem [shape: f32[32,32], index: 12, kind: input, shape index: {}]   ;;  %s22381_s13 = inlined_call_operand.vmem [shape: f32[1,32], index: 13, kind: input, shape index: {}]   ;;  %s22382_s14 = inlined_call_operand.hbm [shape: f32[4,1,32], index: 14, kind: output, shape index: {}]  }
   0x1   :  { %22465 = sst [smem:[#allocation65_spill]] %s22368_s0 }
   0x2   :  { %19 = vsyncpa [#allocation8], 0 }
   0x3   :  { %21 = vsyncpa [#allocation8 + $0x1], 0  ;;  %s17266_s29 = smov 0   ;;  %s17268_s30 = smov 0  }
   0x4   :  { %s17270_s15 = smov 0   ;;  %s17272_s16 = smov 0  }
   0x5 LB: > { %22466 = sst [smem:[#allocation10_spill]] %s17180_s15  ;;  %s17287_s17 = sadd.s32 4294967295, %s17184_s16   ;;  %s17184_s16 = sphi %s17272_s16, %s22733_s16   ;;  %s17180_s15 = sphi %s17270_s15, %s22735_s15   ;;  %s17176_s30 = sphi %s17268_s30, %s22737_s30   ;;  %s17172_s29 = sphi %s17266_s29, %s22736_s29  }
   0x6   : > { %s12067_s18 = sadd.s32 4294967294, %s17184_s16   ;;  %s17291_s19 = sadd.s32 1, %s17184_s16  }
   0x7   : > { %22467 = sst [smem:[#allocation11_spill]] %s17291_s19  ;;  %s333_s20 = sadd.s32 1, %s17180_s15 }
   0x8   : > { %s330_s21 = ssub.s32 %s17184_s16, %s17291_s19  ;;  %p343_p0 = scmp.ne.s32.totalorder %s17180_s15, %s17176_s30 }
   0x9   : > { %p331_p1 = scmp.eq.s32.totalorder %s330_s21, 0  ;;  %p344_p2 = scmp.eq.s32.totalorder %s17287_s17, 1 }
   0xa   : > { %p349_p3 = scmp.ne.s32.totalorder %s17176_s30, %s17172_s29  ;;  %p350_p4 = scmp.eq.s32.totalorder %s12067_s18, 1 }
   0xb   : > { %s17302_s22 = scalar_select %p331_p1, %s17180_s15, %s333_s20  }
   0xc   : > { %p17304_p5 = por %p344_p2, %p343_p0  ;;  %p17308_p6 = por %p350_p4, %p349_p3 }
   0xd   : > { %22468 = sst [smem:[#allocation12_spill]] %s17302_s22  ;;  %p12070_p7 = scmp.ge.s32.totalorder %s17184_s16, 1 }
   0xe   : > { %p417_p8 = scmp.lt.s32.totalorder %s17184_s16, 3 }
  0x10   : > { %p418_p9 = pnand %p12070_p7, %p417_p8 }
  0x12   : > { %421 = sbr.rel (%p418_p9) target bundleno = 3907 (0xf43), region = 76 }
  0x17   : > { %v12075_v0 = vld [vmem:[%s22369_s1 + $0x18] sm:$0xff]  ;;  %v504_v1 = vld [vmem:[%s22369_s1 + $0x8] sm:$0xff]  ;;  %v12074_v2 = vld [vmem:[%s22369_s1 + $0x10] sm:$0xff]  ;;  %s12072_s21 = sshll.u32 %s17287_s17, 1  ;;  %vm526_vm0 = vcmask 130048   ;;  %s22471_s0 = sld [smem:[#allocation65_spill]] }
  0x18   : > { %14529 = vmatprep.subr.mxu0 %v12075_v0  ;;  %14560 = vmatprep.subr.mxu1 %v504_v1  ;;  %v503_v3 = vld [vmem:[%s22369_s1] sm:$0xff]  ;;  %p465_p10 = scmp.lt.s32.totalorder %s12072_s21, 3  ;;  %v12113_v4 = vld [vmem:[%s22369_s1 + $0x28] sm:$0xff]  ;;  %v12133_v5 = vld [vmem:[%s22369_s1 + $0x38] sm:$0xff]  ;;  %vm17187_vm1 = vmmov 0   ;;  %vm472_vm2 = vcmask 523264  }
  0x19   : > { %14530 = vmatpush3.msra.mxu0 %v12075_v0  ;;  %14561 = vmatpush3.msra.mxu1 %v504_v1  ;;  %v12112_v6 = vld [vmem:[%s22369_s1 + $0x20] sm:$0xff]  ;;  %v17360_v17 = vld [vmem:[%s22369_s1 + $0x48] sm:$0xff]  ;;  %v12132_v18 = vld [vmem:[%s22369_s1 + $0x30] sm:$0xff]  ;;  %vm480_vm3 = vcmask 519168   ;;  %vm6189_vm4 = vcmask 261120   ;;  %s22464_s25 = sand.u32 1, %s17176_s30  }
  0x1a   : > { %14531 = vmatprep.subr.mxu0 %v12074_v2  ;;  %14562 = vmatprep.subr.mxu1 %v503_v3  ;;  %s22739_s21 = smov (!%p465_p10, %s12072_s21), 3  ;;  %v17377_v23 = vld [vmem:[%s22369_s1 + $0x58] sm:$0xff]  ;;  %v12152_v51 = vld [vmem:[%s22369_s1 + $0x40] sm:$0xff]  ;;  %v12193_v54 = vld [vmem:[%s22369_s1 + $0x68] sm:$0xff]  ;;  %s12071_s27 = sshll.u32 %s22464_s25, 1  ;;  %vm6263_vm5 = vcmask 253952  }
  0x1b   : > { %14532 = vmatpush3.msra.mxu0 %v12074_v2  ;;  %14563 = vmatpush3.msra.mxu1 %v503_v3  ;;  %s17065_s18 = smul.u32 184, %s22739_s21  ;;  %v12172_v55 = vld [vmem:[%s22369_s1 + $0x50] sm:$0xff]  ;;  %v12213_v58 = vld [vmem:[%s22369_s1 + $0x78] sm:$0xff]  ;;  %s20439_s21 = scalar_lea.vmem [#allocation7], %s12071_s27 }
  0x1c   : > { %14591 = vmatprep.subr.mxu0 %v12113_v4  ;;  %14622 = vmatprep.subr.mxu1 %v12133_v5  ;;  %s12005_s26 = sshll.u32 %s20439_s21, 4  ;;  %s13232_s27 = sshll.u32 %s17287_s17, 5  ;;  %s22317_s26 = int_to_ptr.vmem [resolvable:$true] %s12005_s26 }
  0x1d   : > { %s17336_s20 = scalar_lea.vmem %s22471_s0, %s17065_s18  ;;  %s22322_s22 = scalar_lea.hbm %s22382_s14, %s13232_s27 }
  0x1e   : > { %v505_v7 = vld [vmem:[%s17336_s20 + $0x1] sm:$0xff]  ;;  %v506_v9 = vld [vmem:[%s17336_s20 + $0x9] sm:$0xff]  ;;  %v507_v11 = vld [vmem:[%s17336_s20 + $0x11] sm:$0xff]  ;;  %s22732_s0 = sand.u32 1, %s17176_s30   ;;  %s17188_s17 = smov [#allocation7]  }
  0x1f   : > { %v485_v8 = vld [vmem:[%s17336_s20] sm:$0xff]  ;;  %14533 = vmatprep.mubr.msk.f32.mxu0 %vm526_vm0, %v505_v7  ;;  %v486_v10 = vld [vmem:[%s17336_s20 + $0x8] sm:$0xff]  ;;  %v487_v12 = vld [vmem:[%s17336_s20 + $0x10] sm:$0xff]  ;;  %s22328_s19 = scalar_lea.sflag [#allocation8], %s22732_s0  ;;  %s17128_s28 = sshll.u32 %s17188_s17, 4  ;;  %s17129_s28 = int_to_ptr.vmem [resolvable:$false] %s17128_s28 }
  0x20   : > { %14564 = vmatprep.mubr.msk.f32.mxu1 %vm526_vm0, %v485_v8  ;;  %14534 = vmatmul.mubr.msk.f32.vlgmr.msra.gmra.mxu0 %vm526_vm0, %v506_v9  ;;  %v508_v13 = vld [vmem:[%s17336_s20 + $0x19] sm:$0xff]  ;;  %v509_v15 = vld [vmem:[%s17336_s20 + $0x21] sm:$0xff]  ;;  %v510_v19 = vld [vmem:[%s17336_s20 + $0x29] sm:$0xff]  ;;  %s17130_s18 = scalar_lea.vmem %s17129_s28, 64  ;;  %p17131_p0 = scmp.lt.s32.totalorder %s22317_s26, %s17129_s28 }
  0x21   : > { %14565 = vmatmul.mubr.msk.f32.vlgmr.msra.gmra.mxu1 %vm526_vm0, %v486_v10  ;;  %14592 = vmatpush3.msra.mxu0 %v12113_v4  ;;  %v488_v14 = vld [vmem:[%s17336_s20 + $0x18] sm:$0xff]  ;;  %v489_v16 = vld [vmem:[%s17336_s20 + $0x20] sm:$0xff]  ;;  %v490_v20 = vld [vmem:[%s17336_s20 + $0x28] sm:$0xff] }
  0x22   : > { %14536 = vmatprep.mubr.msk.f32.mxu0 %vm526_vm0, %v507_v11  ;;  %14567 = vmatprep.mubr.msk.f32.mxu1 %vm526_vm0, %v487_v12  ;;  %v511_v21 = vld [vmem:[%s17336_s20 + $0x31] sm:$0xff]  ;;  %v512_v24 = vld [vmem:[%s17336_s20 + $0x39] sm:$0xff]  ;;  %v513_v26 = vld [vmem:[%s17336_s20 + $0x41] sm:$0xff] }
  0x23   : > { %14593 = vmatprep.subr.mxu0 %v12112_v6  ;;  %14623 = vmatpush3.msra.mxu1 %v12133_v5  ;;  %v491_v22 = vld [vmem:[%s17336_s20 + $0x30] sm:$0xff]  ;;  %v492_v25 = vld [vmem:[%s17336_s20 + $0x38] sm:$0xff]  ;;  %v493_v27 = vld [vmem:[%s17336_s20 + $0x40] sm:$0xff] }
  0x24   : > { %14594 = vmatpush3.msra.mxu0 %v12112_v6  ;;  %14624 = vmatprep.subr.mxu1 %v12132_v18  ;;  %v514_v28 = vld [vmem:[%s17336_s20 + $0x49] sm:$0xff]  ;;  %v515_v30 = vld [vmem:[%s17336_s20 + $0x51] sm:$0xff]  ;;  %v516_v32 = vld [vmem:[%s17336_s20 + $0x59] sm:$0xff] }
  0x25   : > { %14537 = vmatmul.mubr.msk.f32.gmra.mxu0 %vm526_vm0, %v508_v13  ;;  %14568 = vmatmul.mubr.msk.f32.gmra.mxu1 %vm526_vm0, %v488_v14  ;;  %v494_v29 = vld [vmem:[%s17336_s20 + $0x48] sm:$0xff]  ;;  %v495_v31 = vld [vmem:[%s17336_s20 + $0x50] sm:$0xff]  ;;  %v496_v33 = vld [vmem:[%s17336_s20 + $0x58] sm:$0xff] }
  0x26   : > { %14539 = vmatprep.mubr.msk.f32.mxu0 %vm526_vm0, %v509_v15  ;;  %14570 = vmatprep.mubr.msk.f32.mxu1 %vm526_vm0, %v489_v16  ;;  %v517_v34 = vld [vmem:[%s17336_s20 + $0x61] sm:$0xff]  ;;  %v518_v36 = vld [vmem:[%s17336_s20 + $0x69] sm:$0xff]  ;;  %v519_v38 = vld [vmem:[%s17336_s20 + $0x71] sm:$0xff] }
  0x27   : > { %14653 = vmatprep.subr.mxu0 %v17360_v17  ;;  %14625 = vmatpush3.msra.mxu1 %v12132_v18  ;;  %v497_v35 = vld [vmem:[%s17336_s20 + $0x60] sm:$0xff]  ;;  %v498_v37 = vld [vmem:[%s17336_s20 + $0x68] sm:$0xff]  ;;  %v499_v39 = vld [vmem:[%s17336_s20 + $0x70] sm:$0xff] }
  0x28   : > { %14684 = vmatprep.subr.mxu1 %v17377_v23  ;;  %v520_v40 = vld [vmem:[%s17336_s20 + $0x79] sm:$0xff]  ;;  %v521_v42 = vld [vmem:[%s17336_s20 + $0x81] sm:$0xff]  ;;  %v522_v44 = vld [vmem:[%s17336_s20 + $0x89] sm:$0x3f] }
  0x29   : > { %14540 = vmatmul.mubr.msk.f32.gmra.mxu0 %vm526_vm0, %v510_v19  ;;  %14571 = vmatmul.mubr.msk.f32.gmra.mxu1 %vm526_vm0, %v490_v20  ;;  %v500_v41 = vld [vmem:[%s17336_s20 + $0x78] sm:$0xff]  ;;  %v501_v43 = vld [vmem:[%s17336_s20 + $0x80] sm:$0xff]  ;;  %v502_v45 = vld [vmem:[%s17336_s20 + $0x88] sm:$0x3f] }
  0x2a   : > { %14542 = vmatprep.mubr.msk.f32.mxu0 %vm526_vm0, %v511_v21  ;;  %14573 = vmatprep.mubr.msk.f32.mxu1 %vm526_vm0, %v491_v22  ;;  %v945_v46 = vld [vmem:[%s17336_s20 + $0x2] sm:$0xff]  ;;  %v1193_v47 = vld [vmem:[%s17336_s20 + $0x12] sm:$0xff]  ;;  %v946_v48 = vld [vmem:[%s17336_s20 + $0xa] sm:$0xff] }
  0x2b   : > { %v1194_v49 = vld [vmem:[%s17336_s20 + $0x1a] sm:$0xff]  ;;  %v1195_v50 = vld [vmem:[%s17336_s20 + $0x22] sm:$0xff]  ;;  %v1196_v52 = vld [vmem:[%s17336_s20 + $0x2a] sm:$0xff] }
  0x2c   : > { %v1197_v53 = vld [vmem:[%s17336_s20 + $0x32] sm:$0xff]  ;;  %v1198_v56 = vld [vmem:[%s17336_s20 + $0x3a] sm:$0xff]  ;;  %v1199_v57 = vld [vmem:[%s17336_s20 + $0x42] sm:$0xff] }
  0x2d   : > { %14543 = vmatmul.mubr.msk.f32.gmra.mxu0 %vm526_vm0, %v512_v24  ;;  %14574 = vmatmul.mubr.msk.f32.gmra.mxu1 %vm526_vm0, %v492_v25  ;;  %v1200_v59 = vld [vmem:[%s17336_s20 + $0x4a] sm:$0xff]  ;;  %v1201_v60 = vld [vmem:[%s17336_s20 + $0x52] sm:$0xff]  ;;  %v1202_v61 = vld [vmem:[%s17336_s20 + $0x5a] sm:$0xff] }
  0x2e   : > { %14545 = vmatprep.mubr.msk.f32.mxu0 %vm526_vm0, %v513_v26  ;;  %14576 = vmatprep.mubr.msk.f32.mxu1 %vm526_vm0, %v493_v27  ;;  %v1203_v62 = vld [vmem:[%s17336_s20 + $0x62] sm:$0xff]  ;;  %v1204_v63 = vld [vmem:[%s17336_s20 + $0x6a] sm:$0xff]  ;;  %v1205_v0 = vld [vmem:[%s17336_s20 + $0x72] sm:$0xff] }
  0x2f   : > { %v1206_v1 = vld [vmem:[%s17336_s20 + $0x7a] sm:$0xff]  ;;  %v1207_v2 = vld [vmem:[%s17336_s20 + $0x82] sm:$0xff]  ;;  %v1208_v3 = vld [vmem:[%s17336_s20 + $0x8a] sm:$0xff] }
  0x30   : > { %v1209_v4 = vld [vmem:[%s17336_s20 + $0x92] sm:$0xff]  ;;  %v962_v5 = vld [vmem:[%s17336_s20 + $0x8a] sm:$0x3f]  ;;  %v1210_v6 = vld [vmem:[%s17336_s20 + $0x9a] sm:$0x3f] }
  0x31   : > { %14546 = vmatmul.mubr.msk.f32.gmra.mxu0 %vm526_vm0, %v514_v28  ;;  %14577 = vmatmul.mubr.msk.f32.gmra.mxu1 %vm526_vm0, %v494_v29  ;;  %v1441_v7 = vld [vmem:[%s17336_s20 + $0x13] sm:$0xff]  ;;  %v1442_v9 = vld [vmem:[%s17336_s20 + $0x1b] sm:$0xff]  ;;  %v1443_v11 = vld [vmem:[%s17336_s20 + $0x23] sm:$0xff] }
  0x32   : > { %14548 = vmatprep.mubr.msk.f32.mxu0 %vm526_vm0, %v515_v30  ;;  %14579 = vmatprep.mubr.msk.f32.mxu1 %vm526_vm0, %v495_v31  ;;  %v1689_v8 = vld [vmem:[%s17336_s20 + $0x14] sm:$0xff]  ;;  %v1690_v10 = vld [vmem:[%s17336_s20 + $0x1c] sm:$0xff]  ;;  %v17507_v12 = vld [vmem:[%s17336_s20 + $0x24] sm:$0xff] }
  0x33   : > { %v12192_v13 = vld [vmem:[%s22369_s1 + $0x60] sm:$0xff]  ;;  %v1444_v14 = vld [vmem:[%s17336_s20 + $0x2b] sm:$0xff]  ;;  %v1445_v16 = vld [vmem:[%s17336_s20 + $0x33] sm:$0xff] }
  0x34   : > { %v17517_v15 = vld [vmem:[%s17336_s20 + $0x2c] sm:$0xff]  ;;  %v1446_v20 = vld [vmem:[%s17336_s20 + $0x3b] sm:$0xff]  ;;  %v1447_v22 = vld [vmem:[%s17336_s20 + $0x43] sm:$0xff] }
  0x35   : > { %14549 = vmatmul.mubr.msk.f32.gmra.mxu0 %vm526_vm0, %v516_v32  ;;  %14580 = vmatmul.mubr.msk.f32.gmra.mxu1 %vm526_vm0, %v496_v33  ;;  %v17528_v18 = vld [vmem:[%s22369_s1 + $0x88] sm:$0xff]  ;;  %v12212_v19 = vld [vmem:[%s22369_s1 + $0x70] sm:$0xff]  ;;  %v17541_v21 = vld [vmem:[%s17336_s20 + $0x3c] sm:$0xff] }
  0x36   : > { %14551 = vmatprep.mubr.msk.f32.mxu0 %vm526_vm0, %v517_v34  ;;  %14582 = vmatprep.mubr.msk.f32.mxu1 %vm526_vm0, %v497_v35  ;;  %v1448_v24 = vld [vmem:[%s17336_s20 + $0x4b] sm:$0xff]  ;;  %v1449_v26 = vld [vmem:[%s17336_s20 + $0x53] sm:$0xff]  ;;  %v1450_v28 = vld [vmem:[%s17336_s20 + $0x5b] sm:$0xff] }
  0x37   : > { %v17556_v25 = vld [vmem:[%s17336_s20 + $0x4c] sm:$0xff]  ;;  %v17560_v27 = vld [vmem:[%s17336_s20 + $0x54] sm:$0xff]  ;;  %v1698_v29 = vld [vmem:[%s17336_s20 + $0x5c] sm:$0xff] }
  0x38   : > { %v1451_v30 = vld [vmem:[%s17336_s20 + $0x63] sm:$0xff]  ;;  %v1452_v32 = vld [vmem:[%s17336_s20 + $0x6b] sm:$0xff]  ;;  %v1453_v34 = vld [vmem:[%s17336_s20 + $0x73] sm:$0xff] }
  0x39   : > { %14552 = vmatmul.mubr.msk.f32.gmra.mxu0 %vm526_vm0, %v518_v36  ;;  %14583 = vmatmul.mubr.msk.f32.gmra.mxu1 %vm526_vm0, %v498_v37  ;;  %v1699_v31 = vld [vmem:[%s17336_s20 + $0x64] sm:$0xff]  ;;  %v1700_v33 = vld [vmem:[%s17336_s20 + $0x6c] sm:$0xff]  ;;  %v1701_v35 = vld [vmem:[%s17336_s20 + $0x74] sm:$0xff] }
  0x3a   : > { %14554 = vmatprep.mubr.msk.f32.mxu0 %vm526_vm0, %v519_v38  ;;  %14585 = vmatprep.mubr.msk.f32.mxu1 %vm526_vm0, %v499_v39  ;;  %v1454_v36 = vld [vmem:[%s17336_s20 + $0x7b] sm:$0xff]  ;;  %v1455_v38 = vld [vmem:[%s17336_s20 + $0x83] sm:$0xff] }
  0x3b   : > { %v1702_v37 = vld [vmem:[%s17336_s20 + $0x7c] sm:$0xff]  ;;  %v1703_v39 = vld [vmem:[%s17336_s20 + $0x84] sm:$0xff] }
  0x3d   : > { %14555 = vmatmul.mubr.msk.f32.gmra.mxu0 %vm526_vm0, %v520_v40  ;;  %14586 = vmatmul.mubr.msk.f32.gmra.mxu1 %vm526_vm0, %v500_v41  ;;  %v1456_v40 = vld [vmem:[%s17336_s20 + $0x8b] sm:$0xff] }
  0x3e   : > { %14557 = vmatprep.mubr.msk.f32.mxu0 %vm526_vm0, %v521_v42  ;;  %14588 = vmatprep.mubr.msk.f32.mxu1 %vm526_vm0, %v501_v43  ;;  %v1704_v41 = vld [vmem:[%s17336_s20 + $0x8c] sm:$0xff]  ;;  %v1705_v43 = vld [vmem:[%s17336_s20 + $0x94] sm:$0xff] }
  0x3f   : > { %v1457_v42 = vld [vmem:[%s17336_s20 + $0x93] sm:$0xff] }
  0x41   : > { %14558 = vmatmul.mubr.msk.f32.gmra.mxu0 %vm526_vm0, %v522_v44  ;;  %14589 = vmatmul.mubr.msk.f32.gmra.mxu1 %vm526_vm0, %v502_v45  ;;  %v1458_v44 = vld [vmem:[%s17336_s20 + $0x9b] sm:$0x3f] }
  0x42   : > { %14595 = vmatprep.mubr.msk.f32.mxu0 %vm526_vm0, %v945_v46  ;;  %14626 = vmatprep.mubr.msk.f32.mxu1 %vm526_vm0, %v1193_v47  ;;  %v1706_v45 = vld [vmem:[%s17336_s20 + $0x9c] sm:$0x3f]  ;;  %v2185_v46 = vld [vmem:[%s17336_s20 + $0x25] sm:$0xff] }
  0x45   : > { %14596 = vmatmul.mubr.msk.f32.vlgmr.msra.gmra.mxu0 %vm526_vm0, %v946_v48  ;;  %14627 = vmatmul.mubr.msk.f32.vlgmr.msra.gmra.mxu1 %vm526_vm0, %v1194_v49  ;;  %v2187_v48 = vld [vmem:[%s17336_s20 + $0x35] sm:$0xff] }
  0x46   : > { %14654 = vmatpush3.msra.mxu0 %v17360_v17  ;;  %14598 = vmatprep.mubr.msk.f32.mxu0 %vm526_vm0, %v1193_v47  ;;  %v17523_v17 = vld [vmem:[%s17336_s20 + $0x34] sm:$0xff] }
  0x47   : > { %14629 = vmatprep.mubr.msk.f32.mxu1 %vm526_vm0, %v1195_v50  ;;  %14655 = vmatprep.subr.mxu0 %v12152_v51  ;;  %v2186_v47 = vld [vmem:[%s17336_s20 + $0x2d] sm:$0xff] }
  0x48   : > { %14656 = vmatpush3.msra.mxu0 %v12152_v51  ;;  %14685 = vmatpush3.msra.mxu1 %v17377_v23  ;;  %v17545_v23 = vld [vmem:[%s17336_s20 + $0x44] sm:$0xff] }
  0x49   : > { %14599 = vmatmul.mubr.msk.f32.gmra.mxu0 %vm526_vm0, %v1194_v49  ;;  %14630 = vmatmul.mubr.msk.f32.gmra.mxu1 %vm526_vm0, %v1196_v52  ;;  %v12232_v49 = vld [vmem:[%s22369_s1 + $0x80] sm:$0xff] }
  0x4a   : > { %14601 = vmatprep.mubr.msk.f32.mxu0 %vm526_vm0, %v1195_v50  ;;  %14632 = vmatprep.mubr.msk.f32.mxu1 %vm526_vm0, %v1197_v53  ;;  %v2188_v50 = vld [vmem:[%s17336_s20 + $0x3d] sm:$0xff]  ;;  %v2189_v51 = vld [vmem:[%s17336_s20 + $0x45] sm:$0xff] }
  0x4b   : > { %14715 = vmatprep.subr.mxu0 %v12193_v54  ;;  %14686 = vmatprep.subr.mxu1 %v12172_v55 }
  0x4c   : > { %14687 = vmatpush3.msra.mxu1 %v12172_v55  ;;  %v2193_v55 = vld [vmem:[%s17336_s20 + $0x65] sm:$0xff] }
  0x4d   : > { %14602 = vmatmul.mubr.msk.f32.gmra.mxu0 %vm526_vm0, %v1196_v52  ;;  %14633 = vmatmul.mubr.msk.f32.gmra.mxu1 %vm526_vm0, %v1198_v56  ;;  %v2190_v52 = vld [vmem:[%s17336_s20 + $0x4d] sm:$0xff] }
  0x4e   : > { %14604 = vmatprep.mubr.msk.f32.mxu0 %vm526_vm0, %v1197_v53  ;;  %14635 = vmatprep.mubr.msk.f32.mxu1 %vm526_vm0, %v1199_v57  ;;  %v2191_v53 = vld [vmem:[%s17336_s20 + $0x55] sm:$0xff] }
  0x4f   : > { %14746 = vmatprep.subr.mxu1 %v12213_v58 }
  0x51   : > { %14605 = vmatmul.mubr.msk.f32.gmra.mxu0 %vm526_vm0, %v1198_v56  ;;  %14636 = vmatmul.mubr.msk.f32.gmra.mxu1 %vm526_vm0, %v1200_v59  ;;  %v2194_v56 = vld [vmem:[%s17336_s20 + $0x6d] sm:$0xff] }
  0x52   : > { %14607 = vmatprep.mubr.msk.f32.mxu0 %vm526_vm0, %v1199_v57  ;;  %14638 = vmatprep.mubr.msk.f32.mxu1 %vm526_vm0, %v1201_v60  ;;  %v2195_v57 = vld [vmem:[%s17336_s20 + $0x75] sm:$0xff] }
  0x55   : > { %14608 = vmatmul.mubr.msk.f32.gmra.mxu0 %vm526_vm0, %v1200_v59  ;;  %14639 = vmatmul.mubr.msk.f32.gmra.mxu1 %vm526_vm0, %v1202_v61  ;;  %v2197_v59 = vld [vmem:[%s17336_s20 + $0x85] sm:$0xff] }
  0x56   : > { %14610 = vmatprep.mubr.msk.f32.mxu0 %vm526_vm0, %v1201_v60  ;;  %14641 = vmatprep.mubr.msk.f32.mxu1 %vm526_vm0, %v1203_v62  ;;  %v2198_v60 = vld [vmem:[%s17336_s20 + $0x8d] sm:$0xff] }
  0x59   : > { %14611 = vmatmul.mubr.msk.f32.gmra.mxu0 %vm526_vm0, %v1202_v61  ;;  %14642 = vmatmul.mubr.msk.f32.gmra.mxu1 %vm526_vm0, %v1204_v63  ;;  %v2199_v61 = vld [vmem:[%s17336_s20 + $0x95] sm:$0xff] }
  0x5a   : > { %14613 = vmatprep.mubr.msk.f32.mxu0 %vm526_vm0, %v1203_v62  ;;  %14644 = vmatprep.mubr.msk.f32.mxu1 %vm526_vm0, %v1205_v0  ;;  %v1952_v62 = vld [vmem:[%s17336_s20 + $0x9c] sm:$0xff] }
  0x5d   : > { %14614 = vmatmul.mubr.msk.f32.gmra.mxu0 %vm526_vm0, %v1204_v63  ;;  %14645 = vmatmul.mubr.msk.f32.gmra.mxu1 %vm526_vm0, %v1206_v1  ;;  %v2200_v63 = vld [vmem:[%s17336_s20 + $0x9d] sm:$0xff] }
  0x5e   : > { %14616 = vmatprep.mubr.msk.f32.mxu0 %vm526_vm0, %v1205_v0  ;;  %14647 = vmatprep.mubr.msk.f32.mxu1 %vm526_vm0, %v1207_v2  ;;  %v1953_v0 = vld [vmem:[%s17336_s20 + $0xa4] sm:$0xff] }
  0x61   : > { %14617 = vmatmul.mubr.msk.f32.gmra.mxu0 %vm526_vm0, %v1206_v1  ;;  %14648 = vmatmul.mubr.msk.f32.gmra.mxu1 %vm526_vm0, %v1208_v3  ;;  %v2201_v1 = vld [vmem:[%s17336_s20 + $0xa5] sm:$0xff]  ;;  %v2202_v3 = vld [vmem:[%s17336_s20 + $0xad] sm:$0x3f] }
  0x62   : > { %14619 = vmatprep.mubr.msk.f32.mxu0 %vm526_vm0, %v1207_v2  ;;  %14650 = vmatprep.mubr.msk.f32.mxu1 %vm526_vm0, %v1209_v4  ;;  %v1954_v2 = vld [vmem:[%s17336_s20 + $0xac] sm:$0x3f] }
  0x63   : > { %v2433_v4 = vld [vmem:[%s17336_s20 + $0x26] sm:$0xff] }
  0x65   : > { %14620 = vmatmul.mubr.msk.f32.gmra.mxu0 %vm526_vm0, %v962_v5  ;;  %14651 = vmatmul.mubr.msk.f32.gmra.mxu1 %vm526_vm0, %v1210_v6  ;;  %v2434_v5 = vld [vmem:[%s17336_s20 + $0x2e] sm:$0xff]  ;;  %v2435_v6 = vld [vmem:[%s17336_s20 + $0x36] sm:$0xff] }
  0x66   : > { %14657 = vmatprep.mubr.msk.f32.mxu0 %vm526_vm0, %v1441_v7  ;;  %14688 = vmatprep.mubr.msk.f32.mxu1 %vm526_vm0, %v1689_v8  ;;  %v2436_v7 = vld [vmem:[%s17336_s20 + $0x3e] sm:$0xff]  ;;  %v2437_v8 = vld [vmem:[%s17336_s20 + $0x46] sm:$0xff] }
  0x69   : > { %14658 = vmatmul.mubr.msk.f32.vlgmr.msra.gmra.mxu0 %vm526_vm0, %v1442_v9  ;;  %14689 = vmatmul.mubr.msk.f32.vlgmr.msra.gmra.mxu1 %vm526_vm0, %v1690_v10  ;;  %v2438_v9 = vld [vmem:[%s17336_s20 + $0x4e] sm:$0xff]  ;;  %v2439_v10 = vld [vmem:[%s17336_s20 + $0x56] sm:$0xff] }
  0x6a   : > { %14716 = vmatpush3.msra.mxu0 %v12193_v54  ;;  %14660 = vmatprep.mubr.msk.f32.mxu0 %vm526_vm0, %v1443_v11  ;;  %v2192_v54 = vld [vmem:[%s17336_s20 + $0x5d] sm:$0xff] }
  0x6b   : > { %14691 = vmatprep.mubr.msk.f32.mxu1 %vm526_vm0, %v17507_v12  ;;  %14717 = vmatprep.subr.mxu0 %v12192_v13  ;;  %v2440_v11 = vld [vmem:[%s17336_s20 + $0x5e] sm:$0xff] }
  0x6c   : > { %14718 = vmatpush3.msra.mxu0 %v12192_v13  ;;  %14747 = vmatpush3.msra.mxu1 %v12213_v58  ;;  %v2196_v58 = vld [vmem:[%s17336_s20 + $0x7d] sm:$0xff]  ;;  %v2442_v13 = vld [vmem:[%s17336_s20 + $0x6e] sm:$0xff] }
  0x6d   : > { %14661 = vmatmul.mubr.msk.f32.gmra.mxu0 %vm526_vm0, %v1444_v14  ;;  %14692 = vmatmul.mubr.msk.f32.gmra.mxu1 %vm526_vm0, %v17517_v15  ;;  %v2443_v14 = vld [vmem:[%s17336_s20 + $0x76] sm:$0xff] }
  0x6e   : > { %14663 = vmatprep.mubr.msk.f32.mxu0 %vm526_vm0, %v1445_v16  ;;  %14694 = vmatprep.mubr.msk.f32.mxu1 %vm526_vm0, %v17523_v17  ;;  %v2445_v16 = vld [vmem:[%s17336_s20 + $0x86] sm:$0xff] }
  0x6f   : > { %14777 = vmatprep.subr.mxu0 %v17528_v18  ;;  %14748 = vmatprep.subr.mxu1 %v12212_v19 }
  0x70   : > { %14749 = vmatpush3.msra.mxu1 %v12212_v19  ;;  %v2448_v19 = vld [vmem:[%s17336_s20 + $0x9e] sm:$0xff] }
  0x71   : > { %14664 = vmatmul.mubr.msk.f32.gmra.mxu0 %vm526_vm0, %v1446_v20  ;;  %14695 = vmatmul.mubr.msk.f32.gmra.mxu1 %vm526_vm0, %v17541_v21  ;;  %v2449_v20 = vld [vmem:[%s17336_s20 + $0xa6] sm:$0xff] }
  0x72   : > { %14666 = vmatprep.mubr.msk.f32.mxu0 %vm526_vm0, %v1447_v22  ;;  %14697 = vmatprep.mubr.msk.f32.mxu1 %vm526_vm0, %v17545_v23 }
  0x75   : > { %14667 = vmatmul.mubr.msk.f32.gmra.mxu0 %vm526_vm0, %v1448_v24  ;;  %14698 = vmatmul.mubr.msk.f32.gmra.mxu1 %vm526_vm0, %v17556_v25 }
  0x76   : > { %14669 = vmatprep.mubr.msk.f32.mxu0 %vm526_vm0, %v1449_v26  ;;  %14700 = vmatprep.mubr.msk.f32.mxu1 %vm526_vm0, %v17560_v27 }
  0x79   : > { %14670 = vmatmul.mubr.msk.f32.gmra.mxu0 %vm526_vm0, %v1450_v28  ;;  %14701 = vmatmul.mubr.msk.f32.gmra.mxu1 %vm526_vm0, %v1698_v29 }
  0x7a   : > { %14672 = vmatprep.mubr.msk.f32.mxu0 %vm526_vm0, %v1451_v30  ;;  %14703 = vmatprep.mubr.msk.f32.mxu1 %vm526_vm0, %v1699_v31 }
  0x7d   : > { %14673 = vmatmul.mubr.msk.f32.gmra.mxu0 %vm526_vm0, %v1452_v32  ;;  %14704 = vmatmul.mubr.msk.f32.gmra.mxu1 %vm526_vm0, %v1700_v33 }
  0x7e   : > { %14675 = vmatprep.mubr.msk.f32.mxu0 %vm526_vm0, %v1453_v34  ;;  %14706 = vmatprep.mubr.msk.f32.mxu1 %vm526_vm0, %v1701_v35 }
  0x81   : > { %14676 = vmatmul.mubr.msk.f32.gmra.mxu0 %vm526_vm0, %v1454_v36  ;;  %14707 = vmatmul.mubr.msk.f32.gmra.mxu1 %vm526_vm0, %v1702_v37 }
  0x82   : > { %14678 = vmatprep.mubr.msk.f32.mxu0 %vm526_vm0, %v1455_v38  ;;  %14709 = vmatprep.mubr.msk.f32.mxu1 %vm526_vm0, %v1703_v39  ;;  %v22384_v38 = vmov 0.0  }
  0x83   : > { %14808 = vmatprep.subr.mxu1 %v22384_v38 }
  0x85   : > { %14679 = vmatmul.mubr.msk.f32.gmra.mxu0 %vm526_vm0, %v1456_v40  ;;  %14710 = vmatmul.mubr.msk.f32.gmra.mxu1 %vm526_vm0, %v1704_v41 }
  0x86   : > { %14681 = vmatprep.mubr.msk.f32.mxu0 %vm526_vm0, %v1457_v42  ;;  %14712 = vmatprep.mubr.msk.f32.mxu1 %vm526_vm0, %v1705_v43  ;;  %v17742_v42 = vld [vmem:[%s22375_s7 + $0x70] sm:$0xff] }
  0x87   : > { %22473 = vst [vmem:[#allocation14_spill] sm:$0xff] %v17742_v42 }
  0x89   : > { %14682 = vmatmul.mubr.msk.f32.gmra.mxu0 %vm526_vm0, %v1458_v44  ;;  %14713 = vmatmul.mubr.msk.f32.gmra.mxu1 %vm526_vm0, %v1706_v45  ;;  %v17754_v45 = vld [vmem:[%s22375_s7 + $0x68] sm:$0xff] }
  0x8a   : > { %14719 = vmatprep.mubr.msk.f32.mxu0 %vm526_vm0, %v17507_v12  ;;  %14750 = vmatprep.mubr.msk.f32.mxu1 %vm526_vm0, %v2185_v46  ;;  %v2441_v12 = vld [vmem:[%s17336_s20 + $0x66] sm:$0xff]  ;;  %22474 = vst [vmem:[#allocation15_spill] sm:$0xff] %v17754_v45 }
  0x8d   : > { %14720 = vmatmul.mubr.msk.f32.vlgmr.msra.gmra.mxu0 %vm526_vm0, %v17517_v15  ;;  %14751 = vmatmul.mubr.msk.f32.vlgmr.msra.gmra.mxu1 %vm526_vm0, %v2186_v47  ;;  %v2444_v15 = vld [vmem:[%s17336_s20 + $0x7e] sm:$0xff] }
  0x8e   : > { %14778 = vmatpush3.msra.mxu0 %v17528_v18  ;;  %14722 = vmatprep.mubr.msk.f32.mxu0 %vm526_vm0, %v17523_v17  ;;  %v2446_v17 = vld [vmem:[%s17336_s20 + $0x8e] sm:$0xff]  ;;  %v2447_v18 = vld [vmem:[%s17336_s20 + $0x96] sm:$0xff] }
  0x8f   : > { %14753 = vmatprep.mubr.msk.f32.mxu1 %vm526_vm0, %v2187_v48  ;;  %14779 = vmatprep.subr.mxu0 %v12232_v49 }
  0x90   : > { %14780 = vmatpush3.msra.mxu0 %v12232_v49 }
  0x91   : > { %14723 = vmatmul.mubr.msk.f32.gmra.mxu0 %vm526_vm0, %v17541_v21  ;;  %14754 = vmatmul.mubr.msk.f32.gmra.mxu1 %vm526_vm0, %v2188_v50  ;;  %v2450_v21 = vld [vmem:[%s17336_s20 + $0xae] sm:$0x3f] }
  0x92   : > { %14725 = vmatprep.mubr.msk.f32.mxu0 %vm526_vm0, %v17545_v23  ;;  %14756 = vmatprep.mubr.msk.f32.mxu1 %vm526_vm0, %v2189_v51  ;;  %v17770_v51 = vld [vmem:[%s22375_s7 + $0x60] sm:$0xff] }
  0x93   : > { %14878 = vmatprep.subr.mxu0 %v22384_v38  ;;  %22475 = vst [vmem:[#allocation16_spill] sm:$0xff] %v17770_v51 }
  0x95   : > { %14726 = vmatmul.mubr.msk.f32.gmra.mxu0 %vm526_vm0, %v17556_v25  ;;  %14757 = vmatmul.mubr.msk.f32.gmra.mxu1 %vm526_vm0, %v2190_v52 }
  0x96   : > { %14728 = vmatprep.mubr.msk.f32.mxu0 %vm526_vm0, %v17560_v27  ;;  %14759 = vmatprep.mubr.msk.f32.mxu1 %vm526_vm0, %v2191_v53 }
  0x99   : > { %14729 = vmatmul.mubr.msk.f32.gmra.mxu0 %vm526_vm0, %v1698_v29  ;;  %14760 = vmatmul.mubr.msk.f32.gmra.mxu1 %vm526_vm0, %v2192_v54  ;;  %v17778_v54 = vld [vmem:[%s22375_s7 + $0x58] sm:$0xff] }
  0x9a   : > { %14731 = vmatprep.mubr.msk.f32.mxu0 %vm526_vm0, %v1699_v31  ;;  %14762 = vmatprep.mubr.msk.f32.mxu1 %vm526_vm0, %v2193_v55  ;;  %22476 = vst [vmem:[#allocation17_spill] sm:$0xff] %v17778_v54 }
  0x9d   : > { %14732 = vmatmul.mubr.msk.f32.gmra.mxu0 %vm526_vm0, %v1700_v33  ;;  %14763 = vmatmul.mubr.msk.f32.gmra.mxu1 %vm526_vm0, %v2194_v56 }
  0x9e   : > { %14734 = vmatprep.mubr.msk.f32.mxu0 %vm526_vm0, %v1701_v35  ;;  %14765 = vmatprep.mubr.msk.f32.mxu1 %vm526_vm0, %v2195_v57  ;;  %v17725_v35 = vld [vmem:[%s22375_s7 + $0x78] sm:$0xff] }
  0x9f   : > { %22472 = vst [vmem:[#allocation13_spill] sm:$0xff] %v17725_v35  ;;  %14809 = vmatpush3.msra.mxu1 %v17725_v35 }
  0xa0   : > { %14810 = vmatprep.subr.mxu1 %v22384_v38 }
  0xa1   : > { %14735 = vmatmul.mubr.msk.f32.gmra.mxu0 %vm526_vm0, %v1702_v37  ;;  %14766 = vmatmul.mubr.msk.f32.gmra.mxu1 %vm526_vm0, %v2196_v58  ;;  %v17793_v58 = vld [vmem:[%s22375_s7 + $0x50] sm:$0xff] }
  0xa2   : > { %14737 = vmatprep.mubr.msk.f32.mxu0 %vm526_vm0, %v1703_v39  ;;  %14768 = vmatprep.mubr.msk.f32.mxu1 %vm526_vm0, %v2197_v59  ;;  %22477 = vst [vmem:[#allocation18_spill] sm:$0xff] %v17793_v58 }
  0xa3   : > { %14811 = vmatpush3.msra.mxu1 %v17742_v42 }
  0xa4   : > { %14812 = vmatprep.subr.mxu1 %v22384_v38 }
  0xa5   : > { %14738 = vmatmul.mubr.msk.f32.gmra.mxu0 %vm526_vm0, %v1704_v41  ;;  %14769 = vmatmul.mubr.msk.f32.gmra.mxu1 %vm526_vm0, %v2198_v60 }
  0xa6   : > { %14740 = vmatprep.mubr.msk.f32.mxu0 %vm526_vm0, %v1705_v43  ;;  %14771 = vmatprep.mubr.msk.f32.mxu1 %vm526_vm0, %v2199_v61  ;;  %v17802_v61 = vld [vmem:[%s22375_s7 + $0x48] sm:$0xff] }
  0xa7   : > { %14813 = vmatpush3.msra.mxu1 %v17754_v45  ;;  %22478 = vst [vmem:[#allocation19_spill] sm:$0xff] %v17802_v61 }
  0xa8   : > { %14814 = vmatprep.subr.mxu1 %v22384_v38 }
  0xa9   : > { %14741 = vmatmul.mubr.msk.f32.gmra.mxu0 %vm526_vm0, %v1952_v62  ;;  %14772 = vmatmul.mubr.msk.f32.gmra.mxu1 %vm526_vm0, %v2200_v63 }
  0xaa   : > { %14743 = vmatprep.mubr.msk.f32.mxu0 %vm526_vm0, %v1953_v0  ;;  %14774 = vmatprep.mubr.msk.f32.mxu1 %vm526_vm0, %v2201_v1  ;;  %v17817_v1 = vld [vmem:[%s22375_s7 + $0x40] sm:$0xff] }
  0xab   : > { %14815 = vmatpush3.msra.mxu1 %v17770_v51  ;;  %22479 = vst [vmem:[#allocation20_spill] sm:$0xff] %v17817_v1 }
  0xac   : > { %14816 = vmatprep.subr.mxu1 %v22384_v38 }
  0xad   : > { %14744 = vmatmul.mubr.msk.f32.gmra.mxu0 %vm526_vm0, %v1954_v2  ;;  %14775 = vmatmul.mubr.msk.f32.gmra.mxu1 %vm526_vm0, %v2202_v3 }
  0xae   : > { %14781 = vmatprep.mubr.msk.f32.mxu0 %vm526_vm0, %v2433_v4  ;;  %14817 = vmatpush3.msra.mxu1 %v17778_v54  ;;  %v17826_v4 = vld [vmem:[%s22375_s7 + $0x38] sm:$0xff] }
  0xaf   : > { %14818 = vmatprep.subr.mxu1 %v22384_v38  ;;  %22480 = vst [vmem:[#allocation21_spill] sm:$0xff] %v17826_v4  ;;  %14840 = vmatprep.mubr.msk.f32.mxu1 %vm17187_vm1, %v22384_v38 }
  0xb0   : > { %14819 = vmatpush3.msra.mxu1 %v17793_v58 }
  0xb1   : > { %14782 = vmatmul.mubr.msk.f32.vlgmr.msra.gmra.mxu0 %vm526_vm0, %v2434_v5  ;;  %14820 = vmatprep.subr.mxu1 %v22384_v38 }
  0xb2   : > { %14784 = vmatprep.mubr.msk.f32.mxu0 %vm526_vm0, %v2435_v6  ;;  %14879 = vmatpush3.msra.mxu0 %v17725_v35 }
  0xb3   : > { %14880 = vmatprep.subr.mxu0 %v22384_v38  ;;  %14821 = vmatpush3.msra.mxu1 %v17802_v61 }
  0xb4   : > { %14881 = vmatpush3.msra.mxu0 %v17742_v42  ;;  %14822 = vmatprep.subr.mxu1 %v22384_v38 }
  0xb5   : > { %14785 = vmatmul.mubr.msk.f32.gmra.mxu0 %vm526_vm0, %v2436_v7  ;;  %14882 = vmatprep.subr.mxu0 %v22384_v38 }
  0xb6   : > { %14787 = vmatprep.mubr.msk.f32.mxu0 %vm526_vm0, %v2437_v8  ;;  %14883 = vmatpush3.msra.mxu0 %v17754_v45  ;;  %v17841_v8 = vld [vmem:[%s22375_s7 + $0x30] sm:$0xff] }
  0xb7   : > { %14884 = vmatprep.subr.mxu0 %v22384_v38  ;;  %14823 = vmatpush3.msra.mxu1 %v17817_v1  ;;  %22483 = vst [vmem:[#allocation24_spill] sm:$0xff] %v17841_v8 }
  0xb8   : > { %14885 = vmatpush3.msra.mxu0 %v17770_v51  ;;  %14824 = vmatprep.subr.mxu1 %v22384_v38 }
  0xb9   : > { %14788 = vmatmul.mubr.msk.f32.gmra.mxu0 %vm526_vm0, %v2438_v9  ;;  %14886 = vmatprep.subr.mxu0 %v22384_v38 }
  0xba   : > { %14790 = vmatprep.mubr.msk.f32.mxu0 %vm526_vm0, %v2439_v10  ;;  %14887 = vmatpush3.msra.mxu0 %v17778_v54 }
  0xbb   : > { %14888 = vmatprep.subr.mxu0 %v22384_v38  ;;  %14825 = vmatpush3.msra.mxu1 %v17826_v4 }
  0xbc   : > { %14889 = vmatpush3.msra.mxu0 %v17793_v58  ;;  %14826 = vmatprep.subr.mxu1 %v22384_v38 }
  0xbd   : > { %14791 = vmatmul.mubr.msk.f32.gmra.mxu0 %vm526_vm0, %v2440_v11  ;;  %14890 = vmatprep.subr.mxu0 %v22384_v38  ;;  %v17850_v11 = vld [vmem:[%s22375_s7 + $0x28] sm:$0xff] }
  0xbe   : > { %14793 = vmatprep.mubr.msk.f32.mxu0 %vm526_vm0, %v2441_v12  ;;  %14891 = vmatpush3.msra.mxu0 %v17802_v61  ;;  %22484 = vst [vmem:[#allocation25_spill] sm:$0xff] %v17850_v11 }
  0xbf   : > { %14892 = vmatprep.subr.mxu0 %v22384_v38  ;;  %14827 = vmatpush3.msra.mxu1 %v17841_v8 }
  0xc0   : > { %14893 = vmatpush3.msra.mxu0 %v17817_v1  ;;  %14828 = vmatprep.subr.mxu1 %v22384_v38 }
  0xc1   : > { %14794 = vmatmul.mubr.msk.f32.gmra.mxu0 %vm526_vm0, %v2442_v13  ;;  %14894 = vmatprep.subr.mxu0 %v22384_v38 }
  0xc2   : > { %14796 = vmatprep.mubr.msk.f32.mxu0 %vm526_vm0, %v2443_v14  ;;  %14895 = vmatpush3.msra.mxu0 %v17826_v4 }
  0xc3   : > { %14896 = vmatprep.subr.mxu0 %v22384_v38  ;;  %14829 = vmatpush3.msra.mxu1 %v17850_v11 }
  0xc4   : > { %14897 = vmatpush3.msra.mxu0 %v17841_v8  ;;  %14830 = vmatprep.subr.mxu1 %v22384_v38 }
  0xc5   : > { %14797 = vmatmul.mubr.msk.f32.gmra.mxu0 %vm526_vm0, %v2444_v15  ;;  %14898 = vmatprep.subr.mxu0 %v22384_v38  ;;  %v17865_v15 = vld [vmem:[%s22375_s7 + $0x20] sm:$0xff] }
  0xc6   : > { %14799 = vmatprep.mubr.msk.f32.mxu0 %vm526_vm0, %v2445_v16  ;;  %14899 = vmatpush3.msra.mxu0 %v17850_v11  ;;  %22487 = vst [vmem:[#allocation28_spill] sm:$0xff] %v17865_v15 }
  0xc7   : > { %14900 = vmatprep.subr.mxu0 %v22384_v38  ;;  %14831 = vmatpush3.msra.mxu1 %v17865_v15 }
  0xc8   : > { %14901 = vmatpush3.msra.mxu0 %v17865_v15  ;;  %14832 = vmatprep.subr.mxu1 %v22384_v38 }
  0xc9   : > { %14800 = vmatmul.mubr.msk.f32.gmra.mxu0 %vm526_vm0, %v2446_v17  ;;  %14902 = vmatprep.subr.mxu0 %v22384_v38 }
  0xca   : > { %14802 = vmatprep.mubr.msk.f32.mxu0 %vm526_vm0, %v2447_v18  ;;  %v17874_v18 = vld [vmem:[%s22375_s7 + $0x18] sm:$0xff] }
  0xcb   : > { %22488 = vst [vmem:[#allocation29_spill] sm:$0xff] %v17874_v18  ;;  %14833 = vmatpush3.msra.mxu1 %v17874_v18  ;;  %14903 = vmatpush3.msra.mxu0 %v17874_v18 }
  0xcc   : > { %14834 = vmatprep.subr.mxu1 %v22384_v38  ;;  %14904 = vmatprep.subr.mxu0 %v22384_v38 }
  0xcd   : > { %14803 = vmatmul.mubr.msk.f32.gmra.mxu0 %vm526_vm0, %v2448_v19 }
  0xce   : > { %14805 = vmatprep.mubr.msk.f32.mxu0 %vm526_vm0, %v2449_v20 }
  0xd1   : > { %14806 = vmatmul.mubr.msk.f32.gmra.mxu0 %vm526_vm0, %v2450_v21 }
  0xd2   : > { %14910 = vmatprep.mubr.msk.f32.mxu0 %vm17187_vm1, %v22384_v38 }
  0xe0   : > { %v14535_v22 = vpop.f32.mrf.mxu0 }
  0xe1   : > { %v14566_v23 = vpop.f32.mrf.mxu1 }
  0xe2   : > { %v17708_v24 = vadd.f32 %v14566_v23, %v14535_v22  ;;  %v17710_v25 = vpop.f32.mrf.mxu0  ;;  %v17888_v22 = vld [vmem:[%s22375_s7 + $0x10] sm:$0xff] }
  0xe3   : > { %v17712_v26 = vpop.f32.mrf.mxu1  ;;  %22489 = vst [vmem:[#allocation30_spill] sm:$0xff] %v17888_v22  ;;  %14835 = vmatpush3.msra.mxu1 %v17888_v22  ;;  %14905 = vmatpush3.msra.mxu0 %v17888_v22 }
  0xe4   : > { %14836 = vmatprep.subr.mxu1 %v22384_v38  ;;  %14906 = vmatprep.subr.mxu0 %v22384_v38 }
  0xe5   : > { %v14538_v27 = vpop.f32.mrf.mxu0  ;;  %v14569_v28 = vpop.f32.mrf.mxu1 }
  0xe6   : > { %v17714_v29 = vadd.f32 %v14569_v28, %v14538_v27  ;;  %v17899_v28 = vld [vmem:[%s22375_s7 + $0x8] sm:$0xff] }
  0xe7   : > { %v17716_v30 = vpop.f32.mrf.mxu0  ;;  %v17718_v31 = vpop.f32.mrf.mxu1  ;;  %22490 = vst [vmem:[#allocation31_spill] sm:$0xff] %v17899_v28  ;;  %14837 = vmatpush3.msra.mxu1 %v17899_v28  ;;  %14907 = vmatpush3.msra.mxu0 %v17899_v28 }
  0xe8   : > { %14838 = vmatprep.subr.mxu1 %v22384_v38  ;;  %14908 = vmatprep.subr.mxu0 %v22384_v38 }
  0xe9   : > { %v14541_v32 = vpop.f32.mrf.mxu0  ;;  %v14572_v33 = vpop.f32.mrf.mxu1 }
  0xea   : > { %v17720_v34 = vadd.f32 %v14572_v33, %v14541_v32 }
  0xeb   : > { %v17727_v36 = vpop.f32.mrf.mxu0  ;;  %v17729_v37 = vpop.f32.mrf.mxu1 }
  0xed   : > { %v14544_v39 = vpop.f32.mrf.mxu0  ;;  %v14575_v40 = vpop.f32.mrf.mxu1 }
  0xee   : > { %v17737_v41 = vadd.f32 %v14575_v40, %v14544_v39  ;;  %v17913_v40 = vld [vmem:[%s22375_s7] sm:$0xff] }
  0xef   : > { %v17744_v43 = vpop.f32.mrf.mxu0  ;;  %v17746_v44 = vpop.f32.mrf.mxu1  ;;  %22491 = vst [vmem:[#allocation32_spill] sm:$0xff] %v17913_v40  ;;  %14839 = vmatpush3.msra.mxu1 %v17913_v40  ;;  %14909 = vmatpush3.msra.mxu0 %v17913_v40 }
  0xf0   : > { %14843 = vmatprep.subr.mxu1 %v22384_v38  ;;  %14948 = vmatprep.subr.mxu0 %v22384_v38 }
  0xf1   : > { %v14547_v46 = vpop.f32.mrf.mxu0  ;;  %v14578_v47 = vpop.f32.mrf.mxu1 }
  0xf2   : > { %v17759_v48 = vadd.f32 %v14578_v47, %v14547_v46 }
  0xf3   : > { %v17763_v49 = vpop.f32.mrf.mxu0  ;;  %v17765_v50 = vpop.f32.mrf.mxu1 }
  0xf5   : > { %v14550_v52 = vpop.f32.mrf.mxu0  ;;  %v14581_v53 = vpop.f32.mrf.mxu1 }
  0xf6   : > { %v17781_v55 = vadd.f32 %v14581_v53, %v14550_v52 }
  0xf7   : > { %v17785_v56 = vpop.f32.mrf.mxu0  ;;  %v17787_v57 = vpop.f32.mrf.mxu1 }
  0xf9   : > { %v14553_v59 = vpop.f32.mrf.mxu0  ;;  %v14584_v60 = vpop.f32.mrf.mxu1 }
  0xfa   : > { %v17805_v62 = vadd.f32 %v14584_v60, %v14553_v59 }
  0xfb   : > { %v17809_v63 = vpop.f32.mrf.mxu0  ;;  %v17811_v0 = vpop.f32.mrf.mxu1 }
  0xfd   : > { %v14556_v2 = vpop.f32.mrf.mxu0  ;;  %v14587_v3 = vpop.f32.mrf.mxu1 }
  0xfe   : > { %v17829_v5 = vadd.f32 %v14587_v3, %v14556_v2 }
  0xff   : > { %v17833_v6 = vpop.f32.mrf.mxu0  ;;  %v17835_v7 = vpop.f32.mrf.mxu1 }
 0x100   : > { %22481 = vst [vmem:[#allocation22_spill] sm:$0xff] %v17833_v6  ;;  %22482 = vst [vmem:[#allocation23_spill] sm:$0xff] %v17835_v7 }
 0x101   : > { %v14559_v9 = vpop.f32.mrf.mxu0  ;;  %v14590_v10 = vpop.f32.mrf.mxu1 }
 0x102   : > { %v17853_v12 = vadd.f32 %v14590_v10, %v14559_v9 }
 0x103   : > { %v17857_v13 = vpop.f32.mrf.mxu0  ;;  %v17859_v14 = vpop.f32.mrf.mxu1 }
 0x104   : > { %22485 = vst [vmem:[#allocation26_spill] sm:$0xff] %v17857_v13  ;;  %22486 = vst [vmem:[#allocation27_spill] sm:$0xff] %v17859_v14 }
 0x105   : > { %v14597_v16 = vpop.f32.mrf.mxu0  ;;  %v14628_v17 = vpop.f32.mrf.mxu1 }
 0x106   : > { %v1176_v19 = vadd.f32 %v14597_v16, %v17708_v24 }
 0x107   : > { %v17880_v20 = vpop.f32.mrf.mxu0  ;;  %v17882_v21 = vpop.f32.mrf.mxu1 }
 0x108   : > { %v17891_v23 = vadd.f32 %v14628_v17, %v1176_v19 }
 0x109   : > { %v14600_v24 = vpop.f32.mrf.mxu0  ;;  %v14631_v27 = vpop.f32.mrf.mxu1 }
 0x10a   : > { %v1178_v32 = vadd.f32 %v14600_v24, %v17714_v29 }
 0x10b   : > { %v17905_v33 = vpop.f32.mrf.mxu0  ;;  %v17907_v39 = vpop.f32.mrf.mxu1 }
 0x10c   : > { %v1426_v46 = vadd.f32 %v14631_v27, %v1178_v32 }
 0x10d   : > { %v14603_v29 = vpop.f32.mrf.mxu0  ;;  %v14634_v47 = vpop.f32.mrf.mxu1 }
 0x10e   : > { %v1180_v52 = vadd.f32 %v14603_v29, %v17720_v34 }
 0x10f   : > { %v17925_v53 = vpop.f32.mrf.mxu0  ;;  %v17927_v59 = vpop.f32.mrf.mxu1 }
 0x110   : > { %v1428_v60 = vadd.f32 %v14634_v47, %v1180_v52 }
 0x111   : > { %v14606_v2 = vpop.f32.mrf.mxu0  ;;  %v14637_v3 = vpop.f32.mrf.mxu1 }
 0x112   : > { %v1182_v9 = vadd.f32 %v14606_v2, %v17737_v41 }
 0x113   : > { %v17930_v10 = vpop.f32.mrf.mxu0  ;;  %v17932_v16 = vpop.f32.mrf.mxu1 }
 0x114   : > { %v1430_v17 = vadd.f32 %v14637_v3, %v1182_v9 }
 0x115   : > { %v14609_v34 = vpop.f32.mrf.mxu0  ;;  %v14640_v19 = vpop.f32.mrf.mxu1 }
 0x116   : > { %v1184_v24 = vadd.f32 %v14609_v34, %v17759_v48 }
 0x117   : > { %v17935_v27 = vpop.f32.mrf.mxu0  ;;  %v17937_v32 = vpop.f32.mrf.mxu1 }
 0x118   : > { %v1432_v29 = vadd.f32 %v14640_v19, %v1184_v24 }
 0x119   : > { %v14612_v38 = vpop.f32.mrf.mxu0  ;;  %v14643_v47 = vpop.f32.mrf.mxu1 }
 0x11a   : > { %v1186_v52 = vadd.f32 %v14612_v38, %v17781_v55 }
 0x11b   : > { %v17940_v40 = vpop.f32.mrf.mxu0  ;;  %v17942_v41 = vpop.f32.mrf.mxu1 }
 0x11c   : > { %22492 = vst [vmem:[#allocation33_spill] sm:$0xff] %v17942_v41  ;;  %v1434_v2 = vadd.f32 %v14643_v47, %v1186_v52 }
 0x11d   : > { %v14615_v28 = vpop.f32.mrf.mxu0  ;;  %v14646_v3 = vpop.f32.mrf.mxu1 }
 0x11e   : > { %v1188_v9 = vadd.f32 %v14615_v28, %v17805_v62 }
 0x11f   : > { %v17945_v22 = vpop.f32.mrf.mxu0  ;;  %v17947_v48 = vpop.f32.mrf.mxu1 }
 0x120   : > { %22493 = vst [vmem:[#allocation34_spill] sm:$0xff] %v17945_v22  ;;  %22494 = vst [vmem:[#allocation35_spill] sm:$0xff] %v17947_v48  ;;  %v1436_v34 = vadd.f32 %v14646_v3, %v1188_v9 }
 0x121   : > { %v14618_v18 = vpop.f32.mrf.mxu0  ;;  %v14649_v19 = vpop.f32.mrf.mxu1 }
 0x122   : > { %v1190_v24 = vadd.f32 %v14618_v18, %v17829_v5 }
 0x123   : > { %v17950_v15 = vpop.f32.mrf.mxu0  ;;  %v17952_v38 = vpop.f32.mrf.mxu1 }
 0x124   : > { %22495 = vst [vmem:[#allocation36_spill] sm:$0xff] %v17950_v15  ;;  %22496 = vst [vmem:[#allocation37_spill] sm:$0xff] %v17952_v38  ;;  %v1438_v55 = vadd.f32 %v14649_v19, %v1190_v24 }
 0x125   : > { %v14621_v11 = vpop.f32.mrf.mxu0  ;;  %v14652_v47 = vpop.f32.mrf.mxu1 }
 0x126   : > { %v1192_v52 = vadd.f32 %v14621_v11, %v17853_v12 }
 0x127   : > { %v17955_v8 = vpop.f32.mrf.mxu0  ;;  %v17957_v62 = vpop.f32.mrf.mxu1 }
 0x128   : > { %22497 = vst [vmem:[#allocation38_spill] sm:$0xff] %v17955_v8  ;;  %22498 = vst [vmem:[#allocation39_spill] sm:$0xff] %v17957_v62  ;;  %v1440_v28 = vadd.f32 %v14652_v47, %v1192_v52 }
 0x129   : > { %v14659_v4 = vpop.f32.mrf.mxu0  ;;  %v17959_v3 = vpop.f32.mrf.mxu1 }
 0x12a   : > { %v17962_v9 = vadd.f32 %v14659_v4, %v17891_v23 }
 0x12b   : > { %v17964_v5 = vpop.f32.mrf.mxu0  ;;  %v17966_v18 = vpop.f32.mrf.mxu1 }
 0x12d   : > { %v14662_v19 = vpop.f32.mrf.mxu0  ;;  %v17968_v24 = vpop.f32.mrf.mxu1 }
 0x12e   : > { %v17970_v1 = vadd.f32 %v14662_v19, %v1426_v46 }
 0x12f   : > { %v17972_v11 = vpop.f32.mrf.mxu0  ;;  %v17974_v12 = vpop.f32.mrf.mxu1 }
 0x131   : > { %v14665_v47 = vpop.f32.mrf.mxu0  ;;  %v17976_v52 = vpop.f32.mrf.mxu1 }
 0x132   : > { %v17978_v61 = vadd.f32 %v14665_v47, %v1428_v60 }
 0x133   : > { %v17980_v4 = vpop.f32.mrf.mxu0  ;;  %v17982_v23 = vpop.f32.mrf.mxu1 }
 0x135   : > { %v14668_v58 = vpop.f32.mrf.mxu0  ;;  %v17984_v54 = vpop.f32.mrf.mxu1 }
 0x136   : > { %v17986_v51 = vadd.f32 %v14668_v58, %v1430_v17 }
 0x137   : > { %v17988_v46 = vpop.f32.mrf.mxu0  ;;  %v17990_v19 = vpop.f32.mrf.mxu1 }
 0x139   : > { %v14671_v45 = vpop.f32.mrf.mxu0  ;;  %v17992_v42 = vpop.f32.mrf.mxu1 }
 0x13a   : > { %22499 = vst [vmem:[#allocation40_spill] sm:$0xff] %v17992_v42  ;;  %v17994_v35 = vadd.f32 %v14671_v45, %v1432_v29 }
 0x13b   : > { %v17996_v60 = vpop.f32.mrf.mxu0  ;;  %v17998_v47 = vpop.f32.mrf.mxu1 }
 0x13c   : > { %22500 = vst [vmem:[#allocation41_spill] sm:$0xff] %v17994_v35  ;;  %22501 = vst [vmem:[#allocation42_spill] sm:$0xff] %v17998_v47 }
 0x13d   : > { %v14674_v62 = vpop.f32.mrf.mxu0  ;;  %v18000_v8 = vpop.f32.mrf.mxu1 }
 0x13e   : > { %22502 = vst [vmem:[#allocation43_spill] sm:$0xff] %v18000_v8  ;;  %v18002_v38 = vadd.f32 %v14674_v62, %v1434_v2 }
 0x13f   : > { %v18004_v58 = vpop.f32.mrf.mxu0  ;;  %v18006_v17 = vpop.f32.mrf.mxu1 }
 0x140   : > { %22503 = vst [vmem:[#allocation44_spill] sm:$0xff] %v18002_v38  ;;  %22504 = vst [vmem:[#allocation45_spill] sm:$0xff] %v18004_v58 }
 0x141   : > { %22505 = vst [vmem:[#allocation46_spill] sm:$0xff] %v18006_v17  ;;  %v14677_v14 = vpop.f32.mrf.mxu0  ;;  %v18008_v13 = vpop.f32.mrf.mxu1 }
 0x142   : > { %22506 = vst [vmem:[#allocation47_spill] sm:$0xff] %v18008_v13  ;;  %v18010_v15 = vadd.f32 %v14677_v14, %v1436_v34 }
 0x143   : > { %v18012_v45 = vpop.f32.mrf.mxu0  ;;  %v18014_v29 = vpop.f32.mrf.mxu1 }
 0x144   : > { %22507 = vst [vmem:[#allocation48_spill] sm:$0xff] %v18010_v15  ;;  %22508 = vst [vmem:[#allocation49_spill] sm:$0xff] %v18012_v45 }
 0x145   : > { %22509 = vst [vmem:[#allocation50_spill] sm:$0xff] %v18014_v29  ;;  %v14680_v48 = vpop.f32.mrf.mxu0  ;;  %v18016_v47 = vpop.f32.mrf.mxu1 }
 0x146   : > { %22510 = vst [vmem:[#allocation51_spill] sm:$0xff] %v18016_v47  ;;  %v18018_v7 = vadd.f32 %v14680_v48, %v1438_v55 }
 0x147   : > { %v18020_v2 = vpop.f32.mrf.mxu0  ;;  %v18022_v62 = vpop.f32.mrf.mxu1 }
 0x148   : > { %22511 = vst [vmem:[#allocation52_spill] sm:$0xff] %v18018_v7  ;;  %22512 = vst [vmem:[#allocation53_spill] sm:$0xff] %v18020_v2 }
 0x149   : > { %22513 = vst [vmem:[#allocation54_spill] sm:$0xff] %v18022_v62  ;;  %v14683_v8 = vpop.f32.mrf.mxu0  ;;  %v18024_v17 = vpop.f32.mrf.mxu1 }
 0x14a   : > { %22514 = vst [vmem:[#allocation55_spill] sm:$0xff] %v18024_v17  ;;  %v18026_v38 = vadd.f32 %v14683_v8, %v1440_v28 }
 0x14b   : > { %v18028_v14 = vpop.f32.mrf.mxu0  ;;  %v18030_v34 = vpop.f32.mrf.mxu1 }
 0x14c   : > { %22515 = vst [vmem:[#allocation56_spill] sm:$0xff] %v18026_v38  ;;  %22516 = vst [vmem:[#allocation57_spill] sm:$0xff] %v18028_v14  ;;  %v857_v14 = vadd.f32 %v17712_v26, %v17710_v25  ;;  %v877_v25 = vadd.f32 %v17729_v37, %v17727_v36 }
 0x14d   : > { %22517 = vst [vmem:[#allocation58_spill] sm:$0xff] %v18030_v34  ;;  %v14721_v13 = vpop.f32.mrf.mxu0  ;;  %v14752_v29 = vpop.f32.mrf.mxu1 }
 0x14e   : > { %v1175_v42 = vadd.f32 %v17880_v20, %v857_v14  ;;  %v1179_v14 = vadd.f32 %v17925_v53, %v877_v25 }
 0x14f   : > { %v2078_v15 = vpop.f32.mrf.mxu0  ;;  %v2326_v45 = vpop.f32.mrf.mxu1 }
 0x150   : > { %v1427_v53 = vadd.f32 %v17927_v59, %v1179_v14 }
 0x151   : > { %v14724_v47 = vpop.f32.mrf.mxu0  ;;  %v14755_v48 = vpop.f32.mrf.mxu1 }
 0x153   : > { %v2088_v55 = vpop.f32.mrf.mxu0  ;;  %v18032_v2 = vpop.f32.mrf.mxu1 }
 0x155   : > { %v14727_v7 = vpop.f32.mrf.mxu0  ;;  %v18036_v17 = vpop.f32.mrf.mxu1 }
 0x157   : > { %v2098_v62 = vpop.f32.mrf.mxu0  ;;  %v18042_v34 = vpop.f32.mrf.mxu1 }
 0x158   : > { %22520 = vst [vmem:[#allocation61_spill] sm:$0xff] %v18042_v34 }
 0x159   : > { %v18034_v58 = vpop.f32.mrf.mxu0  ;;  %v18051_v35 = vpop.f32.mrf.mxu1 }
 0x15b   : > { %v18038_v8 = vpop.f32.mrf.mxu0  ;;  %v18061_v34 = vpop.f32.mrf.mxu1 }
 0x15c   : > { %22518 = vst [vmem:[#allocation59_spill] sm:$0xff] %v18038_v8  ;;  %v867_v8 = vadd.f32 %v17718_v31, %v17716_v30  ;;  %v1920_v31 = vadd.f32 %v17959_v3, %v17962_v9 }
 0x15d   : > { %v18040_v28 = vpop.f32.mrf.mxu0 }
 0x15e   : > { %22519 = vst [vmem:[#allocation60_spill] sm:$0xff] %v18040_v28  ;;  %v1423_v28 = vadd.f32 %v17882_v21, %v1175_v42  ;;  %v18074_v42 = vpop.f32.mrf.mxu1  ;;  %v887_v21 = vadd.f32 %v17746_v44, %v17744_v43  ;;  %v897_v43 = vadd.f32 %v17765_v50, %v17763_v49  ;;  %v1675_v44 = vadd.f32 %v17980_v4, %v1427_v53  ;;  %v18103_v49 = vld [vmem:[%s22370_s2] ss:$0 sm:$0xff]  ;;  %v22524_v53 = vld [vmem:[#allocation34_spill] sm:$0xff] }
 0x15f   : > { %v18044_v38 = vpop.f32.mrf.mxu0 }
 0x160   : > { %22521 = vst [vmem:[#allocation62_spill] sm:$0xff] %v18044_v38  ;;  %v1177_v38 = vadd.f32 %v17905_v33, %v867_v8  ;;  %v1671_v20 = vadd.f32 %v17964_v5, %v1423_v28  ;;  %v2168_v5 = vadd.f32 %v14721_v13, %v1920_v31  ;;  %v1181_v8 = vadd.f32 %v17930_v10, %v887_v21  ;;  %v18088_v9 = vpop.f32.mrf.mxu1 }
 0x161   : > { %v18048_v6 = vpop.f32.mrf.mxu0  ;;  %v1183_v28 = vadd.f32 %v17935_v27, %v897_v43 }
 0x162   : > { %v1425_v30 = vadd.f32 %v17907_v39, %v1177_v38  ;;  %v1919_v36 = vadd.f32 %v17966_v18, %v1671_v20  ;;  %v1922_v38 = vadd.f32 %v17968_v24, %v17970_v1  ;;  %v2416_v59 = vadd.f32 %v14752_v29, %v2168_v5  ;;  %v18105_v4 = vpop.f32.mrf.mxu1 }
 0x163   : > { %v18053_v22 = vpop.f32.mrf.mxu0  ;;  %v1429_v10 = vadd.f32 %v17932_v16, %v1181_v8  ;;  %v1924_v1 = vadd.f32 %v17976_v52, %v17978_v61  ;;  %v1923_v16 = vadd.f32 %v17982_v23, %v1675_v44  ;;  %v1431_v14 = vadd.f32 %v17937_v32, %v1183_v28  ;;  %v22528_v43 = vld [vmem:[#allocation59_spill] sm:$0xff] }
 0x164   : > { %22522 = vst [vmem:[#allocation63_spill] sm:$0xff] %v18053_v22  ;;  %v1673_v37 = vadd.f32 %v17972_v11, %v1425_v30  ;;  %v2167_v3 = vadd.f32 %v2078_v15, %v1919_v36  ;;  %v2170_v11 = vadd.f32 %v14724_v47, %v1922_v38  ;;  %v907_v47 = vadd.f32 %v17787_v57, %v17785_v56  ;;  %v18117_v57 = vpop.f32.mrf.mxu1  ;;  %v22525_v38 = vld [vmem:[#allocation41_spill] sm:$0xff] }
 0x165   : > { %v18057_v41 = vpop.f32.mrf.mxu0  ;;  %v1677_v27 = vadd.f32 %v17988_v46, %v1429_v10  ;;  %v2172_v29 = vadd.f32 %v14727_v7, %v1924_v1  ;;  %v2171_v30 = vadd.f32 %v2098_v62, %v1923_v16  ;;  %v22530_v10 = vld [vmem:[#allocation23_spill] sm:$0xff]  ;;  %v22531_v1 = vld [vmem:[#allocation42_spill] sm:$0xff] }
 0x166   : > { %v1921_v13 = vadd.f32 %v17974_v12, %v1673_v37  ;;  %v2415_v50 = vadd.f32 %v2326_v45, %v2167_v3  ;;  %v2418_v52 = vadd.f32 %v14755_v48, %v2170_v11  ;;  %v1185_v45 = vadd.f32 %v17940_v40, %v907_v47  ;;  %v22523_v37 = vld [vmem:[#allocation33_spill] sm:$0xff]  ;;  %v18133_v44 = vpop.f32.mrf.mxu1  ;;  %v22529_v11 = vld [vmem:[#allocation22_spill] sm:$0xff] }
 0x167   : > { %v18065_v26 = vpop.f32.mrf.mxu0  ;;  %v917_v48 = vadd.f32 %v17811_v0, %v17809_v63  ;;  %v1925_v32 = vadd.f32 %v17990_v19, %v1677_v27  ;;  %v1679_v40 = vadd.f32 %v17996_v60, %v1431_v14  ;;  %v2420_v21 = vadd.f32 %v18036_v17, %v2172_v29  ;;  %v22526_v63 = vld [vmem:[#allocation40_spill] sm:$0xff]  ;;  %v22527_v19 = vld [vmem:[#allocation61_spill] sm:$0xff] }
 0x168   : > { %v2169_v24 = vadd.f32 %v2088_v55, %v1921_v13  ;;  %v1926_v55 = vadd.f32 %v17984_v54, %v17986_v51  ;;  %v1433_v5 = vadd.f32 %v22523_v37, %v1185_v45  ;;  %v1928_v0 = vadd.f32 %v22526_v63, %v22525_v38  ;;  %v22535_v14 = vld [vmem:[#allocation36_spill] sm:$0xff] }
 0x169   : > { %v18069_v22 = vpop.f32.mrf.mxu0  ;;  %v1187_v8 = vadd.f32 %v22524_v53, %v917_v48  ;;  %v2419_v3 = vadd.f32 %v22527_v19, %v2171_v30  ;;  %v2173_v17 = vadd.f32 %v22528_v43, %v1925_v32  ;;  %v927_v28 = vadd.f32 %v22530_v10, %v22529_v11  ;;  %v22537_v30 = vld [vmem:[#allocation43_spill] sm:$0xff]  ;;  %v2386_v48 = vpop.f32.mrf.mxu1  ;;  %v22545_v43 = vld [vmem:[#allocation48_spill] sm:$0xff] }
 0x16a   : > { %v2417_v56 = vadd.f32 %v18032_v2, %v2169_v24  ;;  %v2174_v54 = vadd.f32 %v18034_v58, %v1926_v55  ;;  %v22536_v55 = vld [vmem:[#allocation44_spill] sm:$0xff] }
 0x16b   : > { %v18078_v33 = vpop.f32.mrf.mxu0  ;;  %v1189_v45 = vadd.f32 %v22535_v14, %v927_v28  ;;  %v22547_v11 = vld [vmem:[#allocation63_spill] sm:$0xff]  ;;  %v14773_v10 = vpop.f32.mrf.mxu1 }
 0x16c   : > { %v2422_v27 = vadd.f32 %v18051_v35, %v2174_v54  ;;  %v22552_v14 = vld [vmem:[#allocation51_spill] sm:$0xff] }
 0x16d   : > { %v18084_v39 = vpop.f32.mrf.mxu0 }
 0x16f   : > { %v18093_v18 = vpop.f32.mrf.mxu0 }
 0x171   : > { %v14783_v15 = vpop.f32.mrf.mxu0 }
 0x172   : > { %v2664_v12 = vadd.f32 %v14783_v15, %v2416_v59  ;;  %v1927_v15 = vadd.f32 %v22531_v1, %v1679_v40 }
 0x173   : > { %v2574_v61 = vpop.f32.mrf.mxu0 }
 0x174   : > { %v2689_v25 = vadd.f32 %v18103_v49, %v2664_v12  ;;  %v2663_v20 = vadd.f32 %v2574_v61, %v2415_v50  ;;  %v22532_v50 = vld [vmem:[#allocation45_spill] sm:$0xff]  ;;  %v22533_v12 = vld [vmem:[#allocation60_spill] sm:$0xff] }
 0x175   : > { %v14786_v31 = vpop.f32.mrf.mxu0  ;;  %v1681_v24 = vadd.f32 %v22532_v50, %v1433_v5  ;;  %v2176_v47 = vadd.f32 %v22533_v12, %v1928_v0  ;;  %v22543_v0 = vld [vmem:[#allocation37_spill] sm:$0xff] }
 0x176   : > { %v2707_v23 = vmax.f32 %v2689_v25, 0.0  ;;  %v2688_v7 = vadd.f32 %v18103_v49, %v2663_v20  ;;  %v2666_v46 = vadd.f32 %v14786_v31, %v2418_v52  ;;  %v22534_v25 = vld [vmem:[#allocation35_spill] sm:$0xff]  ;;  %v1930_v31 = vadd.f32 %v22537_v30, %v22536_v55 }
 0x177   : > { %v2584_v51 = vpop.f32.mrf.mxu0  ;;  %v1435_v20 = vadd.f32 %v22534_v25, %v1187_v8  ;;  %v2424_v5 = vadd.f32 %v18074_v42, %v2176_v47  ;;  %v1437_v19 = vadd.f32 %v22543_v0, %v1189_v45 }
 0x178   : > { %2725 = vst [vmem:[#allocation2 + $0x8] sm:$0xff] %v2707_v23  ;;  %v2706_v2 = vmax.f32 %v2688_v7, 0.0  ;;  %v2691_v62 = vadd.f32 %v18103_v49, %v2666_v46  ;;  %v2665_v36 = vadd.f32 %v2584_v51, %v2417_v56  ;;  %v22538_v56 = vld [vmem:[#allocation62_spill] sm:$0xff]  ;;  %v2421_v46 = vadd.f32 %v18061_v34, %v2173_v17  ;;  %v22540_v51 = vld [vmem:[#allocation27_spill] sm:$0xff] }
 0x179   : > { %v14789_v60 = vpop.f32.mrf.mxu0  ;;  %v2175_v23 = vadd.f32 %v22538_v56, %v1927_v15  ;;  %v2178_v8 = vadd.f32 %v18048_v6, %v1930_v31  ;;  %v22546_v17 = vld [vmem:[#allocation47_spill] sm:$0xff]  ;;  %v22548_v15 = vld [vmem:[#allocation50_spill] sm:$0xff] }
 0x17a   : > { %2724 = vst [vmem:[#allocation2] sm:$0xff] %v2706_v2  ;;  %v2709_v58 = vmax.f32 %v2691_v62, 0.0  ;;  %v2690_v13 = vadd.f32 %v18103_v49, %v2665_v36  ;;  %v2668_v59 = vadd.f32 %v14789_v60, %v2420_v21  ;;  %v22539_v21 = vld [vmem:[#allocation26_spill] sm:$0xff]  ;;  %v22542_v36 = vld [vmem:[#allocation49_spill] sm:$0xff] }
 0x17b   : > { %v2594_v16 = vpop.f32.mrf.mxu0  ;;  %v937_v54 = vadd.f32 %v22540_v51, %v22539_v21  ;;  %v22541_v2 = vld [vmem:[#allocation46_spill] sm:$0xff]  ;;  %v1683_v37 = vadd.f32 %v22542_v36, %v1435_v20  ;;  %v22551_v20 = vld [vmem:[#allocation52_spill] sm:$0xff] }
 0x17c   : > { %2727 = vst [vmem:[#allocation2 + $0x18] sm:$0xff] %v2709_v58  ;;  %v2708_v29 = vmax.f32 %v2690_v13, 0.0  ;;  %v2693_v61 = vadd.f32 %v18103_v49, %v2668_v59  ;;  %v2667_v52 = vadd.f32 %v2594_v16, %v2419_v3  ;;  %v1929_v62 = vadd.f32 %v22541_v2, %v1681_v24  ;;  %v22544_v3 = vld [vmem:[#allocation38_spill] sm:$0xff]  ;;  %v22549_v24 = vld [vmem:[#allocation53_spill] sm:$0xff] }
 0x17d   : > { %v14792_v7 = vpop.f32.mrf.mxu0  ;;  %v1191_v60 = vadd.f32 %v22544_v3, %v937_v54  ;;  %v1932_v58 = vadd.f32 %v22546_v17, %v22545_v43  ;;  %v2423_v13 = vadd.f32 %v18088_v9, %v2175_v23  ;;  %v1931_v50 = vadd.f32 %v22548_v15, %v1683_v37  ;;  %v2396_v23 = vpop.f32.mrf.mxu1  ;;  %v22555_v37 = vld [vmem:[#allocation56_spill] sm:$0xff] }
 0x17e   : > { %2726 = vst [vmem:[#allocation2 + $0x10] sm:$0xff] %v2708_v29  ;;  %v2711_v35 = vmax.f32 %v2693_v61, 0.0  ;;  %v2692_v32 = vadd.f32 %v18103_v49, %v2667_v52  ;;  %v2670_v40 = vadd.f32 %v14792_v7, %v2422_v27  ;;  %v2177_v42 = vadd.f32 %v22547_v11, %v1929_v62  ;;  %v22550_v52 = vld [vmem:[#allocation39_spill] sm:$0xff] }
 0x17f   : > { %v2604_v53 = vpop.f32.mrf.mxu0  ;;  %v1685_v12 = vadd.f32 %v22549_v24, %v1437_v19  ;;  %v2180_v47 = vadd.f32 %v18057_v41, %v1932_v58  ;;  %v2426_v27 = vadd.f32 %v18105_v4, %v2178_v8  ;;  %v1439_v25 = vadd.f32 %v22550_v52, %v1191_v60  ;;  %v14776_v0 = vpop.f32.mrf.mxu1  ;;  %v22557_v60 = vld [vmem:[#allocation58_spill] sm:$0xff] }
 0x180   : > { %2729 = vst [vmem:[#allocation2 + $0x28] sm:$0xff] %v2711_v35  ;;  %v2710_v34 = vmax.f32 %v2692_v32, 0.0  ;;  %v2695_v38 = vadd.f32 %v18103_v49, %v2670_v40  ;;  %v2669_v63 = vadd.f32 %v2604_v53, %v2421_v46  ;;  %v1934_v45 = vadd.f32 %v22552_v14, %v22551_v20  ;;  %v22553_v35 = vld [vmem:[#allocation54_spill] sm:$0xff]  ;;  %v22554_v40 = vld [vmem:[#allocation57_spill] sm:$0xff] }
 0x181   : > { %v14795_v59 = vpop.f32.mrf.mxu0  ;;  %v2179_v55 = vadd.f32 %v18065_v26, %v1931_v50  ;;  %v2742_v31 = vld [vmem:[#allocation2] ss:$2 sm:$0xff]  ;;  %v2744_v56 = vld [vmem:[#allocation2 + $0x1] ss:$2 sm:$0xff]  ;;  %v2425_v41 = vadd.f32 %v18117_v57, %v2177_v42  ;;  %v1933_v32 = vadd.f32 %v22553_v35, %v1685_v12  ;;  %v1687_v21 = vadd.f32 %v22554_v40, %v1439_v25  ;;  %v2406_v50 = vpop.f32.mrf.mxu1  ;;  %v18226_v40 = vld [vmem:[%s22375_s7 + $0xd8] sm:$0xff] }
 0x182   : > { %2728 = vst [vmem:[#allocation2 + $0x20] sm:$0xff] %v2710_v34  ;;  %v2713_v6 = vmax.f32 %v2695_v38, 0.0  ;;  %v2694_v28 = vadd.f32 %v18103_v49, %v2669_v63  ;;  %v2672_v1 = vadd.f32 %v14795_v59, %v2424_v5  ;;  %v2428_v51 = vadd.f32 %v18133_v44, %v2180_v47  ;;  %v22556_v5 = vld [vmem:[#allocation55_spill] sm:$0xff]  ;;  %v18210_v25 = vld [vmem:[%s22375_s7 + $0xe8] sm:$0xff] }
 0x183   : > { %v2614_v16 = vpop.f32.mrf.mxu0  ;;  %v2182_v54 = vadd.f32 %v18069_v22, %v1934_v45  ;;  %v2745_v36 = vmax.f32 %v2742_v31, %v2744_v56  ;;  %v1936_v53 = vadd.f32 %v22556_v5, %v22555_v37  ;;  %v2427_v8 = vadd.f32 %v2386_v48, %v2179_v55  ;;  %v22561_v37 = vld [vmem:[#allocation15_spill] sm:$0xff] }
 0x184   : > { %2731 = vst [vmem:[#allocation2 + $0x38] sm:$0xff] %v2713_v6  ;;  %v2712_v9 = vmax.f32 %v2694_v28, 0.0  ;;  %v2697_v29 = vadd.f32 %v18103_v49, %v2672_v1  ;;  %v2671_v61 = vadd.f32 %v2614_v16, %v2423_v13  ;;  %v2181_v34 = vadd.f32 %v18078_v33, %v1933_v32  ;;  %v18192_v6 = vld [vmem:[%s22375_s7 + $0xf8] sm:$0xff]  ;;  %v18200_v16 = vld [vmem:[%s22375_s7 + $0xf0] sm:$0xff] }
 0x185   : > { %v14798_v30 = vpop.f32.mrf.mxu0  ;;  %v1935_v43 = vadd.f32 %v22557_v60, %v1687_v21  ;;  %v2430_v17 = vadd.f32 %v14773_v10, %v2182_v54  ;;  %v2184_v58 = vadd.f32 %v18084_v39, %v1936_v53  ;;  %v18264_v5 = vld [vmem:[%s22375_s7 + $0xb8] sm:$0xff]  ;;  %v22567_v60 = vld [vmem:[#allocation21_spill] sm:$0xff] }
 0x186   : > { %2730 = vst [vmem:[#allocation2 + $0x30] sm:$0xff] %v2712_v9  ;;  %v2715_v4 = vmax.f32 %v2697_v29, 0.0  ;;  %v2696_v7 = vadd.f32 %v18103_v49, %v2671_v61  ;;  %v2674_v46 = vadd.f32 %v14798_v30, %v2426_v27  ;;  %v2429_v39 = vadd.f32 %v2396_v23, %v2181_v34  ;;  %v22562_v53 = vld [vmem:[#allocation16_spill] sm:$0xff]  ;;  %v22563_v34 = vld [vmem:[#allocation17_spill] sm:$0xff] }
 0x187   : > { %v2624_v26 = vpop.f32.mrf.mxu0  ;;  %v2183_v28 = vadd.f32 %v18093_v18, %v1935_v43  ;;  %v2432_v27 = vadd.f32 %v14776_v0, %v2184_v58  ;;  %v22558_v9 = vmov 0.0   ;;  %v18291_v0 = vld [vmem:[%s22375_s7 + $0xa0] sm:$0xff]  ;;  %v18318_v43 = vld [vmem:[%s22375_s7 + $0x88] sm:$0xff] }
 0x188   : > { %2733 = vst [vmem:[#allocation2 + $0x48] sm:$0xff] %v2715_v4  ;;  %v2714_v2 = vmax.f32 %v2696_v7, 0.0  ;;  %v2699_v62 = vadd.f32 %v18103_v49, %v2674_v46  ;;  %v2673_v57 = vadd.f32 %v2624_v26, %v2425_v41  ;;  %v18218_v41 = vld [vmem:[%s22375_s7 + $0xe0] sm:$0xff]  ;;  %v18237_v26 = vld [vmem:[%s22375_s7 + $0xd0] sm:$0xff]  ;;  %474 = vst.msk [vmem:[#allocation3 + $0x8] sm:$0xff] %vm472_vm2, %v22558_v9 }
 0x189   : > { %v14801_v38 = vpop.f32.mrf.mxu0  ;;  %v2747_v63 = vld [vmem:[#allocation2 + $0x12] ss:$2 sm:$0xff]  ;;  %v2750_v59 = vld [vmem:[#allocation2 + $0x13] ss:$2 sm:$0xff]  ;;  %v2431_v14 = vadd.f32 %v2406_v50, %v2183_v28  ;;  %475 = vst.msk [vmem:[#allocation3 + $0x10] sm:$0xff] %vm472_vm2, %v22558_v9  ;;  %473 = vst.msk [vmem:[#allocation3] sm:$0xff] %vm472_vm2, %v22558_v9 }
 0x18a   : > { %2732 = vst [vmem:[#allocation2 + $0x40] sm:$0xff] %v2714_v2  ;;  %v2717_v44 = vmax.f32 %v2699_v62, 0.0  ;;  %v2698_v22 = vadd.f32 %v18103_v49, %v2673_v57  ;;  %v2676_v19 = vadd.f32 %v14801_v38, %v2428_v51  ;;  %v2748_v3 = vmax.f32 %v2745_v36, %v2747_v63  ;;  %v22559_v2 = vld [vmem:[#allocation13_spill] sm:$0xff]  ;;  %v22560_v57 = vld [vmem:[#allocation14_spill] sm:$0xff]  ;;  %476 = vst.msk [vmem:[#allocation3 + $0x18] sm:$0xff] %vm472_vm2, %v22558_v9 }
 0x18b   : > { %v2634_v13 = vpop.f32.mrf.mxu0  ;;  %v18255_v36 = vld [vmem:[%s22375_s7 + $0xc0] sm:$0xff]  ;;  %v18282_v38 = vld [vmem:[%s22375_s7 + $0xa8] sm:$0xff]  ;;  %477 = vst.msk [vmem:[#allocation3 + $0x20] sm:$0xff] %vm472_vm2, %v22558_v9  ;;  %478 = vst.msk [vmem:[#allocation3 + $0x28] sm:$0xff] %vm472_vm2, %v22558_v9 }
 0x18c   : > { %2735 = vst [vmem:[#allocation2 + $0x58] sm:$0xff] %v2717_v44  ;;  %v2716_v48 = vmax.f32 %v2698_v22, 0.0  ;;  %v2701_v33 = vadd.f32 %v18103_v49, %v2676_v19  ;;  %v2675_v11 = vadd.f32 %v2634_v13, %v2427_v8  ;;  %v18187_v42 = vmax.f32 %v2748_v3, %v2750_v59  ;;  %v18273_v8 = vld [vmem:[%s22375_s7 + $0xb0] sm:$0xff]  ;;  %v18300_v22 = vld [vmem:[%s22375_s7 + $0x98] sm:$0xff]  ;;  %v18327_v58 = vld [vmem:[%s22375_s7 + $0x80] sm:$0xff] }
 0x18d   : > { %v14804_v1 = vpop.f32.mrf.mxu0  ;;  %v2928_v10 = vld [vmem:[#allocation2 + $0x24] ss:$2 sm:$0xff]  ;;  %v2930_v15 = vld [vmem:[#allocation2 + $0x25] ss:$2 sm:$0xff]  ;;  %v22565_v44 = vld [vmem:[#allocation19_spill] sm:$0xff]  ;;  %479 = vst.msk [vmem:[#allocation3 + $0x30] sm:$0xff] %vm472_vm2, %v22558_v9 }
 0x18e   : > { %2734 = vst [vmem:[#allocation2 + $0x50] sm:$0xff] %v2716_v48  ;;  %v2719_v24 = vmax.f32 %v2701_v33, 0.0  ;;  %v2700_v12 = vadd.f32 %v18103_v49, %v2675_v11  ;;  %v2678_v47 = vadd.f32 %v14804_v1, %v2430_v17  ;;  %14841 = vmatmul.mubr.f32.vlgmr.msra.gmra.mxu1 %v18187_v42  ;;  %v2931_v20 = vmax.f32 %v2928_v10, %v2930_v15  ;;  %v22564_v63 = vld [vmem:[#allocation18_spill] sm:$0xff]  ;;  %v22566_v19 = vld [vmem:[#allocation20_spill] sm:$0xff]  ;;  %v22569_v13 = vld [vmem:[#allocation25_spill] sm:$0xff] }
 0x18f   : > { %14844 = vmatpush3.msra.mxu1 %v18192_v6  ;;  %v2644_v18 = vpop.f32.mrf.mxu0  ;;  %14875 = vmatprep.mubr.msk.f32.mxu1 %vm17187_vm1, %v22558_v9  ;;  %v18309_v3 = vld [vmem:[%s22375_s7 + $0x90] sm:$0xff]  ;;  %v22568_v17 = vld [vmem:[#allocation24_spill] sm:$0xff]  ;;  %v22571_v1 = vld [vmem:[#allocation29_spill] sm:$0xff]  ;;  %482 = vst.msk [vmem:[#allocation5] sm:$0xff] %vm472_vm2, %v22558_v9 }
 0x190   : > { %2737 = vst [vmem:[#allocation2 + $0x68] sm:$0xff] %v2719_v24  ;;  %v2718_v29 = vmax.f32 %v2700_v12, 0.0  ;;  %v2703_v61 = vadd.f32 %v18103_v49, %v2678_v47  ;;  %v2677_v52 = vadd.f32 %v2644_v18, %v2429_v39  ;;  %14845 = vmatprep.subr.mxu1 %v22558_v9  ;;  %v22570_v33 = vld [vmem:[#allocation28_spill] sm:$0xff]  ;;  %v22572_v15 = vld [vmem:[#allocation30_spill] sm:$0xff]  ;;  %483 = vst.msk [vmem:[#allocation5 + $0x8] sm:$0xff] %vm472_vm2, %v22558_v9 }
 0x191   : > { %14846 = vmatpush3.msra.mxu1 %v18200_v16  ;;  %v14807_v45 = vpop.f32.mrf.mxu0  ;;  %v2933_v55 = vld [vmem:[#allocation2 + $0x36] ss:$2 sm:$0xff]  ;;  %v2936_v7 = vld [vmem:[#allocation2 + $0x37] ss:$2 sm:$0xff]  ;;  %484 = vst.msk [vmem:[#allocation5 + $0x10] sm:$0xff] %vm472_vm2, %v22558_v9 }
 0x192   : > { %2736 = vst [vmem:[#allocation2 + $0x60] sm:$0xff] %v2718_v29  ;;  %v2721_v30 = vmax.f32 %v2703_v61, 0.0  ;;  %v2702_v31 = vadd.f32 %v18103_v49, %v2677_v52  ;;  %v2680_v56 = vadd.f32 %v14807_v45, %v2432_v27  ;;  %14847 = vmatprep.subr.mxu1 %v22558_v9  ;;  %v2934_v23 = vmax.f32 %v2931_v20, %v2933_v55  ;;  %v22574_v24 = vld [vmem:[#allocation32_spill] sm:$0xff]  ;;  %v17110_v47 = vld [vmem:[%s22375_s7 + $0x70] sm:$0xff]  ;;  %v17111_v27 = vld [vmem:[%s22375_s7 + $0x68] sm:$0xff] }
 0x193   : > { %14848 = vmatpush3.msra.mxu1 %v18210_v25  ;;  %v2654_v4 = vpop.f32.mrf.mxu0  ;;  %v17109_v12 = vld [vmem:[%s22375_s7 + $0x78] sm:$0xff]  ;;  %v17112_v18 = vld [vmem:[%s22375_s7 + $0x60] sm:$0xff]  ;;  %v17114_v61 = vld [vmem:[%s22375_s7 + $0x50] sm:$0xff]  ;;  %481 = vst.msk [vmem:[#allocation3 + $0x38] sm:$0xf] %vm480_vm3, %v22558_v9 }
 0x194   : > { %2739 = vst [vmem:[#allocation2 + $0x78] sm:$0xff] %v2721_v30  ;;  %v2720_v46 = vmax.f32 %v2702_v31, 0.0  ;;  %v2705_v35 = vadd.f32 %v18103_v49, %v2680_v56  ;;  %v2679_v32 = vadd.f32 %v2654_v4, %v2431_v14  ;;  %14849 = vmatprep.subr.mxu1 %v22558_v9  ;;  %v18228_v21 = vmax.f32 %v2934_v23, %v2936_v7  ;;  %v17113_v29 = vld [vmem:[%s22375_s7 + $0x58] sm:$0xff]  ;;  %v17115_v52 = vld [vmem:[%s22375_s7 + $0x48] sm:$0xff]  ;;  %v17116_v20 = vld [vmem:[%s22375_s7 + $0x40] sm:$0xff] }
 0x195   : > { %14850 = vmatpush3.msra.mxu1 %v18218_v41  ;;  %v3113_v59 = vld [vmem:[#allocation2 + $0x48] ss:$2 sm:$0xff]  ;;  %v3115_v48 = vld [vmem:[#allocation2 + $0x49] ss:$2 sm:$0xff]  ;;  %v17117_v14 = vld [vmem:[%s22375_s7 + $0x38] sm:$0xff] }
 0x196   : > { %2738 = vst [vmem:[#allocation2 + $0x70] sm:$0xff] %v2720_v46  ;;  %v2723_v51 = vmax.f32 %v2705_v35, 0.0  ;;  %v2704_v54 = vadd.f32 %v18103_v49, %v2679_v32  ;;  %14851 = vmatprep.subr.mxu1 %v22558_v9  ;;  %14911 = vmatmul.mubr.f32.vlgmr.msra.gmra.mxu0 %v18228_v21  ;;  %v18246_v49 = vld [vmem:[%s22375_s7 + $0xc8] sm:$0xff]  ;;  %v3116_v28 = vmax.f32 %v3113_v59, %v3115_v48  ;;  %v17118_v45 = vld [vmem:[%s22375_s7 + $0x30] sm:$0xff]  ;;  %v12324_v46 = vld [vmem:[%s22371_s3 + $0x78] sm:$0xff] }
 0x197   : > { %14852 = vmatpush3.msra.mxu1 %v18226_v40  ;;  %14949 = vmatpush3.msra.mxu0 %v22559_v2  ;;  %v12323_v35 = vld [vmem:[%s22371_s3 + $0x70] sm:$0xff]  ;;  %v12322_v32 = vld [vmem:[%s22371_s3 + $0x68] sm:$0xff] }
 0x198   : > { %2741 = vst [vmem:[#allocation2 + $0x88] sm:$0x3f] %v2723_v51  ;;  %v2722_v62 = vmax.f32 %v2704_v54, 0.0  ;;  %14853 = vmatprep.subr.mxu1 %v22558_v9  ;;  %14950 = vmatprep.subr.mxu0 %v22558_v9  ;;  %v12320_v51 = vld [vmem:[%s22371_s3 + $0x58] sm:$0xff]  ;;  %v12319_v54 = vld [vmem:[%s22371_s3 + $0x50] sm:$0xff]  ;;  %v12318_v2 = vld [vmem:[%s22371_s3 + $0x48] sm:$0xff] }
 0x199   : > { %14854 = vmatpush3.msra.mxu1 %v18237_v26  ;;  %14951 = vmatpush3.msra.mxu0 %v22560_v57  ;;  %v3118_v11 = vld [vmem:[#allocation2 + $0x5a] ss:$2 sm:$0xff]  ;;  %v3121_v39 = vld [vmem:[#allocation2 + $0x5b] ss:$2 sm:$0xff] }
 0x19a   : > { %2740 = vst [vmem:[#allocation2 + $0x80] sm:$0xff] %v2722_v62  ;;  %14855 = vmatprep.subr.mxu1 %v22558_v9  ;;  %14952 = vmatprep.subr.mxu0 %v22558_v9  ;;  %v3119_v10 = vmax.f32 %v3116_v28, %v3118_v11  ;;  %v12338_v62 = vld [vmem:[%s22371_s3 + $0x98] sm:$0xff]  ;;  %v12336_v57 = vld [vmem:[%s22371_s3 + $0x88] sm:$0xff] }
 0x19b   : > { %14856 = vmatpush3.msra.mxu1 %v18246_v49  ;;  %14953 = vmatpush3.msra.mxu0 %v22561_v37  ;;  %v12335_v37 = vld [vmem:[%s22371_s3 + $0x80] sm:$0xff] }
 0x19c   : > { %14857 = vmatprep.subr.mxu1 %v22558_v9  ;;  %14954 = vmatprep.subr.mxu0 %v22558_v9  ;;  %v18351_v50 = vmax.f32 %v3119_v10, %v3121_v39 }
 0x19d   : > { %14858 = vmatpush3.msra.mxu1 %v18255_v36  ;;  %14955 = vmatpush3.msra.mxu0 %v22562_v53  ;;  %v3298_v55 = vld [vmem:[#allocation2 + $0x6c] ss:$2 sm:$0xff]  ;;  %v3300_v30 = vld [vmem:[#allocation2 + $0x6d] ss:$2 sm:$0xff] }
 0x19e   : > { %14859 = vmatprep.subr.mxu1 %v22558_v9  ;;  %14956 = vmatprep.subr.mxu0 %v22558_v9  ;;  %v3301_v56 = vmax.f32 %v3298_v55, %v3300_v30  ;;  %v3493_v53 = vld [vmem:[%s22371_s3 + $0x30] sm:$0xff] }
 0x19f   : > { %14860 = vmatpush3.msra.mxu1 %v18264_v5  ;;  %14957 = vmatpush3.msra.mxu0 %v22563_v34  ;;  %v12368_v34 = vld [vmem:[%s22371_s3 + $0x138] sm:$0xff] }
 0x1a0   : > { %14861 = vmatprep.subr.mxu1 %v22558_v9  ;;  %14958 = vmatprep.subr.mxu0 %v22558_v9 }
 0x1a1   : > { %14862 = vmatpush3.msra.mxu1 %v18273_v8  ;;  %14959 = vmatpush3.msra.mxu0 %v22564_v63  ;;  %v3303_v31 = vld [vmem:[#allocation2 + $0x7e] ss:$2 sm:$0xff]  ;;  %v3306_v4 = vld [vmem:[#allocation2 + $0x7f] ss:$2 sm:$0xff] }
 0x1a2   : > { %14863 = vmatprep.subr.mxu1 %v22558_v9  ;;  %14960 = vmatprep.subr.mxu0 %v22558_v9  ;;  %v3304_v23 = vmax.f32 %v3301_v56, %v3303_v31  ;;  %v3491_v63 = vld [vmem:[%s22371_s3 + $0x20] sm:$0xff] }
 0x1a3   : > { %14864 = vmatpush3.msra.mxu1 %v18282_v38  ;;  %14961 = vmatpush3.msra.mxu0 %v22565_v44  ;;  %v3490_v44 = vld [vmem:[%s22371_s3 + $0x18] sm:$0xff] }
 0x1a4   : > { %14865 = vmatprep.subr.mxu1 %v22558_v9  ;;  %14962 = vmatprep.subr.mxu0 %v22558_v9  ;;  %v18443_v7 = vmax.f32 %v3304_v23, %v3306_v4  ;;  %v3482_v4 = vld [vmem:[#allocation3] sm:$0xff] }
 0x1a5   : > { %14866 = vmatpush3.msra.mxu1 %v18291_v0  ;;  %14963 = vmatpush3.msra.mxu0 %v22566_v19  ;;  %v3489_v19 = vld [vmem:[%s22371_s3 + $0x10] sm:$0xff] }
 0x1a6   : > { %14867 = vmatprep.subr.mxu1 %v22558_v9  ;;  %14964 = vmatprep.subr.mxu0 %v22558_v9 }
 0x1a7   : > { %14868 = vmatpush3.msra.mxu1 %v18300_v22  ;;  %14965 = vmatpush3.msra.mxu0 %v22567_v60  ;;  %v3488_v60 = vld [vmem:[%s22371_s3 + $0x8] sm:$0xff] }
 0x1a8   : > { %14869 = vmatprep.subr.mxu1 %v22558_v9  ;;  %14966 = vmatprep.subr.mxu0 %v22558_v9 }
 0x1a9   : > { %14870 = vmatpush3.msra.mxu1 %v18309_v3  ;;  %14967 = vmatpush3.msra.mxu0 %v22568_v17  ;;  %v12362_v17 = vld [vmem:[%s22371_s3 + $0x108] sm:$0xff] }
 0x1aa   : > { %14871 = vmatprep.subr.mxu1 %v22558_v9  ;;  %14968 = vmatprep.subr.mxu0 %v22558_v9 }
 0x1ab   : > { %14872 = vmatpush3.msra.mxu1 %v18318_v43  ;;  %14969 = vmatpush3.msra.mxu0 %v22569_v13 }
 0x1ac   : > { %14873 = vmatprep.subr.mxu1 %v22558_v9  ;;  %14970 = vmatprep.subr.mxu0 %v22558_v9 }
 0x1ad   : > { %14874 = vmatpush3.msra.mxu1 %v18327_v58  ;;  %14971 = vmatpush3.msra.mxu0 %v22570_v33 }
 0x1ae   : > { %14876 = vmatmul.mubr.f32.vlgmr.msra.gmra.mxu1 %v18187_v42  ;;  %14913 = vmatprep.subr.mxu1 %v22558_v9  ;;  %v22573_v42 = vld [vmem:[#allocation31_spill] sm:$0xff] }
 0x1af   : > { %14972 = vmatprep.subr.mxu0 %v22558_v9  ;;  %14914 = vmatpush3.msra.mxu1 %v18192_v6 }
 0x1b0   : > { %14973 = vmatpush3.msra.mxu0 %v22571_v1  ;;  %14915 = vmatprep.subr.mxu1 %v22558_v9 }
 0x1b1   : > { %14974 = vmatprep.subr.mxu0 %v22558_v9  ;;  %14916 = vmatpush3.msra.mxu1 %v18200_v16 }
 0x1b2   : > { %14975 = vmatpush3.msra.mxu0 %v22572_v15  ;;  %14917 = vmatprep.subr.mxu1 %v22558_v9 }
 0x1b3   : > { %14976 = vmatprep.subr.mxu0 %v22558_v9  ;;  %14918 = vmatpush3.msra.mxu1 %v18210_v25 }
 0x1b4   : > { %14977 = vmatpush3.msra.mxu0 %v22573_v42  ;;  %14919 = vmatprep.subr.mxu1 %v22558_v9 }
 0x1b5   : > { %14978 = vmatprep.subr.mxu0 %v22558_v9  ;;  %14920 = vmatpush3.msra.mxu1 %v18218_v41 }
 0x1b6   : > { %14979 = vmatpush3.msra.mxu0 %v22574_v24  ;;  %14980 = vmatprep.mubr.msk.f32.mxu0 %vm17187_vm1, %v22558_v9 }
 0x1b7   : > { %14921 = vmatprep.subr.mxu1 %v22558_v9  ;;  %14981 = vmatmul.mubr.f32.vlgmr.msra.gmra.mxu0 %v18351_v50 }
 0x1b8   : > { %15018 = vmatprep.subr.mxu0 %v22558_v9  ;;  %14922 = vmatpush3.msra.mxu1 %v18226_v40 }
 0x1b9   : > { %15019 = vmatpush3.msra.mxu0 %v17109_v12  ;;  %14923 = vmatprep.subr.mxu1 %v22558_v9 }
 0x1ba   : > { %15020 = vmatprep.subr.mxu0 %v22558_v9  ;;  %14924 = vmatpush3.msra.mxu1 %v18237_v26 }
 0x1bb   : > { %15021 = vmatpush3.msra.mxu0 %v17110_v47  ;;  %14925 = vmatprep.subr.mxu1 %v22558_v9 }
 0x1bc   : > { %15022 = vmatprep.subr.mxu0 %v22558_v9  ;;  %14926 = vmatpush3.msra.mxu1 %v18246_v49 }
 0x1bd   : > { %15023 = vmatpush3.msra.mxu0 %v17111_v27  ;;  %14927 = vmatprep.subr.mxu1 %v22558_v9 }
 0x1be   : > { %15024 = vmatprep.subr.mxu0 %v22558_v9  ;;  %14928 = vmatpush3.msra.mxu1 %v18255_v36 }
 0x1bf   : > { %15025 = vmatpush3.msra.mxu0 %v17112_v18  ;;  %14929 = vmatprep.subr.mxu1 %v22558_v9 }
 0x1c0   : > { %15026 = vmatprep.subr.mxu0 %v22558_v9  ;;  %14930 = vmatpush3.msra.mxu1 %v18264_v5 }
 0x1c1   : > { %15027 = vmatpush3.msra.mxu0 %v17113_v29  ;;  %14931 = vmatprep.subr.mxu1 %v22558_v9 }
 0x1c2   : > { %15028 = vmatprep.subr.mxu0 %v22558_v9  ;;  %14932 = vmatpush3.msra.mxu1 %v18273_v8 }
 0x1c3   : > { %15029 = vmatpush3.msra.mxu0 %v17114_v61  ;;  %14933 = vmatprep.subr.mxu1 %v22558_v9 }
 0x1c4   : > { %15030 = vmatprep.subr.mxu0 %v22558_v9  ;;  %14934 = vmatpush3.msra.mxu1 %v18282_v38 }
 0x1c5   : > { %15031 = vmatpush3.msra.mxu0 %v17115_v52  ;;  %14935 = vmatprep.subr.mxu1 %v22558_v9 }
 0x1c6   : > { %15032 = vmatprep.subr.mxu0 %v22558_v9  ;;  %14936 = vmatpush3.msra.mxu1 %v18291_v0 }
 0x1c7   : > { %15033 = vmatpush3.msra.mxu0 %v17116_v20  ;;  %14937 = vmatprep.subr.mxu1 %v22558_v9 }
 0x1c8   : > { %15034 = vmatprep.subr.mxu0 %v22558_v9  ;;  %14938 = vmatpush3.msra.mxu1 %v18300_v22 }
 0x1c9   : > { %15035 = vmatpush3.msra.mxu0 %v17117_v14  ;;  %14939 = vmatprep.subr.mxu1 %v22558_v9 }
 0x1ca   : > { %15036 = vmatprep.subr.mxu0 %v22558_v9  ;;  %14940 = vmatpush3.msra.mxu1 %v18309_v3 }
 0x1cb   : > { %15037 = vmatpush3.msra.mxu0 %v17118_v45  ;;  %14941 = vmatprep.subr.mxu1 %v22558_v9 }
 0x1cc   : > { %15038 = vmatprep.subr.mxu0 %v22558_v9  ;;  %14942 = vmatpush3.msra.mxu1 %v18318_v43 }
 0x1cd   : > { %15039 = vmatpush3.msra.mxu0 %v22569_v13  ;;  %14943 = vmatprep.subr.mxu1 %v22558_v9  ;;  %v12361_v13 = vld [vmem:[%s22371_s3 + $0x100] sm:$0xff] }
 0x1ce   : > { %15040 = vmatprep.subr.mxu0 %v22558_v9  ;;  %14944 = vmatpush3.msra.mxu1 %v18327_v58 }
 0x1cf   : > { %14945 = vmatprep.mubr.msk.f32.mxu1 %vm17187_vm1, %v22558_v9  ;;  %15041 = vmatpush3.msra.mxu0 %v22570_v33 }
 0x1d0   : > { %14946 = vmatmul.mubr.f32.vlgmr.msra.gmra.mxu1 %v18228_v21  ;;  %14983 = vmatprep.subr.mxu1 %v22558_v9  ;;  %v12321_v21 = vld [vmem:[%s22371_s3 + $0x60] sm:$0xff] }
 0x1d1   : > { %15042 = vmatprep.subr.mxu0 %v22558_v9  ;;  %14984 = vmatpush3.msra.mxu1 %v18192_v6 }
 0x1d2   : > { %15043 = vmatpush3.msra.mxu0 %v22571_v1  ;;  %14985 = vmatprep.subr.mxu1 %v22558_v9 }
 0x1d3   : > { %15044 = vmatprep.subr.mxu0 %v22558_v9  ;;  %14986 = vmatpush3.msra.mxu1 %v18200_v16 }
 0x1d4   : > { %15045 = vmatpush3.msra.mxu0 %v22572_v15  ;;  %14987 = vmatprep.subr.mxu1 %v22558_v9 }
 0x1d5   : > { %15046 = vmatprep.subr.mxu0 %v22558_v9  ;;  %14988 = vmatpush3.msra.mxu1 %v18210_v25 }
 0x1d6   : > { %15047 = vmatpush3.msra.mxu0 %v22573_v42  ;;  %14989 = vmatprep.subr.mxu1 %v22558_v9 }
 0x1d7   : > { %15048 = vmatprep.subr.mxu0 %v22558_v9  ;;  %14990 = vmatpush3.msra.mxu1 %v18218_v41 }
 0x1d8   : > { %15049 = vmatpush3.msra.mxu0 %v22574_v24  ;;  %15050 = vmatprep.mubr.msk.f32.mxu0 %vm17187_vm1, %v22558_v9 }
 0x1d9   : > { %14991 = vmatprep.subr.mxu1 %v22558_v9  ;;  %15051 = vmatmul.mubr.f32.vlgmr.msra.gmra.mxu0 %v18443_v7 }
 0x1da   : > { %14992 = vmatpush3.msra.mxu1 %v18226_v40  ;;  %15015 = vmatprep.mubr.msk.f32.mxu1 %vm17187_vm1, %v22558_v9 }
 0x1db   : > { %14993 = vmatprep.subr.mxu1 %v22558_v9  ;;  %15088 = vmatprep.subr.mxu0 %v22558_v9 }
 0x1dc   : > { %14994 = vmatpush3.msra.mxu1 %v18237_v26  ;;  %15089 = vmatpush3.msra.mxu0 %v12324_v46 }
 0x1dd   : > { %14995 = vmatprep.subr.mxu1 %v22558_v9  ;;  %15090 = vmatprep.subr.mxu0 %v22558_v9 }
 0x1de   : > { %14996 = vmatpush3.msra.mxu1 %v18246_v49  ;;  %15091 = vmatpush3.msra.mxu0 %v12323_v35  ;;  %v12354_v35 = vld [vmem:[%s22371_s3 + $0xf0] sm:$0xff] }
 0x1df   : > { %14997 = vmatprep.subr.mxu1 %v22558_v9  ;;  %15092 = vmatprep.subr.mxu0 %v22558_v9 }
 0x1e0   : > { %14998 = vmatpush3.msra.mxu1 %v18255_v36  ;;  %15093 = vmatpush3.msra.mxu0 %v12322_v32  ;;  %v12394_v32 = vld [vmem:[%s22371_s3 + $0x1b8] sm:$0xff] }
 0x1e1   : > { %14999 = vmatprep.subr.mxu1 %v22558_v9  ;;  %15094 = vmatprep.subr.mxu0 %v22558_v9 }
 0x1e2   : > { %15000 = vmatpush3.msra.mxu1 %v18264_v5  ;;  %15095 = vmatpush3.msra.mxu0 %v12321_v21  ;;  %v12353_v21 = vld [vmem:[%s22371_s3 + $0xe8] sm:$0xff] }
 0x1e3   : > { %15001 = vmatprep.subr.mxu1 %v22558_v9  ;;  %15096 = vmatprep.subr.mxu0 %v22558_v9 }
 0x1e4   : > { %15002 = vmatpush3.msra.mxu1 %v18273_v8  ;;  %15104 = vmatprep.mubr.msk.f32.mxu0 %vm17187_vm1, %v22558_v9 }
 0x1e5   : > { %15003 = vmatprep.subr.mxu1 %v22558_v9  ;;  %15097 = vmatpush3.msra.mxu0 %v12320_v51 }
 0x1e6   : > { %15004 = vmatpush3.msra.mxu1 %v18282_v38  ;;  %15098 = vmatprep.subr.mxu0 %v22558_v9 }
 0x1e7   : > { %15005 = vmatprep.subr.mxu1 %v22558_v9  ;;  %15099 = vmatpush3.msra.mxu0 %v12319_v54 }
 0x1e8   : > { %15006 = vmatpush3.msra.mxu1 %v18291_v0  ;;  %15100 = vmatprep.subr.mxu0 %v22558_v9 }
 0x1e9   : > { %15007 = vmatprep.subr.mxu1 %v22558_v9  ;;  %15101 = vmatpush3.msra.mxu0 %v12318_v2  ;;  %v12352_v2 = vld [vmem:[%s22371_s3 + $0xe0] sm:$0xff] }
 0x1ea   : > { %15008 = vmatpush3.msra.mxu1 %v18300_v22  ;;  %15102 = vmatprep.subr.mxu0 %v22558_v9 }
 0x1eb   : > { %15009 = vmatprep.subr.mxu1 %v22558_v9 }
 0x1ec   : > { %15010 = vmatpush3.msra.mxu1 %v18309_v3 }
 0x1ed   : > { %15011 = vmatprep.subr.mxu1 %v22558_v9 }
 0x1ee   : > { %15012 = vmatpush3.msra.mxu1 %v18318_v43 }
 0x1ef   : > { %15013 = vmatprep.subr.mxu1 %v22558_v9 }
 0x1f0   : > { %15014 = vmatpush3.msra.mxu1 %v18327_v58 }
 0x1f1   : > { %15016 = vmatmul.mubr.f32.vlgmr.msra.gmra.mxu1 %v18351_v50  ;;  %15053 = vmatprep.subr.mxu1 %v22558_v9 }
 0x1f2   : > { %15054 = vmatpush3.msra.mxu1 %v18192_v6  ;;  %15085 = vmatprep.mubr.msk.f32.mxu1 %vm17187_vm1, %v22558_v9  ;;  %v12317_v6 = vld [vmem:[%s22371_s3 + $0x40] sm:$0xff] }
 0x1f3   : > { %15055 = vmatprep.subr.mxu1 %v22558_v9  ;;  %15103 = vmatpush3.msra.mxu0 %v12317_v6  ;;  %v12351_v6 = vld [vmem:[%s22371_s3 + $0xd8] sm:$0xff] }
 0x1f4   : > { %15056 = vmatpush3.msra.mxu1 %v18200_v16  ;;  %v3495_v16 = vld [vmem:[#allocation3 + $0x1] sm:$0xff]  ;;  %15119 = vmatprep.subr.mxu0 %v22558_v9 }
 0x1f5   : > { %15057 = vmatprep.subr.mxu1 %v22558_v9  ;;  %15105 = vmatmul.mubr.msk.f32.vlgmr.msra.gmra.mxu0 %vm472_vm2, %v3495_v16 }
 0x1f6   : > { %15058 = vmatpush3.msra.mxu1 %v18210_v25  ;;  %15107 = vmatprep.mubr.msk.f32.mxu0 %vm17187_vm1, %v22558_v9  ;;  %v12342_v25 = vld [vmem:[%s22371_s3 + $0xb8] sm:$0xff] }
 0x1f7   : > { %15059 = vmatprep.subr.mxu1 %v22558_v9 }
 0x1f8   : > { %15060 = vmatpush3.msra.mxu1 %v18218_v41  ;;  %v12341_v41 = vld [vmem:[%s22371_s3 + $0xb0] sm:$0xff] }
 0x1f9   : > { %15061 = vmatprep.subr.mxu1 %v22558_v9 }
 0x1fa   : > { %15062 = vmatpush3.msra.mxu1 %v18226_v40  ;;  %v12340_v40 = vld [vmem:[%s22371_s3 + $0xa8] sm:$0xff] }
 0x1fb   : > { %15063 = vmatprep.subr.mxu1 %v22558_v9 }
 0x1fc   : > { %15064 = vmatpush3.msra.mxu1 %v18237_v26  ;;  %v12339_v26 = vld [vmem:[%s22371_s3 + $0xa0] sm:$0xff] }
 0x1fd   : > { %15065 = vmatprep.subr.mxu1 %v22558_v9 }
 0x1fe   : > { %15066 = vmatpush3.msra.mxu1 %v18246_v49  ;;  %v12337_v49 = vld [vmem:[%s22371_s3 + $0x90] sm:$0xff] }
 0x1ff   : > { %15067 = vmatprep.subr.mxu1 %v22558_v9 }
 0x200   : > { %15068 = vmatpush3.msra.mxu1 %v18255_v36  ;;  %v3494_v36 = vld [vmem:[%s22371_s3 + $0x38] sm:$0xff] }
 0x201   : > { %15069 = vmatprep.subr.mxu1 %v22558_v9  ;;  %15120 = vmatpush3.msra.mxu0 %v3494_v36 }
 0x202   : > { %15070 = vmatpush3.msra.mxu1 %v18264_v5  ;;  %15121 = vmatprep.subr.mxu0 %v22558_v9  ;;  %v3719_v5 = vld [vmem:[#allocation3 + $0x2] sm:$0xff] }
 0x203   : > { %15071 = vmatprep.subr.mxu1 %v22558_v9  ;;  %15122 = vmatpush3.msra.mxu0 %v3493_v53 }
 0x204   : > { %15072 = vmatpush3.msra.mxu1 %v18273_v8  ;;  %v3492_v8 = vld [vmem:[%s22371_s3 + $0x28] sm:$0xff]  ;;  %15123 = vmatprep.subr.mxu0 %v22558_v9 }
 0x205   : > { %15073 = vmatprep.subr.mxu1 %v22558_v9  ;;  %15124 = vmatpush3.msra.mxu0 %v3492_v8  ;;  %v12391_v8 = vld [vmem:[%s22371_s3 + $0x1a0] sm:$0xff] }
 0x206   : > { %15074 = vmatpush3.msra.mxu1 %v18282_v38  ;;  %v12367_v38 = vld [vmem:[%s22371_s3 + $0x130] sm:$0xff]  ;;  %15125 = vmatprep.subr.mxu0 %v22558_v9 }
 0x207   : > { %15075 = vmatprep.subr.mxu1 %v22558_v9  ;;  %15126 = vmatpush3.msra.mxu0 %v3491_v63  ;;  %v12380_v63 = vld [vmem:[%s22371_s3 + $0x170] sm:$0xff] }
 0x208   : > { %15076 = vmatpush3.msra.mxu1 %v18291_v0  ;;  %v12366_v0 = vld [vmem:[%s22371_s3 + $0x128] sm:$0xff]  ;;  %15127 = vmatprep.subr.mxu0 %v22558_v9 }
 0x209   : > { %15077 = vmatprep.subr.mxu1 %v22558_v9  ;;  %15128 = vmatpush3.msra.mxu0 %v3490_v44  ;;  %v12379_v44 = vld [vmem:[%s22371_s3 + $0x168] sm:$0xff] }
 0x20a   : > { %15078 = vmatpush3.msra.mxu1 %v18300_v22  ;;  %v12365_v22 = vld [vmem:[%s22371_s3 + $0x120] sm:$0xff]  ;;  %15129 = vmatprep.subr.mxu0 %v22558_v9 }
 0x20b   : > { %15079 = vmatprep.subr.mxu1 %v22558_v9  ;;  %15130 = vmatpush3.msra.mxu0 %v3489_v19  ;;  %v12378_v19 = vld [vmem:[%s22371_s3 + $0x160] sm:$0xff] }
 0x20c   : > { %15080 = vmatpush3.msra.mxu1 %v18309_v3  ;;  %v12364_v3 = vld [vmem:[%s22371_s3 + $0x118] sm:$0xff]  ;;  %15131 = vmatprep.subr.mxu0 %v22558_v9 }
 0x20d   : > { %15081 = vmatprep.subr.mxu1 %v22558_v9  ;;  %15132 = vmatpush3.msra.mxu0 %v3488_v60  ;;  %v12388_v60 = vld [vmem:[%s22371_s3 + $0x188] sm:$0xff] }
 0x20e   : > { %15082 = vmatpush3.msra.mxu1 %v18318_v43  ;;  %v12363_v43 = vld [vmem:[%s22371_s3 + $0x110] sm:$0xff]  ;;  %15133 = vmatprep.subr.mxu0 %v22558_v9 }
 0x20f   : > { %15083 = vmatprep.subr.mxu1 %v22558_v9 }
 0x210   : > { %15084 = vmatpush3.msra.mxu1 %v18327_v58  ;;  %v3487_v58 = vld [vmem:[%s22371_s3] sm:$0xff] }
 0x211   : > { %15086 = vmatmul.mubr.f32.vlgmr.msra.gmra.mxu1 %v18443_v7  ;;  %15150 = vmatprep.subr.mxu1 %v22558_v9  ;;  %v12355_v7 = vld [vmem:[%s22371_s3 + $0xf8] sm:$0xff] }
 0x212   : > { %15151 = vmatpush3.msra.mxu1 %v12342_v25  ;;  %15166 = vmatprep.mubr.msk.f32.mxu1 %vm17187_vm1, %v22558_v9 }
 0x213   : > { %15152 = vmatprep.subr.mxu1 %v22558_v9  ;;  %15134 = vmatpush3.msra.mxu0 %v3487_v58 }
 0x214   : > { %15153 = vmatpush3.msra.mxu1 %v12341_v41  ;;  %15181 = vmatprep.subr.mxu0 %v22558_v9  ;;  %v12350_v41 = vld [vmem:[%s22371_s3 + $0xd0] sm:$0xff] }
 0x215   : > { %15154 = vmatprep.subr.mxu1 %v22558_v9 }
 0x216   : > { %15155 = vmatpush3.msra.mxu1 %v12340_v40  ;;  %v12349_v40 = vld [vmem:[%s22371_s3 + $0xc8] sm:$0xff] }
 0x217   : > { %15156 = vmatprep.subr.mxu1 %v22558_v9 }
 0x218   : > { %15157 = vmatpush3.msra.mxu1 %v12339_v26 }
 0x219   : > { %15158 = vmatprep.subr.mxu1 %v22558_v9 }
 0x21a   : > { %15159 = vmatpush3.msra.mxu1 %v12338_v62  ;;  %v12393_v62 = vld [vmem:[%s22371_s3 + $0x1b0] sm:$0xff] }
 0x21b   : > { %15160 = vmatprep.subr.mxu1 %v22558_v9 }
 0x21c   : > { %15161 = vmatpush3.msra.mxu1 %v12337_v49  ;;  %v12348_v49 = vld [vmem:[%s22371_s3 + $0xc0] sm:$0xff] }
 0x21d   : > { %15162 = vmatprep.subr.mxu1 %v22558_v9 }
 0x21e   : > { %15163 = vmatpush3.msra.mxu1 %v12336_v57 }
 0x21f   : > { %15164 = vmatprep.subr.mxu1 %v22558_v9 }
 0x220   : > { %15165 = vmatpush3.msra.mxu1 %v12335_v37  ;;  %v12392_v37 = vld [vmem:[%s22371_s3 + $0x1a8] sm:$0xff] }
 0x221   : > { %15167 = vmatmul.mubr.msk.f32.vlgmr.msra.gmra.mxu1 %vm472_vm2, %v3719_v5  ;;  %15212 = vmatprep.subr.mxu1 %v22558_v9 }
 0x222   : > { %15169 = vmatprep.mubr.msk.f32.mxu1 %vm17187_vm1, %v22558_v9  ;;  %15213 = vmatpush3.msra.mxu1 %v12368_v34  ;;  %v12381_v34 = vld [vmem:[%s22371_s3 + $0x178] sm:$0xff] }
 0x223   : > { %15214 = vmatprep.subr.mxu1 %v22558_v9 }
 0x224   : > { %15215 = vmatpush3.msra.mxu1 %v12367_v38  ;;  %v12390_v38 = vld [vmem:[%s22371_s3 + $0x198] sm:$0xff] }
 0x225   : > { %15216 = vmatprep.subr.mxu1 %v22558_v9 }
 0x226   : > { %15217 = vmatpush3.msra.mxu1 %v12366_v0 }
 0x227   : > { %15218 = vmatprep.subr.mxu1 %v22558_v9 }
 0x228   : > { %15219 = vmatpush3.msra.mxu1 %v12365_v22  ;;  %v12389_v22 = vld [vmem:[%s22371_s3 + $0x190] sm:$0xff] }
 0x229   : > { %15220 = vmatprep.subr.mxu1 %v22558_v9 }
 0x22a   : > { %15221 = vmatpush3.msra.mxu1 %v12364_v3 }
 0x22b   : > { %15222 = vmatprep.subr.mxu1 %v22558_v9 }
 0x22c   : > { %15223 = vmatpush3.msra.mxu1 %v12363_v43  ;;  %v12377_v43 = vld [vmem:[%s22371_s3 + $0x158] sm:$0xff] }
 0x22d   : > { %15224 = vmatprep.subr.mxu1 %v22558_v9 }
 0x22e   : > { %15225 = vmatpush3.msra.mxu1 %v12362_v17  ;;  %v12387_v17 = vld [vmem:[%s22371_s3 + $0x180] sm:$0xff] }
 0x22f   : > { %15226 = vmatprep.subr.mxu1 %v22558_v9 }
 0x230   : > { %15227 = vmatpush3.msra.mxu1 %v12361_v13 }
 0x231   : > { %15274 = vmatprep.subr.mxu1 %v22558_v9 }
 0x24e   : > { %v2834_v59 = vpop.f32.mrf.mxu1 }
 0x250   : > { %v14842_v48 = vpop.f32.mrf.mxu1 }
 0x251   : > { %v12376_v48 = vld [vmem:[%s22371_s3 + $0x150] sm:$0xff] }
 0x256   : > { %v3020_v33 = vpop.f32.mrf.mxu0 }
 0x258   : > { %v14912_v11 = vpop.f32.mrf.mxu0 }
 0x259   : > { %v12375_v11 = vld [vmem:[%s22371_s3 + $0x148] sm:$0xff] }
 0x26e   : > { %v2921_v28 = vpop.f32.mrf.mxu1 }
 0x26f   : > { %v2925_v1 = vmax.f32 %v2834_v59, %v2921_v28  ;;  %v12420_v28 = vld [vmem:[%s22371_s3 + $0x238] sm:$0xff] }
 0x270   : > { %v14877_v10 = vpop.f32.mrf.mxu1 }
 0x271   : > { %2926 = vst.msk [vmem:[#allocation3 + $0xb] sm:$0xff] %vm472_vm2, %v2925_v1 }
 0x277   : > { %v3205_v15 = vpop.f32.mrf.mxu0 }
 0x278   : > { %v3496_v42 = vld [vmem:[#allocation3 + $0x9] sm:$0xff] }
 0x279   : > { %v18674_v39 = vld [vmem:[#allocation3 + $0xa] sm:$0xff]  ;;  %v14982_v50 = vpop.f32.mrf.mxu0  ;;  %15108 = vmatmul.mubr.msk.f32.gmra.mxu0 %vm472_vm2, %v3496_v42  ;;  %v12419_v42 = vld [vmem:[%s22371_s3 + $0x230] sm:$0xff] }
 0x27a   : > { %15170 = vmatmul.mubr.msk.f32.gmra.mxu1 %vm472_vm2, %v18674_v39  ;;  %15110 = vmatprep.mubr.msk.f32.mxu0 %vm17187_vm1, %v22558_v9  ;;  %v3967_v46 = vld [vmem:[#allocation3 + $0xb] sm:$0xff] }
 0x27b   : > { %15172 = vmatprep.mubr.msk.f32.mxu1 %vm17187_vm1, %v22558_v9  ;;  %v3483_v51 = vld [vmem:[#allocation3 + $0x8] sm:$0xff] }
 0x27c   : > { %v4091_v50 = vld [vmem:[#allocation3 + $0xc] sm:$0xff] }
 0x290   : > { %v3106_v24 = vpop.f32.mrf.mxu1 }
 0x291   : > { %v3110_v12 = vmax.f32 %v3020_v33, %v3106_v24 }
 0x292   : > { %v14947_v47 = vpop.f32.mrf.mxu1 }
 0x293   : > { %3111 = vst.msk [vmem:[#allocation3 + $0x15] sm:$0xff] %vm472_vm2, %v3110_v12  ;;  %v12418_v12 = vld [vmem:[%s22371_s3 + $0x228] sm:$0xff]  ;;  %v12406_v47 = vld [vmem:[%s22371_s3 + $0x1f0] sm:$0xff] }
 0x299   : > { %v18684_v27 = vpop.f32.mrf.mxu0 }
 0x29a   : > { %v3497_v18 = vld [vmem:[#allocation3 + $0x11] sm:$0xff] }
 0x29b   : > { %v18686_v29 = vld [vmem:[#allocation3 + $0x12] sm:$0xff]  ;;  %v15052_v61 = vpop.f32.mrf.mxu0  ;;  %15111 = vmatmul.mubr.msk.f32.gmra.mxu0 %vm472_vm2, %v3497_v18 }
 0x29c   : > { %15173 = vmatmul.mubr.msk.f32.gmra.mxu1 %vm472_vm2, %v18686_v29  ;;  %15113 = vmatprep.mubr.msk.f32.mxu0 %vm17187_vm1, %v22558_v9  ;;  %v3968_v54 = vld [vmem:[#allocation3 + $0x13] sm:$0xff]  ;;  %v12416_v61 = vld [vmem:[%s22371_s3 + $0x218] sm:$0xff] }
 0x29d   : > { %15175 = vmatprep.mubr.msk.f32.mxu1 %vm17187_vm1, %v22558_v9  ;;  %v3484_v16 = vld [vmem:[#allocation3 + $0x10] sm:$0xff]  ;;  %v12405_v18 = vld [vmem:[%s22371_s3 + $0x1e8] sm:$0xff] }
 0x29e   : > { %v4215_v33 = vld [vmem:[#allocation3 + $0x14] sm:$0xff] }
 0x2b1   : > { %v3291_v52 = vpop.f32.mrf.mxu1 }
 0x2b2   : > { %v3295_v20 = vmax.f32 %v3205_v15, %v3291_v52  ;;  %v12374_v15 = vld [vmem:[%s22371_s3 + $0x140] sm:$0xff]  ;;  %v12415_v52 = vld [vmem:[%s22371_s3 + $0x210] sm:$0xff] }
 0x2b3   : > { %v15017_v14 = vpop.f32.mrf.mxu1 }
 0x2b4   : > { %3296 = vst.msk [vmem:[#allocation3 + $0x1f] sm:$0xff] %vm472_vm2, %v3295_v20  ;;  %v4219_v20 = vld [vmem:[#allocation3 + $0x34] sm:$0x3f] }
 0x2b5   : > { %v18696_v45 = vpop.f32.mrf.mxu0  ;;  %v12404_v14 = vld [vmem:[%s22371_s3 + $0x1e0] sm:$0xff] }
 0x2b7   : > { %v15106_v31 = vpop.f32.mrf.mxu0 }
 0x2b8   : > { %v12413_v31 = vld [vmem:[%s22371_s3 + $0x200] sm:$0xff] }
 0x2bb   : > { %v3498_v55 = vld [vmem:[#allocation3 + $0x19] sm:$0xff]  ;;  %v3499_v56 = vld [vmem:[#allocation3 + $0x21] sm:$0x3f] }
 0x2bc   : > { %v18698_v30 = vld [vmem:[#allocation3 + $0x1a] sm:$0xff]  ;;  %15114 = vmatmul.mubr.msk.f32.gmra.mxu0 %vm472_vm2, %v3498_v55  ;;  %v3723_v23 = vld [vmem:[#allocation3 + $0x22] sm:$0x3f] }
 0x2bd   : > { %15176 = vmatmul.mubr.msk.f32.gmra.mxu1 %vm472_vm2, %v18698_v30  ;;  %15116 = vmatprep.mubr.msk.f32.mxu0 %vm17187_vm1, %v22558_v9  ;;  %v3969_v25 = vld [vmem:[#allocation3 + $0x1b] sm:$0xff] }
 0x2be   : > { %15178 = vmatprep.mubr.msk.f32.mxu1 %vm17187_vm1, %v22558_v9  ;;  %v3485_v26 = vld [vmem:[#allocation3 + $0x18] sm:$0xff]  ;;  %v3486_v53 = vld [vmem:[#allocation3 + $0x20] sm:$0x3f] }
 0x2bf   : > { %v4216_v10 = vld [vmem:[#allocation3 + $0x1c] sm:$0xff] }
 0x2c0   : > { %15117 = vmatmul.mubr.msk.f32.gmra.mxu0 %vm472_vm2, %v3499_v56  ;;  %v12414_v55 = vld [vmem:[%s22371_s3 + $0x208] sm:$0xff]  ;;  %v12402_v56 = vld [vmem:[%s22371_s3 + $0x1d0] sm:$0xff] }
 0x2c1   : > { %15179 = vmatmul.mubr.msk.f32.gmra.mxu1 %vm472_vm2, %v3723_v23  ;;  %15135 = vmatprep.mubr.msk.f32.mxu0 %vm17187_vm1, %v22558_v9  ;;  %v4463_v23 = vld [vmem:[#allocation3 + $0x16] sm:$0xff] }
 0x2c2   : > { %15228 = vmatprep.mubr.msk.f32.mxu1 %vm17187_vm1, %v22558_v9 }
 0x2c4   : > { %15136 = vmatmul.mubr.msk.f32.vlgmr.msra.gmra.mxu0 %vm472_vm2, %v3482_v4  ;;  %v12401_v4 = vld [vmem:[%s22371_s3 + $0x1c8] sm:$0xff] }
 0x2c5   : > { %15229 = vmatmul.mubr.msk.f32.vlgmr.msra.gmra.mxu1 %vm472_vm2, %v3967_v46  ;;  %15182 = vmatpush3.msra.mxu0 %v12355_v7  ;;  %v4464_v46 = vld [vmem:[#allocation3 + $0x1e] sm:$0xff] }
 0x2c6   : > { %15138 = vmatprep.mubr.msk.f32.mxu0 %vm17187_vm1, %v22558_v9  ;;  %15183 = vmatprep.subr.mxu0 %v22558_v9 }
 0x2c7   : > { %15231 = vmatprep.mubr.msk.f32.mxu1 %vm17187_vm1, %v22558_v9  ;;  %15184 = vmatpush3.msra.mxu0 %v12354_v35  ;;  %v12400_v35 = vld [vmem:[%s22371_s3 + $0x1c0] sm:$0xff] }
 0x2c8   : > { %15275 = vmatpush3.msra.mxu1 %v12394_v32  ;;  %15139 = vmatmul.mubr.msk.f32.gmra.mxu0 %vm472_vm2, %v3483_v51  ;;  %v4339_v32 = vld [vmem:[#allocation3 + $0x15] sm:$0xff]  ;;  %v4340_v51 = vld [vmem:[#allocation3 + $0x1d] sm:$0xff] }
 0x2c9   : > { %15185 = vmatprep.subr.mxu0 %v22558_v9  ;;  %15232 = vmatmul.mubr.msk.f32.gmra.mxu1 %vm472_vm2, %v3968_v54 }
 0x2ca   : > { %15186 = vmatpush3.msra.mxu0 %v12353_v21  ;;  %15141 = vmatprep.mubr.msk.f32.mxu0 %vm17187_vm1, %v22558_v9 }
 0x2cb   : > { %15187 = vmatprep.subr.mxu0 %v22558_v9  ;;  %15234 = vmatprep.mubr.msk.f32.mxu1 %vm17187_vm1, %v22558_v9 }
 0x2cc   : > { %15188 = vmatpush3.msra.mxu0 %v12352_v2  ;;  %15276 = vmatprep.subr.mxu1 %v22558_v9  ;;  %v4467_v2 = vld [vmem:[#allocation3 + $0x36] sm:$0x3f] }
 0x2cd   : > { %15142 = vmatmul.mubr.msk.f32.gmra.mxu0 %vm472_vm2, %v3484_v16  ;;  %15189 = vmatprep.subr.mxu0 %v22558_v9 }
 0x2ce   : > { %15235 = vmatmul.mubr.msk.f32.gmra.mxu1 %vm472_vm2, %v3969_v25  ;;  %15190 = vmatpush3.msra.mxu0 %v12351_v6  ;;  %v4343_v25 = vld [vmem:[#allocation3 + $0x35] sm:$0x3f] }
 0x2cf   : > { %15144 = vmatprep.mubr.msk.f32.mxu0 %vm17187_vm1, %v22558_v9  ;;  %15191 = vmatprep.subr.mxu0 %v22558_v9 }
 0x2d0   : > { %15192 = vmatpush3.msra.mxu0 %v12350_v41  ;;  %15277 = vmatpush3.msra.mxu1 %v12393_v62 }
 0x2d1   : > { %15145 = vmatmul.mubr.msk.f32.gmra.mxu0 %vm472_vm2, %v3485_v26  ;;  %15193 = vmatprep.subr.mxu0 %v22558_v9  ;;  %v3476_v57 = vpop.f32.mrf.mxu1 }
 0x2d2   : > { %15147 = vmatprep.mubr.msk.f32.mxu0 %vm17187_vm1, %v22558_v9  ;;  %15194 = vmatpush3.msra.mxu0 %v12349_v40  ;;  %v3480_v36 = vmax.f32 %v18684_v27, %v3476_v57  ;;  %v12417_v27 = vld [vmem:[%s22371_s3 + $0x220] sm:$0xff]  ;;  %v18997_v57 = vld [vmem:[%s22376_s8 + $0xf8] sm:$0xff] }
 0x2d3   : > { %15195 = vmatprep.subr.mxu0 %v22558_v9  ;;  %v15087_v5 = vpop.f32.mrf.mxu1  ;;  %15278 = vmatprep.subr.mxu1 %v22558_v9 }
 0x2d4   : > { %15196 = vmatpush3.msra.mxu0 %v12348_v49  ;;  %3481 = vst.msk [vmem:[#allocation3 + $0x29] sm:$0xff] %vm472_vm2, %v3480_v36  ;;  %15279 = vmatpush3.msra.mxu1 %v12392_v37  ;;  %v18992_v49 = vld [vmem:[%s22376_s8 + $0x78] sm:$0xff]  ;;  %v19006_v36 = vld [vmem:[%s22376_s8 + $0x70] sm:$0xff]  ;;  %v19020_v5 = vld [vmem:[%s22376_s8 + $0x68] sm:$0xff] }
 0x2d5   : > { %15148 = vmatmul.mubr.msk.f32.gmra.mxu0 %vm472_vm2, %v3486_v53  ;;  %15243 = vmatprep.subr.mxu0 %v22558_v9  ;;  %v19011_v37 = vld [vmem:[%s22376_s8 + $0xf0] sm:$0xff]  ;;  %v19025_v53 = vld [vmem:[%s22376_s8 + $0xe8] sm:$0xff] }
 0x2d6   : > { %15197 = vmatprep.mubr.msk.f32.mxu0 %vm17187_vm1, %v22558_v9  ;;  %15280 = vmatprep.subr.mxu1 %v22558_v9 }
 0x2d7   : > { %15237 = vmatprep.mubr.msk.f32.mxu1 %vm17187_vm1, %v22558_v9  ;;  %15281 = vmatpush3.msra.mxu1 %v12391_v8  ;;  %v19034_v8 = vld [vmem:[%s22376_s8 + $0x60] sm:$0xff] }
 0x2d8   : > { %15282 = vmatprep.subr.mxu1 %v22558_v9 }
 0x2d9   : > { %15198 = vmatmul.mubr.msk.f32.vlgmr.msra.gmra.mxu0 %vm472_vm2, %v18674_v39  ;;  %15283 = vmatpush3.msra.mxu1 %v12390_v38  ;;  %v12407_v39 = vld [vmem:[%s22371_s3 + $0x1f8] sm:$0xff] }
 0x2da   : > { %15244 = vmatpush3.msra.mxu0 %v12381_v34  ;;  %15200 = vmatprep.mubr.msk.f32.mxu0 %vm17187_vm1, %v22558_v9  ;;  %v19039_v34 = vld [vmem:[%s22376_s8 + $0xe0] sm:$0xff]  ;;  %v19048_v38 = vld [vmem:[%s22376_s8 + $0x58] sm:$0xff] }
 0x2db   : > { %15245 = vmatprep.subr.mxu0 %v22558_v9  ;;  %v3970_v0 = vld [vmem:[#allocation3 + $0x23] sm:$0xff]  ;;  %15284 = vmatprep.subr.mxu1 %v22558_v9  ;;  %v3971_v3 = vld [vmem:[#allocation3 + $0x2b] sm:$0x3f] }
 0x2dc   : > { %15246 = vmatpush3.msra.mxu0 %v12380_v63  ;;  %15238 = vmatmul.mubr.msk.f32.gmra.mxu1 %vm472_vm2, %v3970_v0  ;;  %v3846_v59 = vld [vmem:[#allocation3 + $0x22] sm:$0xff]  ;;  %v3847_v1 = vld [vmem:[#allocation3 + $0x2a] sm:$0x3f] }
 0x2dd   : > { %15201 = vmatmul.mubr.msk.f32.gmra.mxu0 %vm472_vm2, %v18686_v29  ;;  %15247 = vmatprep.subr.mxu0 %v22558_v9  ;;  %v4217_v24 = vld [vmem:[#allocation3 + $0x24] sm:$0xff]  ;;  %v4218_v29 = vld [vmem:[#allocation3 + $0x2c] sm:$0xff] }
 0x2de   : > { %15203 = vmatprep.mubr.msk.f32.mxu0 %vm17187_vm1, %v22558_v9  ;;  %15248 = vmatpush3.msra.mxu0 %v12379_v44  ;;  %v4095_v7 = vld [vmem:[#allocation3 + $0x2c] sm:$0x3f]  ;;  %v19062_v0 = vld [vmem:[%s22376_s8 + $0x50] sm:$0xff] }
 0x2df   : > { %15240 = vmatprep.mubr.msk.f32.mxu1 %vm17187_vm1, %v22558_v9  ;;  %15249 = vmatprep.subr.mxu0 %v22558_v9  ;;  %v4465_v21 = vld [vmem:[#allocation3 + $0x26] sm:$0xff]  ;;  %v4466_v54 = vld [vmem:[#allocation3 + $0x2e] sm:$0xff] }
 0x2e0   : > { %15285 = vmatpush3.msra.mxu1 %v12389_v22  ;;  %15250 = vmatpush3.msra.mxu0 %v12378_v19  ;;  %v4341_v6 = vld [vmem:[#allocation3 + $0x25] sm:$0xff]  ;;  %v4342_v16 = vld [vmem:[#allocation3 + $0x2d] sm:$0xff]  ;;  %v19076_v22 = vld [vmem:[%s22376_s8 + $0x48] sm:$0xff] }
 0x2e1   : > { %15204 = vmatmul.mubr.msk.f32.gmra.mxu0 %vm472_vm2, %v18698_v30  ;;  %15241 = vmatmul.mubr.msk.f32.gmra.mxu1 %vm472_vm2, %v3971_v3  ;;  %v18833_v58 = vpop.f32.mrf.mxu1  ;;  %v12403_v30 = vld [vmem:[%s22371_s3 + $0x1d8] sm:$0xff]  ;;  %v19067_v44 = vld [vmem:[%s22376_s8 + $0xd0] sm:$0xff]  ;;  %v19081_v19 = vld [vmem:[%s22376_s8 + $0xc8] sm:$0xff] }
 0x2e2   : > { %15286 = vmatprep.subr.mxu1 %v22558_v9  ;;  %15251 = vmatprep.subr.mxu0 %v22558_v9  ;;  %v19053_v63 = vld [vmem:[%s22376_s8 + $0xd8] sm:$0xff]  ;;  %v19090_v3 = vld [vmem:[%s22376_s8 + $0x40] sm:$0xff] }
 0x2e3   : > { %15287 = vmatpush3.msra.mxu1 %v12388_v60  ;;  %15252 = vmatpush3.msra.mxu0 %v12377_v43  ;;  %v15168_v13 = vpop.f32.mrf.mxu1  ;;  %v19095_v60 = vld [vmem:[%s22376_s8 + $0xc0] sm:$0xff]  ;;  %v19104_v43 = vld [vmem:[%s22376_s8 + $0x38] sm:$0xff] }
 0x2e4   : > { %15288 = vmatprep.subr.mxu1 %v22558_v9  ;;  %15206 = vmatprep.mubr.msk.f32.mxu0 %vm17187_vm1, %v22558_v9  ;;  %v19118_v13 = vld [vmem:[%s22376_s8 + $0x30] sm:$0xff] }
 0x2e5   : > { %15289 = vmatpush3.msra.mxu1 %v12387_v17  ;;  %15290 = vmatprep.mubr.msk.f32.mxu1 %vm17187_vm1, %v22558_v9  ;;  %v19109_v17 = vld [vmem:[%s22376_s8 + $0xb8] sm:$0xff] }
 0x2e6   : > { %15207 = vmatmul.mubr.msk.f32.gmra.mxu0 %vm472_vm2, %v3846_v59  ;;  %15253 = vmatprep.subr.mxu0 %v22558_v9  ;;  %v19123_v59 = vld [vmem:[%s22376_s8 + $0xb0] sm:$0xff] }
 0x2e7   : > { %15291 = vmatmul.mubr.msk.f32.vlgmr.msra.gmra.mxu1 %vm472_vm2, %v4215_v33  ;;  %15254 = vmatpush3.msra.mxu0 %v12376_v48  ;;  %22575 = vst [vmem:[#allocation33_spill] sm:$0xff] %v19123_v59  ;;  %v19132_v48 = vld [vmem:[%s22376_s8 + $0x28] sm:$0xff] }
 0x2e8   : > { %15209 = vmatprep.mubr.msk.f32.mxu0 %vm17187_vm1, %v22558_v9  ;;  %15255 = vmatprep.subr.mxu0 %v22558_v9  ;;  %22576 = vst [vmem:[#allocation34_spill] sm:$0xff] %v19132_v48 }
 0x2e9   : > { %15293 = vmatprep.mubr.msk.f32.mxu1 %vm17187_vm1, %v22558_v9  ;;  %15256 = vmatpush3.msra.mxu0 %v12375_v11  ;;  %v19146_v11 = vld [vmem:[%s22376_s8 + $0x20] sm:$0xff] }
 0x2ea   : > { %15336 = vmatprep.subr.mxu1 %v22558_v9  ;;  %15210 = vmatmul.mubr.msk.f32.gmra.mxu0 %vm472_vm2, %v3847_v1  ;;  %22578 = vst [vmem:[#allocation40_spill] sm:$0xff] %v19146_v11 }
 0x2eb   : > { %15294 = vmatmul.mubr.msk.f32.gmra.mxu1 %vm472_vm2, %v4216_v10  ;;  %15257 = vmatprep.subr.mxu0 %v22558_v9 }
 0x2ec   : > { %15337 = vmatpush3.msra.mxu1 %v12420_v28  ;;  %15258 = vmatpush3.msra.mxu0 %v12374_v15  ;;  %v19151_v28 = vld [vmem:[%s22376_s8 + $0xa0] sm:$0xff]  ;;  %v19160_v15 = vld [vmem:[%s22376_s8 + $0x18] sm:$0xff] }
 0x2ed   : > { %15338 = vmatprep.subr.mxu1 %v22558_v9  ;;  %15259 = vmatprep.mubr.msk.f32.mxu0 %vm17187_vm1, %v22558_v9  ;;  %22579 = vst [vmem:[#allocation61_spill] sm:$0xff] %v19151_v28  ;;  %22580 = vst [vmem:[#allocation59_spill] sm:$0xff] %v19160_v15 }
 0x2ee   : > { %15296 = vmatprep.mubr.msk.f32.mxu1 %vm17187_vm1, %v22558_v9  ;;  %15305 = vmatprep.subr.mxu0 %v22558_v9 }
 0x2ef   : > { %15339 = vmatpush3.msra.mxu1 %v12419_v42  ;;  %15260 = vmatmul.mubr.msk.f32.vlgmr.msra.gmra.mxu0 %vm472_vm2, %v4091_v50  ;;  %v19165_v42 = vld [vmem:[%s22376_s8 + $0x98] sm:$0xff] }
 0x2f0   : > { %15297 = vmatmul.mubr.msk.f32.gmra.mxu1 %vm472_vm2, %v4217_v24  ;;  %15306 = vmatpush3.msra.mxu0 %v12407_v39  ;;  %22581 = vst [vmem:[#allocation22_spill] sm:$0xff] %v19165_v42 }
 0x2f1   : > { %15340 = vmatprep.subr.mxu1 %v22558_v9  ;;  %15307 = vmatprep.subr.mxu0 %v22558_v9 }
 0x2f2   : > { %15341 = vmatpush3.msra.mxu1 %v12418_v12  ;;  %15262 = vmatprep.mubr.msk.f32.mxu0 %vm17187_vm1, %v22558_v9  ;;  %v19179_v12 = vld [vmem:[%s22376_s8 + $0x90] sm:$0xff] }
 0x2f3   : > { %15342 = vmatprep.subr.mxu1 %v22558_v9  ;;  %15299 = vmatprep.mubr.msk.f32.mxu1 %vm17187_vm1, %v22558_v9  ;;  %22583 = vst [vmem:[#allocation42_spill] sm:$0xff] %v19179_v12 }
 0x2f4   : > { %15308 = vmatpush3.msra.mxu0 %v12406_v47  ;;  %15343 = vmatpush3.msra.mxu1 %v12417_v27  ;;  %v19188_v47 = vld [vmem:[%s22376_s8 + $0x8] sm:$0xff] }
 0x2f5   : > { %15263 = vmatmul.mubr.msk.f32.gmra.mxu0 %vm472_vm2, %v4215_v33  ;;  %15300 = vmatmul.mubr.msk.f32.gmra.mxu1 %vm472_vm2, %v4218_v29  ;;  %v19137_v33 = vld [vmem:[%s22376_s8 + $0xa8] sm:$0xff]  ;;  %22584 = vst [vmem:[#allocation45_spill] sm:$0xff] %v19188_v47  ;;  %v19205_v29 = vld [vmem:[%s22376_s8 + $0x80] sm:$0xff] }
 0x2f6   : > { %15309 = vmatprep.subr.mxu0 %v22558_v9  ;;  %15344 = vmatprep.subr.mxu1 %v22558_v9  ;;  %22577 = vst [vmem:[#allocation41_spill] sm:$0xff] %v19137_v33  ;;  %v19193_v27 = vld [vmem:[%s22376_s8 + $0x88] sm:$0xff]  ;;  %22587 = vst [vmem:[#allocation36_spill] sm:$0xff] %v19205_v29 }
 0x2f7   : > { %15310 = vmatpush3.msra.mxu0 %v12405_v18  ;;  %15345 = vmatpush3.msra.mxu1 %v12416_v61  ;;  %22585 = vst [vmem:[#allocation60_spill] sm:$0xff] %v19193_v27  ;;  %v19200_v18 = vld [vmem:[%s22376_s8] sm:$0xff] }
 0x2f8   : > { %15265 = vmatprep.mubr.msk.f32.mxu0 %vm17187_vm1, %v22558_v9  ;;  %15346 = vmatprep.subr.mxu1 %v22558_v9  ;;  %22586 = vst [vmem:[#allocation35_spill] sm:$0xff] %v19200_v18 }
 0x2f9   : > { %15302 = vmatprep.mubr.msk.f32.mxu1 %vm17187_vm1, %v22558_v9  ;;  %15311 = vmatprep.subr.mxu0 %v22558_v9 }
 0x2fa   : > { %15347 = vmatpush3.msra.mxu1 %v12415_v52  ;;  %15266 = vmatmul.mubr.msk.f32.gmra.mxu0 %vm472_vm2, %v4216_v10 }
 0x2fb   : > { %15303 = vmatmul.mubr.msk.f32.gmra.mxu1 %vm472_vm2, %v4219_v20  ;;  %15312 = vmatpush3.msra.mxu0 %v12404_v14 }
 0x2fc   : > { %15348 = vmatprep.subr.mxu1 %v22558_v9  ;;  %15313 = vmatprep.subr.mxu0 %v22558_v9 }
 0x2fd   : > { %15349 = vmatpush3.msra.mxu1 %v12414_v55  ;;  %15314 = vmatpush3.msra.mxu0 %v12403_v30 }
 0x2fe   : > { %15350 = vmatprep.subr.mxu1 %v22558_v9  ;;  %15268 = vmatprep.mubr.msk.f32.mxu0 %vm17187_vm1, %v22558_v9 }
 0x2ff   : > { %15351 = vmatpush3.msra.mxu1 %v12413_v31  ;;  %15352 = vmatprep.mubr.msk.f32.mxu1 %vm17187_vm1, %v22558_v9 }
 0x300   : > { %15269 = vmatmul.mubr.msk.f32.gmra.mxu0 %vm472_vm2, %v4217_v24  ;;  %15315 = vmatprep.subr.mxu0 %v22558_v9  ;;  %v19174_v24 = vld [vmem:[%s22376_s8 + $0x10] sm:$0xff] }
 0x301   : > { %15353 = vmatmul.mubr.msk.f32.vlgmr.msra.gmra.mxu1 %vm472_vm2, %v4463_v23  ;;  %15316 = vmatpush3.msra.mxu0 %v12402_v56  ;;  %22582 = vst [vmem:[#allocation23_spill] sm:$0xff] %v19174_v24 }
 0x302   : > { %15271 = vmatprep.mubr.msk.f32.mxu0 %vm17187_vm1, %v22558_v9  ;;  %15317 = vmatprep.subr.mxu0 %v22558_v9 }
 0x303   : > { %15355 = vmatprep.mubr.msk.f32.mxu1 %vm17187_vm1, %v22558_v9  ;;  %15318 = vmatpush3.msra.mxu0 %v12401_v4 }
 0x304   : > { %15402 = vmatprep.subr.mxu1 %v22558_v9  ;;  %15272 = vmatmul.mubr.msk.f32.gmra.mxu0 %vm472_vm2, %v4095_v7 }
 0x305   : > { %15356 = vmatmul.mubr.msk.f32.gmra.mxu1 %vm472_vm2, %v4464_v46  ;;  %15319 = vmatprep.subr.mxu0 %v22558_v9 }
 0x306   : > { %15321 = vmatprep.mubr.msk.f32.mxu0 %vm17187_vm1, %v22558_v9  ;;  %15320 = vmatpush3.msra.mxu0 %v12400_v35 }
 0x307   : > { %15358 = vmatprep.mubr.msk.f32.mxu1 %vm17187_vm1, %v22558_v9  ;;  %15367 = vmatprep.subr.mxu0 %v22558_v9 }
 0x308   : > { %15322 = vmatmul.mubr.msk.f32.vlgmr.msra.gmra.mxu0 %vm472_vm2, %v4339_v32  ;;  %15403 = vmatpush3.msra.mxu1 %v18997_v57 }
 0x309   : > { %15359 = vmatmul.mubr.msk.f32.gmra.mxu1 %vm472_vm2, %v4465_v21  ;;  %15324 = vmatprep.mubr.msk.f32.mxu0 %vm17187_vm1, %v22558_v9 }
 0x30a   : > { %15361 = vmatprep.mubr.msk.f32.mxu1 %vm17187_vm1, %v22558_v9  ;;  %15368 = vmatpush3.msra.mxu0 %v18992_v49 }
 0x30b   : > { %15369 = vmatprep.subr.mxu0 %v22558_v9  ;;  %15404 = vmatprep.subr.mxu1 %v22558_v9 }
 0x30c   : > { %15325 = vmatmul.mubr.msk.f32.gmra.mxu0 %vm472_vm2, %v4340_v51  ;;  %15405 = vmatpush3.msra.mxu1 %v19011_v37 }
 0x30d   : > { %15362 = vmatmul.mubr.msk.f32.gmra.mxu1 %vm472_vm2, %v4466_v54  ;;  %15327 = vmatprep.mubr.msk.f32.mxu0 %vm17187_vm1, %v22558_v9 }
 0x30e   : > { %15364 = vmatprep.mubr.msk.f32.mxu1 %vm17187_vm1, %v22558_v9  ;;  %15370 = vmatpush3.msra.mxu0 %v19006_v36 }
 0x30f   : > { %15371 = vmatprep.subr.mxu0 %v22558_v9  ;;  %15406 = vmatprep.subr.mxu1 %v22558_v9 }
 0x310   : > { %15328 = vmatmul.mubr.msk.f32.gmra.mxu0 %vm472_vm2, %v4341_v6  ;;  %15407 = vmatpush3.msra.mxu1 %v19025_v53 }
 0x311   : > { %15365 = vmatmul.mubr.msk.f32.gmra.mxu1 %vm472_vm2, %v4467_v2  ;;  %15330 = vmatprep.mubr.msk.f32.mxu0 %vm17187_vm1, %v22558_v9 }
 0x312   : > { %15434 = vmatprep.mubr.msk.f32.mxu1 %vm17187_vm1, %v22558_v9  ;;  %15372 = vmatpush3.msra.mxu0 %v19020_v5 }
 0x313   : > { %15373 = vmatprep.subr.mxu0 %v22558_v9  ;;  %15408 = vmatprep.subr.mxu1 %v22558_v9 }
 0x314   : > { %15331 = vmatmul.mubr.msk.f32.gmra.mxu0 %vm472_vm2, %v4342_v16  ;;  %15409 = vmatpush3.msra.mxu1 %v19039_v34 }
 0x315   : > { %15333 = vmatprep.mubr.msk.f32.mxu0 %vm17187_vm1, %v22558_v9  ;;  %15374 = vmatpush3.msra.mxu0 %v19034_v8 }
 0x316   : > { %15375 = vmatprep.subr.mxu0 %v22558_v9  ;;  %15410 = vmatprep.subr.mxu1 %v22558_v9 }
 0x317   : > { %15376 = vmatpush3.msra.mxu0 %v19048_v38  ;;  %15411 = vmatpush3.msra.mxu1 %v19053_v63 }
 0x318   : > { %15334 = vmatmul.mubr.msk.f32.gmra.mxu0 %vm472_vm2, %v4343_v25  ;;  %15377 = vmatprep.subr.mxu0 %v22558_v9 }
 0x319   : > { %15399 = vmatprep.mubr.msk.f32.mxu0 %vm17187_vm1, %v22558_v9  ;;  %15412 = vmatprep.subr.mxu1 %v22558_v9 }
 0x31a   : > { %15378 = vmatpush3.msra.mxu0 %v19062_v0  ;;  %15413 = vmatpush3.msra.mxu1 %v19067_v44 }
 0x31b   : > { %15379 = vmatprep.subr.mxu0 %v22558_v9  ;;  %15414 = vmatprep.subr.mxu1 %v22558_v9 }
 0x31c   : > { %15380 = vmatpush3.msra.mxu0 %v19076_v22  ;;  %15415 = vmatpush3.msra.mxu1 %v19081_v19 }
 0x31d   : > { %15381 = vmatprep.subr.mxu0 %v22558_v9  ;;  %15416 = vmatprep.subr.mxu1 %v22558_v9 }
 0x31e   : > { %15382 = vmatpush3.msra.mxu0 %v19090_v3  ;;  %15417 = vmatpush3.msra.mxu1 %v19095_v60 }
 0x31f   : > { %15383 = vmatprep.subr.mxu0 %v22558_v9  ;;  %15418 = vmatprep.subr.mxu1 %v22558_v9 }
 0x320   : > { %15384 = vmatpush3.msra.mxu0 %v19104_v43  ;;  %15419 = vmatpush3.msra.mxu1 %v19109_v17 }
 0x321   : > { %15385 = vmatprep.subr.mxu0 %v22558_v9  ;;  %15420 = vmatprep.subr.mxu1 %v22558_v9 }
 0x322   : > { %15386 = vmatpush3.msra.mxu0 %v19118_v13  ;;  %15421 = vmatpush3.msra.mxu1 %v19123_v59 }
 0x323   : > { %15387 = vmatprep.subr.mxu0 %v22558_v9  ;;  %15422 = vmatprep.subr.mxu1 %v22558_v9 }
 0x324   : > { %15388 = vmatpush3.msra.mxu0 %v19132_v48  ;;  %15423 = vmatpush3.msra.mxu1 %v19137_v33 }
 0x325   : > { %15389 = vmatprep.subr.mxu0 %v22558_v9  ;;  %15424 = vmatprep.subr.mxu1 %v22558_v9 }
 0x326   : > { %15390 = vmatpush3.msra.mxu0 %v19146_v11  ;;  %15425 = vmatpush3.msra.mxu1 %v19151_v28 }
 0x327   : > { %15391 = vmatprep.subr.mxu0 %v22558_v9  ;;  %15426 = vmatprep.subr.mxu1 %v22558_v9 }
 0x328   : > { %15392 = vmatpush3.msra.mxu0 %v19160_v15  ;;  %15427 = vmatpush3.msra.mxu1 %v19165_v42 }
 0x329   : > { %15393 = vmatprep.subr.mxu0 %v22558_v9  ;;  %15428 = vmatprep.subr.mxu1 %v22558_v9 }
 0x32a   : > { %15394 = vmatpush3.msra.mxu0 %v19174_v24  ;;  %15429 = vmatpush3.msra.mxu1 %v19179_v12 }
 0x32b   : > { %15395 = vmatprep.subr.mxu0 %v22558_v9  ;;  %15430 = vmatprep.subr.mxu1 %v22558_v9 }
 0x32c   : > { %15396 = vmatpush3.msra.mxu0 %v19188_v47  ;;  %15431 = vmatpush3.msra.mxu1 %v19193_v27 }
 0x32d   : > { %15397 = vmatprep.subr.mxu0 %v22558_v9  ;;  %15432 = vmatprep.subr.mxu1 %v22558_v9 }
 0x32e   : > { %15398 = vmatpush3.msra.mxu0 %v19200_v18  ;;  %15433 = vmatpush3.msra.mxu1 %v19205_v29 }
 0x32f   : > { %15437 = vmatprep.subr.mxu0 %v22558_v9  ;;  %15472 = vmatprep.subr.mxu1 %v22558_v9 }
 0x339   : > { %v18985_v41 = vpop.f32.mrf.mxu0 }
 0x33a   : > { %v18987_v40 = vpop.f32.mrf.mxu1 }
 0x33b   : > { %v15109_v26 = vpop.f32.mrf.mxu0 }
 0x33c   : > { %v15171_v62 = vpop.f32.mrf.mxu1 }
 0x35b   : > { %v3600_v1 = vpop.f32.mrf.mxu0 }
 0x35c   : > { %v3824_v10 = vpop.f32.mrf.mxu1 }
 0x35d   : > { %v15112_v39 = vpop.f32.mrf.mxu0 }
 0x35e   : > { %v15174_v50 = vpop.f32.mrf.mxu1 }
 0x37c   : > { %v3605_v61 = vpop.f32.mrf.mxu0 }
 0x37d   : > { %v3829_v52 = vpop.f32.mrf.mxu1 }
 0x37e   : > { %v15115_v20 = vpop.f32.mrf.mxu0 }
 0x37f   : > { %v15177_v14 = vpop.f32.mrf.mxu1 }
 0x380   : > { %v3610_v55 = vpop.f32.mrf.mxu0 }
 0x381   : > { %v3834_v30 = vpop.f32.mrf.mxu1 }
 0x382   : > { %v15118_v31 = vpop.f32.mrf.mxu0 }
 0x383   : > { %v15180_v56 = vpop.f32.mrf.mxu1 }
 0x384   : > { %v3695_v23 = vpop.f32.mrf.mxu0 }
 0x385   : > { %v4062_v4 = vpop.f32.mrf.mxu1  ;;  %v3696_v47 = vadd.f32 %v3695_v23, %v18696_v45 }
 0x386   : > { %v15137_v7 = vpop.f32.mrf.mxu0 }
 0x387   : > { %v15230_v46 = vpop.f32.mrf.mxu1 }
 0x388   : > { %v3700_v35 = vpop.f32.mrf.mxu0 }
 0x389   : > { %v4067_v32 = vpop.f32.mrf.mxu1 }
 0x38a   : > { %v15140_v21 = vpop.f32.mrf.mxu0 }
 0x38b   : > { %v15233_v51 = vpop.f32.mrf.mxu1 }
 0x38d   : > { %v3705_v54 = vpop.f32.mrf.mxu0 }
 0x38e   : > { %v3706_v2 = vadd.f32 %v3705_v54, %v3600_v1  ;;  %v19213_v6 = vpop.f32.mrf.mxu1 }
 0x38f   : > { %v15143_v16 = vpop.f32.mrf.mxu0 }
 0x390   : > { %v15236_v25 = vpop.f32.mrf.mxu1  ;;  %v3840_v26 = vadd.f32 %v3824_v10, %v3706_v2 }
 0x391   : > { %v3710_v62 = vpop.f32.mrf.mxu0 }
 0x392   : > { %v3711_v39 = vadd.f32 %v3710_v62, %v3605_v61 }
 0x393   : > { %v15146_v50 = vpop.f32.mrf.mxu0 }
 0x394   : > { %v3841_v20 = vadd.f32 %v3829_v52, %v3711_v39 }
 0x395   : > { %v3715_v14 = vpop.f32.mrf.mxu0 }
 0x396   : > { %v3716_v31 = vadd.f32 %v3715_v14, %v3610_v55 }
 0x397   : > { %v15149_v56 = vpop.f32.mrf.mxu0 }
 0x398   : > { %v19215_v7 = vadd.f32 %v3834_v30, %v3716_v31 }
 0x399   : > { %v3938_v46 = vpop.f32.mrf.mxu0 }
 0x39b   : > { %v15199_v29 = vpop.f32.mrf.mxu0 }
 0x39c   : > { %v4077_v51 = vpop.f32.mrf.mxu1 }
 0x39d   : > { %v3943_v21 = vpop.f32.mrf.mxu0 }
 0x39e   : > { %v15239_v1 = vpop.f32.mrf.mxu1 }
 0x39f   : > { %v15202_v18 = vpop.f32.mrf.mxu0 }
 0x3a1   : > { %v3948_v54 = vpop.f32.mrf.mxu0  ;;  %v19217_v27 = vpop.f32.mrf.mxu1 }
 0x3a2   : > { %v3964_v33 = vadd.f32 %v3948_v54, %v3840_v26 }
 0x3a3   : > { %v15205_v16 = vpop.f32.mrf.mxu0  ;;  %v15242_v10 = vpop.f32.mrf.mxu1 }
 0x3a6   : > { %v3953_v2 = vpop.f32.mrf.mxu0 }
 0x3a7   : > { %v4310_v61 = vpop.f32.mrf.mxu1 }
 0x3a8   : > { %v15208_v25 = vpop.f32.mrf.mxu0 }
 0x3a9   : > { %v15292_v52 = vpop.f32.mrf.mxu1  ;;  %v3701_v25 = vadd.f32 %v3700_v35, %v18985_v41 }
 0x3aa   : > { %v3958_v62 = vpop.f32.mrf.mxu0  ;;  %v3838_v52 = vadd.f32 %v18833_v58, %v3696_v47 }
 0x3ab   : > { %v4315_v55 = vpop.f32.mrf.mxu1  ;;  %v3839_v42 = vadd.f32 %v18987_v40, %v3701_v25  ;;  %v4088_v40 = vadd.f32 %v19213_v6, %v3964_v33 }
 0x3ac   : > { %v15211_v39 = vpop.f32.mrf.mxu0 }
 0x3ad   : > { %v15295_v30 = vpop.f32.mrf.mxu1  ;;  %v3963_v15 = vadd.f32 %v3943_v21, %v3839_v42  ;;  %v12426_v42 = vld [vmem:[%s22372_s4] ss:$0 sm:$0xff] }
 0x3ae   : > { %v3962_v30 = vadd.f32 %v3938_v46, %v3838_v52  ;;  %v3965_v46 = vadd.f32 %v3953_v2, %v3841_v20 }
 0x3af   : > { %v4186_v50 = vpop.f32.mrf.mxu0  ;;  %v4087_v48 = vadd.f32 %v4067_v32, %v3963_v15 }
 0x3b0   : > { %v4320_v14 = vpop.f32.mrf.mxu1  ;;  %v4086_v28 = vadd.f32 %v4062_v4, %v3962_v30  ;;  %v4089_v32 = vadd.f32 %v4077_v51, %v3965_v46 }
 0x3b1   : > { %v15261_v29 = vpop.f32.mrf.mxu0 }
 0x3b2   : > { %v15298_v31 = vpop.f32.mrf.mxu1  ;;  %v4210_v45 = vadd.f32 %v4186_v50, %v4086_v28 }
 0x3b4   : > { %v4334_v58 = vadd.f32 %v4310_v61, %v4210_v45 }
 0x3b5   : > { %v4191_v56 = vpop.f32.mrf.mxu0  ;;  %v4325_v18 = vpop.f32.mrf.mxu1 }
 0x3b6   : > { %v4211_v35 = vadd.f32 %v4191_v56, %v4087_v48  ;;  %v3966_v48 = vadd.f32 %v3958_v62, %v19215_v7 }
 0x3b7   : > { %v15264_v1 = vpop.f32.mrf.mxu0  ;;  %v15301_v12 = vpop.f32.mrf.mxu1 }
 0x3b8   : > { %v4335_v26 = vadd.f32 %v4315_v55, %v4211_v35  ;;  %v4090_v30 = vadd.f32 %v19217_v27, %v3966_v48 }
 0x3ba   : > { %v4196_v16 = vpop.f32.mrf.mxu0 }
 0x3bb   : > { %v19220_v10 = vpop.f32.mrf.mxu1  ;;  %v4212_v4 = vadd.f32 %v4196_v16, %v4088_v40 }
 0x3bc   : > { %v15267_v24 = vpop.f32.mrf.mxu0 }
 0x3bd   : > { %v15304_v39 = vpop.f32.mrf.mxu1  ;;  %v4336_v56 = vadd.f32 %v4320_v14, %v4212_v4 }
 0x3c0   : > { %v4201_v29 = vpop.f32.mrf.mxu0 }
 0x3c1   : > { %v4558_v31 = vpop.f32.mrf.mxu1  ;;  %v4213_v33 = vadd.f32 %v4201_v29, %v4089_v32  ;;  %v22600_v32 = vld [vmem:[#allocation36_spill] sm:$0xff] }
 0x3c2   : > { %v15270_v1 = vpop.f32.mrf.mxu0 }
 0x3c3   : > { %v15354_v11 = vpop.f32.mrf.mxu1  ;;  %v4337_v62 = vadd.f32 %v4325_v18, %v4213_v33  ;;  %v12463_v33 = vld [vmem:[%s22373_s5 + $0x60] sm:$0xff] }
 0x3c4   : > { %v4206_v12 = vpop.f32.mrf.mxu0 }
 0x3c5   : > { %v4563_v23 = vpop.f32.mrf.mxu1  ;;  %v4214_v45 = vadd.f32 %v4206_v12, %v4090_v30  ;;  %v12460_v30 = vld [vmem:[%s22373_s5 + $0x48] sm:$0xff] }
 0x3c6   : > { %v15273_v59 = vpop.f32.mrf.mxu0 }
 0x3c7   : > { %v15357_v41 = vpop.f32.mrf.mxu1 }
 0x3c8   : > { %v4434_v24 = vpop.f32.mrf.mxu0 }
 0x3c9   : > { %v4568_v47 = vpop.f32.mrf.mxu1  ;;  %v4458_v25 = vadd.f32 %v4434_v24, %v4334_v58  ;;  %v4338_v24 = vadd.f32 %v19220_v10, %v4214_v45  ;;  %v12466_v10 = vld [vmem:[%s22373_s5 + $0x78] sm:$0xff] }
 0x3ca   : > { %v15323_v11 = vpop.f32.mrf.mxu0  ;;  %v12488_v45 = vld [vmem:[%s22373_s5 + $0xf8] sm:$0xff] }
 0x3cb   : > { %v15360_v28 = vpop.f32.mrf.mxu1  ;;  %v4582_v21 = vadd.f32 %v4558_v31, %v4458_v25 }
 0x3cc   : > { %v4439_v15 = vpop.f32.mrf.mxu0 }
 0x3cd   : > { %v4573_v59 = vpop.f32.mrf.mxu1  ;;  %v4594_v54 = vadd.f32 %v12426_v42, %v4582_v21  ;;  %v4459_v61 = vadd.f32 %v4439_v15, %v4335_v26 }
 0x3ce   : > { %v15326_v20 = vpop.f32.mrf.mxu0 }
 0x3cf   : > { %v15363_v2 = vpop.f32.mrf.mxu1  ;;  %v4599_v6 = vmax.f32 %v4594_v54, 0.0  ;;  %v4583_v50 = vadd.f32 %v4563_v23, %v4459_v61  ;;  %v12465_v54 = vld [vmem:[%s22373_s5 + $0x70] sm:$0xff]  ;;  %v12464_v20 = vld [vmem:[%s22373_s5 + $0x68] sm:$0xff] }
 0x3d0   : > { %v4444_v52 = vpop.f32.mrf.mxu0  ;;  %v4987_v61 = vld [vmem:[%s22373_s5 + $0x30] sm:$0xff]  ;;  %v4986_v2 = vld [vmem:[%s22373_s5 + $0x28] sm:$0xff] }
 0x3d1   : > { %v4578_v39 = vpop.f32.mrf.mxu1  ;;  %4604 = vst [vmem:[#allocation4] sm:$0xff] %v4599_v6  ;;  %v4595_v16 = vadd.f32 %v12426_v42, %v4583_v50  ;;  %v4460_v55 = vadd.f32 %v4444_v52, %v4336_v56  ;;  %v4985_v6 = vld [vmem:[%s22373_s5 + $0x20] sm:$0xff]  ;;  %v12462_v50 = vld [vmem:[%s22373_s5 + $0x58] sm:$0xff]  ;;  %v12461_v52 = vld [vmem:[%s22373_s5 + $0x50] sm:$0xff] }
 0x3d2   : > { %v15329_v31 = vpop.f32.mrf.mxu0  ;;  %v4984_v56 = vld [vmem:[%s22373_s5 + $0x18] sm:$0xff] }
 0x3d3   : > { %v15366_v1 = vpop.f32.mrf.mxu1  ;;  %v4600_v7 = vmax.f32 %v4595_v16, 0.0  ;;  %v4584_v51 = vadd.f32 %v4568_v47, %v4460_v55  ;;  %v4982_v16 = vld [vmem:[%s22373_s5 + $0x8] sm:$0xff]  ;;  %v12459_v55 = vld [vmem:[%s22373_s5 + $0x40] sm:$0xff] }
 0x3d4   : > { %v4449_v41 = vpop.f32.mrf.mxu0  ;;  %v4981_v31 = vld [vmem:[%s22373_s5] sm:$0xff]  ;;  %v12478_v1 = vld [vmem:[%s22373_s5 + $0xb8] sm:$0xff] }
 0x3d5   : > { %4605 = vst [vmem:[#allocation4 + $0x8] sm:$0xff] %v4600_v7  ;;  %v4596_v35 = vadd.f32 %v12426_v42, %v4584_v51  ;;  %v4461_v29 = vadd.f32 %v4449_v41, %v4337_v62 }
 0x3d6   : > { %v15332_v58 = vpop.f32.mrf.mxu0 }
 0x3d7   : > { %v4601_v23 = vmax.f32 %v4596_v35, 0.0  ;;  %v4585_v14 = vadd.f32 %v4573_v59, %v4461_v29 }
 0x3d8   : > { %v4454_v46 = vpop.f32.mrf.mxu0  ;;  %v4609_v12 = vld [vmem:[#allocation4] ss:$2 sm:$0xf]  ;;  %v4611_v4 = vld [vmem:[#allocation4 + $0x1] ss:$2 sm:$0xf] }
 0x3d9   : > { %4606 = vst [vmem:[#allocation4 + $0x10] sm:$0xff] %v4601_v23  ;;  %v4597_v27 = vadd.f32 %v12426_v42, %v4585_v14  ;;  %v4462_v40 = vadd.f32 %v4454_v46, %v4338_v24  ;;  %v4612_v21 = vmax.f32 %v4609_v12, %v4611_v4  ;;  %v12477_v24 = vld [vmem:[%s22373_s5 + $0xb0] sm:$0xff]  ;;  %v12474_v12 = vld [vmem:[%s22373_s5 + $0x98] sm:$0xff] }
 0x3da   : > { %v15335_v25 = vpop.f32.mrf.mxu0  ;;  %v12484_v4 = vld [vmem:[%s22373_s5 + $0xd8] sm:$0xff] }
 0x3db   : > { %v4602_v11 = vmax.f32 %v4597_v27, 0.0  ;;  %v4586_v28 = vadd.f32 %v4578_v39, %v4462_v40  ;;  %v4983_v39 = vld [vmem:[%s22373_s5 + $0x10] sm:$0xff]  ;;  %v12476_v40 = vld [vmem:[%s22373_s5 + $0xa8] sm:$0xff] }
 0x3dc   : > { %v12487_v27 = vld [vmem:[%s22373_s5 + $0xf0] sm:$0xff]  ;;  %v12486_v25 = vld [vmem:[%s22373_s5 + $0xe8] sm:$0xff] }
 0x3dd   : > { %4607 = vst [vmem:[#allocation4 + $0x18] sm:$0xff] %v4602_v11  ;;  %v4598_v18 = vadd.f32 %v12426_v42, %v4586_v28  ;;  %v4988_v42 = vld [vmem:[%s22373_s5 + $0x38] sm:$0xff]  ;;  %v12475_v11 = vld [vmem:[%s22373_s5 + $0xa0] sm:$0xff] }
 0x3de   : > { %v12485_v28 = vld [vmem:[%s22373_s5 + $0xe0] sm:$0xff] }
 0x3df   : > { %v4603_v47 = vmax.f32 %v4598_v18, 0.0  ;;  %v12473_v18 = vld [vmem:[%s22373_s5 + $0x90] sm:$0xff] }
 0x3e0   : > { %v4614_v26 = vld [vmem:[#allocation4 + $0xa] ss:$2 sm:$0xf]  ;;  %v4617_v48 = vld [vmem:[#allocation4 + $0xb] ss:$2 sm:$0xf] }
 0x3e1   : > { %4608 = vst [vmem:[#allocation4 + $0x20] sm:$0x3f] %v4603_v47  ;;  %v4615_v15 = vmax.f32 %v4612_v21, %v4614_v26  ;;  %v12483_v47 = vld [vmem:[%s22373_s5 + $0xd0] sm:$0xff]  ;;  %v12472_v21 = vld [vmem:[%s22373_s5 + $0x88] sm:$0xff] }
 0x3e2   : > { %v12482_v26 = vld [vmem:[%s22373_s5 + $0xc8] sm:$0xff] }
 0x3e3   : > { %v4618_v59 = vmax.f32 %v4615_v15, %v4617_v48  ;;  %v12471_v15 = vld [vmem:[%s22373_s5 + $0x80] sm:$0xff] }
 0x3e4   : > { %v12481_v48 = vld [vmem:[%s22373_s5 + $0xc0] sm:$0xff] }
 0x3e5   : > { %15400 = vmatmul.mubr.f32.vlgmr.msra.gmra.mxu0 %v4618_v59  ;;  %15435 = vmatmul.mubr.f32.vlgmr.msra.gmra.mxu1 %v4618_v59  ;;  %v12498_v59 = vld [vmem:[%s22373_s5 + $0x138] sm:$0xff] }
 0x3e6   : > { %15438 = vmatpush3.msra.mxu0 %v18992_v49  ;;  %15473 = vmatpush3.msra.mxu1 %v18997_v57  ;;  %v22588_v49 = vld [vmem:[#allocation33_spill] sm:$0xff]  ;;  %v22589_v57 = vld [vmem:[#allocation34_spill] sm:$0xff] }
 0x3e7   : > { %15439 = vmatprep.subr.mxu0 %v22558_v9  ;;  %15474 = vmatprep.subr.mxu1 %v22558_v9 }
 0x3e8   : > { %15440 = vmatpush3.msra.mxu0 %v19006_v36  ;;  %15475 = vmatpush3.msra.mxu1 %v19011_v37  ;;  %v22590_v36 = vld [vmem:[#allocation41_spill] sm:$0xff] }
 0x3e9   : > { %15441 = vmatprep.subr.mxu0 %v22558_v9  ;;  %15476 = vmatprep.subr.mxu1 %v22558_v9  ;;  %v4795_v37 = vld [vmem:[#allocation4 + $0x14] ss:$2 sm:$0xf] }
 0x3ea   : > { %15442 = vmatpush3.msra.mxu0 %v19020_v5  ;;  %15477 = vmatpush3.msra.mxu1 %v19025_v53  ;;  %v4797_v5 = vld [vmem:[#allocation4 + $0x15] ss:$2 sm:$0xf]  ;;  %v22591_v53 = vld [vmem:[#allocation40_spill] sm:$0xff] }
 0x3eb   : > { %15443 = vmatprep.subr.mxu0 %v22558_v9  ;;  %15478 = vmatprep.subr.mxu1 %v22558_v9 }
 0x3ec   : > { %15444 = vmatpush3.msra.mxu0 %v19034_v8  ;;  %15479 = vmatpush3.msra.mxu1 %v19039_v34  ;;  %v22592_v8 = vld [vmem:[#allocation61_spill] sm:$0xff]  ;;  %v4800_v34 = vld [vmem:[#allocation4 + $0x1e] ss:$2 sm:$0xf] }
 0x3ed   : > { %15445 = vmatprep.subr.mxu0 %v22558_v9  ;;  %15480 = vmatprep.subr.mxu1 %v22558_v9 }
 0x3ee   : > { %15446 = vmatpush3.msra.mxu0 %v19048_v38  ;;  %15481 = vmatpush3.msra.mxu1 %v19053_v63  ;;  %v22593_v38 = vld [vmem:[#allocation59_spill] sm:$0xff]  ;;  %v22594_v63 = vld [vmem:[#allocation22_spill] sm:$0xff] }
 0x3ef   : > { %15447 = vmatprep.subr.mxu0 %v22558_v9  ;;  %15482 = vmatprep.subr.mxu1 %v22558_v9 }
 0x3f0   : > { %15448 = vmatpush3.msra.mxu0 %v19062_v0  ;;  %15483 = vmatpush3.msra.mxu1 %v19067_v44  ;;  %v4798_v0 = vmax.f32 %v4795_v37, %v4797_v5  ;;  %v22595_v44 = vld [vmem:[#allocation23_spill] sm:$0xff]  ;;  %v12496_v37 = vld [vmem:[%s22373_s5 + $0x128] sm:$0xff]  ;;  %v12495_v5 = vld [vmem:[%s22373_s5 + $0x120] sm:$0xff] }
 0x3f1   : > { %15449 = vmatprep.subr.mxu0 %v22558_v9  ;;  %15484 = vmatprep.subr.mxu1 %v22558_v9 }
 0x3f2   : > { %15450 = vmatpush3.msra.mxu0 %v19076_v22  ;;  %15485 = vmatpush3.msra.mxu1 %v19081_v19  ;;  %v22596_v22 = vld [vmem:[#allocation42_spill] sm:$0xff]  ;;  %v4801_v19 = vmax.f32 %v4798_v0, %v4800_v34  ;;  %v12494_v34 = vld [vmem:[%s22373_s5 + $0x118] sm:$0xff] }
 0x3f3   : > { %15451 = vmatprep.subr.mxu0 %v22558_v9  ;;  %15486 = vmatprep.subr.mxu1 %v22558_v9 }
 0x3f4   : > { %15452 = vmatpush3.msra.mxu0 %v19090_v3  ;;  %15487 = vmatpush3.msra.mxu1 %v19095_v60  ;;  %v22597_v3 = vld [vmem:[#allocation45_spill] sm:$0xff]  ;;  %v22598_v60 = vld [vmem:[#allocation60_spill] sm:$0xff] }
 0x3f5   : > { %15453 = vmatprep.subr.mxu0 %v22558_v9  ;;  %15488 = vmatprep.subr.mxu1 %v22558_v9 }
 0x3f6   : > { %15454 = vmatpush3.msra.mxu0 %v19104_v43  ;;  %15489 = vmatpush3.msra.mxu1 %v19109_v17  ;;  %v4803_v43 = vld [vmem:[#allocation4 + $0x1f] ss:$2 sm:$0xf] }
 0x3f7   : > { %15455 = vmatprep.subr.mxu0 %v22558_v9  ;;  %15490 = vmatprep.subr.mxu1 %v22558_v9  ;;  %v22599_v17 = vld [vmem:[#allocation35_spill] sm:$0xff] }
 0x3f8   : > { %15456 = vmatpush3.msra.mxu0 %v19118_v13  ;;  %15491 = vmatpush3.msra.mxu1 %v22588_v49  ;;  %v4804_v13 = vmax.f32 %v4801_v19, %v4803_v43  ;;  %v12491_v19 = vld [vmem:[%s22373_s5 + $0x100] sm:$0xff] }
 0x3f9   : > { %15457 = vmatprep.subr.mxu0 %v22558_v9  ;;  %15492 = vmatprep.subr.mxu1 %v22558_v9 }
 0x3fa   : > { %15458 = vmatpush3.msra.mxu0 %v22589_v57  ;;  %15493 = vmatpush3.msra.mxu1 %v22590_v36  ;;  %v12497_v57 = vld [vmem:[%s22373_s5 + $0x130] sm:$0xff]  ;;  %v12508_v36 = vld [vmem:[%s22373_s5 + $0x178] sm:$0xff] }
 0x3fb   : > { %15459 = vmatprep.subr.mxu0 %v22558_v9  ;;  %15494 = vmatprep.subr.mxu1 %v22558_v9 }
 0x3fc   : > { %15460 = vmatpush3.msra.mxu0 %v22591_v53  ;;  %15495 = vmatpush3.msra.mxu1 %v22592_v8 }
 0x3fd   : > { %15461 = vmatprep.subr.mxu0 %v22558_v9  ;;  %15496 = vmatprep.subr.mxu1 %v22558_v9 }
 0x3fe   : > { %15462 = vmatpush3.msra.mxu0 %v22593_v38  ;;  %15497 = vmatpush3.msra.mxu1 %v22594_v63 }
 0x3ff   : > { %15463 = vmatprep.subr.mxu0 %v22558_v9  ;;  %15498 = vmatprep.subr.mxu1 %v22558_v9 }
 0x400   : > { %15464 = vmatpush3.msra.mxu0 %v22595_v44  ;;  %15499 = vmatpush3.msra.mxu1 %v22596_v22  ;;  %v12493_v44 = vld [vmem:[%s22373_s5 + $0x110] sm:$0xff]  ;;  %v12492_v22 = vld [vmem:[%s22373_s5 + $0x108] sm:$0xff] }
 0x401   : > { %15465 = vmatprep.subr.mxu0 %v22558_v9  ;;  %15500 = vmatprep.subr.mxu1 %v22558_v9 }
 0x402   : > { %15466 = vmatpush3.msra.mxu0 %v22597_v3  ;;  %15501 = vmatpush3.msra.mxu1 %v22598_v60  ;;  %v12518_v3 = vld [vmem:[%s22373_s5 + $0x1b8] sm:$0xff] }
 0x403   : > { %15467 = vmatprep.subr.mxu0 %v22558_v9  ;;  %15502 = vmatprep.subr.mxu1 %v22558_v9 }
 0x404   : > { %15468 = vmatpush3.msra.mxu0 %v22599_v17  ;;  %15469 = vmatprep.mubr.msk.f32.mxu0 %vm17187_vm1, %v22558_v9 }
 0x405   : > { %15503 = vmatpush3.msra.mxu1 %v22600_v32  ;;  %15504 = vmatprep.mubr.msk.f32.mxu1 %vm17187_vm1, %v22558_v9  ;;  %v12517_v32 = vld [vmem:[%s22373_s5 + $0x1b0] sm:$0xff] }
 0x406   : > { %15470 = vmatmul.mubr.f32.vlgmr.msra.gmra.mxu0 %v4804_v13  ;;  %15505 = vmatmul.mubr.f32.vlgmr.msra.gmra.mxu1 %v4804_v13 }
 0x407   : > { %15507 = vmatprep.subr.mxu0 %v12466_v10  ;;  %15526 = vmatprep.subr.mxu1 %v4988_v42 }
 0x408   : > { %15508 = vmatpush3.msra.mxu0 %v12466_v10  ;;  %15527 = vmatpush3.msra.mxu1 %v4988_v42  ;;  %v12507_v10 = vld [vmem:[%s22373_s5 + $0x170] sm:$0xff] }
 0x409   : > { %15509 = vmatprep.subr.mxu0 %v12465_v54  ;;  %15528 = vmatprep.subr.mxu1 %v4987_v61 }
 0x40a   : > { %15510 = vmatpush3.msra.mxu0 %v12465_v54  ;;  %15529 = vmatpush3.msra.mxu1 %v4987_v61  ;;  %v12506_v61 = vld [vmem:[%s22373_s5 + $0x168] sm:$0xff] }
 0x40b   : > { %15511 = vmatprep.subr.mxu0 %v12464_v20  ;;  %15530 = vmatprep.subr.mxu1 %v4986_v2 }
 0x40c   : > { %15512 = vmatpush3.msra.mxu0 %v12464_v20  ;;  %15531 = vmatpush3.msra.mxu1 %v4986_v2  ;;  %v12516_v20 = vld [vmem:[%s22373_s5 + $0x1a8] sm:$0xff]  ;;  %v12505_v2 = vld [vmem:[%s22373_s5 + $0x160] sm:$0xff] }
 0x40d   : > { %15513 = vmatprep.subr.mxu0 %v12463_v33  ;;  %15532 = vmatprep.subr.mxu1 %v4985_v6 }
 0x40e   : > { %15514 = vmatpush3.msra.mxu0 %v12463_v33  ;;  %15533 = vmatpush3.msra.mxu1 %v4985_v6  ;;  %v12515_v33 = vld [vmem:[%s22373_s5 + $0x1a0] sm:$0xff]  ;;  %v12504_v6 = vld [vmem:[%s22373_s5 + $0x158] sm:$0xff] }
 0x40f   : > { %15515 = vmatprep.subr.mxu0 %v12462_v50  ;;  %15534 = vmatprep.subr.mxu1 %v4984_v56 }
 0x410   : > { %15516 = vmatpush3.msra.mxu0 %v12462_v50  ;;  %15535 = vmatpush3.msra.mxu1 %v4984_v56  ;;  %v12514_v50 = vld [vmem:[%s22373_s5 + $0x198] sm:$0xff]  ;;  %v12503_v56 = vld [vmem:[%s22373_s5 + $0x150] sm:$0xff] }
 0x411   : > { %15517 = vmatprep.subr.mxu0 %v12461_v52  ;;  %15536 = vmatprep.subr.mxu1 %v4983_v39 }
 0x412   : > { %15518 = vmatpush3.msra.mxu0 %v12461_v52  ;;  %15537 = vmatpush3.msra.mxu1 %v4983_v39  ;;  %v12513_v52 = vld [vmem:[%s22373_s5 + $0x190] sm:$0xff]  ;;  %v12502_v39 = vld [vmem:[%s22373_s5 + $0x148] sm:$0xff] }
 0x413   : > { %15519 = vmatprep.subr.mxu0 %v12460_v30  ;;  %15538 = vmatprep.subr.mxu1 %v4982_v16 }
 0x414   : > { %15520 = vmatpush3.msra.mxu0 %v12460_v30  ;;  %15539 = vmatpush3.msra.mxu1 %v4982_v16  ;;  %v12512_v30 = vld [vmem:[%s22373_s5 + $0x188] sm:$0xff]  ;;  %v12501_v16 = vld [vmem:[%s22373_s5 + $0x140] sm:$0xff] }
 0x415   : > { %15521 = vmatprep.subr.mxu0 %v12459_v55  ;;  %15540 = vmatprep.subr.mxu1 %v4981_v31 }
 0x416   : > { %15522 = vmatpush3.msra.mxu0 %v12459_v55  ;;  %15541 = vmatpush3.msra.mxu1 %v4981_v31  ;;  %v12511_v55 = vld [vmem:[%s22373_s5 + $0x180] sm:$0xff]  ;;  %v12528_v31 = vld [vmem:[%s22373_s5 + $0x1f8] sm:$0xff] }
 0x417   : > { %15545 = vmatprep.subr.mxu0 %v12478_v1  ;;  %15564 = vmatprep.subr.mxu1 %v12488_v45 }
 0x4a5   : > { %v4701_v7 = vpop.f32.mrf.mxu0  ;;  %v4788_v51 = vpop.f32.mrf.mxu1 }
 0x4a6   : > { %v4792_v62 = vmax.f32 %v4701_v7, %v4788_v51  ;;  %v12538_v7 = vld [vmem:[%s22373_s5 + $0x238] sm:$0xff]  ;;  %v12527_v51 = vld [vmem:[%s22373_s5 + $0x1f0] sm:$0xff] }
 0x4a7   : > { %v15401_v41 = vpop.f32.mrf.mxu0  ;;  %v15436_v35 = vpop.f32.mrf.mxu1 }
 0x4a8   : > { %4793 = vst.msk [vmem:[#allocation5 + $0x7] sm:$0xf] %vm480_vm3, %v4792_v62  ;;  %v12537_v41 = vld [vmem:[%s22373_s5 + $0x230] sm:$0xff] }
 0x4af   : > { %v4989_v29 = vld [vmem:[#allocation5 + $0x1] sm:$0xff]  ;;  %v4990_v23 = vld [vmem:[#allocation5 + $0x9] sm:$0x3] }
 0x4b0   : > { %v4979_v58 = vld [vmem:[#allocation5] sm:$0xff]  ;;  %15523 = vmatprep.mubr.msk.f32.mxu0 %vm472_vm2, %v4989_v29  ;;  %v4980_v14 = vld [vmem:[#allocation5 + $0x8] sm:$0x3]  ;;  %v5163_v49 = vld [vmem:[#allocation5 + $0xa] sm:$0x3] }
 0x4b1   : > { %15542 = vmatprep.mubr.msk.f32.mxu1 %vm472_vm2, %v4979_v58  ;;  %15524 = vmatmul.mubr.msk.f32.vlgmr.msra.gmra.mxu0 %vm472_vm2, %v4990_v23  ;;  %v5162_v46 = vld [vmem:[#allocation5 + $0x2] sm:$0xff]  ;;  %v12526_v29 = vld [vmem:[%s22373_s5 + $0x1e8] sm:$0xff] }
 0x4b2   : > { %15543 = vmatmul.mubr.msk.f32.vlgmr.msra.gmra.mxu1 %vm472_vm2, %v4980_v14  ;;  %15546 = vmatpush3.msra.mxu0 %v12478_v1  ;;  %v5539_v1 = vld [vmem:[#allocation5 + $0x14] sm:$0x3]  ;;  %v12525_v23 = vld [vmem:[%s22373_s5 + $0x1e0] sm:$0xff] }
 0x4b3   : > { %15561 = vmatprep.mubr.msk.f32.mxu0 %vm472_vm2, %v5162_v46  ;;  %15547 = vmatprep.subr.mxu0 %v12477_v24  ;;  %v12536_v58 = vld [vmem:[%s22373_s5 + $0x228] sm:$0xff]  ;;  %v12535_v14 = vld [vmem:[%s22373_s5 + $0x220] sm:$0xff]  ;;  %v12534_v46 = vld [vmem:[%s22373_s5 + $0x218] sm:$0xff] }
 0x4b4   : > { %15565 = vmatpush3.msra.mxu1 %v12488_v45  ;;  %15548 = vmatpush3.msra.mxu0 %v12477_v24  ;;  %v12524_v24 = vld [vmem:[%s22373_s5 + $0x1d8] sm:$0xff] }
 0x4b5   : > { %15566 = vmatprep.subr.mxu1 %v12487_v27  ;;  %15549 = vmatprep.subr.mxu0 %v12476_v40 }
 0x4b6   : > { %15567 = vmatpush3.msra.mxu1 %v12487_v27  ;;  %15550 = vmatpush3.msra.mxu0 %v12476_v40  ;;  %v12523_v27 = vld [vmem:[%s22373_s5 + $0x1d0] sm:$0xff] }
 0x4b7   : > { %15568 = vmatprep.subr.mxu1 %v12486_v25  ;;  %15551 = vmatprep.subr.mxu0 %v12475_v11  ;;  %v12533_v40 = vld [vmem:[%s22373_s5 + $0x210] sm:$0xff] }
 0x4b8   : > { %15569 = vmatpush3.msra.mxu1 %v12486_v25  ;;  %15552 = vmatpush3.msra.mxu0 %v12475_v11  ;;  %v12522_v25 = vld [vmem:[%s22373_s5 + $0x1c8] sm:$0xff] }
 0x4b9   : > { %15570 = vmatprep.subr.mxu1 %v12485_v28  ;;  %15553 = vmatprep.subr.mxu0 %v12474_v12  ;;  %v12532_v11 = vld [vmem:[%s22373_s5 + $0x208] sm:$0xff] }
 0x4ba   : > { %15571 = vmatpush3.msra.mxu1 %v12485_v28  ;;  %15554 = vmatpush3.msra.mxu0 %v12474_v12  ;;  %v12521_v28 = vld [vmem:[%s22373_s5 + $0x1c0] sm:$0xff] }
 0x4bb   : > { %15572 = vmatprep.subr.mxu1 %v12484_v4  ;;  %15555 = vmatprep.subr.mxu0 %v12473_v18  ;;  %v12531_v12 = vld [vmem:[%s22373_s5 + $0x200] sm:$0xff] }
 0x4bc   : > { %15573 = vmatpush3.msra.mxu1 %v12484_v4  ;;  %15556 = vmatpush3.msra.mxu0 %v12473_v18  ;;  %v5633_v4 = vld [vmem:[#allocation5 + $0x15] sm:$0x3] }
 0x4bd   : > { %15574 = vmatprep.subr.mxu1 %v12483_v47  ;;  %15557 = vmatprep.subr.mxu0 %v12472_v21  ;;  %v5727_v18 = vld [vmem:[#allocation5 + $0x16] sm:$0x3] }
 0x4be   : > { %15575 = vmatpush3.msra.mxu1 %v12483_v47  ;;  %15558 = vmatpush3.msra.mxu0 %v12472_v21  ;;  %v5859_v47 = vld [vmem:[%s22377_s9 + $0x78] sm:$0xff] }
 0x4bf   : > { %15576 = vmatprep.subr.mxu1 %v12482_v26  ;;  %15559 = vmatprep.subr.mxu0 %v12471_v15  ;;  %v12557_v21 = vld [vmem:[%s22377_s9 + $0xf8] sm:$0xff] }
 0x4c0   : > { %15577 = vmatpush3.msra.mxu1 %v12482_v26  ;;  %15560 = vmatpush3.msra.mxu0 %v12471_v15  ;;  %v5858_v26 = vld [vmem:[%s22377_s9 + $0x70] sm:$0xff] }
 0x4c1   : > { %15578 = vmatprep.subr.mxu1 %v12481_v48  ;;  %15562 = vmatmul.mubr.msk.f32.vlgmr.msra.gmra.mxu0 %vm472_vm2, %v5163_v49  ;;  %v12556_v15 = vld [vmem:[%s22377_s9 + $0xf0] sm:$0xff]  ;;  %v5856_v49 = vld [vmem:[%s22377_s9 + $0x60] sm:$0xff] }
 0x4c2   : > { %15583 = vmatprep.subr.mxu0 %v12498_v59  ;;  %15579 = vmatpush3.msra.mxu1 %v12481_v48  ;;  %v5857_v48 = vld [vmem:[%s22377_s9 + $0x68] sm:$0xff] }
 0x4c3   : > { %15584 = vmatpush3.msra.mxu0 %v12498_v59  ;;  %15602 = vmatprep.subr.mxu1 %v12508_v36  ;;  %v12555_v59 = vld [vmem:[%s22377_s9 + $0xe8] sm:$0xff] }
 0x4c4   : > { %15585 = vmatprep.subr.mxu0 %v12497_v57 }
 0x4c5   : > { %15586 = vmatpush3.msra.mxu0 %v12497_v57  ;;  %v12554_v57 = vld [vmem:[%s22377_s9 + $0xe0] sm:$0xff] }
 0x4c6   : > { %15587 = vmatprep.subr.mxu0 %v12496_v37  ;;  %v4887_v53 = vpop.f32.mrf.mxu0  ;;  %v4973_v8 = vpop.f32.mrf.mxu1 }
 0x4c7   : > { %15588 = vmatpush3.msra.mxu0 %v12496_v37  ;;  %v4977_v38 = vmax.f32 %v4887_v53, %v4973_v8  ;;  %v12553_v37 = vld [vmem:[%s22377_s9 + $0xd8] sm:$0xff]  ;;  %v12552_v53 = vld [vmem:[%s22377_s9 + $0xd0] sm:$0xff]  ;;  %v5853_v8 = vld [vmem:[%s22377_s9 + $0x48] sm:$0xff] }
 0x4c8   : > { %15589 = vmatprep.subr.mxu0 %v12495_v5  ;;  %v15471_v63 = vpop.f32.mrf.mxu0  ;;  %v15506_v0 = vpop.f32.mrf.mxu1 }
 0x4c9   : > { %15590 = vmatpush3.msra.mxu0 %v12495_v5  ;;  %4978 = vst.msk [vmem:[#allocation5 + $0xd] sm:$0xf] %vm480_vm3, %v4977_v38  ;;  %v5854_v5 = vld [vmem:[%s22377_s9 + $0x50] sm:$0xff]  ;;  %v5852_v38 = vld [vmem:[%s22377_s9 + $0x40] sm:$0xff]  ;;  %v5851_v0 = vld [vmem:[%s22377_s9 + $0x38] sm:$0xff] }
 0x4ca   : > { %15591 = vmatprep.subr.mxu0 %v12494_v34  ;;  %v12550_v63 = vld [vmem:[%s22377_s9 + $0xc0] sm:$0xff] }
 0x4cb   : > { %15592 = vmatpush3.msra.mxu0 %v12494_v34  ;;  %v12551_v34 = vld [vmem:[%s22377_s9 + $0xc8] sm:$0xff] }
 0x4cc   : > { %15593 = vmatprep.subr.mxu0 %v12493_v44 }
 0x4cd   : > { %15594 = vmatpush3.msra.mxu0 %v12493_v44  ;;  %v12549_v44 = vld [vmem:[%s22377_s9 + $0xb8] sm:$0xff] }
 0x4ce   : > { %15595 = vmatprep.subr.mxu0 %v12492_v22 }
 0x4cf   : > { %15596 = vmatpush3.msra.mxu0 %v12492_v22  ;;  %v5850_v22 = vld [vmem:[%s22377_s9 + $0x30] sm:$0xff] }
 0x4d0   : > { %15597 = vmatprep.subr.mxu0 %v12491_v19  ;;  %v5256_v60 = vld [vmem:[#allocation5 + $0x6] sm:$0xff]  ;;  %v5257_v17 = vld [vmem:[#allocation5 + $0xe] sm:$0x3]  ;;  %v5445_v45 = vld [vmem:[#allocation5 + $0x10] sm:$0x3] }
 0x4d1   : > { %15598 = vmatpush3.msra.mxu0 %v12491_v19  ;;  %v5350_v43 = vld [vmem:[#allocation5 + $0x7] sm:$0xff]  ;;  %15580 = vmatprep.mubr.msk.f32.mxu1 %vm472_vm2, %v5256_v60  ;;  %v5351_v13 = vld [vmem:[#allocation5 + $0xf] sm:$0x3]  ;;  %v12548_v19 = vld [vmem:[%s22377_s9 + $0xb0] sm:$0xff] }
 0x4d2   : > { %15599 = vmatprep.mubr.msk.f32.mxu0 %vm472_vm2, %v5350_v43  ;;  %15581 = vmatmul.mubr.msk.f32.vlgmr.msra.gmra.mxu1 %vm472_vm2, %v5257_v17  ;;  %v5444_v42 = vld [vmem:[#allocation5 + $0x8] sm:$0xff]  ;;  %v12547_v60 = vld [vmem:[%s22377_s9 + $0xa8] sm:$0xff] }
 0x4d3   : > { %15600 = vmatmul.mubr.msk.f32.vlgmr.msra.gmra.mxu0 %vm472_vm2, %v5351_v13  ;;  %15603 = vmatpush3.msra.mxu1 %v12508_v36  ;;  %v5538_v54 = vld [vmem:[#allocation5 + $0xc] sm:$0xff]  ;;  %v5855_v36 = vld [vmem:[%s22377_s9 + $0x58] sm:$0xff] }
 0x4d4   : > { %15621 = vmatprep.subr.mxu0 %v12518_v3  ;;  %15604 = vmatprep.subr.mxu1 %v12507_v10  ;;  %v5632_v62 = vld [vmem:[#allocation5 + $0xd] sm:$0xff]  ;;  %v5847_v13 = vld [vmem:[%s22377_s9 + $0x18] sm:$0xff] }
 0x4d5   : > { %15618 = vmatprep.mubr.msk.f32.mxu1 %vm472_vm2, %v5444_v42  ;;  %15622 = vmatpush3.msra.mxu0 %v12518_v3  ;;  %v5726_v35 = vld [vmem:[#allocation5 + $0xe] sm:$0xff]  ;;  %v5846_v42 = vld [vmem:[%s22377_s9 + $0x10] sm:$0xff] }
 0x4d6   : > { %15637 = vmatprep.mubr.msk.f32.mxu0 %vm472_vm2, %v5538_v54  ;;  %15605 = vmatpush3.msra.mxu1 %v12507_v10  ;;  %v5849_v3 = vld [vmem:[%s22377_s9 + $0x28] sm:$0xff]  ;;  %v5848_v43 = vld [vmem:[%s22377_s9 + $0x20] sm:$0xff]  ;;  %v12545_v10 = vld [vmem:[%s22377_s9 + $0x98] sm:$0xff] }
 0x4d7   : > { %15623 = vmatprep.subr.mxu0 %v12517_v32  ;;  %15606 = vmatprep.subr.mxu1 %v12506_v61  ;;  %v12546_v17 = vld [vmem:[%s22377_s9 + $0xa0] sm:$0xff]  ;;  %v5845_v54 = vld [vmem:[%s22377_s9 + $0x8] sm:$0xff] }
 0x4d8   : > { %15624 = vmatpush3.msra.mxu0 %v12517_v32  ;;  %15607 = vmatpush3.msra.mxu1 %v12506_v61  ;;  %v12544_v32 = vld [vmem:[%s22377_s9 + $0x90] sm:$0xff]  ;;  %v12543_v61 = vld [vmem:[%s22377_s9 + $0x88] sm:$0xff] }
 0x4d9   : > { %15625 = vmatprep.subr.mxu0 %v12516_v20  ;;  %15608 = vmatprep.subr.mxu1 %v12505_v2 }
 0x4da   : > { %15626 = vmatpush3.msra.mxu0 %v12516_v20  ;;  %15609 = vmatpush3.msra.mxu1 %v12505_v2  ;;  %v5844_v20 = vld [vmem:[%s22377_s9] sm:$0xff] }
 0x4db   : > { %15627 = vmatprep.subr.mxu0 %v12515_v33  ;;  %15610 = vmatprep.subr.mxu1 %v12504_v6  ;;  %v12542_v2 = vld [vmem:[%s22377_s9 + $0x80] sm:$0xff] }
 0x4dc   : > { %15628 = vmatpush3.msra.mxu0 %v12515_v33  ;;  %15611 = vmatpush3.msra.mxu1 %v12504_v6 }
 0x4dd   : > { %15629 = vmatprep.subr.mxu0 %v12514_v50  ;;  %15612 = vmatprep.subr.mxu1 %v12503_v56 }
 0x4de   : > { %15630 = vmatpush3.msra.mxu0 %v12514_v50  ;;  %15613 = vmatpush3.msra.mxu1 %v12503_v56 }
 0x4df   : > { %15631 = vmatprep.subr.mxu0 %v12513_v52  ;;  %15614 = vmatprep.subr.mxu1 %v12502_v39 }
 0x4e0   : > { %15632 = vmatpush3.msra.mxu0 %v12513_v52  ;;  %15615 = vmatpush3.msra.mxu1 %v12502_v39 }
 0x4e1   : > { %15633 = vmatprep.subr.mxu0 %v12512_v30  ;;  %15616 = vmatprep.subr.mxu1 %v12501_v16 }
 0x4e2   : > { %15634 = vmatpush3.msra.mxu0 %v12512_v30  ;;  %15617 = vmatpush3.msra.mxu1 %v12501_v16 }
 0x4e3   : > { %15635 = vmatprep.subr.mxu0 %v12511_v55  ;;  %15619 = vmatmul.mubr.msk.f32.vlgmr.msra.gmra.mxu1 %vm472_vm2, %v5445_v45 }
 0x4e4   : > { %15636 = vmatpush3.msra.mxu0 %v12511_v55  ;;  %15640 = vmatprep.subr.mxu1 %v12528_v31 }
 0x4e5   : > { %15638 = vmatmul.mubr.msk.f32.vlgmr.msra.gmra.mxu0 %vm472_vm2, %v5539_v1  ;;  %15641 = vmatpush3.msra.mxu1 %v12528_v31 }
 0x4e6   : > { %15656 = vmatprep.mubr.msk.f32.mxu1 %vm472_vm2, %v5632_v62  ;;  %15659 = vmatprep.subr.mxu0 %v12538_v7 }
 0x4e7   : > { %15642 = vmatprep.subr.mxu1 %v12527_v51  ;;  %15660 = vmatpush3.msra.mxu0 %v12538_v7 }
 0x4e8   : > { %15675 = vmatprep.mubr.msk.f32.mxu0 %vm472_vm2, %v5726_v35  ;;  %15643 = vmatpush3.msra.mxu1 %v12527_v51 }
 0x4e9   : > { %15661 = vmatprep.subr.mxu0 %v12537_v41  ;;  %15644 = vmatprep.subr.mxu1 %v12526_v29 }
 0x4ea   : > { %15662 = vmatpush3.msra.mxu0 %v12537_v41  ;;  %15645 = vmatpush3.msra.mxu1 %v12526_v29 }
 0x4eb   : > { %15663 = vmatprep.subr.mxu0 %v12536_v58  ;;  %15646 = vmatprep.subr.mxu1 %v12525_v23 }
 0x4ec   : > { %15664 = vmatpush3.msra.mxu0 %v12536_v58  ;;  %15647 = vmatpush3.msra.mxu1 %v12525_v23 }
 0x4ed   : > { %15665 = vmatprep.subr.mxu0 %v12535_v14  ;;  %15648 = vmatprep.subr.mxu1 %v12524_v24 }
 0x4ee   : > { %15666 = vmatpush3.msra.mxu0 %v12535_v14  ;;  %15649 = vmatpush3.msra.mxu1 %v12524_v24 }
 0x4ef   : > { %15667 = vmatprep.subr.mxu0 %v12534_v46  ;;  %15650 = vmatprep.subr.mxu1 %v12523_v27 }
 0x4f0   : > { %15668 = vmatpush3.msra.mxu0 %v12534_v46  ;;  %15651 = vmatpush3.msra.mxu1 %v12523_v27 }
 0x4f1   : > { %15669 = vmatprep.subr.mxu0 %v12533_v40  ;;  %15652 = vmatprep.subr.mxu1 %v12522_v25 }
 0x4f2   : > { %15670 = vmatpush3.msra.mxu0 %v12533_v40  ;;  %15653 = vmatpush3.msra.mxu1 %v12522_v25 }
 0x4f3   : > { %15671 = vmatprep.subr.mxu0 %v12532_v11  ;;  %15654 = vmatprep.subr.mxu1 %v12521_v28 }
 0x4f4   : > { %15672 = vmatpush3.msra.mxu0 %v12532_v11  ;;  %15655 = vmatpush3.msra.mxu1 %v12521_v28 }
 0x4f5   : > { %15673 = vmatprep.subr.mxu0 %v12531_v12  ;;  %15657 = vmatmul.mubr.msk.f32.vlgmr.msra.gmra.mxu1 %vm472_vm2, %v5633_v4  ;;  %v12541_v4 = vld [vmem:[%s22374_s6] ss:$0 sm:$0xff] }
 0x4f6   : > { %15674 = vmatpush3.msra.mxu0 %v12531_v12  ;;  %15678 = vmatprep.subr.mxu1 %v22558_v9 }
 0x4f7   : > { %15676 = vmatmul.mubr.msk.f32.vlgmr.msra.gmra.mxu0 %vm472_vm2, %v5727_v18  ;;  %15713 = vmatprep.subr.mxu0 %v22558_v9 }
 0x4f8   : > { %15710 = vmatprep.mubr.msk.f32.mxu1 %vm17187_vm1, %v22558_v9  ;;  %15745 = vmatprep.mubr.msk.f32.mxu0 %vm17187_vm1, %v22558_v9 }
 0x4f9   : > { %15679 = vmatpush3.msra.mxu1 %v5859_v47  ;;  %15714 = vmatpush3.msra.mxu0 %v12557_v21 }
 0x4fa   : > { %15680 = vmatprep.subr.mxu1 %v22558_v9  ;;  %15715 = vmatprep.subr.mxu0 %v22558_v9 }
 0x4fb   : > { %15681 = vmatpush3.msra.mxu1 %v5858_v26  ;;  %15716 = vmatpush3.msra.mxu0 %v12556_v15 }
 0x4fc   : > { %15682 = vmatprep.subr.mxu1 %v22558_v9  ;;  %15717 = vmatprep.subr.mxu0 %v22558_v9 }
 0x4fd   : > { %15683 = vmatpush3.msra.mxu1 %v5857_v48  ;;  %15718 = vmatpush3.msra.mxu0 %v12555_v59 }
 0x4fe   : > { %15684 = vmatprep.subr.mxu1 %v22558_v9  ;;  %15719 = vmatprep.subr.mxu0 %v22558_v9 }
 0x4ff   : > { %15685 = vmatpush3.msra.mxu1 %v5856_v49  ;;  %15720 = vmatpush3.msra.mxu0 %v12554_v57 }
 0x500   : > { %15686 = vmatprep.subr.mxu1 %v22558_v9  ;;  %15721 = vmatprep.subr.mxu0 %v22558_v9 }
 0x501   : > { %15687 = vmatpush3.msra.mxu1 %v5855_v36  ;;  %15722 = vmatpush3.msra.mxu0 %v12553_v37 }
 0x502   : > { %15688 = vmatprep.subr.mxu1 %v22558_v9  ;;  %15723 = vmatprep.subr.mxu0 %v22558_v9 }
 0x503   : > { %15689 = vmatpush3.msra.mxu1 %v5854_v5  ;;  %15724 = vmatpush3.msra.mxu0 %v12552_v53 }
 0x504   : > { %15690 = vmatprep.subr.mxu1 %v22558_v9  ;;  %15725 = vmatprep.subr.mxu0 %v22558_v9 }
 0x505   : > { %15691 = vmatpush3.msra.mxu1 %v5853_v8  ;;  %15726 = vmatpush3.msra.mxu0 %v12551_v34 }
 0x506   : > { %15692 = vmatprep.subr.mxu1 %v22558_v9  ;;  %15727 = vmatprep.subr.mxu0 %v22558_v9 }
 0x507   : > { %15693 = vmatpush3.msra.mxu1 %v5852_v38  ;;  %15728 = vmatpush3.msra.mxu0 %v12550_v63  ;;  %v6025_v63 = vld [vmem:[%s22378_s10 + $0x38] sm:$0xff] }
 0x508   : > { %15694 = vmatprep.subr.mxu1 %v22558_v9  ;;  %15729 = vmatprep.subr.mxu0 %v22558_v9 }
 0x509   : > { %15695 = vmatpush3.msra.mxu1 %v5851_v0  ;;  %15730 = vmatpush3.msra.mxu0 %v12549_v44  ;;  %v12566_v0 = vld [vmem:[%s22378_s10 + $0x78] sm:$0xff]  ;;  %v6024_v44 = vld [vmem:[%s22378_s10 + $0x30] sm:$0xff] }
 0x50a   : > { %15696 = vmatprep.subr.mxu1 %v22558_v9  ;;  %15731 = vmatprep.subr.mxu0 %v22558_v9 }
 0x50b   : > { %15697 = vmatpush3.msra.mxu1 %v5850_v22  ;;  %15732 = vmatpush3.msra.mxu0 %v12548_v19  ;;  %v12565_v22 = vld [vmem:[%s22378_s10 + $0x70] sm:$0xff]  ;;  %v6023_v19 = vld [vmem:[%s22378_s10 + $0x28] sm:$0xff] }
 0x50c   : > { %15698 = vmatprep.subr.mxu1 %v22558_v9  ;;  %15733 = vmatprep.subr.mxu0 %v22558_v9 }
 0x50d   : > { %15699 = vmatpush3.msra.mxu1 %v5849_v3  ;;  %15734 = vmatpush3.msra.mxu0 %v12547_v60  ;;  %v12564_v3 = vld [vmem:[%s22378_s10 + $0x68] sm:$0xff]  ;;  %v6022_v60 = vld [vmem:[%s22378_s10 + $0x20] sm:$0xff] }
 0x50e   : > { %15700 = vmatprep.subr.mxu1 %v22558_v9  ;;  %15735 = vmatprep.subr.mxu0 %v22558_v9 }
 0x50f   : > { %15701 = vmatpush3.msra.mxu1 %v5848_v43  ;;  %15736 = vmatpush3.msra.mxu0 %v12546_v17  ;;  %v12563_v43 = vld [vmem:[%s22378_s10 + $0x60] sm:$0xff]  ;;  %v6021_v17 = vld [vmem:[%s22378_s10 + $0x18] sm:$0xff] }
 0x510   : > { %15702 = vmatprep.subr.mxu1 %v22558_v9  ;;  %15737 = vmatprep.subr.mxu0 %v22558_v9 }
 0x511   : > { %15703 = vmatpush3.msra.mxu1 %v5847_v13  ;;  %15738 = vmatpush3.msra.mxu0 %v12545_v10  ;;  %v12562_v13 = vld [vmem:[%s22378_s10 + $0x58] sm:$0xff]  ;;  %v6020_v10 = vld [vmem:[%s22378_s10 + $0x10] sm:$0xff] }
 0x512   : > { %15704 = vmatprep.subr.mxu1 %v22558_v9  ;;  %15739 = vmatprep.subr.mxu0 %v22558_v9 }
 0x513   : > { %15705 = vmatpush3.msra.mxu1 %v5846_v42  ;;  %15740 = vmatpush3.msra.mxu0 %v12544_v32  ;;  %v6019_v42 = vld [vmem:[%s22378_s10 + $0x8] sm:$0xff]  ;;  %v12561_v32 = vld [vmem:[%s22378_s10 + $0x50] sm:$0xff] }
 0x514   : > { %15706 = vmatprep.subr.mxu1 %v22558_v9  ;;  %15741 = vmatprep.subr.mxu0 %v22558_v9 }
 0x515   : > { %15707 = vmatpush3.msra.mxu1 %v5845_v54  ;;  %15742 = vmatpush3.msra.mxu0 %v12543_v61  ;;  %v6018_v54 = vld [vmem:[%s22378_s10] sm:$0xff]  ;;  %v12560_v61 = vld [vmem:[%s22378_s10 + $0x48] sm:$0xff] }
 0x516   : > { %15708 = vmatprep.subr.mxu1 %v22558_v9  ;;  %15743 = vmatprep.subr.mxu0 %v22558_v9 }
 0x517   : > { %15709 = vmatpush3.msra.mxu1 %v5844_v20  ;;  %15744 = vmatpush3.msra.mxu0 %v12542_v2  ;;  %v12559_v20 = vld [vmem:[%s22378_s10 + $0x40] sm:$0xff]  ;;  %v12606_v2 = vld [vmem:[%s22369_s1 + $0x18] sm:$0xff] }
 0x518   : > { %15748 = vmatprep.subr.mxu1 %v22558_v9  ;;  %15767 = vmatprep.subr.mxu0 %v22558_v9 }
 0x571   : > { %v15525_v33 = vpop.f32.mrf.mxu0 }
 0x572   : > { %v15544_v6 = vpop.f32.mrf.mxu1 }
 0x573   : > { %v5072_v50 = vpop.f32.mrf.mxu0  ;;  %v5159_v30 = vadd.f32 %v15544_v6, %v15525_v33 }
 0x574   : > { %v5153_v56 = vpop.f32.mrf.mxu1 }
 0x575   : > { %v5154_v55 = vadd.f32 %v5153_v56, %v5072_v50  ;;  %v6187_v56 = vld [vmem:[%s22380_s12 + $0x18] sm:$0xff] }
 0x581   : > { %v15563_v52 = vpop.f32.mrf.mxu0 }
 0x582   : > { %v5255_v31 = vadd.f32 %v15563_v52, %v5159_v30 }
 0x583   : > { %v5245_v16 = vpop.f32.mrf.mxu0 }
 0x584   : > { %v5254_v7 = vadd.f32 %v5245_v16, %v5154_v55  ;;  %v12587_v16 = vld [vmem:[%s17336_s20 + $0xb9] sm:$0xff]  ;;  %v12605_v55 = vld [vmem:[%s22369_s1 + $0x10] sm:$0xff] }
 0x592   : > { %v15582_v39 = vpop.f32.mrf.mxu1 }
 0x593   : > { %v15601_v1 = vpop.f32.mrf.mxu0  ;;  %v5349_v51 = vadd.f32 %v15582_v39, %v5255_v31  ;;  %v12588_v31 = vld [vmem:[%s17336_s20 + $0xc1] sm:$0xff] }
 0x594   : > { %v5339_v45 = vpop.f32.mrf.mxu1 }
 0x595   : > { %v5348_v41 = vadd.f32 %v5339_v45, %v5254_v7  ;;  %v5433_v35 = vpop.f32.mrf.mxu0  ;;  %v5443_v29 = vadd.f32 %v15601_v1, %v5349_v51  ;;  %v12662_v1 = vld [vmem:[%s22369_s1 + $0x28] sm:$0xff]  ;;  %v12661_v7 = vld [vmem:[%s22369_s1 + $0x20] sm:$0xff]  ;;  %v12590_v51 = vld [vmem:[%s17336_s20 + $0xd1] sm:$0xff] }
 0x596   : > { %v12589_v45 = vld [vmem:[%s17336_s20 + $0xc9] sm:$0xff] }
 0x597   : > { %v5442_v14 = vadd.f32 %v5433_v35, %v5348_v41  ;;  %v12592_v41 = vld [vmem:[%s17336_s20 + $0xe1] sm:$0xff]  ;;  %v12593_v35 = vld [vmem:[%s17336_s20 + $0xe9] sm:$0xff] }
 0x5a3   : > { %v15620_v62 = vpop.f32.mrf.mxu1 }
 0x5a4   : > { %v5537_v24 = vadd.f32 %v15620_v62, %v5443_v29  ;;  %v12591_v62 = vld [vmem:[%s17336_s20 + $0xd9] sm:$0xff]  ;;  %v12594_v29 = vld [vmem:[%s17336_s20 + $0xf1] sm:$0xff] }
 0x5a5   : > { %v15639_v58 = vpop.f32.mrf.mxu0  ;;  %v5527_v23 = vpop.f32.mrf.mxu1 }
 0x5a6   : > { %v5536_v46 = vadd.f32 %v5527_v23, %v5442_v14  ;;  %v5631_v40 = vadd.f32 %v15639_v58, %v5537_v24  ;;  %v12595_v58 = vld [vmem:[%s17336_s20 + $0xf9] sm:$0xff]  ;;  %v12596_v23 = vld [vmem:[%s17336_s20 + $0x101] sm:$0xff]  ;;  %v12597_v14 = vld [vmem:[%s17336_s20 + $0x109] sm:$0xff] }
 0x5a7   : > { %v5621_v27 = vpop.f32.mrf.mxu0  ;;  %v12598_v24 = vld [vmem:[%s17336_s20 + $0x111] sm:$0xff] }
 0x5a8   : > { %v5630_v11 = vadd.f32 %v5621_v27, %v5536_v46  ;;  %v12599_v46 = vld [vmem:[%s17336_s20 + $0x119] sm:$0xff]  ;;  %v12600_v27 = vld [vmem:[%s17336_s20 + $0x121] sm:$0xff] }
 0x5b5   : > { %v15658_v25 = vpop.f32.mrf.mxu1 }
 0x5b6   : > { %v5725_v28 = vadd.f32 %v15658_v25, %v5631_v40  ;;  %v6186_v40 = vld [vmem:[%s22380_s12 + $0x10] sm:$0xff] }
 0x5b7   : > { %v15677_v12 = vpop.f32.mrf.mxu0  ;;  %v5715_v18 = vpop.f32.mrf.mxu1  ;;  %v12601_v25 = vld [vmem:[%s17336_s20 + $0x129] sm:$0xff] }
 0x5b8   : > { %v5819_v47 = vadd.f32 %v15677_v12, %v5725_v28  ;;  %v5724_v21 = vadd.f32 %v5715_v18, %v5630_v11  ;;  %v12602_v11 = vld [vmem:[%s17336_s20 + $0x131] sm:$0xff]  ;;  %v6185_v28 = vld [vmem:[%s22380_s12 + $0x8] sm:$0xff]  ;;  %v6184_v12 = vld [vmem:[%s22380_s12] sm:$0xff] }
 0x5b9   : > { %v5809_v26 = vpop.f32.mrf.mxu0  ;;  %v19804_v18 = vld [vmem:[%s22369_s1 + $0x8] sm:$0xff] }
 0x5ba   : > { %v5828_v15 = vadd.f32 %v12541_v4, %v5819_v47  ;;  %v5818_v48 = vadd.f32 %v5809_v26, %v5724_v21  ;;  %v12604_v47 = vld [vmem:[%s17336_s20 + $0x141] sm:$0x3f] }
 0x5bb   : > { %v12643_v21 = vld [vmem:[%s17336_s20 + $0xba] sm:$0xff]  ;;  %v12644_v26 = vld [vmem:[%s17336_s20 + $0xc2] sm:$0xff] }
 0x5bc   : > { %v5830_v59 = vmax.f32 %v5828_v15, 0.0  ;;  %v5827_v49 = vadd.f32 %v12541_v4, %v5818_v48  ;;  %v12603_v4 = vld [vmem:[%s17336_s20 + $0x139] sm:$0xff]  ;;  %v12738_v15 = vld [vmem:[%s22369_s1 + $0x48] sm:$0xff] }
 0x5bd   : > { %v19819_v48 = vld [vmem:[%s17336_s20 + $0xca] sm:$0xff] }
 0x5be   : > { %5832 = vst [vmem:[#allocation6 + $0x8] sm:$0x3] %v5830_v59  ;;  %v5829_v57 = vmax.f32 %v5827_v49, 0.0  ;;  %v19824_v59 = vld [vmem:[%s17336_s20 + $0xd2] sm:$0xff]  ;;  %v19829_v49 = vld [vmem:[%s17336_s20 + $0xda] sm:$0xff] }
 0x5c0   : > { %5831 = vst [vmem:[#allocation6] sm:$0xff] %v5829_v57  ;;  %v19834_v57 = vld [vmem:[%s17336_s20 + $0xe2] sm:$0xff] }
 0x5c7   : > { %v5834_v36 = vld [vmem:[#allocation6] ss:$2 sm:$0x3]  ;;  %v5836_v37 = vld [vmem:[#allocation6 + $0x1] ss:$2 sm:$0x3] }
 0x5c8   : > { %v5837_v5 = vmax.f32 %v5834_v36, %v5836_v37  ;;  %v5839_v53 = vld [vmem:[#allocation6 + $0x6] ss:$2 sm:$0x3]  ;;  %v5842_v34 = vld [vmem:[#allocation6 + $0x7] ss:$2 sm:$0x3] }
 0x5c9   : > { %v19839_v36 = vld [vmem:[%s17336_s20 + $0xea] sm:$0xff]  ;;  %v19844_v37 = vld [vmem:[%s17336_s20 + $0xf2] sm:$0xff] }
 0x5ca   : > { %v5840_v8 = vmax.f32 %v5837_v5, %v5839_v53  ;;  %v19849_v5 = vld [vmem:[%s17336_s20 + $0xfa] sm:$0xff]  ;;  %v19854_v53 = vld [vmem:[%s17336_s20 + $0x102] sm:$0xff] }
 0x5cc   : > { %v5843_v38 = vmax.f32 %v5840_v8, %v5842_v34  ;;  %v19859_v8 = vld [vmem:[%s17336_s20 + $0x10a] sm:$0xff]  ;;  %v12737_v34 = vld [vmem:[%s22369_s1 + $0x40] sm:$0xff] }
 0x5ce   : > { %15711 = vmatmul.mubr.f32.vlgmr.msra.gmra.mxu1 %v5843_v38  ;;  %15746 = vmatmul.mubr.f32.vlgmr.msra.gmra.mxu0 %v5843_v38  ;;  %v19867_v38 = vld [vmem:[%s17336_s20 + $0x112] sm:$0xff] }
 0x5cf   : > { %15749 = vmatpush3.msra.mxu1 %v6025_v63  ;;  %15768 = vmatpush3.msra.mxu0 %v12566_v0  ;;  %v19872_v63 = vld [vmem:[%s17336_s20 + $0x11a] sm:$0xff]  ;;  %v19877_v0 = vld [vmem:[%s17336_s20 + $0x122] sm:$0xff] }
 0x5d0   : > { %15750 = vmatprep.subr.mxu1 %v22558_v9  ;;  %15769 = vmatprep.subr.mxu0 %v22558_v9 }
 0x5d1   : > { %15751 = vmatpush3.msra.mxu1 %v6024_v44  ;;  %15770 = vmatpush3.msra.mxu0 %v12565_v22  ;;  %v19882_v44 = vld [vmem:[%s17336_s20 + $0x12a] sm:$0xff]  ;;  %v19887_v22 = vld [vmem:[%s17336_s20 + $0x132] sm:$0xff] }
 0x5d2   : > { %15752 = vmatprep.subr.mxu1 %v22558_v9  ;;  %15771 = vmatprep.subr.mxu0 %v22558_v9 }
 0x5d3   : > { %15753 = vmatpush3.msra.mxu1 %v6023_v19  ;;  %15772 = vmatpush3.msra.mxu0 %v12564_v3  ;;  %v19892_v19 = vld [vmem:[%s17336_s20 + $0x13a] sm:$0xff]  ;;  %v12660_v3 = vld [vmem:[%s17336_s20 + $0x142] sm:$0x3f] }
 0x5d4   : > { %15754 = vmatprep.subr.mxu1 %v22558_v9  ;;  %15773 = vmatprep.subr.mxu0 %v22558_v9 }
 0x5d5   : > { %15755 = vmatpush3.msra.mxu1 %v6022_v60  ;;  %15774 = vmatpush3.msra.mxu0 %v12563_v43  ;;  %v12719_v60 = vld [vmem:[%s17336_s20 + $0xcb] sm:$0xff]  ;;  %v12720_v43 = vld [vmem:[%s17336_s20 + $0xd3] sm:$0xff] }
 0x5d6   : > { %15756 = vmatprep.subr.mxu1 %v22558_v9  ;;  %15775 = vmatprep.subr.mxu0 %v22558_v9 }
 0x5d7   : > { %15757 = vmatpush3.msra.mxu1 %v6021_v17  ;;  %15776 = vmatpush3.msra.mxu0 %v12562_v13  ;;  %v12814_v17 = vld [vmem:[%s22369_s1 + $0x68] sm:$0xff]  ;;  %v12721_v13 = vld [vmem:[%s17336_s20 + $0xdb] sm:$0xff] }
 0x5d8   : > { %15758 = vmatprep.subr.mxu1 %v22558_v9  ;;  %15777 = vmatprep.subr.mxu0 %v22558_v9 }
 0x5d9   : > { %15759 = vmatpush3.msra.mxu1 %v6020_v10  ;;  %15764 = vmatprep.mubr.msk.f32.mxu1 %vm17187_vm1, %v22558_v9  ;;  %v12722_v10 = vld [vmem:[%s17336_s20 + $0xe3] sm:$0xff] }
 0x5da   : > { %15760 = vmatprep.subr.mxu1 %v22558_v9  ;;  %15783 = vmatprep.mubr.msk.f32.mxu0 %vm17187_vm1, %v22558_v9 }
 0x5db   : > { %15761 = vmatpush3.msra.mxu1 %v6019_v42  ;;  %15778 = vmatpush3.msra.mxu0 %v12561_v32  ;;  %v12723_v42 = vld [vmem:[%s17336_s20 + $0xeb] sm:$0xff]  ;;  %v12724_v32 = vld [vmem:[%s17336_s20 + $0xf3] sm:$0xff] }
 0x5dc   : > { %15762 = vmatprep.subr.mxu1 %v22558_v9  ;;  %15779 = vmatprep.subr.mxu0 %v22558_v9 }
 0x5dd   : > { %15763 = vmatpush3.msra.mxu1 %v6018_v54  ;;  %15780 = vmatpush3.msra.mxu0 %v12560_v61  ;;  %v12725_v54 = vld [vmem:[%s17336_s20 + $0xfb] sm:$0xff]  ;;  %v12726_v61 = vld [vmem:[%s17336_s20 + $0x103] sm:$0xff] }
 0x5de   : > { %15781 = vmatprep.subr.mxu0 %v22558_v9  ;;  %15786 = vmatprep.subr.mxu1 %v22558_v9 }
 0x5df   : > { %15782 = vmatpush3.msra.mxu0 %v12559_v20  ;;  %v12727_v20 = vld [vmem:[%s17336_s20 + $0x10b] sm:$0xff] }
 0x5e0   : > { %15797 = vmatprep.subr.mxu0 %v12606_v2 }
 0x68e   : > { %v5926_v33 = vpop.f32.mrf.mxu1  ;;  %v6013_v6 = vpop.f32.mrf.mxu0 }
 0x68f   : > { %v6017_v50 = vmax.f32 %v5926_v33, %v6013_v6  ;;  %v12729_v33 = vld [vmem:[%s17336_s20 + $0x11b] sm:$0xff] }
 0x690   : > { %v15712_v52 = vpop.f32.mrf.mxu1  ;;  %v15747_v39 = vpop.f32.mrf.mxu0  ;;  %v12813_v6 = vld [vmem:[%s22369_s1 + $0x60] sm:$0xff] }
 0x691   : > { %v6109_v30 = vrot.slane %v6017_v50, 1  ;;  %15765 = vmatmul.mubr.msk.f32.vlgmr.msra.gmra.mxu1 %vm472_vm2, %v6017_v50  ;;  %v12730_v50 = vld [vmem:[%s17336_s20 + $0x123] sm:$0xff]  ;;  %v12732_v52 = vld [vmem:[%s17336_s20 + $0x133] sm:$0xff]  ;;  %v12733_v39 = vld [vmem:[%s17336_s20 + $0x13b] sm:$0xff] }
 0x692   : > { %15787 = vmatpush3.msra.mxu1 %v6187_v56  ;;  %15794 = vmatprep.mubr.msk.f32.mxu1 %vm17187_vm1, %v22558_v9  ;;  %v12731_v56 = vld [vmem:[%s17336_s20 + $0x12b] sm:$0xff] }
 0x693   : > { %15784 = vmatmul.mubr.msk.f32.vlgmr.msra.gmra.mxu0 %vm472_vm2, %v6109_v30  ;;  %15788 = vmatprep.subr.mxu1 %v22558_v9  ;;  %v12734_v30 = vld [vmem:[%s17336_s20 + $0x143] sm:$0xff] }
 0x694   : > { %15798 = vmatpush3.msra.mxu0 %v12606_v2  ;;  %15801 = vmatprep.mubr.msk.f32.mxu0 %vm526_vm0, %v12587_v16  ;;  %v12728_v2 = vld [vmem:[%s17336_s20 + $0x113] sm:$0xff]  ;;  %v12735_v16 = vld [vmem:[%s17336_s20 + $0x14b] sm:$0xff] }
 0x695   : > { %15799 = vmatprep.subr.mxu0 %v12605_v55  ;;  %15789 = vmatpush3.msra.mxu1 %v6186_v40  ;;  %v20013_v40 = vld [vmem:[%s17336_s20 + $0x144] sm:$0xff] }
 0x696   : > { %15800 = vmatpush3.msra.mxu0 %v12605_v55  ;;  %15790 = vmatprep.subr.mxu1 %v22558_v9  ;;  %v12736_v55 = vld [vmem:[%s17336_s20 + $0x153] sm:$0x3f] }
 0x697   : > { %15802 = vmatmul.mubr.msk.f32.vlgmr.msra.gmra.mxu0 %vm526_vm0, %v12588_v31  ;;  %15859 = vmatprep.subr.mxu0 %v12662_v1  ;;  %v19941_v31 = vld [vmem:[%s17336_s20 + $0xdc] sm:$0xff] }
 0x698   : > { %15860 = vmatpush3.msra.mxu0 %v12662_v1  ;;  %15804 = vmatprep.mubr.msk.f32.mxu0 %vm526_vm0, %v12589_v45  ;;  %v19946_v1 = vld [vmem:[%s17336_s20 + $0xe4] sm:$0xff] }
 0x699   : > { %15861 = vmatprep.subr.mxu0 %v12661_v7  ;;  %15791 = vmatpush3.msra.mxu1 %v6185_v28  ;;  %v12890_v45 = vld [vmem:[%s22369_s1 + $0x88] sm:$0xff]  ;;  %v12811_v28 = vld [vmem:[%s17336_s20 + $0x15c] sm:$0xff] }
 0x69a   : > { %15862 = vmatpush3.msra.mxu0 %v12661_v7  ;;  %15792 = vmatprep.subr.mxu1 %v22558_v9  ;;  %v19954_v7 = vld [vmem:[%s17336_s20 + $0xec] sm:$0xff] }
 0x69b   : > { %15805 = vmatmul.mubr.msk.f32.gmra.mxu0 %vm526_vm0, %v12590_v51  ;;  %15793 = vmatpush3.msra.mxu1 %v6184_v12  ;;  %v19959_v51 = vld [vmem:[%s17336_s20 + $0xf4] sm:$0xff]  ;;  %v12812_v12 = vld [vmem:[%s17336_s20 + $0x164] sm:$0x3f] }
 0x69c   : > { %15807 = vmatprep.mubr.msk.f32.mxu0 %vm526_vm0, %v12591_v62  ;;  %15828 = vmatprep.subr.mxu1 %v19804_v18  ;;  %v19964_v62 = vld [vmem:[%s17336_s20 + $0xfc] sm:$0xff] }
 0x69d   : > { %15921 = vmatprep.subr.mxu0 %v12738_v15 }
 0x69f   : > { %15808 = vmatmul.mubr.msk.f32.gmra.mxu0 %vm526_vm0, %v12592_v41  ;;  %v19969_v41 = vld [vmem:[%s17336_s20 + $0x104] sm:$0xff] }
 0x6a0   : > { %15810 = vmatprep.mubr.msk.f32.mxu0 %vm526_vm0, %v12593_v35  ;;  %v19974_v35 = vld [vmem:[%s17336_s20 + $0x10c] sm:$0xff] }
 0x6a3   : > { %15811 = vmatmul.mubr.msk.f32.gmra.mxu0 %vm526_vm0, %v12594_v29  ;;  %v19979_v29 = vld [vmem:[%s17336_s20 + $0x114] sm:$0xff] }
 0x6a4   : > { %15813 = vmatprep.mubr.msk.f32.mxu0 %vm526_vm0, %v12595_v58  ;;  %v19984_v58 = vld [vmem:[%s17336_s20 + $0x11c] sm:$0xff] }
 0x6a7   : > { %15814 = vmatmul.mubr.msk.f32.gmra.mxu0 %vm526_vm0, %v12596_v23  ;;  %v19989_v23 = vld [vmem:[%s17336_s20 + $0x124] sm:$0xff] }
 0x6a8   : > { %15816 = vmatprep.mubr.msk.f32.mxu0 %vm526_vm0, %v12597_v14  ;;  %v19994_v14 = vld [vmem:[%s17336_s20 + $0x12c] sm:$0xff] }
 0x6ab   : > { %15817 = vmatmul.mubr.msk.f32.gmra.mxu0 %vm526_vm0, %v12598_v24  ;;  %v12889_v24 = vld [vmem:[%s22369_s1 + $0x80] sm:$0xff] }
 0x6ac   : > { %15819 = vmatprep.mubr.msk.f32.mxu0 %vm526_vm0, %v12599_v46  ;;  %v20002_v46 = vld [vmem:[%s17336_s20 + $0x134] sm:$0xff] }
 0x6af   : > { %15820 = vmatmul.mubr.msk.f32.gmra.mxu0 %vm526_vm0, %v12600_v27  ;;  %v20008_v27 = vld [vmem:[%s17336_s20 + $0x13c] sm:$0xff] }
 0x6b0   : > { %15822 = vmatprep.mubr.msk.f32.mxu0 %vm526_vm0, %v12601_v25  ;;  %v20018_v25 = vld [vmem:[%s17336_s20 + $0x14c] sm:$0xff] }
 0x6b3   : > { %15823 = vmatmul.mubr.msk.f32.gmra.mxu0 %vm526_vm0, %v12602_v11  ;;  %v12810_v11 = vld [vmem:[%s17336_s20 + $0x154] sm:$0xff] }
 0x6b4   : > { %15825 = vmatprep.mubr.msk.f32.mxu0 %vm526_vm0, %v12603_v4  ;;  %v12871_v4 = vld [vmem:[%s17336_s20 + $0xde] sm:$0xff] }
 0x6b7   : > { %15826 = vmatmul.mubr.msk.f32.gmra.mxu0 %vm526_vm0, %v12604_v47  ;;  %v12872_v47 = vld [vmem:[%s17336_s20 + $0xe6] sm:$0xff] }
 0x6b8   : > { %15863 = vmatprep.mubr.msk.f32.mxu0 %vm526_vm0, %v12643_v21  ;;  %v12873_v21 = vld [vmem:[%s17336_s20 + $0xee] sm:$0xff] }
 0x6bb   : > { %15864 = vmatmul.mubr.msk.f32.vlgmr.msra.gmra.mxu0 %vm526_vm0, %v12644_v26  ;;  %v12874_v26 = vld [vmem:[%s17336_s20 + $0xf6] sm:$0xff] }
 0x6bc   : > { %15866 = vmatprep.mubr.msk.f32.mxu0 %vm526_vm0, %v19819_v48  ;;  %15922 = vmatpush3.msra.mxu0 %v12738_v15  ;;  %v12875_v15 = vld [vmem:[%s17336_s20 + $0xfe] sm:$0xff] }
 0x6bd   : > { %15923 = vmatprep.subr.mxu0 %v12737_v34 }
 0x6be   : > { %15924 = vmatpush3.msra.mxu0 %v12737_v34  ;;  %v5833_v34 = vld [vmem:[%s22379_s11] sm:$0x1] }
 0x6bf   : > { %15867 = vmatmul.mubr.msk.f32.gmra.mxu0 %vm526_vm0, %v19824_v59  ;;  %15983 = vmatprep.subr.mxu0 %v12814_v17 }
 0x6c0   : > { %15869 = vmatprep.mubr.msk.f32.mxu0 %vm526_vm0, %v19829_v49 }
 0x6c3   : > { %15870 = vmatmul.mubr.msk.f32.gmra.mxu0 %vm526_vm0, %v19834_v57 }
 0x6c4   : > { %15872 = vmatprep.mubr.msk.f32.mxu0 %vm526_vm0, %v19839_v36 }
 0x6c7   : > { %15873 = vmatmul.mubr.msk.f32.gmra.mxu0 %vm526_vm0, %v19844_v37 }
 0x6c8   : > { %15875 = vmatprep.mubr.msk.f32.mxu0 %vm526_vm0, %v19849_v5 }
 0x6cb   : > { %15876 = vmatmul.mubr.msk.f32.gmra.mxu0 %vm526_vm0, %v19854_v53 }
 0x6cc   : > { %15878 = vmatprep.mubr.msk.f32.mxu0 %vm526_vm0, %v19859_v8 }
 0x6cf   : > { %15879 = vmatmul.mubr.msk.f32.gmra.mxu0 %vm526_vm0, %v19867_v38 }
 0x6d0   : > { %15881 = vmatprep.mubr.msk.f32.mxu0 %vm526_vm0, %v19872_v63 }
 0x6d3   : > { %15882 = vmatmul.mubr.msk.f32.gmra.mxu0 %vm526_vm0, %v19877_v0 }
 0x6d4   : > { %15884 = vmatprep.mubr.msk.f32.mxu0 %vm526_vm0, %v19882_v44 }
 0x6d7   : > { %15885 = vmatmul.mubr.msk.f32.gmra.mxu0 %vm526_vm0, %v19887_v22 }
 0x6d8   : > { %15887 = vmatprep.mubr.msk.f32.mxu0 %vm526_vm0, %v19892_v19 }
 0x6db   : > { %15888 = vmatmul.mubr.msk.f32.gmra.mxu0 %vm526_vm0, %v12660_v3  ;;  %v12876_v3 = vld [vmem:[%s17336_s20 + $0x106] sm:$0xff] }
 0x6dc   : > { %15925 = vmatprep.mubr.msk.f32.mxu0 %vm526_vm0, %v12719_v60 }
 0x6df   : > { %15926 = vmatmul.mubr.msk.f32.vlgmr.msra.gmra.mxu0 %vm526_vm0, %v12720_v43 }
 0x6e0   : > { %15928 = vmatprep.mubr.msk.f32.mxu0 %vm526_vm0, %v12721_v13  ;;  %15984 = vmatpush3.msra.mxu0 %v12814_v17 }
 0x6e1   : > { %15985 = vmatprep.subr.mxu0 %v12813_v6 }
 0x6e2   : > { %15986 = vmatpush3.msra.mxu0 %v12813_v6  ;;  %v12880_v6 = vld [vmem:[%s17336_s20 + $0x126] sm:$0xff] }
 0x6e3   : > { %15929 = vmatmul.mubr.msk.f32.gmra.mxu0 %vm526_vm0, %v12722_v10  ;;  %16045 = vmatprep.subr.mxu0 %v12890_v45 }
 0x6e4   : > { %15931 = vmatprep.mubr.msk.f32.mxu0 %vm526_vm0, %v12723_v42  ;;  %v12877_v42 = vld [vmem:[%s17336_s20 + $0x10e] sm:$0xff] }
 0x6e7   : > { %15932 = vmatmul.mubr.msk.f32.gmra.mxu0 %vm526_vm0, %v12724_v32  ;;  %v12878_v32 = vld [vmem:[%s17336_s20 + $0x116] sm:$0xff] }
 0x6e8   : > { %15934 = vmatprep.mubr.msk.f32.mxu0 %vm526_vm0, %v12725_v54 }
 0x6eb   : > { %15935 = vmatmul.mubr.msk.f32.gmra.mxu0 %vm526_vm0, %v12726_v61 }
 0x6ec   : > { %15937 = vmatprep.mubr.msk.f32.mxu0 %vm526_vm0, %v12727_v20  ;;  %v12569_v20 = vld [vmem:[%s17336_s20 + $0xb8] sm:$0xff] }
 0x6ef   : > { %15938 = vmatmul.mubr.msk.f32.gmra.mxu0 %vm526_vm0, %v12728_v2  ;;  %v6284_v2 = vld [vmem:[%s22369_s1] sm:$0xff] }
 0x6f0   : > { %15940 = vmatprep.mubr.msk.f32.mxu0 %vm526_vm0, %v12729_v33  ;;  %v12879_v33 = vld [vmem:[%s17336_s20 + $0x11e] sm:$0xff] }
 0x6f3   : > { %15941 = vmatmul.mubr.msk.f32.gmra.mxu0 %vm526_vm0, %v12730_v50  ;;  %v12700_v50 = vld [vmem:[%s22369_s1 + $0x38] sm:$0xff] }
 0x6f4   : > { %15943 = vmatprep.mubr.msk.f32.mxu0 %vm526_vm0, %v12731_v56  ;;  %v12570_v56 = vld [vmem:[%s17336_s20 + $0xc0] sm:$0xff] }
 0x6f7   : > { %15944 = vmatmul.mubr.msk.f32.gmra.mxu0 %vm526_vm0, %v12732_v52  ;;  %v12571_v52 = vld [vmem:[%s17336_s20 + $0xc8] sm:$0xff] }
 0x6f8   : > { %15946 = vmatprep.mubr.msk.f32.mxu0 %vm526_vm0, %v12733_v39  ;;  %v12699_v39 = vld [vmem:[%s22369_s1 + $0x30] sm:$0xff] }
 0x6fb   : > { %15947 = vmatmul.mubr.msk.f32.gmra.mxu0 %vm526_vm0, %v12734_v30  ;;  %v12882_v30 = vld [vmem:[%s17336_s20 + $0x136] sm:$0xff] }
 0x6fc   : > { %15949 = vmatprep.mubr.msk.f32.mxu0 %vm526_vm0, %v12735_v16  ;;  %v12572_v16 = vld [vmem:[%s17336_s20 + $0xd0] sm:$0xff] }
 0x6ff   : > { %15950 = vmatmul.mubr.msk.f32.gmra.mxu0 %vm526_vm0, %v12736_v55  ;;  %v12776_v55 = vld [vmem:[%s22369_s1 + $0x58] sm:$0xff] }
 0x700   : > { %15987 = vmatprep.mubr.msk.f32.mxu0 %vm526_vm0, %v19941_v31 }
 0x703   : > { %15988 = vmatmul.mubr.msk.f32.vlgmr.msra.gmra.mxu0 %vm526_vm0, %v19946_v1 }
 0x704   : > { %15990 = vmatprep.mubr.msk.f32.mxu0 %vm526_vm0, %v19954_v7  ;;  %16046 = vmatpush3.msra.mxu0 %v12890_v45  ;;  %v12573_v45 = vld [vmem:[%s17336_s20 + $0xd8] sm:$0xff] }
 0x705   : > { %16047 = vmatprep.subr.mxu0 %v12889_v24 }
 0x706   : > { %16048 = vmatpush3.msra.mxu0 %v12889_v24  ;;  %v12883_v24 = vld [vmem:[%s17336_s20 + $0x13e] sm:$0xff] }
 0x707   : > { %15991 = vmatmul.mubr.msk.f32.gmra.mxu0 %vm526_vm0, %v19959_v51  ;;  %16146 = vmatprep.subr.mxu0 %v22558_v9 }
 0x708   : > { %15993 = vmatprep.mubr.msk.f32.mxu0 %vm526_vm0, %v19964_v62 }
 0x70b   : > { %15994 = vmatmul.mubr.msk.f32.gmra.mxu0 %vm526_vm0, %v19969_v41 }
 0x70c   : > { %15996 = vmatprep.mubr.msk.f32.mxu0 %vm526_vm0, %v19974_v35 }
 0x70f   : > { %15997 = vmatmul.mubr.msk.f32.gmra.mxu0 %vm526_vm0, %v19979_v29 }
 0x710   : > { %15999 = vmatprep.mubr.msk.f32.mxu0 %vm526_vm0, %v19984_v58 }
 0x713   : > { %16000 = vmatmul.mubr.msk.f32.gmra.mxu0 %vm526_vm0, %v19989_v23 }
 0x714   : > { %16002 = vmatprep.mubr.msk.f32.mxu0 %vm526_vm0, %v19994_v14 }
 0x717   : > { %16003 = vmatmul.mubr.msk.f32.gmra.mxu0 %vm526_vm0, %v20002_v46 }
 0x718   : > { %16005 = vmatprep.mubr.msk.f32.mxu0 %vm526_vm0, %v20008_v27 }
 0x71b   : > { %16006 = vmatmul.mubr.msk.f32.gmra.mxu0 %vm526_vm0, %v20013_v40 }
 0x71c   : > { %16008 = vmatprep.mubr.msk.f32.mxu0 %vm526_vm0, %v20018_v25 }
 0x71f   : > { %16009 = vmatmul.mubr.msk.f32.gmra.mxu0 %vm526_vm0, %v12810_v11  ;;  %v12884_v11 = vld [vmem:[%s17336_s20 + $0x146] sm:$0xff] }
 0x720   : > { %16011 = vmatprep.mubr.msk.f32.mxu0 %vm526_vm0, %v12811_v28  ;;  %v12574_v28 = vld [vmem:[%s17336_s20 + $0xe0] sm:$0xff] }
 0x723   : > { %16012 = vmatmul.mubr.msk.f32.gmra.mxu0 %vm526_vm0, %v12812_v12  ;;  %v12575_v12 = vld [vmem:[%s17336_s20 + $0xe8] sm:$0xff] }
 0x724   : > { %16049 = vmatprep.mubr.msk.f32.mxu0 %vm526_vm0, %v12871_v4  ;;  %v12885_v4 = vld [vmem:[%s17336_s20 + $0x14e] sm:$0xff] }
 0x727   : > { %16050 = vmatmul.mubr.msk.f32.vlgmr.msra.gmra.mxu0 %vm526_vm0, %v12872_v47  ;;  %v12886_v47 = vld [vmem:[%s17336_s20 + $0x156] sm:$0xff] }
 0x728   : > { %16052 = vmatprep.mubr.msk.f32.mxu0 %vm526_vm0, %v12873_v21  ;;  %v12576_v21 = vld [vmem:[%s17336_s20 + $0xf0] sm:$0xff] }
 0x72b   : > { %16053 = vmatmul.mubr.msk.f32.gmra.mxu0 %vm526_vm0, %v12874_v26  ;;  %v12577_v26 = vld [vmem:[%s17336_s20 + $0xf8] sm:$0xff] }
 0x72c   : > { %16055 = vmatprep.mubr.msk.f32.mxu0 %vm526_vm0, %v12875_v15  ;;  %v12887_v15 = vld [vmem:[%s17336_s20 + $0x15e] sm:$0xff] }
 0x72f   : > { %16056 = vmatmul.mubr.msk.f32.gmra.mxu0 %vm526_vm0, %v12876_v3 }
 0x730   : > { %16058 = vmatprep.mubr.msk.f32.mxu0 %vm526_vm0, %v12877_v42  ;;  %v12581_v42 = vld [vmem:[%s17336_s20 + $0x118] sm:$0xff] }
 0x733   : > { %16059 = vmatmul.mubr.msk.f32.gmra.mxu0 %vm526_vm0, %v12878_v32 }
 0x734   : > { %16061 = vmatprep.mubr.msk.f32.mxu0 %vm526_vm0, %v12879_v33  ;;  %v12584_v33 = vld [vmem:[%s17336_s20 + $0x130] sm:$0xff] }
 0x737   : > { %16062 = vmatmul.mubr.msk.f32.gmra.mxu0 %vm526_vm0, %v12880_v6 }
 0x751   : > { %v6095_v60 = vpop.f32.mrf.mxu1 }
 0x752   : > { %v6099_v43 = vadd.f32 %v6095_v60, %v5833_v34  ;;  %v12888_v34 = vld [vmem:[%s17336_s20 + $0x166] sm:$0x3f] }
 0x753   : > { %v15766_v17 = vpop.f32.mrf.mxu1  ;;  %v6178_v13 = vpop.f32.mrf.mxu0  ;;  %v12578_v60 = vld [vmem:[%s17336_s20 + $0x100] sm:$0xff] }
 0x754   : > { %v6182_v10 = vadd.f32 %v6178_v13, %v6099_v43  ;;  %v12579_v43 = vld [vmem:[%s17336_s20 + $0x108] sm:$0xff] }
 0x755   : > { %v15785_v54 = vpop.f32.mrf.mxu0 }
 0x756   : > { %v6183_v61 = vmax.f32 %v6182_v10, 0.0  ;;  %v12580_v10 = vld [vmem:[%s17336_s20 + $0x110] sm:$0xff] }
 0x757   : > { %v20096_v3 = vpop.f32.mrf.mxu0 }
 0x758   : > { %15795 = vmatmul.mubr.msk.f32.vlgmr.msra.gmra.mxu1 %vm6189_vm4, %v6183_v61  ;;  %v12582_v61 = vld [vmem:[%s17336_s20 + $0x120] sm:$0xff] }
 0x759   : > { %15829 = vmatpush3.msra.mxu1 %v19804_v18  ;;  %15832 = vmatprep.mubr.msk.f32.mxu1 %vm526_vm0, %v12569_v20  ;;  %v12881_v18 = vld [vmem:[%s17336_s20 + $0x12e] sm:$0xff]  ;;  %v20102_v17 = vpop.f32.mrf.mxu0 }
 0x75a   : > { %15830 = vmatprep.subr.mxu1 %v6284_v2  ;;  %16064 = vmatprep.mubr.msk.f32.mxu0 %vm526_vm0, %v12881_v18  ;;  %v12583_v20 = vld [vmem:[%s17336_s20 + $0x128] sm:$0xff]  ;;  %v12775_v18 = vld [vmem:[%s22369_s1 + $0x50] sm:$0xff] }
 0x75b   : > { %15831 = vmatpush3.msra.mxu1 %v6284_v2  ;;  %16065 = vmatmul.mubr.msk.f32.gmra.mxu0 %vm526_vm0, %v12882_v30  ;;  %v20106_v13 = vpop.f32.mrf.mxu0  ;;  %v12852_v30 = vld [vmem:[%s22369_s1 + $0x78] sm:$0xff] }
 0x75c   : > { %15890 = vmatprep.subr.mxu1 %v12700_v50  ;;  %15833 = vmatmul.mubr.msk.f32.vlgmr.msra.gmra.mxu1 %vm526_vm0, %v12570_v56  ;;  %v12586_v56 = vld [vmem:[%s17336_s20 + $0x140] sm:$0x3f] }
 0x75d   : > { %15891 = vmatpush3.msra.mxu1 %v12700_v50  ;;  %15835 = vmatprep.mubr.msk.f32.mxu1 %vm526_vm0, %v12571_v52  ;;  %v20113_v32 = vpop.f32.mrf.mxu0  ;;  %v12585_v50 = vld [vmem:[%s17336_s20 + $0x138] sm:$0xff] }
 0x75e   : > { %15892 = vmatprep.subr.mxu1 %v12699_v39  ;;  %16067 = vmatprep.mubr.msk.f32.mxu0 %vm526_vm0, %v12883_v24 }
 0x75f   : > { %15893 = vmatpush3.msra.mxu1 %v12699_v39  ;;  %16068 = vmatmul.mubr.msk.f32.gmra.mxu0 %vm526_vm0, %v12884_v11  ;;  %v20116_v54 = vpop.f32.mrf.mxu0 }
 0x760   : > { %15836 = vmatmul.mubr.msk.f32.gmra.mxu1 %vm526_vm0, %v12572_v16  ;;  %15952 = vmatprep.subr.mxu1 %v12776_v55 }
 0x761   : > { %15838 = vmatprep.mubr.msk.f32.mxu1 %vm526_vm0, %v12573_v45  ;;  %16070 = vmatprep.mubr.msk.f32.mxu0 %vm526_vm0, %v12885_v4  ;;  %v20121_v2 = vpop.f32.mrf.mxu0  ;;  %v12851_v45 = vld [vmem:[%s22369_s1 + $0x70] sm:$0xff]  ;;  %v12838_v4 = vld [vmem:[%s17336_s20 + $0x105] sm:$0xff] }
 0x763   : > { %16071 = vmatmul.mubr.msk.f32.gmra.mxu0 %vm526_vm0, %v12886_v47  ;;  %v20126_v6 = vpop.f32.mrf.mxu0  ;;  %v12839_v47 = vld [vmem:[%s17336_s20 + $0x10d] sm:$0xff] }
 0x764   : > { %15839 = vmatmul.mubr.msk.f32.gmra.mxu1 %vm526_vm0, %v12574_v28  ;;  %16073 = vmatprep.mubr.msk.f32.mxu0 %vm526_vm0, %v12887_v15  ;;  %v12841_v15 = vld [vmem:[%s17336_s20 + $0x11d] sm:$0xff] }
 0x765   : > { %15841 = vmatprep.mubr.msk.f32.mxu1 %vm526_vm0, %v12575_v12  ;;  %v20132_v52 = vpop.f32.mrf.mxu0 }
 0x767   : > { %16074 = vmatmul.mubr.msk.f32.gmra.mxu0 %vm526_vm0, %v12888_v34  ;;  %v20137_v39 = vpop.f32.mrf.mxu0 }
 0x768   : > { %15842 = vmatmul.mubr.msk.f32.gmra.mxu1 %vm526_vm0, %v12576_v21  ;;  %16178 = vmatprep.mubr.msk.f32.mxu0 %vm17187_vm1, %v22558_v9 }
 0x769   : > { %15844 = vmatprep.mubr.msk.f32.mxu1 %vm526_vm0, %v12577_v26  ;;  %v20149_v16 = vpop.f32.mrf.mxu0  ;;  %v12840_v26 = vld [vmem:[%s17336_s20 + $0x115] sm:$0xff] }
 0x76a   : > { %22601 = vst [vmem:[#allocation44_spill] sm:$0xff] %v20149_v16 }
 0x76c   : > { %15845 = vmatmul.mubr.msk.f32.gmra.mxu1 %vm526_vm0, %v12578_v60  ;;  %v12842_v60 = vld [vmem:[%s17336_s20 + $0x125] sm:$0xff] }
 0x76d   : > { %15847 = vmatprep.mubr.msk.f32.mxu1 %vm526_vm0, %v12579_v43  ;;  %v12843_v43 = vld [vmem:[%s17336_s20 + $0x12d] sm:$0xff] }
 0x770   : > { %15848 = vmatmul.mubr.msk.f32.gmra.mxu1 %vm526_vm0, %v12580_v10 }
 0x771   : > { %15850 = vmatprep.mubr.msk.f32.mxu1 %vm526_vm0, %v12581_v42  ;;  %v12844_v42 = vld [vmem:[%s17336_s20 + $0x135] sm:$0xff] }
 0x774   : > { %15851 = vmatmul.mubr.msk.f32.gmra.mxu1 %vm526_vm0, %v12582_v61  ;;  %v12845_v61 = vld [vmem:[%s17336_s20 + $0x13d] sm:$0xff] }
 0x775   : > { %15853 = vmatprep.mubr.msk.f32.mxu1 %vm526_vm0, %v12583_v20 }
 0x778   : > { %15854 = vmatmul.mubr.msk.f32.gmra.mxu1 %vm526_vm0, %v12584_v33  ;;  %v12846_v33 = vld [vmem:[%s17336_s20 + $0x145] sm:$0xff] }
 0x779   : > { %15856 = vmatprep.mubr.msk.f32.mxu1 %vm526_vm0, %v12585_v50  ;;  %v12847_v50 = vld [vmem:[%s17336_s20 + $0x14d] sm:$0xff] }
 0x77c   : > { %15857 = vmatmul.mubr.msk.f32.gmra.mxu1 %vm526_vm0, %v12586_v56 }
 0x77d   : > { %15894 = vmatprep.mubr.msk.f32.mxu1 %vm526_vm0, %v19819_v48  ;;  %v20155_v48 = vpop.f32.mrf.mxu0 }
 0x780   : > { %15895 = vmatmul.mubr.msk.f32.vlgmr.msra.gmra.mxu1 %vm526_vm0, %v19824_v59  ;;  %v20161_v59 = vpop.f32.mrf.mxu0 }
 0x781   : > { %15953 = vmatpush3.msra.mxu1 %v12776_v55  ;;  %15897 = vmatprep.mubr.msk.f32.mxu1 %vm526_vm0, %v19829_v49  ;;  %22602 = vst [vmem:[#allocation43_spill] sm:$0xff] %v20161_v59 }
 0x782   : > { %15954 = vmatprep.subr.mxu1 %v12775_v18  ;;  %v20167_v49 = vpop.f32.mrf.mxu0 }
 0x783   : > { %15955 = vmatpush3.msra.mxu1 %v12775_v18  ;;  %v12848_v18 = vld [vmem:[%s17336_s20 + $0x155] sm:$0xff] }
 0x784   : > { %15898 = vmatmul.mubr.msk.f32.gmra.mxu1 %vm526_vm0, %v19834_v57  ;;  %16014 = vmatprep.subr.mxu1 %v12852_v30  ;;  %v20173_v57 = vpop.f32.mrf.mxu0 }
 0x785   : > { %15900 = vmatprep.mubr.msk.f32.mxu1 %vm526_vm0, %v19839_v36  ;;  %22603 = vst [vmem:[#allocation62_spill] sm:$0xff] %v20173_v57 }
 0x786   : > { %v20179_v36 = vpop.f32.mrf.mxu0 }
 0x788   : > { %15901 = vmatmul.mubr.msk.f32.gmra.mxu1 %vm526_vm0, %v19844_v37  ;;  %v20181_v37 = vpop.f32.mrf.mxu0 }
 0x789   : > { %15903 = vmatprep.mubr.msk.f32.mxu1 %vm526_vm0, %v19849_v5  ;;  %22604 = vst [vmem:[#allocation26_spill] sm:$0xff] %v20181_v37  ;;  %v12696_v5 = vld [vmem:[%s17336_s20 + $0x142] sm:$0xff] }
 0x78c   : > { %15904 = vmatmul.mubr.msk.f32.gmra.mxu1 %vm526_vm0, %v19854_v53  ;;  %v20188_v53 = vpop.f32.mrf.mxu0 }
 0x78d   : > { %15906 = vmatprep.mubr.msk.f32.mxu1 %vm526_vm0, %v19859_v8  ;;  %v12697_v8 = vld [vmem:[%s17336_s20 + $0x14a] sm:$0xff] }
 0x790   : > { %15907 = vmatmul.mubr.msk.f32.gmra.mxu1 %vm526_vm0, %v19867_v38  ;;  %v20191_v38 = vpop.f32.mrf.mxu0 }
 0x791   : > { %15909 = vmatprep.mubr.msk.f32.mxu1 %vm526_vm0, %v19872_v63  ;;  %v12698_v63 = vld [vmem:[%s17336_s20 + $0x152] sm:$0x3f] }
 0x794   : > { %15910 = vmatmul.mubr.msk.f32.gmra.mxu1 %vm526_vm0, %v19877_v0  ;;  %v20196_v0 = vpop.f32.mrf.mxu0 }
 0x795   : > { %15912 = vmatprep.mubr.msk.f32.mxu1 %vm526_vm0, %v19882_v44  ;;  %v12757_v44 = vld [vmem:[%s17336_s20 + $0xcc] sm:$0xff] }
 0x796   : > { %v20199_v55 = vpop.f32.mrf.mxu0 }
 0x798   : > { %15913 = vmatmul.mubr.msk.f32.gmra.mxu1 %vm526_vm0, %v19887_v22  ;;  %v12758_v22 = vld [vmem:[%s17336_s20 + $0xd4] sm:$0xff] }
 0x799   : > { %15915 = vmatprep.mubr.msk.f32.mxu1 %vm526_vm0, %v19892_v19  ;;  %v20204_v19 = vpop.f32.mrf.mxu0 }
 0x79b   : > { %v20209_v24 = vpop.f32.mrf.mxu0 }
 0x79c   : > { %15916 = vmatmul.mubr.msk.f32.gmra.mxu1 %vm526_vm0, %v12696_v5 }
 0x79d   : > { %15918 = vmatprep.mubr.msk.f32.mxu1 %vm526_vm0, %v12697_v8  ;;  %v20214_v11 = vpop.f32.mrf.mxu0  ;;  %v12850_v8 = vld [vmem:[%s17336_s20 + $0x165] sm:$0x3f] }
 0x79f   : > { %v20216_v28 = vpop.f32.mrf.mxu0 }
 0x7a0   : > { %15919 = vmatmul.mubr.msk.f32.gmra.mxu1 %vm526_vm0, %v12698_v63 }
 0x7a1   : > { %15956 = vmatprep.mubr.msk.f32.mxu1 %vm526_vm0, %v12757_v44  ;;  %v20223_v12 = vpop.f32.mrf.mxu0 }
 0x7a4   : > { %15957 = vmatmul.mubr.msk.f32.vlgmr.msra.gmra.mxu1 %vm526_vm0, %v12758_v22 }
 0x7a5   : > { %16015 = vmatpush3.msra.mxu1 %v12852_v30  ;;  %15959 = vmatprep.mubr.msk.f32.mxu1 %vm526_vm0, %v19941_v31  ;;  %v20227_v31 = vpop.f32.mrf.mxu0  ;;  %v12849_v30 = vld [vmem:[%s17336_s20 + $0x15d] sm:$0xff] }
 0x7a6   : > { %16016 = vmatprep.subr.mxu1 %v12851_v45  ;;  %22605 = vst [vmem:[#allocation27_spill] sm:$0xff] %v20227_v31 }
 0x7a7   : > { %16017 = vmatpush3.msra.mxu1 %v12851_v45 }
 0x7a8   : > { %15960 = vmatmul.mubr.msk.f32.gmra.mxu1 %vm526_vm0, %v19946_v1  ;;  %16076 = vmatprep.subr.mxu1 %v22558_v9  ;;  %v20233_v1 = vpop.f32.mrf.mxu0 }
 0x7a9   : > { %15962 = vmatprep.mubr.msk.f32.mxu1 %vm526_vm0, %v19954_v7 }
 0x7aa   : > { %v20239_v7 = vpop.f32.mrf.mxu0 }
 0x7ab   : > { %22606 = vst [vmem:[#allocation46_spill] sm:$0xff] %v20239_v7 }
 0x7ac   : > { %15963 = vmatmul.mubr.msk.f32.gmra.mxu1 %vm526_vm0, %v19959_v51  ;;  %v20245_v51 = vpop.f32.mrf.mxu0 }
 0x7ad   : > { %15965 = vmatprep.mubr.msk.f32.mxu1 %vm526_vm0, %v19964_v62 }
 0x7ae   : > { %v20251_v62 = vpop.f32.mrf.mxu0 }
 0x7af   : > { %22607 = vst [vmem:[#allocation49_spill] sm:$0xff] %v20251_v62 }
 0x7b0   : > { %15966 = vmatmul.mubr.msk.f32.gmra.mxu1 %vm526_vm0, %v19969_v41  ;;  %v20257_v41 = vpop.f32.mrf.mxu0 }
 0x7b1   : > { %15968 = vmatprep.mubr.msk.f32.mxu1 %vm526_vm0, %v19974_v35  ;;  %v12774_v35 = vld [vmem:[%s17336_s20 + $0x154] sm:$0x3f] }
 0x7b4   : > { %15969 = vmatmul.mubr.msk.f32.gmra.mxu1 %vm526_vm0, %v19979_v29  ;;  %v12833_v29 = vld [vmem:[%s17336_s20 + $0xdd] sm:$0xff] }
 0x7b5   : > { %15971 = vmatprep.mubr.msk.f32.mxu1 %vm526_vm0, %v19984_v58  ;;  %v20264_v58 = vpop.f32.mrf.mxu0 }
 0x7b6   : > { %22608 = vst [vmem:[#allocation37_spill] sm:$0xff] %v20264_v58 }
 0x7b8   : > { %15972 = vmatmul.mubr.msk.f32.gmra.mxu1 %vm526_vm0, %v19989_v23  ;;  %v12834_v23 = vld [vmem:[%s17336_s20 + $0xe5] sm:$0xff] }
 0x7b9   : > { %15974 = vmatprep.mubr.msk.f32.mxu1 %vm526_vm0, %v19994_v14  ;;  %v12835_v14 = vld [vmem:[%s17336_s20 + $0xed] sm:$0xff] }
 0x7bc   : > { %15975 = vmatmul.mubr.msk.f32.gmra.mxu1 %vm526_vm0, %v20002_v46  ;;  %v20270_v46 = vpop.f32.mrf.mxu0 }
 0x7bd   : > { %15977 = vmatprep.mubr.msk.f32.mxu1 %vm526_vm0, %v20008_v27  ;;  %v12836_v27 = vld [vmem:[%s17336_s20 + $0xf5] sm:$0xff] }
 0x7c0   : > { %15978 = vmatmul.mubr.msk.f32.gmra.mxu1 %vm526_vm0, %v20013_v40  ;;  %v12837_v40 = vld [vmem:[%s17336_s20 + $0xfd] sm:$0xff]  ;;  %s17124_s20 = scalar_lea.vmem %s22317_s26, 32 }
 0x7c1   : > { %15980 = vmatprep.mubr.msk.f32.mxu1 %vm526_vm0, %v20018_v25  ;;  %v20276_v25 = vpop.f32.mrf.mxu0  ;;  %p17125_p11 = scmp.ne.s32.totalorder %s22317_s26, %s17124_s20  ;;  %p17132_p1 = scmp.lt.s32.totalorder %s17130_s18, %s17124_s20 }
 0x7c2   : > { %22609 = vst [vmem:[#allocation38_spill] sm:$0xff] %v20276_v25 }
 0x7c3   : > { %v20282_v21 = vpop.f32.mrf.mxu0  ;;  %p17126_p12 = pnand %p17125_p11, %p17304_p5  ;;  %p17133_p2 = por %p17132_p1, %p17131_p0 }
 0x7c4   : > { %15981 = vmatmul.mubr.msk.f32.gmra.mxu1 %vm526_vm0, %v12774_v35 }
 0x7c5   : > { %16018 = vmatprep.mubr.msk.f32.mxu1 %vm526_vm0, %v12833_v29  ;;  %v20288_v34 = vpop.f32.mrf.mxu0  ;;  %p17127_p13 = pneg %p17126_p12 }
 0x7c7   : > { %v20294_v10 = vpop.f32.mrf.mxu0  ;;  %p17134_p3 = pnand %p17133_p2, %p17127_p13 }
 0x7c8   : > { %16019 = vmatmul.mubr.msk.f32.vlgmr.msra.gmra.mxu1 %vm526_vm0, %v12834_v23 }
 0x7c9   : > { %16021 = vmatprep.mubr.msk.f32.mxu1 %vm526_vm0, %v12835_v14  ;;  %v20300_v20 = vpop.f32.mrf.mxu0 }
 0x7cb   : > { %v20306_v56 = vpop.f32.mrf.mxu0 }
 0x7cc   : > { %16022 = vmatmul.mubr.msk.f32.gmra.mxu1 %vm526_vm0, %v12836_v27  ;;  %v20338_v27 = vld [vmem:[%s22375_s7 + $0x78] sm:$0xff] }
 0x7cd   : > { %16024 = vmatprep.mubr.msk.f32.mxu1 %vm526_vm0, %v12837_v40  ;;  %v20312_v5 = vpop.f32.mrf.mxu0  ;;  %22614 = vst [vmem:[#allocation53_spill] sm:$0xff] %v20338_v27  ;;  %16077 = vmatpush3.msra.mxu1 %v20338_v27 }
 0x7ce   : > { %16147 = vmatpush3.msra.mxu0 %v20338_v27  ;;  %16078 = vmatprep.subr.mxu1 %v22558_v9 }
 0x7cf   : > { %v20317_v63 = vpop.f32.mrf.mxu0  ;;  %16148 = vmatprep.subr.mxu0 %v22558_v9 }
 0x7d0   : > { %16025 = vmatmul.mubr.msk.f32.gmra.mxu1 %vm526_vm0, %v12838_v4  ;;  %v20349_v4 = vld [vmem:[%s22375_s7 + $0x70] sm:$0xff] }
 0x7d1   : > { %16027 = vmatprep.mubr.msk.f32.mxu1 %vm526_vm0, %v12839_v47  ;;  %v20321_v44 = vpop.f32.mrf.mxu0  ;;  %22615 = vst [vmem:[#allocation39_spill] sm:$0xff] %v20349_v4  ;;  %16079 = vmatpush3.msra.mxu1 %v20349_v4  ;;  %v20357_v47 = vld [vmem:[%s22375_s7 + $0x68] sm:$0xff] }
 0x7d2   : > { %22610 = vst [vmem:[#allocation48_spill] sm:$0xff] %v20321_v44  ;;  %16149 = vmatpush3.msra.mxu0 %v20349_v4  ;;  %16080 = vmatprep.subr.mxu1 %v22558_v9  ;;  %22616 = vst [vmem:[#allocation52_spill] sm:$0xff] %v20357_v47 }
 0x7d3   : > { %v20323_v22 = vpop.f32.mrf.mxu0  ;;  %16150 = vmatprep.subr.mxu0 %v22558_v9  ;;  %16081 = vmatpush3.msra.mxu1 %v20357_v47 }
 0x7d4   : > { %16028 = vmatmul.mubr.msk.f32.gmra.mxu1 %vm526_vm0, %v12840_v26  ;;  %16151 = vmatpush3.msra.mxu0 %v20357_v47 }
 0x7d5   : > { %16030 = vmatprep.mubr.msk.f32.mxu1 %vm526_vm0, %v12841_v15  ;;  %v20325_v45 = vpop.f32.mrf.mxu0  ;;  %16082 = vmatprep.subr.mxu1 %v22558_v9  ;;  %v20368_v15 = vld [vmem:[%s22375_s7 + $0x60] sm:$0xff] }
 0x7d6   : > { %22611 = vst [vmem:[#allocation47_spill] sm:$0xff] %v20325_v45  ;;  %22618 = vst [vmem:[#allocation54_spill] sm:$0xff] %v20368_v15  ;;  %16152 = vmatprep.subr.mxu0 %v22558_v9  ;;  %16083 = vmatpush3.msra.mxu1 %v20368_v15 }
 0x7d7   : > { %v20327_v35 = vpop.f32.mrf.mxu0  ;;  %16153 = vmatpush3.msra.mxu0 %v20368_v15  ;;  %16084 = vmatprep.subr.mxu1 %v22558_v9 }
 0x7d8   : > { %16031 = vmatmul.mubr.msk.f32.gmra.mxu1 %vm526_vm0, %v12842_v60  ;;  %v20377_v60 = vld [vmem:[%s22375_s7 + $0x58] sm:$0xff]  ;;  %16154 = vmatprep.subr.mxu0 %v22558_v9 }
 0x7d9   : > { %16033 = vmatprep.mubr.msk.f32.mxu1 %vm526_vm0, %v12843_v43  ;;  %v20329_v29 = vpop.f32.mrf.mxu0  ;;  %22619 = vst [vmem:[#allocation57_spill] sm:$0xff] %v20377_v60  ;;  %16085 = vmatpush3.msra.mxu1 %v20377_v60 }
 0x7da   : > { %22612 = vst [vmem:[#allocation63_spill] sm:$0xff] %v20329_v29  ;;  %16155 = vmatpush3.msra.mxu0 %v20377_v60  ;;  %16086 = vmatprep.subr.mxu1 %v22558_v9 }
 0x7db   : > { %v20331_v23 = vpop.f32.mrf.mxu0  ;;  %16156 = vmatprep.subr.mxu0 %v22558_v9 }
 0x7dc   : > { %16034 = vmatmul.mubr.msk.f32.gmra.mxu1 %vm526_vm0, %v12844_v42  ;;  %v20388_v42 = vld [vmem:[%s22375_s7 + $0x50] sm:$0xff] }
 0x7dd   : > { %16036 = vmatprep.mubr.msk.f32.mxu1 %vm526_vm0, %v12845_v61  ;;  %v20333_v14 = vpop.f32.mrf.mxu0  ;;  %22620 = vst [vmem:[#allocation56_spill] sm:$0xff] %v20388_v42  ;;  %16087 = vmatpush3.msra.mxu1 %v20388_v42  ;;  %v20398_v61 = vld [vmem:[%s22375_s7 + $0x48] sm:$0xff] }
 0x7de   : > { %22613 = vst [vmem:[#allocation50_spill] sm:$0xff] %v20333_v14  ;;  %16157 = vmatpush3.msra.mxu0 %v20388_v42  ;;  %16088 = vmatprep.subr.mxu1 %v22558_v9  ;;  %22621 = vst [vmem:[#allocation55_spill] sm:$0xff] %v20398_v61 }
 0x7df   : > { %v20344_v40 = vpop.f32.mrf.mxu0  ;;  %16158 = vmatprep.subr.mxu0 %v22558_v9  ;;  %16089 = vmatpush3.msra.mxu1 %v20398_v61 }
 0x7e0   : > { %16037 = vmatmul.mubr.msk.f32.gmra.mxu1 %vm526_vm0, %v12846_v33  ;;  %16159 = vmatpush3.msra.mxu0 %v20398_v61 }
 0x7e1   : > { %16039 = vmatprep.mubr.msk.f32.mxu1 %vm526_vm0, %v12847_v50  ;;  %v20360_v26 = vpop.f32.mrf.mxu0  ;;  %16090 = vmatprep.subr.mxu1 %v22558_v9  ;;  %v20411_v50 = vld [vmem:[%s22375_s7 + $0x40] sm:$0xff] }
 0x7e2   : > { %22617 = vst [vmem:[#allocation51_spill] sm:$0xff] %v20360_v26  ;;  %22623 = vst [vmem:[#allocation13_spill] sm:$0xff] %v20411_v50  ;;  %16160 = vmatprep.subr.mxu0 %v22558_v9  ;;  %16091 = vmatpush3.msra.mxu1 %v20411_v50 }
 0x7e3   : > { %v20380_v43 = vpop.f32.mrf.mxu0  ;;  %16161 = vmatpush3.msra.mxu0 %v20411_v50  ;;  %16092 = vmatprep.subr.mxu1 %v22558_v9  ;;  %v20434_v50 = vld [vmem:[%s22375_s7 + $0x30] sm:$0xff] }
 0x7e4   : > { %16040 = vmatmul.mubr.msk.f32.gmra.mxu1 %vm526_vm0, %v12848_v18  ;;  %v6188_v18 = vld [vmem:[%s22381_s13] sm:$0x1]  ;;  %16162 = vmatprep.subr.mxu0 %v22558_v9  ;;  %22625 = vst [vmem:[#allocation15_spill] sm:$0xff] %v20434_v50 }
 0x7e5   : > { %16042 = vmatprep.mubr.msk.f32.mxu1 %vm526_vm0, %v12849_v30  ;;  %v20401_v33 = vpop.f32.mrf.mxu0  ;;  %v20423_v30 = vld [vmem:[%s22375_s7 + $0x38] sm:$0xff] }
 0x7e6   : > { %22622 = vst [vmem:[#allocation58_spill] sm:$0xff] %v20401_v33  ;;  %22624 = vst [vmem:[#allocation14_spill] sm:$0xff] %v20423_v30  ;;  %16093 = vmatpush3.msra.mxu1 %v20423_v30  ;;  %16163 = vmatpush3.msra.mxu0 %v20423_v30 }
 0x7e7   : > { %v20426_v61 = vpop.f32.mrf.mxu0  ;;  %16094 = vmatprep.subr.mxu1 %v22558_v9  ;;  %16164 = vmatprep.subr.mxu0 %v22558_v9 }
 0x7e8   : > { %16043 = vmatmul.mubr.msk.f32.gmra.mxu1 %vm526_vm0, %v12850_v8  ;;  %16165 = vmatpush3.msra.mxu0 %v20434_v50 }
 0x7e9   : > { %16108 = vmatprep.mubr.msk.f32.mxu1 %vm17187_vm1, %v22558_v9  ;;  %16095 = vmatpush3.msra.mxu1 %v20434_v50 }
 0x7ea   : > { %16096 = vmatprep.subr.mxu1 %v22558_v9  ;;  %16166 = vmatprep.subr.mxu0 %v22558_v9 }
 0x818   : > { %v6259_v8 = vpop.f32.mrf.mxu1 }
 0x819   : > { %v6260_v42 = vadd.f32 %v6259_v8, %v6188_v18  ;;  %v20447_v18 = vld [vmem:[%s22375_s7 + $0x28] sm:$0xff] }
 0x81a   : > { %v15796_v60 = vpop.f32.mrf.mxu1  ;;  %22626 = vst [vmem:[#allocation16_spill] sm:$0xff] %v20447_v18  ;;  %16097 = vmatpush3.msra.mxu1 %v20447_v18  ;;  %16167 = vmatpush3.msra.mxu0 %v20447_v18  ;;  %v20469_v18 = vld [vmem:[%s22375_s7 + $0x18] sm:$0xff] }
 0x81b   : > { %6264 = vst.msk [vmem:[%s20439_s21] sm:$0x1] %vm6263_vm5, %v6260_v42  ;;  %v20450_v60 = vpop.f32.mrf.mxu0  ;;  %16098 = vmatprep.subr.mxu1 %v22558_v9  ;;  %v20458_v42 = vld [vmem:[%s22375_s7 + $0x20] sm:$0xff]  ;;  %16168 = vmatprep.subr.mxu0 %v22558_v9  ;;  %22628 = vst [vmem:[#allocation18_spill] sm:$0xff] %v20469_v18 }
 0x81c   : > { %v15834_v8 = vpop.f32.mrf.mxu1  ;;  %22627 = vst [vmem:[#allocation17_spill] sm:$0xff] %v20458_v42  ;;  %16099 = vmatpush3.msra.mxu1 %v20458_v42  ;;  %16169 = vmatpush3.msra.mxu0 %v20458_v42  ;;  %v20480_v42 = vld [vmem:[%s22375_s7 + $0x10] sm:$0xff] }
 0x81d   : > { %16100 = vmatprep.subr.mxu1 %v22558_v9  ;;  %16170 = vmatprep.subr.mxu0 %v22558_v9  ;;  %v20472_v15 = vpop.f32.mrf.mxu0  ;;  %22630 = vst [vmem:[#allocation20_spill] sm:$0xff] %v20480_v42  ;;  %v6641_v44 = vadd.f32 %v15834_v8, %v20096_v3 }
 0x81e   : > { %v20461_v50 = vpop.f32.mrf.mxu1  ;;  %22629 = vst [vmem:[#allocation19_spill] sm:$0xff] %v20472_v15  ;;  %16101 = vmatpush3.msra.mxu1 %v20469_v18  ;;  %16171 = vmatpush3.msra.mxu0 %v20469_v18  ;;  %v20491_v18 = vld [vmem:[%s22375_s7 + $0x8] sm:$0xff] }
 0x81f   : > { %16102 = vmatprep.subr.mxu1 %v22558_v9  ;;  %16172 = vmatprep.subr.mxu0 %v22558_v9  ;;  %22631 = vst [vmem:[#allocation21_spill] sm:$0xff] %v20491_v18  ;;  %v20494_v27 = vpop.f32.mrf.mxu0 }
 0x820   : > { %v15837_v30 = vpop.f32.mrf.mxu1  ;;  %16103 = vmatpush3.msra.mxu1 %v20480_v42  ;;  %16173 = vmatpush3.msra.mxu0 %v20480_v42  ;;  %22632 = vst [vmem:[#allocation24_spill] sm:$0xff] %v20494_v27  ;;  %v20502_v42 = vld [vmem:[%s22375_s7] sm:$0xff] }
 0x821   : > { %16104 = vmatprep.subr.mxu1 %v22558_v9  ;;  %16174 = vmatprep.subr.mxu0 %v22558_v9  ;;  %22633 = vst [vmem:[#allocation25_spill] sm:$0xff] %v20502_v42  ;;  %v20511_v26 = vpop.f32.mrf.mxu0 }
 0x822   : > { %v20483_v47 = vpop.f32.mrf.mxu1  ;;  %16105 = vmatpush3.msra.mxu1 %v20491_v18  ;;  %16175 = vmatpush3.msra.mxu0 %v20491_v18  ;;  %22634 = vst [vmem:[#allocation28_spill] sm:$0xff] %v20511_v26 }
 0x823   : > { %16106 = vmatprep.subr.mxu1 %v22558_v9  ;;  %16176 = vmatprep.subr.mxu0 %v22558_v9  ;;  %v20515_v37 = vpop.f32.mrf.mxu0 }
 0x824   : > { %v15840_v4 = vpop.f32.mrf.mxu1  ;;  %16107 = vmatpush3.msra.mxu1 %v20502_v42  ;;  %16177 = vmatpush3.msra.mxu0 %v20502_v42  ;;  %22635 = vst [vmem:[#allocation29_spill] sm:$0xff] %v20515_v37 }
 0x825   : > { %16111 = vmatprep.subr.mxu1 %v22558_v9  ;;  %16216 = vmatprep.subr.mxu0 %v22558_v9  ;;  %v20519_v57 = vpop.f32.mrf.mxu0 }
 0x826   : > { %v20505_v33 = vpop.f32.mrf.mxu1  ;;  %22637 = vst [vmem:[#allocation31_spill] sm:$0xff] %v20519_v57  ;;  %v6954_v57 = vadd.f32 %v20196_v0, %v6641_v44 }
 0x827   : > { %v20523_v45 = vpop.f32.mrf.mxu0 }
 0x828   : > { %v15843_v18 = vpop.f32.mrf.mxu1  ;;  %22639 = vst [vmem:[#allocation33_spill] sm:$0xff] %v20523_v45 }
 0x829   : > { %v20527_v7 = vpop.f32.mrf.mxu0  ;;  %v6671_v44 = vadd.f32 %v15843_v18, %v20126_v6 }
 0x82a   : > { %v20513_v25 = vpop.f32.mrf.mxu1  ;;  %22641 = vst [vmem:[#allocation41_spill] sm:$0xff] %v20527_v7 }
 0x82b   : > { %v20532_v27 = vpop.f32.mrf.mxu0 }
 0x82c   : > { %v15846_v14 = vpop.f32.mrf.mxu1  ;;  %22643 = vst [vmem:[#allocation61_spill] sm:$0xff] %v20532_v27 }
 0x82d   : > { %v20536_v31 = vpop.f32.mrf.mxu0 }
 0x82e   : > { %v20517_v58 = vpop.f32.mrf.mxu1 }
 0x82f   : > { %22636 = vst [vmem:[#allocation30_spill] sm:$0xff] %v20517_v58  ;;  %v20545_v27 = vpop.f32.mrf.mxu0 }
 0x830   : > { %v15849_v29 = vpop.f32.mrf.mxu1 }
 0x832   : > { %v20521_v62 = vpop.f32.mrf.mxu1 }
 0x833   : > { %22638 = vst [vmem:[#allocation32_spill] sm:$0xff] %v20521_v62  ;;  %v6651_v62 = vadd.f32 %v15837_v30, %v20106_v13 }
 0x834   : > { %v15852_v42 = vpop.f32.mrf.mxu1 }
 0x835   : > { %v6956_v7 = vadd.f32 %v20204_v19, %v6651_v62  ;;  %v20554_v19 = vpop.f32.mrf.mxu0 }
 0x836   : > { %v20525_v59 = vpop.f32.mrf.mxu1 }
 0x837   : > { %22640 = vst [vmem:[#allocation34_spill] sm:$0xff] %v20525_v59 }
 0x838   : > { %v15855_v9 = vpop.f32.mrf.mxu1 }
 0x83a   : > { %v20529_v26 = vpop.f32.mrf.mxu1 }
 0x83b   : > { %22642 = vst [vmem:[#allocation40_spill] sm:$0xff] %v20529_v26  ;;  %v6661_v26 = vadd.f32 %v15840_v4, %v20116_v54 }
 0x83c   : > { %v15858_v37 = vpop.f32.mrf.mxu1 }
 0x83d   : > { %v6958_v13 = vadd.f32 %v20214_v11, %v6661_v26  ;;  %v20563_v11 = vpop.f32.mrf.mxu0 }
 0x83e   : > { %v6715_v58 = vpop.f32.mrf.mxu1 }
 0x840   : > { %v15896_v16 = vpop.f32.mrf.mxu1 }
 0x841   : > { %v7201_v45 = vadd.f32 %v15896_v16, %v6954_v57 }
 0x842   : > { %v20538_v59 = vpop.f32.mrf.mxu1 }
 0x843   : > { %v20543_v3 = vadd.f32 %v20294_v10, %v7201_v45  ;;  %v6960_v10 = vadd.f32 %v20223_v12, %v6671_v44  ;;  %v6681_v45 = vadd.f32 %v15846_v14, %v20137_v39  ;;  %v20572_v12 = vpop.f32.mrf.mxu0 }
 0x844   : > { %v15899_v8 = vpop.f32.mrf.mxu1 }
 0x845   : > { %v7203_v15 = vadd.f32 %v15899_v8, %v6956_v7  ;;  %v6701_v8 = vadd.f32 %v15852_v42, %v20167_v49 }
 0x846   : > { %v20547_v0 = vpop.f32.mrf.mxu1 }
 0x847   : > { %v20552_v16 = vadd.f32 %v20306_v56, %v7203_v15  ;;  %v6962_v56 = vadd.f32 %v20233_v1, %v6681_v45  ;;  %v6691_v15 = vadd.f32 %v15849_v29, %v20155_v48  ;;  %v20581_v1 = vpop.f32.mrf.mxu0  ;;  %v6721_v45 = vadd.f32 %v15858_v37, %v20188_v53 }
 0x848   : > { %v15902_v57 = vpop.f32.mrf.mxu1 }
 0x849   : > { %v7205_v54 = vadd.f32 %v15902_v57, %v6958_v13  ;;  %v6711_v57 = vadd.f32 %v15855_v9, %v20179_v36  ;;  %v6716_v9 = vadd.f32 %v6715_v58, %v20191_v38 }
 0x84a   : > { %v20556_v62 = vpop.f32.mrf.mxu1 }
 0x84b   : > { %v20561_v7 = vadd.f32 %v20317_v63, %v7205_v54  ;;  %v6964_v63 = vadd.f32 %v20245_v51, %v6691_v15  ;;  %v20590_v51 = vpop.f32.mrf.mxu0  ;;  %v6969_v37 = vadd.f32 %v20288_v34, %v6716_v9 }
 0x84c   : > { %v15905_v4 = vpop.f32.mrf.mxu1  ;;  %22644 = vst [vmem:[#allocation59_spill] sm:$0xff] %v20590_v51 }
 0x84d   : > { %v7207_v6 = vadd.f32 %v15905_v4, %v6960_v10 }
 0x84e   : > { %v20565_v26 = vpop.f32.mrf.mxu1 }
 0x84f   : > { %v20570_v30 = vadd.f32 %v20323_v22, %v7207_v6  ;;  %v6966_v22 = vadd.f32 %v20257_v41, %v6701_v8  ;;  %v20599_v41 = vpop.f32.mrf.mxu0 }
 0x850   : > { %v15908_v18 = vpop.f32.mrf.mxu1  ;;  %22645 = vst [vmem:[#allocation22_spill] sm:$0xff] %v20599_v41 }
 0x851   : > { %v7209_v39 = vadd.f32 %v15908_v18, %v6962_v56  ;;  %v6970_v56 = vadd.f32 %v20282_v21, %v6721_v45 }
 0x852   : > { %v20574_v14 = vpop.f32.mrf.mxu1 }
 0x853   : > { %v20579_v13 = vadd.f32 %v20327_v35, %v7209_v39  ;;  %v6968_v35 = vadd.f32 %v20270_v46, %v6711_v57  ;;  %v20608_v46 = vpop.f32.mrf.mxu0 }
 0x854   : > { %v15911_v44 = vpop.f32.mrf.mxu1  ;;  %22646 = vst [vmem:[#allocation23_spill] sm:$0xff] %v20608_v46 }
 0x855   : > { %v7211_v48 = vadd.f32 %v15911_v44, %v6964_v63  ;;  %v20614_v58 = vpop.f32.mrf.mxu0 }
 0x856   : > { %v20583_v29 = vpop.f32.mrf.mxu1  ;;  %22648 = vst [vmem:[#allocation45_spill] sm:$0xff] %v20614_v58 }
 0x857   : > { %v20588_v54 = vadd.f32 %v20331_v23, %v7211_v48  ;;  %v16051_v44 = vpop.f32.mrf.mxu0 }
 0x858   : > { %v15914_v10 = vpop.f32.mrf.mxu1 }
 0x859   : > { %v7213_v49 = vadd.f32 %v15914_v10, %v6966_v22  ;;  %v8346_v57 = vpop.f32.mrf.mxu0 }
 0x85a   : > { %v20592_v42 = vpop.f32.mrf.mxu1 }
 0x85b   : > { %v20597_v4 = vadd.f32 %v20344_v40, %v7213_v49  ;;  %v20619_v49 = vpop.f32.mrf.mxu0 }
 0x85c   : > { %v15917_v6 = vpop.f32.mrf.mxu1 }
 0x85d   : > { %v7215_v36 = vadd.f32 %v15917_v6, %v6968_v35  ;;  %v20625_v45 = vpop.f32.mrf.mxu0 }
 0x85e   : > { %v20602_v23 = vpop.f32.mrf.mxu1 }
 0x85f   : > { %v20606_v15 = vadd.f32 %v20380_v43, %v7215_v36  ;;  %v20631_v9 = vpop.f32.mrf.mxu0  ;;  %v6636_v36 = vadd.f32 %v20461_v50, %v20102_v17  ;;  %v6656_v17 = vadd.f32 %v20505_v33, %v20121_v2 }
 0x860   : > { %v15920_v18 = vpop.f32.mrf.mxu1 }
 0x861   : > { %v7217_v53 = vadd.f32 %v15920_v18, %v6970_v56 }
 0x862   : > { %v7191_v40 = vpop.f32.mrf.mxu1 }
 0x863   : > { %v20612_v39 = vadd.f32 %v20426_v61, %v7217_v53  ;;  %v7216_v63 = vadd.f32 %v7191_v40, %v6969_v37  ;;  %v20639_v37 = vpop.f32.mrf.mxu0  ;;  %v6953_v53 = vadd.f32 %v20199_v55, %v6636_v36  ;;  %v6646_v40 = vadd.f32 %v20483_v47, %v20113_v32 }
 0x864   : > { %v15958_v38 = vpop.f32.mrf.mxu1  ;;  %v6957_v36 = vadd.f32 %v20216_v28, %v6656_v17  ;;  %v22656_v17 = vld [vmem:[#allocation30_spill] sm:$0xff] }
 0x865   : > { %22647 = vst [vmem:[#allocation42_spill] sm:$0xff] %v20612_v39  ;;  %v20617_v8 = vadd.f32 %v20450_v60, %v7216_v63  ;;  %v20646_v58 = vpop.f32.mrf.mxu0  ;;  %v7200_v46 = vadd.f32 %v20538_v59, %v6953_v53  ;;  %v7695_v47 = vadd.f32 %v15958_v38, %v20543_v3  ;;  %v6666_v59 = vadd.f32 %v20513_v25, %v20132_v52  ;;  %v22654_v38 = vld [vmem:[#allocation27_spill] sm:$0xff] }
 0x866   : > { %v7605_v21 = vpop.f32.mrf.mxu1 }
 0x867   : > { %22649 = vst [vmem:[#allocation60_spill] sm:$0xff] %v20617_v8  ;;  %v6955_v8 = vadd.f32 %v20209_v24, %v6646_v40  ;;  %v20656_v39 = vpop.f32.mrf.mxu0  ;;  %v7447_v55 = vadd.f32 %v20300_v20, %v7200_v46  ;;  %v7204_v24 = vadd.f32 %v20556_v62, %v6957_v36  ;;  %v22653_v46 = vld [vmem:[#allocation19_spill] sm:$0xff]  ;;  %v6959_v28 = vadd.f32 %v22654_v38, %v6666_v59  ;;  %v22658_v36 = vld [vmem:[#allocation48_spill] sm:$0xff] }
 0x868   : > { %v15961_v43 = vpop.f32.mrf.mxu1 }
 0x869   : > { %v7202_v32 = vadd.f32 %v20547_v0, %v6955_v8  ;;  %v7694_v33 = vadd.f32 %v7605_v21, %v7447_v55  ;;  %v20669_v40 = vpop.f32.mrf.mxu0  ;;  %v7942_v0 = vadd.f32 %v22653_v46, %v7695_v47  ;;  %v7697_v3 = vadd.f32 %v15961_v43, %v20552_v16  ;;  %v22655_v8 = vld [vmem:[#allocation44_spill] sm:$0xff] }
 0x86a   : > { %v7615_v48 = vpop.f32.mrf.mxu1  ;;  %v6676_v52 = vadd.f32 %v22656_v17, %v22655_v8  ;;  %v7206_v51 = vadd.f32 %v20565_v26, %v6959_v28  ;;  %v20684_v16 = vld [vmem:[%s22370_s2] ss:$0 sm:$0xff] }
 0x86b   : > { %v7449_v20 = vadd.f32 %v20312_v5, %v7202_v32  ;;  %v20686_v32 = vpop.f32.mrf.mxu0  ;;  %v22659_v47 = vld [vmem:[#allocation28_spill] sm:$0xff] }
 0x86c   : > { %v15964_v22 = vpop.f32.mrf.mxu1  ;;  %v7944_v59 = vadd.f32 %v22659_v47, %v7697_v3  ;;  %v22665_v3 = vld [vmem:[#allocation31_spill] sm:$0xff]  ;;  %v22666_v47 = vld [vmem:[#allocation49_spill] sm:$0xff] }
 0x86d   : > { %v7696_v55 = vadd.f32 %v7615_v48, %v7449_v20  ;;  %v7699_v5 = vadd.f32 %v15964_v22, %v20561_v7  ;;  %v22660_v48 = vld [vmem:[#allocation46_spill] sm:$0xff]  ;;  %v22661_v20 = vld [vmem:[#allocation43_spill] sm:$0xff]  ;;  %v22663_v7 = vld [vmem:[#allocation29_spill] sm:$0xff] }
 0x86e   : > { %v7625_v10 = vpop.f32.mrf.mxu1 }
 0x86f   : > { %v7943_v22 = vadd.f32 %v22663_v7, %v7696_v55 }
 0x870   : > { %v15967_v34 = vpop.f32.mrf.mxu1 }
 0x872   : > { %v20621_v35 = vpop.f32.mrf.mxu1 }
 0x874   : > { %v20623_v61 = vpop.f32.mrf.mxu1 }
 0x876   : > { %v20627_v6 = vpop.f32.mrf.mxu1 }
 0x878   : > { %v20629_v60 = vpop.f32.mrf.mxu1 }
 0x87a   : > { %v20635_v56 = vpop.f32.mrf.mxu1 }
 0x87c   : > { %v20637_v18 = vpop.f32.mrf.mxu1 }
 0x87e   : > { %v20644_v63 = vpop.f32.mrf.mxu1 }
 0x880   : > { %v20651_v50 = vpop.f32.mrf.mxu1 }
 0x882   : > { %v20654_v41 = vpop.f32.mrf.mxu1 }
 0x883   : > { %22650 = vst [vmem:[#allocation35_spill] sm:$0xff] %v20654_v41 }
 0x884   : > { %v20664_v2 = vpop.f32.mrf.mxu1 }
 0x885   : > { %22651 = vst [vmem:[#allocation36_spill] sm:$0xff] %v20664_v2  ;;  %v22657_v2 = vld [vmem:[#allocation24_spill] sm:$0xff] }
 0x886   : > { %v20667_v53 = vpop.f32.mrf.mxu1  ;;  %v7941_v21 = vadd.f32 %v22657_v2, %v7694_v33  ;;  %v6961_v33 = vadd.f32 %v22660_v48, %v6676_v52 }
 0x887   : > { %22652 = vst [vmem:[#allocation64_spill] sm:$0xff] %v20667_v53  ;;  %v7451_v53 = vadd.f32 %v22658_v36, %v7204_v24  ;;  %v22662_v24 = vld [vmem:[#allocation32_spill] sm:$0xff] }
 0x888   : > { %v16020_v25 = vpop.f32.mrf.mxu1  ;;  %v7208_v41 = vadd.f32 %v20574_v14, %v6961_v33 }
 0x889   : > { %v8189_v62 = vadd.f32 %v16020_v25, %v7942_v0  ;;  %v6686_v0 = vadd.f32 %v22662_v24, %v22661_v20  ;;  %v7698_v26 = vadd.f32 %v7625_v10, %v7451_v53  ;;  %v22664_v25 = vld [vmem:[#allocation47_spill] sm:$0xff] }
 0x88a   : > { %v8099_v43 = vpop.f32.mrf.mxu1  ;;  %v7453_v36 = vadd.f32 %v22664_v25, %v7206_v51  ;;  %v22670_v24 = vld [vmem:[#allocation63_spill] sm:$0xff]  ;;  %v22672_v25 = vld [vmem:[#allocation37_spill] sm:$0xff] }
 0x88b   : > { %v8436_v46 = vadd.f32 %v16051_v44, %v8189_v62  ;;  %v8188_v2 = vadd.f32 %v8099_v43, %v7941_v21  ;;  %v7946_v44 = vadd.f32 %v22665_v3, %v7699_v5  ;;  %v7701_v21 = vadd.f32 %v15967_v34, %v20570_v30  ;;  %v20698_v62 = vpop.f32.mrf.mxu0  ;;  %v22674_v3 = vld [vmem:[#allocation40_spill] sm:$0xff] }
 0x88c   : > { %v16023_v38 = vpop.f32.mrf.mxu1  ;;  %v7700_v5 = vadd.f32 %v20621_v35, %v7453_v36 }
 0x88d   : > { %v8461_v28 = vadd.f32 %v20684_v16, %v8436_v46  ;;  %v8435_v8 = vadd.f32 %v8346_v57, %v8188_v2  ;;  %v8191_v17 = vadd.f32 %v16023_v38, %v7944_v59  ;;  %v6963_v57 = vadd.f32 %v22666_v47, %v6686_v0  ;;  %v22667_v59 = vld [vmem:[#allocation62_spill] sm:$0xff]  ;;  %v22669_v2 = vld [vmem:[#allocation33_spill] sm:$0xff] }
 0x88e   : > { %v8109_v52 = vpop.f32.mrf.mxu1  ;;  %v22668_v46 = vld [vmem:[#allocation34_spill] sm:$0xff]  ;;  %v7945_v14 = vadd.f32 %v22669_v2, %v7698_v26  ;;  %v22671_v0 = vld [vmem:[#allocation41_spill] sm:$0xff] }
 0x88f   : > { %v8479_v43 = vmax.f32 %v8461_v28, 0.0  ;;  %v8460_v10 = vadd.f32 %v20684_v16, %v8435_v8  ;;  %v8438_v53 = vadd.f32 %v20619_v49, %v8191_v17  ;;  %v8190_v55 = vadd.f32 %v8109_v52, %v7943_v22  ;;  %v20714_v28 = vpop.f32.mrf.mxu0 }
 0x890   : > { %v6696_v51 = vadd.f32 %v22668_v46, %v22667_v59  ;;  %v16026_v48 = vpop.f32.mrf.mxu1  ;;  %v7455_v49 = vadd.f32 %v22670_v24, %v7208_v41  ;;  %v7210_v38 = vadd.f32 %v20583_v29, %v6963_v57  ;;  %v7948_v7 = vadd.f32 %v22671_v0, %v7701_v21  ;;  %v22673_v41 = vld [vmem:[#allocation26_spill] sm:$0xff] }
 0x891   : > { %8497 = vst [vmem:[#allocation2 + $0x8] sm:$0xff] %v8479_v43  ;;  %v8478_v30 = vmax.f32 %v8460_v10, 0.0  ;;  %v8463_v34 = vadd.f32 %v20684_v16, %v8438_v53  ;;  %v8437_v33 = vadd.f32 %v20625_v45, %v8190_v55  ;;  %v8193_v20 = vadd.f32 %v16026_v48, %v7946_v44  ;;  %v22675_v44 = vld [vmem:[#allocation61_spill] sm:$0xff]  ;;  %v22676_v55 = vld [vmem:[#allocation50_spill] sm:$0xff] }
 0x892   : > { %v7703_v22 = vadd.f32 %v20623_v61, %v20579_v13  ;;  %v8119_v26 = vpop.f32.mrf.mxu1  ;;  %v6965_v36 = vadd.f32 %v22672_v25, %v6696_v51  ;;  %v6706_v29 = vadd.f32 %v22674_v3, %v22673_v41  ;;  %v7947_v21 = vadd.f32 %v22675_v44, %v7700_v5  ;;  %v20730_v51 = vpop.f32.mrf.mxu0  ;;  %v22677_v5 = vld [vmem:[#allocation38_spill] sm:$0xff] }
 0x893   : > { %8496 = vst [vmem:[#allocation2] sm:$0xff] %v8478_v30  ;;  %v8481_v35 = vmax.f32 %v8463_v34, 0.0  ;;  %v8462_v8 = vadd.f32 %v20684_v16, %v8437_v33  ;;  %v8440_v17 = vadd.f32 %v20631_v9, %v8193_v20  ;;  %v8192_v45 = vadd.f32 %v8119_v26, %v7945_v14  ;;  %v22678_v20 = vld [vmem:[#allocation51_spill] sm:$0xff] }
 0x894   : > { %v7702_v52 = vadd.f32 %v20627_v6, %v7455_v49  ;;  %v16029_v13 = vpop.f32.mrf.mxu1  ;;  %v7457_v9 = vadd.f32 %v22676_v55, %v7210_v38  ;;  %v7212_v47 = vadd.f32 %v20592_v42, %v6965_v36  ;;  %v7950_v57 = vadd.f32 %v20536_v31, %v7703_v22  ;;  %v8406_v0 = vpop.f32.mrf.mxu0  ;;  %v22682_v55 = vld [vmem:[#allocation42_spill] sm:$0xff] }
 0x895   : > { %8499 = vst [vmem:[#allocation2 + $0x18] sm:$0xff] %v8481_v35  ;;  %v8480_v61 = vmax.f32 %v8462_v8, 0.0  ;;  %v8465_v43 = vadd.f32 %v20684_v16, %v8440_v17  ;;  %v8439_v10 = vadd.f32 %v20639_v37, %v8192_v45  ;;  %v8195_v53 = vadd.f32 %v16029_v13, %v7948_v7 }
 0x896   : > { %v7705_v59 = vadd.f32 %v20629_v60, %v20588_v54  ;;  %v8129_v46 = vpop.f32.mrf.mxu1  ;;  %v6967_v48 = vadd.f32 %v22677_v5, %v6706_v29  ;;  %v7949_v30 = vadd.f32 %v20545_v27, %v7702_v52  ;;  %v7704_v42 = vadd.f32 %v20635_v56, %v7457_v9  ;;  %v16072_v41 = vpop.f32.mrf.mxu0  ;;  %v22680_v52 = vld [vmem:[#allocation35_spill] sm:$0xff]  ;;  %v22683_v9 = vld [vmem:[#allocation36_spill] sm:$0xff] }
 0x897   : > { %8498 = vst [vmem:[#allocation2 + $0x10] sm:$0xff] %v8480_v61  ;;  %v8483_v6 = vmax.f32 %v8465_v43, 0.0  ;;  %v8464_v2 = vadd.f32 %v20684_v16, %v8439_v10  ;;  %v8194_v14 = vadd.f32 %v8129_v46, %v7947_v21  ;;  %v8442_v37 = vadd.f32 %v20646_v58, %v8195_v53  ;;  %v22681_v10 = vld [vmem:[#allocation59_spill] sm:$0xff] }
 0x898   : > { %v16032_v31 = vpop.f32.mrf.mxu1  ;;  %v7459_v24 = vadd.f32 %v22678_v20, %v7212_v47  ;;  %v7214_v49 = vadd.f32 %v20602_v23, %v6967_v48  ;;  %v7952_v58 = vadd.f32 %v20554_v19, %v7705_v59  ;;  %v7707_v38 = vadd.f32 %v20637_v18, %v20597_v4  ;;  %v22679_v18 = vld [vmem:[#allocation58_spill] sm:$0xff]  ;;  %v8416_v46 = vpop.f32.mrf.mxu0  ;;  %v22685_v48 = vld [vmem:[#allocation60_spill] sm:$0xff] }
 0x899   : > { %8501 = vst [vmem:[#allocation2 + $0x28] sm:$0xff] %v8483_v6  ;;  %v8482_v34 = vmax.f32 %v8464_v2, 0.0  ;;  %v8467_v54 = vadd.f32 %v20684_v16, %v8442_v37  ;;  %v8197_v60 = vadd.f32 %v16032_v31, %v7950_v57  ;;  %v8441_v33 = vadd.f32 %v20656_v39, %v8194_v14  ;;  %v22684_v37 = vld [vmem:[#allocation22_spill] sm:$0xff] }
 0x89a   : > { %v8139_v27 = vpop.f32.mrf.mxu1  ;;  %v7951_v39 = vadd.f32 %v20563_v11, %v7704_v42  ;;  %v7706_v35 = vadd.f32 %v20644_v63, %v7459_v24  ;;  %v7461_v45 = vadd.f32 %v22679_v18, %v7214_v49  ;;  %v7954_v25 = vadd.f32 %v20572_v12, %v7707_v38  ;;  %v8514_v44 = vld [vmem:[#allocation2] ss:$2 sm:$0xff]  ;;  %v8515_v21 = vld [vmem:[#allocation2 + $0x1] ss:$2 sm:$0xff]  ;;  %v22687_v24 = vld [vmem:[#allocation23_spill] sm:$0xff] }
 0x89b   : > { %8500 = vst [vmem:[#allocation2 + $0x20] sm:$0xff] %v8482_v34  ;;  %v8485_v56 = vmax.f32 %v8467_v54, 0.0  ;;  %v8466_v7 = vadd.f32 %v20684_v16, %v8441_v33  ;;  %v8196_v22 = vadd.f32 %v8139_v27, %v7949_v30  ;;  %v8444_v26 = vadd.f32 %v20669_v40, %v8197_v60  ;;  %v16075_v27 = vpop.f32.mrf.mxu0 }
 0x89c   : > { %v16035_v8 = vpop.f32.mrf.mxu1  ;;  %v7709_v36 = vadd.f32 %v20651_v50, %v20606_v15  ;;  %v7708_v13 = vadd.f32 %v22680_v52, %v7461_v45  ;;  %v7711_v47 = vadd.f32 %v22683_v9, %v22682_v55  ;;  %v8516_v57 = vmax.f32 %v8514_v44, %v8515_v21  ;;  %v20820_v55 = vld [vmem:[%s22375_s7 + $0xd0] sm:$0xff] }
 0x89d   : > { %8503 = vst [vmem:[#allocation2 + $0x38] sm:$0xff] %v8485_v56  ;;  %v8484_v23 = vmax.f32 %v8466_v7, 0.0  ;;  %v8469_v19 = vadd.f32 %v20684_v16, %v8444_v26  ;;  %v8199_v17 = vadd.f32 %v16035_v8, %v7952_v58  ;;  %v8443_v4 = vadd.f32 %v20686_v32, %v8196_v22 }
 0x89e   : > { %v8149_v40 = vpop.f32.mrf.mxu1  ;;  %v7953_v32 = vadd.f32 %v20581_v1, %v7706_v35  ;;  %v7956_v53 = vadd.f32 %v22681_v10, %v7709_v36  ;;  %v7955_v5 = vadd.f32 %v22684_v37, %v7708_v13  ;;  %v7958_v49 = vadd.f32 %v22687_v24, %v7711_v47  ;;  %v22688_v35 = vld [vmem:[#allocation45_spill] sm:$0xff]  ;;  %v22695_v37 = vld [vmem:[#allocation56_spill] sm:$0xff] }
 0x89f   : > { %8502 = vst [vmem:[#allocation2 + $0x30] sm:$0xff] %v8484_v23  ;;  %v8487_v11 = vmax.f32 %v8469_v19, 0.0  ;;  %v8468_v63 = vadd.f32 %v20684_v16, %v8443_v4  ;;  %v8198_v3 = vadd.f32 %v8149_v40, %v7951_v39  ;;  %v8446_v29 = vadd.f32 %v20698_v62, %v8199_v17  ;;  %v20783_v19 = vld [vmem:[%s22375_s7 + $0xf0] sm:$0xff]  ;;  %v20793_v40 = vld [vmem:[%s22375_s7 + $0xe8] sm:$0xff] }
 0x8a0   : > { %v16038_v61 = vpop.f32.mrf.mxu1  ;;  %v22690_v47 = vld [vmem:[#allocation53_spill] sm:$0xff] }
 0x8a1   : > { %8505 = vst [vmem:[#allocation2 + $0x48] sm:$0xff] %v8487_v11  ;;  %v8486_v12 = vmax.f32 %v8468_v63, 0.0  ;;  %v8471_v15 = vadd.f32 %v20684_v16, %v8446_v29  ;;  %v8201_v50 = vadd.f32 %v16038_v61, %v7954_v25  ;;  %v8445_v43 = vadd.f32 %v20714_v28, %v8198_v3  ;;  %v22686_v28 = vld [vmem:[#allocation64_spill] sm:$0xff] }
 0x8a2   : > { %v8159_v62 = vpop.f32.mrf.mxu1  ;;  %v8517_v59 = vld [vmem:[#allocation2 + $0x12] ss:$2 sm:$0xff]  ;;  %v7710_v30 = vadd.f32 %v22686_v28, %v22685_v48  ;;  %v8519_v20 = vld [vmem:[#allocation2 + $0x13] ss:$2 sm:$0xff]  ;;  %v22689_v25 = vmov 0.0  }
 0x8a3   : > { %8504 = vst [vmem:[#allocation2 + $0x40] sm:$0xff] %v8486_v12  ;;  %v8489_v1 = vmax.f32 %v8471_v15, 0.0  ;;  %v8470_v6 = vadd.f32 %v20684_v16, %v8445_v43  ;;  %v8200_v2 = vadd.f32 %v8159_v62, %v7953_v32  ;;  %v8448_v14 = vadd.f32 %v20730_v51, %v8201_v50  ;;  %v20775_v51 = vld [vmem:[%s22375_s7 + $0xf8] sm:$0xff]  ;;  %v20801_v32 = vld [vmem:[%s22375_s7 + $0xe0] sm:$0xff] }
 0x8a4   : > { %v16041_v42 = vpop.f32.mrf.mxu1  ;;  %v8518_v31 = vmax.f32 %v8516_v57, %v8517_v59  ;;  %v7957_v8 = vadd.f32 %v22688_v35, %v7710_v30  ;;  %v20809_v50 = vld [vmem:[%s22375_s7 + $0xd8] sm:$0xff]  ;;  %v20838_v57 = vld [vmem:[%s22375_s7 + $0xc0] sm:$0xff] }
 0x8a5   : > { %8507 = vst [vmem:[#allocation2 + $0x58] sm:$0xff] %v8489_v1  ;;  %v8488_v34 = vmax.f32 %v8470_v6, 0.0  ;;  %v8473_v54 = vadd.f32 %v20684_v16, %v8448_v14  ;;  %v8203_v60 = vadd.f32 %v16041_v42, %v7956_v53  ;;  %v8447_v33 = vadd.f32 %v8406_v0, %v8200_v2  ;;  %v22691_v62 = vld [vmem:[#allocation39_spill] sm:$0xff]  ;;  %v22692_v59 = vld [vmem:[#allocation52_spill] sm:$0xff]  ;;  %v22693_v1 = vld [vmem:[#allocation54_spill] sm:$0xff] }
 0x8a6   : > { %v8169_v58 = vpop.f32.mrf.mxu1  ;;  %v20770_v38 = vmax.f32 %v8518_v31, %v8519_v20  ;;  %v8695_v39 = vld [vmem:[#allocation2 + $0x24] ss:$2 sm:$0xff]  ;;  %v8696_v0 = vld [vmem:[#allocation2 + $0x25] ss:$2 sm:$0xff]  ;;  %v22696_v48 = vld [vmem:[#allocation55_spill] sm:$0xff] }
 0x8a7   : > { %8506 = vst [vmem:[#allocation2 + $0x50] sm:$0xff] %v8488_v34  ;;  %v8491_v56 = vmax.f32 %v8473_v54, 0.0  ;;  %v8472_v7 = vadd.f32 %v20684_v16, %v8447_v33  ;;  %v8202_v22 = vadd.f32 %v8169_v58, %v7955_v5  ;;  %v8450_v26 = vadd.f32 %v16072_v41, %v8203_v60  ;;  %v8426_v41 = vpop.f32.mrf.mxu0  ;;  %v20856_v6 = vld [vmem:[%s22375_s7 + $0xb0] sm:$0xff]  ;;  %v22694_v2 = vld [vmem:[#allocation57_spill] sm:$0xff]  ;;  %v20883_v28 = vld [vmem:[%s22375_s7 + $0x98] sm:$0xff] }
 0x8a8   : > { %16109 = vmatmul.mubr.f32.vlgmr.msra.gmra.mxu1 %v20770_v38  ;;  %v16044_v23 = vpop.f32.mrf.mxu1  ;;  %v8697_v11 = vmax.f32 %v8695_v39, %v8696_v0  ;;  %v20865_v14 = vld [vmem:[%s22375_s7 + $0xa8] sm:$0xff]  ;;  %v20874_v5 = vld [vmem:[%s22375_s7 + $0xa0] sm:$0xff]  ;;  %v20892_v42 = vld [vmem:[%s22375_s7 + $0x90] sm:$0xff] }
 0x8a9   : > { %8509 = vst [vmem:[#allocation2 + $0x68] sm:$0xff] %v8491_v56  ;;  %v8490_v17 = vmax.f32 %v8472_v7, 0.0  ;;  %v8475_v4 = vadd.f32 %v20684_v16, %v8450_v26  ;;  %16112 = vmatpush3.msra.mxu1 %v20775_v51  ;;  %v8205_v18 = vadd.f32 %v16044_v23, %v7958_v49  ;;  %v8449_v45 = vadd.f32 %v8416_v46, %v8202_v22  ;;  %v20847_v46 = vld [vmem:[%s22375_s7 + $0xb8] sm:$0xff]  ;;  %v22697_v30 = vld [vmem:[#allocation13_spill] sm:$0xff]  ;;  %v22698_v31 = vld [vmem:[#allocation14_spill] sm:$0xff] }
 0x8aa   : > { %16143 = vmatprep.mubr.msk.f32.mxu1 %vm17187_vm1, %v22689_v25  ;;  %16113 = vmatprep.subr.mxu1 %v22689_v25  ;;  %v8179_v36 = vpop.f32.mrf.mxu1  ;;  %v8698_v63 = vld [vmem:[#allocation2 + $0x36] ss:$2 sm:$0xff]  ;;  %v8700_v15 = vld [vmem:[#allocation2 + $0x37] ss:$2 sm:$0xff]  ;;  %v20901_v34 = vld [vmem:[%s22375_s7 + $0x88] sm:$0xff] }
 0x8ab   : > { %8508 = vst [vmem:[#allocation2 + $0x60] sm:$0xff] %v8490_v17  ;;  %v8493_v3 = vmax.f32 %v8475_v4, 0.0  ;;  %v8474_v29 = vadd.f32 %v20684_v16, %v8449_v45  ;;  %16114 = vmatpush3.msra.mxu1 %v20783_v19  ;;  %v8204_v44 = vadd.f32 %v8179_v36, %v7957_v8  ;;  %v8452_v21 = vadd.f32 %v16075_v27, %v8205_v18  ;;  %v22699_v54 = vld [vmem:[#allocation15_spill] sm:$0xff]  ;;  %v20910_v60 = vld [vmem:[%s22375_s7 + $0x80] sm:$0xff]  ;;  %v22702_v56 = vld [vmem:[#allocation18_spill] sm:$0xff] }
 0x8ac   : > { %16115 = vmatprep.subr.mxu1 %v22689_v25  ;;  %v8699_v52 = vmax.f32 %v8697_v11, %v8698_v63  ;;  %v22700_v33 = vld [vmem:[#allocation16_spill] sm:$0xff]  ;;  %v22701_v49 = vld [vmem:[#allocation17_spill] sm:$0xff]  ;;  %v17120_v8 = vld [vmem:[%s22375_s7 + $0x70] sm:$0xff] }
 0x8ad   : > { %8511 = vst [vmem:[#allocation2 + $0x78] sm:$0xff] %v8493_v3  ;;  %v8492_v13 = vmax.f32 %v8474_v29, 0.0  ;;  %v8477_v61 = vadd.f32 %v20684_v16, %v8452_v21  ;;  %16116 = vmatpush3.msra.mxu1 %v20793_v40  ;;  %v8451_v12 = vadd.f32 %v8426_v41, %v8204_v44  ;;  %v22703_v22 = vld [vmem:[#allocation20_spill] sm:$0xff]  ;;  %v22705_v0 = vld [vmem:[#allocation25_spill] sm:$0xff]  ;;  %v12980_v44 = vld [vmem:[%s22371_s3 + $0x70] sm:$0xff] }
 0x8ae   : > { %16117 = vmatprep.subr.mxu1 %v22689_v25  ;;  %v20811_v43 = vmax.f32 %v8699_v52, %v8700_v15  ;;  %v8876_v20 = vld [vmem:[#allocation2 + $0x48] ss:$2 sm:$0xff]  ;;  %v8877_v24 = vld [vmem:[#allocation2 + $0x49] ss:$2 sm:$0xff]  ;;  %v17119_v35 = vld [vmem:[%s22375_s7 + $0x78] sm:$0xff] }
 0x8af   : > { %8510 = vst [vmem:[#allocation2 + $0x70] sm:$0xff] %v8492_v13  ;;  %v8495_v10 = vmax.f32 %v8477_v61, 0.0  ;;  %v8476_v53 = vadd.f32 %v20684_v16, %v8451_v12  ;;  %16118 = vmatpush3.msra.mxu1 %v20801_v32  ;;  %v20829_v16 = vld [vmem:[%s22375_s7 + $0xc8] sm:$0xff]  ;;  %v8878_v27 = vmax.f32 %v8876_v20, %v8877_v24  ;;  %v17122_v17 = vld [vmem:[%s22375_s7 + $0x60] sm:$0xff]  ;;  %v17123_v4 = vld [vmem:[%s22375_s7 + $0x58] sm:$0xff] }
 0x8b0   : > { %16119 = vmatprep.subr.mxu1 %v22689_v25  ;;  %16179 = vmatmul.mubr.f32.vlgmr.msra.gmra.mxu0 %v20811_v43  ;;  %v17121_v23 = vld [vmem:[%s22375_s7 + $0x68] sm:$0xff]  ;;  %v12981_v29 = vld [vmem:[%s22371_s3 + $0x78] sm:$0xff]  ;;  %v12978_v52 = vld [vmem:[%s22371_s3 + $0x60] sm:$0xff] }
 0x8b1   : > { %8513 = vst [vmem:[#allocation2 + $0x88] sm:$0x3f] %v8495_v10  ;;  %v8494_v9 = vmax.f32 %v8476_v53, 0.0  ;;  %16120 = vmatpush3.msra.mxu1 %v20809_v50  ;;  %16217 = vmatpush3.msra.mxu0 %v22690_v47  ;;  %v12979_v21 = vld [vmem:[%s22371_s3 + $0x68] sm:$0xff]  ;;  %v12977_v13 = vld [vmem:[%s22371_s3 + $0x58] sm:$0xff]  ;;  %v12976_v61 = vld [vmem:[%s22371_s3 + $0x50] sm:$0xff] }
 0x8b2   : > { %16121 = vmatprep.subr.mxu1 %v22689_v25  ;;  %16218 = vmatprep.subr.mxu0 %v22689_v25  ;;  %v8879_v58 = vld [vmem:[#allocation2 + $0x5a] ss:$2 sm:$0xff]  ;;  %v8881_v26 = vld [vmem:[#allocation2 + $0x5b] ss:$2 sm:$0xff]  ;;  %v12994_v10 = vld [vmem:[%s22371_s3 + $0x90] sm:$0xff] }
 0x8b3   : > { %8512 = vst [vmem:[#allocation2 + $0x80] sm:$0xff] %v8494_v9  ;;  %16122 = vmatpush3.msra.mxu1 %v20820_v55  ;;  %16219 = vmatpush3.msra.mxu0 %v22691_v62  ;;  %v8880_v7 = vmax.f32 %v8878_v27, %v8879_v58  ;;  %v12975_v12 = vld [vmem:[%s22371_s3 + $0x48] sm:$0xff]  ;;  %v12992_v9 = vld [vmem:[%s22371_s3 + $0x80] sm:$0xff]  ;;  %v9474_v47 = vld [vmem:[#allocation3 + $0x2] sm:$0xff] }
 0x8b4   : > { %16123 = vmatprep.subr.mxu1 %v22689_v25  ;;  %16220 = vmatprep.subr.mxu0 %v22689_v25  ;;  %v12997_v15 = vld [vmem:[%s22371_s3 + $0xa8] sm:$0xff] }
 0x8b5   : > { %16124 = vmatpush3.msra.mxu1 %v20829_v16  ;;  %16221 = vmatpush3.msra.mxu0 %v22692_v59  ;;  %v20934_v39 = vmax.f32 %v8880_v7, %v8881_v26  ;;  %v12993_v53 = vld [vmem:[%s22371_s3 + $0x88] sm:$0xff]  ;;  %v13024_v59 = vld [vmem:[%s22371_s3 + $0x130] sm:$0xff] }
 0x8b6   : > { %16125 = vmatprep.subr.mxu1 %v22689_v25  ;;  %16222 = vmatprep.subr.mxu0 %v22689_v25  ;;  %v9057_v18 = vld [vmem:[#allocation2 + $0x6c] ss:$2 sm:$0xff]  ;;  %v9058_v45 = vld [vmem:[#allocation2 + $0x6d] ss:$2 sm:$0xff] }
 0x8b7   : > { %16126 = vmatpush3.msra.mxu1 %v20838_v57  ;;  %16223 = vmatpush3.msra.mxu0 %v22693_v1  ;;  %v9059_v41 = vmax.f32 %v9057_v18, %v9058_v45  ;;  %v9248_v62 = vld [vmem:[%s22371_s3 + $0x28] sm:$0xff] }
 0x8b8   : > { %16127 = vmatprep.subr.mxu1 %v22689_v25  ;;  %16224 = vmatprep.subr.mxu0 %v22689_v25  ;;  %v13023_v1 = vld [vmem:[%s22371_s3 + $0x128] sm:$0xff] }
 0x8b9   : > { %16128 = vmatpush3.msra.mxu1 %v20847_v46  ;;  %16225 = vmatpush3.msra.mxu0 %v22694_v2  ;;  %v13022_v2 = vld [vmem:[%s22371_s3 + $0x120] sm:$0xff] }
 0x8ba   : > { %16129 = vmatprep.subr.mxu1 %v22689_v25  ;;  %16226 = vmatprep.subr.mxu0 %v22689_v25  ;;  %v9060_v36 = vld [vmem:[#allocation2 + $0x7e] ss:$2 sm:$0xff]  ;;  %v9062_v63 = vld [vmem:[#allocation2 + $0x7f] ss:$2 sm:$0xff] }
 0x8bb   : > { %16130 = vmatpush3.msra.mxu1 %v20856_v6  ;;  %16227 = vmatpush3.msra.mxu0 %v22695_v37  ;;  %v9061_v11 = vmax.f32 %v9059_v41, %v9060_v36 }
 0x8bc   : > { %16131 = vmatprep.subr.mxu1 %v22689_v25  ;;  %16228 = vmatprep.subr.mxu0 %v22689_v25 }
 0x8bd   : > { %16132 = vmatpush3.msra.mxu1 %v20865_v14  ;;  %16229 = vmatpush3.msra.mxu0 %v22696_v48  ;;  %v21016_v3 = vmax.f32 %v9061_v11, %v9062_v63  ;;  %v9238_v63 = vld [vmem:[#allocation3] sm:$0xff] }
 0x8be   : > { %16133 = vmatprep.subr.mxu1 %v22689_v25  ;;  %16230 = vmatprep.subr.mxu0 %v22689_v25 }
 0x8bf   : > { %16134 = vmatpush3.msra.mxu1 %v20874_v5  ;;  %16231 = vmatpush3.msra.mxu0 %v22697_v30 }
 0x8c0   : > { %16135 = vmatprep.subr.mxu1 %v22689_v25  ;;  %16232 = vmatprep.subr.mxu0 %v22689_v25 }
 0x8c1   : > { %16136 = vmatpush3.msra.mxu1 %v20883_v28  ;;  %16233 = vmatpush3.msra.mxu0 %v22698_v31 }
 0x8c2   : > { %16137 = vmatprep.subr.mxu1 %v22689_v25  ;;  %16234 = vmatprep.subr.mxu0 %v22689_v25 }
 0x8c3   : > { %16138 = vmatpush3.msra.mxu1 %v20892_v42  ;;  %16235 = vmatpush3.msra.mxu0 %v22699_v54 }
 0x8c4   : > { %16139 = vmatprep.subr.mxu1 %v22689_v25  ;;  %16236 = vmatprep.subr.mxu0 %v22689_v25 }
 0x8c5   : > { %16140 = vmatpush3.msra.mxu1 %v20901_v34  ;;  %16237 = vmatpush3.msra.mxu0 %v22700_v33 }
 0x8c6   : > { %16141 = vmatprep.subr.mxu1 %v22689_v25  ;;  %16238 = vmatprep.subr.mxu0 %v22689_v25 }
 0x8c7   : > { %16142 = vmatpush3.msra.mxu1 %v20910_v60  ;;  %16239 = vmatpush3.msra.mxu0 %v22701_v49 }
 0x8c8   : > { %16144 = vmatmul.mubr.f32.vlgmr.msra.gmra.mxu1 %v20770_v38  ;;  %16181 = vmatprep.subr.mxu1 %v22689_v25  ;;  %v22704_v38 = vld [vmem:[#allocation21_spill] sm:$0xff] }
 0x8c9   : > { %16240 = vmatprep.subr.mxu0 %v22689_v25  ;;  %16182 = vmatpush3.msra.mxu1 %v20775_v51 }
 0x8ca   : > { %16241 = vmatpush3.msra.mxu0 %v22702_v56  ;;  %16183 = vmatprep.subr.mxu1 %v22689_v25 }
 0x8cb   : > { %16242 = vmatprep.subr.mxu0 %v22689_v25  ;;  %16184 = vmatpush3.msra.mxu1 %v20783_v19 }
 0x8cc   : > { %16243 = vmatpush3.msra.mxu0 %v22703_v22  ;;  %16185 = vmatprep.subr.mxu1 %v22689_v25 }
 0x8cd   : > { %16244 = vmatprep.subr.mxu0 %v22689_v25  ;;  %16186 = vmatpush3.msra.mxu1 %v20793_v40 }
 0x8ce   : > { %16245 = vmatpush3.msra.mxu0 %v22704_v38  ;;  %16187 = vmatprep.subr.mxu1 %v22689_v25 }
 0x8cf   : > { %16246 = vmatprep.subr.mxu0 %v22689_v25  ;;  %16188 = vmatpush3.msra.mxu1 %v20801_v32 }
 0x8d0   : > { %16247 = vmatpush3.msra.mxu0 %v22705_v0  ;;  %16248 = vmatprep.mubr.msk.f32.mxu0 %vm17187_vm1, %v22689_v25 }
 0x8d1   : > { %16189 = vmatprep.subr.mxu1 %v22689_v25  ;;  %16249 = vmatmul.mubr.f32.vlgmr.msra.gmra.mxu0 %v20934_v39 }
 0x8d2   : > { %16286 = vmatprep.subr.mxu0 %v22689_v25  ;;  %16190 = vmatpush3.msra.mxu1 %v20809_v50 }
 0x8d3   : > { %16287 = vmatpush3.msra.mxu0 %v17119_v35  ;;  %16191 = vmatprep.subr.mxu1 %v22689_v25 }
 0x8d4   : > { %16288 = vmatprep.subr.mxu0 %v22689_v25  ;;  %16192 = vmatpush3.msra.mxu1 %v20820_v55 }
 0x8d5   : > { %16289 = vmatpush3.msra.mxu0 %v17120_v8  ;;  %16193 = vmatprep.subr.mxu1 %v22689_v25 }
 0x8d6   : > { %16290 = vmatprep.subr.mxu0 %v22689_v25  ;;  %16194 = vmatpush3.msra.mxu1 %v20829_v16 }
 0x8d7   : > { %16291 = vmatpush3.msra.mxu0 %v17121_v23  ;;  %16195 = vmatprep.subr.mxu1 %v22689_v25 }
 0x8d8   : > { %16292 = vmatprep.subr.mxu0 %v22689_v25  ;;  %16196 = vmatpush3.msra.mxu1 %v20838_v57 }
 0x8d9   : > { %16293 = vmatpush3.msra.mxu0 %v17122_v17  ;;  %16197 = vmatprep.subr.mxu1 %v22689_v25 }
 0x8da   : > { %16294 = vmatprep.subr.mxu0 %v22689_v25  ;;  %16198 = vmatpush3.msra.mxu1 %v20847_v46 }
 0x8db   : > { %16295 = vmatpush3.msra.mxu0 %v17123_v4  ;;  %16199 = vmatprep.subr.mxu1 %v22689_v25 }
 0x8dc   : > { %16296 = vmatprep.subr.mxu0 %v22689_v25  ;;  %16200 = vmatpush3.msra.mxu1 %v20856_v6 }
 0x8dd   : > { %16297 = vmatpush3.msra.mxu0 %v22695_v37  ;;  %16201 = vmatprep.subr.mxu1 %v22689_v25  ;;  %v13021_v37 = vld [vmem:[%s22371_s3 + $0x118] sm:$0xff] }
 0x8de   : > { %16298 = vmatprep.subr.mxu0 %v22689_v25  ;;  %16202 = vmatpush3.msra.mxu1 %v20865_v14 }
 0x8df   : > { %16299 = vmatpush3.msra.mxu0 %v22696_v48  ;;  %16203 = vmatprep.subr.mxu1 %v22689_v25  ;;  %v13020_v48 = vld [vmem:[%s22371_s3 + $0x110] sm:$0xff] }
 0x8e0   : > { %16300 = vmatprep.subr.mxu0 %v22689_v25  ;;  %16204 = vmatpush3.msra.mxu1 %v20874_v5 }
 0x8e1   : > { %16301 = vmatpush3.msra.mxu0 %v22697_v30  ;;  %16205 = vmatprep.subr.mxu1 %v22689_v25  ;;  %v9243_v30 = vld [vmem:[%s22371_s3] sm:$0xff] }
 0x8e2   : > { %16302 = vmatprep.subr.mxu0 %v22689_v25  ;;  %16206 = vmatpush3.msra.mxu1 %v20883_v28 }
 0x8e3   : > { %16303 = vmatpush3.msra.mxu0 %v22698_v31  ;;  %16207 = vmatprep.subr.mxu1 %v22689_v25 }
 0x8e4   : > { %16304 = vmatprep.subr.mxu0 %v22689_v25  ;;  %16208 = vmatpush3.msra.mxu1 %v20892_v42 }
 0x8e5   : > { %16305 = vmatpush3.msra.mxu0 %v22699_v54  ;;  %16209 = vmatprep.subr.mxu1 %v22689_v25 }
 0x8e6   : > { %16306 = vmatprep.subr.mxu0 %v22689_v25  ;;  %16210 = vmatpush3.msra.mxu1 %v20901_v34 }
 0x8e7   : > { %16307 = vmatpush3.msra.mxu0 %v22700_v33  ;;  %16211 = vmatprep.subr.mxu1 %v22689_v25 }
 0x8e8   : > { %16308 = vmatprep.subr.mxu0 %v22689_v25  ;;  %16212 = vmatpush3.msra.mxu1 %v20910_v60 }
 0x8e9   : > { %16213 = vmatprep.mubr.msk.f32.mxu1 %vm17187_vm1, %v22689_v25  ;;  %16309 = vmatpush3.msra.mxu0 %v22701_v49 }
 0x8ea   : > { %16214 = vmatmul.mubr.f32.vlgmr.msra.gmra.mxu1 %v20811_v43  ;;  %16251 = vmatprep.subr.mxu1 %v22689_v25  ;;  %v12995_v43 = vld [vmem:[%s22371_s3 + $0x98] sm:$0xff] }
 0x8eb   : > { %16310 = vmatprep.subr.mxu0 %v22689_v25  ;;  %16252 = vmatpush3.msra.mxu1 %v20775_v51 }
 0x8ec   : > { %16311 = vmatpush3.msra.mxu0 %v22702_v56  ;;  %16253 = vmatprep.subr.mxu1 %v22689_v25 }
 0x8ed   : > { %16312 = vmatprep.subr.mxu0 %v22689_v25  ;;  %16254 = vmatpush3.msra.mxu1 %v20783_v19 }
 0x8ee   : > { %16313 = vmatpush3.msra.mxu0 %v22703_v22  ;;  %16255 = vmatprep.subr.mxu1 %v22689_v25 }
 0x8ef   : > { %16314 = vmatprep.subr.mxu0 %v22689_v25  ;;  %16256 = vmatpush3.msra.mxu1 %v20793_v40 }
 0x8f0   : > { %16315 = vmatpush3.msra.mxu0 %v22704_v38  ;;  %16257 = vmatprep.subr.mxu1 %v22689_v25 }
 0x8f1   : > { %16316 = vmatprep.subr.mxu0 %v22689_v25  ;;  %16258 = vmatpush3.msra.mxu1 %v20801_v32 }
 0x8f2   : > { %16317 = vmatpush3.msra.mxu0 %v22705_v0  ;;  %16318 = vmatprep.mubr.msk.f32.mxu0 %vm17187_vm1, %v22689_v25 }
 0x8f3   : > { %16259 = vmatprep.subr.mxu1 %v22689_v25  ;;  %16319 = vmatmul.mubr.f32.vlgmr.msra.gmra.mxu0 %v21016_v3 }
 0x8f4   : > { %16260 = vmatpush3.msra.mxu1 %v20809_v50  ;;  %16283 = vmatprep.mubr.msk.f32.mxu1 %vm17187_vm1, %v22689_v25 }
 0x8f5   : > { %16261 = vmatprep.subr.mxu1 %v22689_v25  ;;  %16356 = vmatprep.subr.mxu0 %v22689_v25 }
 0x8f6   : > { %16262 = vmatpush3.msra.mxu1 %v20820_v55  ;;  %16357 = vmatpush3.msra.mxu0 %v12981_v29 }
 0x8f7   : > { %16263 = vmatprep.subr.mxu1 %v22689_v25  ;;  %16358 = vmatprep.subr.mxu0 %v22689_v25 }
 0x8f8   : > { %16264 = vmatpush3.msra.mxu1 %v20829_v16  ;;  %16359 = vmatpush3.msra.mxu0 %v12980_v44  ;;  %v13011_v44 = vld [vmem:[%s22371_s3 + $0xf0] sm:$0xff] }
 0x8f9   : > { %16265 = vmatprep.subr.mxu1 %v22689_v25  ;;  %16360 = vmatprep.subr.mxu0 %v22689_v25 }
 0x8fa   : > { %16266 = vmatpush3.msra.mxu1 %v20838_v57  ;;  %16361 = vmatpush3.msra.mxu0 %v12979_v21  ;;  %v13051_v21 = vld [vmem:[%s22371_s3 + $0x1b8] sm:$0xff] }
 0x8fb   : > { %16267 = vmatprep.subr.mxu1 %v22689_v25  ;;  %16362 = vmatprep.subr.mxu0 %v22689_v25 }
 0x8fc   : > { %16268 = vmatpush3.msra.mxu1 %v20847_v46  ;;  %16363 = vmatpush3.msra.mxu0 %v12978_v52  ;;  %v13010_v52 = vld [vmem:[%s22371_s3 + $0xe8] sm:$0xff] }
 0x8fd   : > { %16269 = vmatprep.subr.mxu1 %v22689_v25  ;;  %16364 = vmatprep.subr.mxu0 %v22689_v25 }
 0x8fe   : > { %16270 = vmatpush3.msra.mxu1 %v20856_v6  ;;  %16372 = vmatprep.mubr.msk.f32.mxu0 %vm17187_vm1, %v22689_v25 }
 0x8ff   : > { %16271 = vmatprep.subr.mxu1 %v22689_v25  ;;  %16365 = vmatpush3.msra.mxu0 %v12977_v13 }
 0x900   : > { %16272 = vmatpush3.msra.mxu1 %v20865_v14  ;;  %16366 = vmatprep.subr.mxu0 %v22689_v25 }
 0x901   : > { %16273 = vmatprep.subr.mxu1 %v22689_v25  ;;  %16367 = vmatpush3.msra.mxu0 %v12976_v61 }
 0x902   : > { %16274 = vmatpush3.msra.mxu1 %v20874_v5  ;;  %16368 = vmatprep.subr.mxu0 %v22689_v25 }
 0x903   : > { %16275 = vmatprep.subr.mxu1 %v22689_v25  ;;  %16369 = vmatpush3.msra.mxu0 %v12975_v12  ;;  %v13009_v12 = vld [vmem:[%s22371_s3 + $0xe0] sm:$0xff] }
 0x904   : > { %16276 = vmatpush3.msra.mxu1 %v20883_v28  ;;  %16370 = vmatprep.subr.mxu0 %v22689_v25 }
 0x905   : > { %16277 = vmatprep.subr.mxu1 %v22689_v25 }
 0x906   : > { %16278 = vmatpush3.msra.mxu1 %v20892_v42 }
 0x907   : > { %16279 = vmatprep.subr.mxu1 %v22689_v25 }
 0x908   : > { %16280 = vmatpush3.msra.mxu1 %v20901_v34 }
 0x909   : > { %16281 = vmatprep.subr.mxu1 %v22689_v25 }
 0x90a   : > { %16282 = vmatpush3.msra.mxu1 %v20910_v60 }
 0x90b   : > { %16284 = vmatmul.mubr.f32.vlgmr.msra.gmra.mxu1 %v20934_v39  ;;  %16321 = vmatprep.subr.mxu1 %v22689_v25 }
 0x90c   : > { %16322 = vmatpush3.msra.mxu1 %v20775_v51  ;;  %16353 = vmatprep.mubr.msk.f32.mxu1 %vm17187_vm1, %v22689_v25  ;;  %v12974_v51 = vld [vmem:[%s22371_s3 + $0x40] sm:$0xff] }
 0x90d   : > { %16323 = vmatprep.subr.mxu1 %v22689_v25  ;;  %16371 = vmatpush3.msra.mxu0 %v12974_v51  ;;  %v13008_v51 = vld [vmem:[%s22371_s3 + $0xd8] sm:$0xff] }
 0x90e   : > { %16324 = vmatpush3.msra.mxu1 %v20783_v19  ;;  %v9251_v19 = vld [vmem:[#allocation3 + $0x1] sm:$0xff]  ;;  %16387 = vmatprep.subr.mxu0 %v22689_v25 }
 0x90f   : > { %16325 = vmatprep.subr.mxu1 %v22689_v25  ;;  %16373 = vmatmul.mubr.msk.f32.vlgmr.msra.gmra.mxu0 %vm472_vm2, %v9251_v19 }
 0x910   : > { %16326 = vmatpush3.msra.mxu1 %v20793_v40  ;;  %16375 = vmatprep.mubr.msk.f32.mxu0 %vm17187_vm1, %v22689_v25  ;;  %v12999_v40 = vld [vmem:[%s22371_s3 + $0xb8] sm:$0xff] }
 0x911   : > { %16327 = vmatprep.subr.mxu1 %v22689_v25 }
 0x912   : > { %16328 = vmatpush3.msra.mxu1 %v20801_v32  ;;  %v12998_v32 = vld [vmem:[%s22371_s3 + $0xb0] sm:$0xff] }
 0x913   : > { %16329 = vmatprep.subr.mxu1 %v22689_v25 }
 0x914   : > { %16330 = vmatpush3.msra.mxu1 %v20809_v50  ;;  %v12996_v50 = vld [vmem:[%s22371_s3 + $0xa0] sm:$0xff] }
 0x915   : > { %16331 = vmatprep.subr.mxu1 %v22689_v25 }
 0x916   : > { %16332 = vmatpush3.msra.mxu1 %v20820_v55  ;;  %v9250_v55 = vld [vmem:[%s22371_s3 + $0x38] sm:$0xff] }
 0x917   : > { %16333 = vmatprep.subr.mxu1 %v22689_v25  ;;  %16388 = vmatpush3.msra.mxu0 %v9250_v55 }
 0x918   : > { %16334 = vmatpush3.msra.mxu1 %v20829_v16  ;;  %16389 = vmatprep.subr.mxu0 %v22689_v25  ;;  %v9249_v16 = vld [vmem:[%s22371_s3 + $0x30] sm:$0xff] }
 0x919   : > { %16335 = vmatprep.subr.mxu1 %v22689_v25  ;;  %16390 = vmatpush3.msra.mxu0 %v9249_v16 }
 0x91a   : > { %16336 = vmatpush3.msra.mxu1 %v20838_v57  ;;  %v13025_v57 = vld [vmem:[%s22371_s3 + $0x138] sm:$0xff]  ;;  %16391 = vmatprep.subr.mxu0 %v22689_v25 }
 0x91b   : > { %16337 = vmatprep.subr.mxu1 %v22689_v25  ;;  %16392 = vmatpush3.msra.mxu0 %v9248_v62  ;;  %v13048_v62 = vld [vmem:[%s22371_s3 + $0x1a0] sm:$0xff] }
 0x91c   : > { %16338 = vmatpush3.msra.mxu1 %v20847_v46  ;;  %v9247_v46 = vld [vmem:[%s22371_s3 + $0x20] sm:$0xff]  ;;  %16393 = vmatprep.subr.mxu0 %v22689_v25 }
 0x91d   : > { %16339 = vmatprep.subr.mxu1 %v22689_v25  ;;  %16394 = vmatpush3.msra.mxu0 %v9247_v46  ;;  %v13037_v46 = vld [vmem:[%s22371_s3 + $0x170] sm:$0xff] }
 0x91e   : > { %16340 = vmatpush3.msra.mxu1 %v20856_v6  ;;  %v9246_v6 = vld [vmem:[%s22371_s3 + $0x18] sm:$0xff]  ;;  %16395 = vmatprep.subr.mxu0 %v22689_v25 }
 0x91f   : > { %16341 = vmatprep.subr.mxu1 %v22689_v25  ;;  %16396 = vmatpush3.msra.mxu0 %v9246_v6  ;;  %v13036_v6 = vld [vmem:[%s22371_s3 + $0x168] sm:$0xff] }
 0x920   : > { %16342 = vmatpush3.msra.mxu1 %v20865_v14  ;;  %16397 = vmatprep.subr.mxu0 %v22689_v25  ;;  %v9245_v14 = vld [vmem:[%s22371_s3 + $0x10] sm:$0xff] }
 0x921   : > { %16343 = vmatprep.subr.mxu1 %v22689_v25  ;;  %16398 = vmatpush3.msra.mxu0 %v9245_v14  ;;  %v13035_v14 = vld [vmem:[%s22371_s3 + $0x160] sm:$0xff] }
 0x922   : > { %16344 = vmatpush3.msra.mxu1 %v20874_v5  ;;  %v9244_v5 = vld [vmem:[%s22371_s3 + $0x8] sm:$0xff]  ;;  %16399 = vmatprep.subr.mxu0 %v22689_v25 }
 0x923   : > { %16345 = vmatprep.subr.mxu1 %v22689_v25  ;;  %16400 = vmatpush3.msra.mxu0 %v9244_v5  ;;  %v13045_v5 = vld [vmem:[%s22371_s3 + $0x188] sm:$0xff] }
 0x924   : > { %16346 = vmatpush3.msra.mxu1 %v20883_v28  ;;  %16401 = vmatprep.subr.mxu0 %v22689_v25  ;;  %v13019_v28 = vld [vmem:[%s22371_s3 + $0x108] sm:$0xff] }
 0x925   : > { %16347 = vmatprep.subr.mxu1 %v22689_v25  ;;  %16402 = vmatpush3.msra.mxu0 %v9243_v30 }
 0x926   : > { %16348 = vmatpush3.msra.mxu1 %v20892_v42  ;;  %v13018_v42 = vld [vmem:[%s22371_s3 + $0x100] sm:$0xff]  ;;  %16449 = vmatprep.subr.mxu0 %v22689_v25 }
 0x927   : > { %16349 = vmatprep.subr.mxu1 %v22689_v25 }
 0x928   : > { %16350 = vmatpush3.msra.mxu1 %v20901_v34 }
 0x929   : > { %16351 = vmatprep.subr.mxu1 %v22689_v25 }
 0x92a   : > { %16352 = vmatpush3.msra.mxu1 %v20910_v60 }
 0x92b   : > { %16354 = vmatmul.mubr.f32.vlgmr.msra.gmra.mxu1 %v21016_v3  ;;  %16418 = vmatprep.subr.mxu1 %v22689_v25  ;;  %v13012_v3 = vld [vmem:[%s22371_s3 + $0xf8] sm:$0xff] }
 0x92c   : > { %16419 = vmatpush3.msra.mxu1 %v12999_v40  ;;  %16434 = vmatprep.mubr.msk.f32.mxu1 %vm17187_vm1, %v22689_v25 }
 0x92d   : > { %16420 = vmatprep.subr.mxu1 %v22689_v25 }
 0x92e   : > { %16421 = vmatpush3.msra.mxu1 %v12998_v32  ;;  %v13007_v32 = vld [vmem:[%s22371_s3 + $0xd0] sm:$0xff] }
 0x92f   : > { %16422 = vmatprep.subr.mxu1 %v22689_v25 }
 0x930   : > { %16423 = vmatpush3.msra.mxu1 %v12997_v15  ;;  %v13006_v15 = vld [vmem:[%s22371_s3 + $0xc8] sm:$0xff] }
 0x931   : > { %16424 = vmatprep.subr.mxu1 %v22689_v25 }
 0x932   : > { %16425 = vmatpush3.msra.mxu1 %v12996_v50 }
 0x933   : > { %16426 = vmatprep.subr.mxu1 %v22689_v25 }
 0x934   : > { %16427 = vmatpush3.msra.mxu1 %v12995_v43  ;;  %v13050_v43 = vld [vmem:[%s22371_s3 + $0x1b0] sm:$0xff] }
 0x935   : > { %16428 = vmatprep.subr.mxu1 %v22689_v25 }
 0x936   : > { %16429 = vmatpush3.msra.mxu1 %v12994_v10  ;;  %v13005_v10 = vld [vmem:[%s22371_s3 + $0xc0] sm:$0xff] }
 0x937   : > { %16430 = vmatprep.subr.mxu1 %v22689_v25 }
 0x938   : > { %16431 = vmatpush3.msra.mxu1 %v12993_v53 }
 0x939   : > { %16432 = vmatprep.subr.mxu1 %v22689_v25 }
 0x93a   : > { %16433 = vmatpush3.msra.mxu1 %v12992_v9  ;;  %v13049_v9 = vld [vmem:[%s22371_s3 + $0x1a8] sm:$0xff] }
 0x93b   : > { %16435 = vmatmul.mubr.msk.f32.vlgmr.msra.gmra.mxu1 %vm472_vm2, %v9474_v47  ;;  %16480 = vmatprep.subr.mxu1 %v22689_v25 }
 0x93c   : > { %16437 = vmatprep.mubr.msk.f32.mxu1 %vm17187_vm1, %v22689_v25  ;;  %16481 = vmatpush3.msra.mxu1 %v13025_v57  ;;  %v13038_v57 = vld [vmem:[%s22371_s3 + $0x178] sm:$0xff] }
 0x93d   : > { %16482 = vmatprep.subr.mxu1 %v22689_v25 }
 0x93e   : > { %16483 = vmatpush3.msra.mxu1 %v13024_v59  ;;  %v13047_v59 = vld [vmem:[%s22371_s3 + $0x198] sm:$0xff] }
 0x93f   : > { %16484 = vmatprep.subr.mxu1 %v22689_v25 }
 0x940   : > { %16485 = vmatpush3.msra.mxu1 %v13023_v1 }
 0x941   : > { %16486 = vmatprep.subr.mxu1 %v22689_v25 }
 0x942   : > { %16487 = vmatpush3.msra.mxu1 %v13022_v2  ;;  %v13046_v2 = vld [vmem:[%s22371_s3 + $0x190] sm:$0xff] }
 0x943   : > { %16488 = vmatprep.subr.mxu1 %v22689_v25 }
 0x944   : > { %16489 = vmatpush3.msra.mxu1 %v13021_v37 }
 0x945   : > { %16490 = vmatprep.subr.mxu1 %v22689_v25 }
 0x946   : > { %16491 = vmatpush3.msra.mxu1 %v13020_v48  ;;  %v13034_v48 = vld [vmem:[%s22371_s3 + $0x158] sm:$0xff] }
 0x947   : > { %16492 = vmatprep.subr.mxu1 %v22689_v25 }
 0x948   : > { %16493 = vmatpush3.msra.mxu1 %v13019_v28  ;;  %v13044_v28 = vld [vmem:[%s22371_s3 + $0x180] sm:$0xff] }
 0x949   : > { %16494 = vmatprep.subr.mxu1 %v22689_v25 }
 0x94a   : > { %16495 = vmatpush3.msra.mxu1 %v13018_v42 }
 0x94b   : > { %16542 = vmatprep.subr.mxu1 %v22689_v25 }
 0x968   : > { %v8603_v31 = vpop.f32.mrf.mxu1 }
 0x96a   : > { %v16110_v34 = vpop.f32.mrf.mxu1 }
 0x96b   : > { %v13033_v34 = vld [vmem:[%s22371_s3 + $0x150] sm:$0xff] }
 0x970   : > { %v8784_v54 = vpop.f32.mrf.mxu0 }
 0x972   : > { %v16180_v60 = vpop.f32.mrf.mxu0 }
 0x973   : > { %v13032_v60 = vld [vmem:[%s22371_s3 + $0x148] sm:$0xff] }
 0x988   : > { %v8689_v33 = vpop.f32.mrf.mxu1 }
 0x989   : > { %v8693_v20 = vmax.f32 %v8603_v31, %v8689_v33  ;;  %v13077_v33 = vld [vmem:[%s22371_s3 + $0x238] sm:$0xff] }
 0x98a   : > { %v16145_v24 = vpop.f32.mrf.mxu1 }
 0x98b   : > { %8694 = vst.msk [vmem:[#allocation3 + $0xb] sm:$0xff] %vm472_vm2, %v8693_v20 }
 0x991   : > { %v8965_v49 = vpop.f32.mrf.mxu0 }
 0x992   : > { %v9252_v58 = vld [vmem:[#allocation3 + $0x9] sm:$0xff] }
 0x993   : > { %v21225_v27 = vld [vmem:[#allocation3 + $0xa] sm:$0xff]  ;;  %v16250_v56 = vpop.f32.mrf.mxu0  ;;  %16376 = vmatmul.mubr.msk.f32.gmra.mxu0 %vm472_vm2, %v9252_v58  ;;  %v13076_v58 = vld [vmem:[%s22371_s3 + $0x230] sm:$0xff] }
 0x994   : > { %16438 = vmatmul.mubr.msk.f32.gmra.mxu1 %vm472_vm2, %v21225_v27  ;;  %16378 = vmatprep.mubr.msk.f32.mxu0 %vm17187_vm1, %v22689_v25  ;;  %v9720_v29 = vld [vmem:[#allocation3 + $0xb] sm:$0xff] }
 0x995   : > { %16440 = vmatprep.mubr.msk.f32.mxu1 %vm17187_vm1, %v22689_v25  ;;  %v9239_v13 = vld [vmem:[#allocation3 + $0x8] sm:$0xff] }
 0x996   : > { %v9843_v56 = vld [vmem:[#allocation3 + $0xc] sm:$0xff] }
 0x9aa   : > { %v8870_v7 = vpop.f32.mrf.mxu1 }
 0x9ab   : > { %v8874_v22 = vmax.f32 %v8784_v54, %v8870_v7 }
 0x9ac   : > { %v16215_v38 = vpop.f32.mrf.mxu1 }
 0x9ad   : > { %8875 = vst.msk [vmem:[#allocation3 + $0x15] sm:$0xff] %vm472_vm2, %v8874_v22  ;;  %v13075_v22 = vld [vmem:[%s22371_s3 + $0x228] sm:$0xff]  ;;  %v13063_v38 = vld [vmem:[%s22371_s3 + $0x1f0] sm:$0xff] }
 0x9b3   : > { %v21235_v26 = vpop.f32.mrf.mxu0 }
 0x9b4   : > { %v9253_v39 = vld [vmem:[#allocation3 + $0x11] sm:$0xff] }
 0x9b5   : > { %v21237_v0 = vld [vmem:[#allocation3 + $0x12] sm:$0xff]  ;;  %v16320_v35 = vpop.f32.mrf.mxu0  ;;  %16379 = vmatmul.mubr.msk.f32.gmra.mxu0 %vm472_vm2, %v9253_v39 }
 0x9b6   : > { %16441 = vmatmul.mubr.msk.f32.gmra.mxu1 %vm472_vm2, %v21237_v0  ;;  %16381 = vmatprep.mubr.msk.f32.mxu0 %vm17187_vm1, %v22689_v25  ;;  %v9721_v61 = vld [vmem:[#allocation3 + $0x13] sm:$0xff]  ;;  %v13073_v35 = vld [vmem:[%s22371_s3 + $0x218] sm:$0xff] }
 0x9b7   : > { %16443 = vmatprep.mubr.msk.f32.mxu1 %vm17187_vm1, %v22689_v25  ;;  %v9240_v19 = vld [vmem:[#allocation3 + $0x10] sm:$0xff]  ;;  %v13062_v39 = vld [vmem:[%s22371_s3 + $0x1e8] sm:$0xff] }
 0x9b8   : > { %v9966_v54 = vld [vmem:[#allocation3 + $0x14] sm:$0xff] }
 0x9cb   : > { %v9051_v8 = vpop.f32.mrf.mxu1 }
 0x9cc   : > { %v9055_v23 = vmax.f32 %v8965_v49, %v9051_v8  ;;  %v13031_v49 = vld [vmem:[%s22371_s3 + $0x140] sm:$0xff]  ;;  %v13072_v8 = vld [vmem:[%s22371_s3 + $0x210] sm:$0xff] }
 0x9cd   : > { %v16285_v17 = vpop.f32.mrf.mxu1 }
 0x9ce   : > { %9056 = vst.msk [vmem:[#allocation3 + $0x1f] sm:$0xff] %vm472_vm2, %v9055_v23  ;;  %v9970_v23 = vld [vmem:[#allocation3 + $0x34] sm:$0x3f] }
 0x9cf   : > { %v21247_v4 = vpop.f32.mrf.mxu0  ;;  %v13061_v17 = vld [vmem:[%s22371_s3 + $0x1e0] sm:$0xff] }
 0x9d1   : > { %v16374_v36 = vpop.f32.mrf.mxu0 }
 0x9d2   : > { %v13070_v36 = vld [vmem:[%s22371_s3 + $0x200] sm:$0xff] }
 0x9d5   : > { %v9254_v18 = vld [vmem:[#allocation3 + $0x19] sm:$0xff]  ;;  %v9255_v41 = vld [vmem:[#allocation3 + $0x21] sm:$0x3f] }
 0x9d6   : > { %v21249_v45 = vld [vmem:[#allocation3 + $0x1a] sm:$0xff]  ;;  %16382 = vmatmul.mubr.msk.f32.gmra.mxu0 %vm472_vm2, %v9254_v18  ;;  %v9478_v11 = vld [vmem:[#allocation3 + $0x22] sm:$0x3f] }
 0x9d7   : > { %16444 = vmatmul.mubr.msk.f32.gmra.mxu1 %vm472_vm2, %v21249_v45  ;;  %16384 = vmatprep.mubr.msk.f32.mxu0 %vm17187_vm1, %v22689_v25  ;;  %v9722_v40 = vld [vmem:[#allocation3 + $0x1b] sm:$0xff] }
 0x9d8   : > { %16446 = vmatprep.mubr.msk.f32.mxu1 %vm17187_vm1, %v22689_v25  ;;  %v9241_v50 = vld [vmem:[#allocation3 + $0x18] sm:$0xff]  ;;  %v9242_v16 = vld [vmem:[#allocation3 + $0x20] sm:$0x3f] }
 0x9d9   : > { %v9967_v24 = vld [vmem:[#allocation3 + $0x1c] sm:$0xff] }
 0x9da   : > { %16385 = vmatmul.mubr.msk.f32.gmra.mxu0 %vm472_vm2, %v9255_v41  ;;  %v13071_v18 = vld [vmem:[%s22371_s3 + $0x208] sm:$0xff]  ;;  %v13059_v41 = vld [vmem:[%s22371_s3 + $0x1d0] sm:$0xff] }
 0x9db   : > { %16447 = vmatmul.mubr.msk.f32.gmra.mxu1 %vm472_vm2, %v9478_v11  ;;  %16403 = vmatprep.mubr.msk.f32.mxu0 %vm17187_vm1, %v22689_v25  ;;  %v10212_v11 = vld [vmem:[#allocation3 + $0x16] sm:$0xff] }
 0x9dc   : > { %16496 = vmatprep.mubr.msk.f32.mxu1 %vm17187_vm1, %v22689_v25 }
 0x9de   : > { %16404 = vmatmul.mubr.msk.f32.vlgmr.msra.gmra.mxu0 %vm472_vm2, %v9238_v63  ;;  %v13058_v63 = vld [vmem:[%s22371_s3 + $0x1c8] sm:$0xff] }
 0x9df   : > { %16497 = vmatmul.mubr.msk.f32.vlgmr.msra.gmra.mxu1 %vm472_vm2, %v9720_v29  ;;  %16450 = vmatpush3.msra.mxu0 %v13012_v3  ;;  %v10213_v29 = vld [vmem:[#allocation3 + $0x1e] sm:$0xff] }
 0x9e0   : > { %16406 = vmatprep.mubr.msk.f32.mxu0 %vm17187_vm1, %v22689_v25  ;;  %16451 = vmatprep.subr.mxu0 %v22689_v25 }
 0x9e1   : > { %16499 = vmatprep.mubr.msk.f32.mxu1 %vm17187_vm1, %v22689_v25  ;;  %16452 = vmatpush3.msra.mxu0 %v13011_v44  ;;  %v13057_v44 = vld [vmem:[%s22371_s3 + $0x1c0] sm:$0xff] }
 0x9e2   : > { %16543 = vmatpush3.msra.mxu1 %v13051_v21  ;;  %16407 = vmatmul.mubr.msk.f32.gmra.mxu0 %vm472_vm2, %v9239_v13  ;;  %v10089_v21 = vld [vmem:[#allocation3 + $0x15] sm:$0xff]  ;;  %v10090_v13 = vld [vmem:[#allocation3 + $0x1d] sm:$0xff] }
 0x9e3   : > { %16453 = vmatprep.subr.mxu0 %v22689_v25  ;;  %16500 = vmatmul.mubr.msk.f32.gmra.mxu1 %vm472_vm2, %v9721_v61 }
 0x9e4   : > { %16454 = vmatpush3.msra.mxu0 %v13010_v52  ;;  %16409 = vmatprep.mubr.msk.f32.mxu0 %vm17187_vm1, %v22689_v25 }
 0x9e5   : > { %16455 = vmatprep.subr.mxu0 %v22689_v25  ;;  %16502 = vmatprep.mubr.msk.f32.mxu1 %vm17187_vm1, %v22689_v25 }
 0x9e6   : > { %16456 = vmatpush3.msra.mxu0 %v13009_v12  ;;  %16544 = vmatprep.subr.mxu1 %v22689_v25  ;;  %v10216_v12 = vld [vmem:[#allocation3 + $0x36] sm:$0x3f] }
 0x9e7   : > { %16410 = vmatmul.mubr.msk.f32.gmra.mxu0 %vm472_vm2, %v9240_v19  ;;  %16457 = vmatprep.subr.mxu0 %v22689_v25 }
 0x9e8   : > { %16503 = vmatmul.mubr.msk.f32.gmra.mxu1 %vm472_vm2, %v9722_v40  ;;  %16458 = vmatpush3.msra.mxu0 %v13008_v51  ;;  %v10093_v40 = vld [vmem:[#allocation3 + $0x35] sm:$0x3f] }
 0x9e9   : > { %16412 = vmatprep.mubr.msk.f32.mxu0 %vm17187_vm1, %v22689_v25  ;;  %16459 = vmatprep.subr.mxu0 %v22689_v25 }
 0x9ea   : > { %16460 = vmatpush3.msra.mxu0 %v13007_v32  ;;  %16545 = vmatpush3.msra.mxu1 %v13050_v43 }
 0x9eb   : > { %16413 = vmatmul.mubr.msk.f32.gmra.mxu0 %vm472_vm2, %v9241_v50  ;;  %16461 = vmatprep.subr.mxu0 %v22689_v25  ;;  %v9232_v53 = vpop.f32.mrf.mxu1 }
 0x9ec   : > { %16415 = vmatprep.mubr.msk.f32.mxu0 %vm17187_vm1, %v22689_v25  ;;  %16462 = vmatpush3.msra.mxu0 %v13006_v15  ;;  %v9236_v55 = vmax.f32 %v21235_v26, %v9232_v53  ;;  %v13074_v26 = vld [vmem:[%s22371_s3 + $0x220] sm:$0xff]  ;;  %v21548_v53 = vld [vmem:[%s22376_s8 + $0xf8] sm:$0xff] }
 0x9ed   : > { %16463 = vmatprep.subr.mxu0 %v22689_v25  ;;  %v16355_v47 = vpop.f32.mrf.mxu1  ;;  %16546 = vmatprep.subr.mxu1 %v22689_v25 }
 0x9ee   : > { %16464 = vmatpush3.msra.mxu0 %v13005_v10  ;;  %9237 = vst.msk [vmem:[#allocation3 + $0x29] sm:$0xff] %vm472_vm2, %v9236_v55  ;;  %16547 = vmatpush3.msra.mxu1 %v13049_v9  ;;  %v21543_v10 = vld [vmem:[%s22376_s8 + $0x78] sm:$0xff]  ;;  %v21557_v55 = vld [vmem:[%s22376_s8 + $0x70] sm:$0xff]  ;;  %v21571_v47 = vld [vmem:[%s22376_s8 + $0x68] sm:$0xff] }
 0x9ef   : > { %16416 = vmatmul.mubr.msk.f32.gmra.mxu0 %vm472_vm2, %v9242_v16  ;;  %16511 = vmatprep.subr.mxu0 %v22689_v25  ;;  %v21562_v9 = vld [vmem:[%s22376_s8 + $0xf0] sm:$0xff]  ;;  %v21576_v16 = vld [vmem:[%s22376_s8 + $0xe8] sm:$0xff] }
 0x9f0   : > { %16465 = vmatprep.mubr.msk.f32.mxu0 %vm17187_vm1, %v22689_v25  ;;  %16548 = vmatprep.subr.mxu1 %v22689_v25 }
 0x9f1   : > { %16505 = vmatprep.mubr.msk.f32.mxu1 %vm17187_vm1, %v22689_v25  ;;  %16549 = vmatpush3.msra.mxu1 %v13048_v62  ;;  %v21585_v62 = vld [vmem:[%s22376_s8 + $0x60] sm:$0xff] }
 0x9f2   : > { %16550 = vmatprep.subr.mxu1 %v22689_v25 }
 0x9f3   : > { %16466 = vmatmul.mubr.msk.f32.vlgmr.msra.gmra.mxu0 %vm472_vm2, %v21225_v27  ;;  %16551 = vmatpush3.msra.mxu1 %v13047_v59  ;;  %v13064_v27 = vld [vmem:[%s22371_s3 + $0x1f8] sm:$0xff] }
 0x9f4   : > { %16512 = vmatpush3.msra.mxu0 %v13038_v57  ;;  %16468 = vmatprep.mubr.msk.f32.mxu0 %vm17187_vm1, %v22689_v25  ;;  %v21590_v57 = vld [vmem:[%s22376_s8 + $0xe0] sm:$0xff]  ;;  %v21599_v59 = vld [vmem:[%s22376_s8 + $0x58] sm:$0xff] }
 0x9f5   : > { %16513 = vmatprep.subr.mxu0 %v22689_v25  ;;  %v9723_v1 = vld [vmem:[#allocation3 + $0x23] sm:$0xff]  ;;  %16552 = vmatprep.subr.mxu1 %v22689_v25  ;;  %v9724_v37 = vld [vmem:[#allocation3 + $0x2b] sm:$0x3f] }
 0x9f6   : > { %16514 = vmatpush3.msra.mxu0 %v13037_v46  ;;  %16506 = vmatmul.mubr.msk.f32.gmra.mxu1 %vm472_vm2, %v9723_v1  ;;  %v9600_v31 = vld [vmem:[#allocation3 + $0x22] sm:$0xff]  ;;  %v9601_v20 = vld [vmem:[#allocation3 + $0x2a] sm:$0x3f] }
 0x9f7   : > { %16469 = vmatmul.mubr.msk.f32.gmra.mxu0 %vm472_vm2, %v21237_v0  ;;  %16515 = vmatprep.subr.mxu0 %v22689_v25  ;;  %v9968_v7 = vld [vmem:[#allocation3 + $0x24] sm:$0xff]  ;;  %v9969_v0 = vld [vmem:[#allocation3 + $0x2c] sm:$0xff] }
 0x9f8   : > { %16471 = vmatprep.mubr.msk.f32.mxu0 %vm17187_vm1, %v22689_v25  ;;  %16516 = vmatpush3.msra.mxu0 %v13036_v6  ;;  %v9847_v3 = vld [vmem:[#allocation3 + $0x2c] sm:$0x3f]  ;;  %v21613_v1 = vld [vmem:[%s22376_s8 + $0x50] sm:$0xff] }
 0x9f9   : > { %16508 = vmatprep.mubr.msk.f32.mxu1 %vm17187_vm1, %v22689_v25  ;;  %16517 = vmatprep.subr.mxu0 %v22689_v25  ;;  %v10214_v52 = vld [vmem:[#allocation3 + $0x26] sm:$0xff]  ;;  %v10215_v61 = vld [vmem:[#allocation3 + $0x2e] sm:$0xff] }
 0x9fa   : > { %16553 = vmatpush3.msra.mxu1 %v13046_v2  ;;  %16518 = vmatpush3.msra.mxu0 %v13035_v14  ;;  %v10091_v51 = vld [vmem:[#allocation3 + $0x25] sm:$0xff]  ;;  %v10092_v19 = vld [vmem:[#allocation3 + $0x2d] sm:$0xff]  ;;  %v21627_v2 = vld [vmem:[%s22376_s8 + $0x48] sm:$0xff] }
 0x9fb   : > { %16472 = vmatmul.mubr.msk.f32.gmra.mxu0 %vm472_vm2, %v21249_v45  ;;  %16509 = vmatmul.mubr.msk.f32.gmra.mxu1 %vm472_vm2, %v9724_v37  ;;  %v21384_v30 = vpop.f32.mrf.mxu1  ;;  %v13060_v45 = vld [vmem:[%s22371_s3 + $0x1d8] sm:$0xff]  ;;  %v21618_v6 = vld [vmem:[%s22376_s8 + $0xd0] sm:$0xff]  ;;  %v21632_v14 = vld [vmem:[%s22376_s8 + $0xc8] sm:$0xff] }
 0x9fc   : > { %16554 = vmatprep.subr.mxu1 %v22689_v25  ;;  %16519 = vmatprep.subr.mxu0 %v22689_v25  ;;  %v21604_v46 = vld [vmem:[%s22376_s8 + $0xd8] sm:$0xff]  ;;  %v21641_v37 = vld [vmem:[%s22376_s8 + $0x40] sm:$0xff] }
 0x9fd   : > { %16555 = vmatpush3.msra.mxu1 %v13045_v5  ;;  %16520 = vmatpush3.msra.mxu0 %v13034_v48  ;;  %v16436_v42 = vpop.f32.mrf.mxu1  ;;  %v21646_v5 = vld [vmem:[%s22376_s8 + $0xc0] sm:$0xff]  ;;  %v21655_v48 = vld [vmem:[%s22376_s8 + $0x38] sm:$0xff] }
 0x9fe   : > { %16556 = vmatprep.subr.mxu1 %v22689_v25  ;;  %16474 = vmatprep.mubr.msk.f32.mxu0 %vm17187_vm1, %v22689_v25  ;;  %v21669_v42 = vld [vmem:[%s22376_s8 + $0x30] sm:$0xff] }
 0x9ff   : > { %16557 = vmatpush3.msra.mxu1 %v13044_v28  ;;  %16558 = vmatprep.mubr.msk.f32.mxu1 %vm17187_vm1, %v22689_v25  ;;  %v21660_v28 = vld [vmem:[%s22376_s8 + $0xb8] sm:$0xff] }
 0xa00   : > { %16475 = vmatmul.mubr.msk.f32.gmra.mxu0 %vm472_vm2, %v9600_v31  ;;  %16521 = vmatprep.subr.mxu0 %v22689_v25  ;;  %v21674_v31 = vld [vmem:[%s22376_s8 + $0xb0] sm:$0xff] }
 0xa01   : > { %16559 = vmatmul.mubr.msk.f32.vlgmr.msra.gmra.mxu1 %vm472_vm2, %v9966_v54  ;;  %16522 = vmatpush3.msra.mxu0 %v13033_v34  ;;  %22706 = vst [vmem:[#allocation19_spill] sm:$0xff] %v21674_v31  ;;  %v21683_v34 = vld [vmem:[%s22376_s8 + $0x28] sm:$0xff] }
 0xa02   : > { %16477 = vmatprep.mubr.msk.f32.mxu0 %vm17187_vm1, %v22689_v25  ;;  %16523 = vmatprep.subr.mxu0 %v22689_v25  ;;  %22707 = vst [vmem:[#allocation27_spill] sm:$0xff] %v21683_v34 }
 0xa03   : > { %16561 = vmatprep.mubr.msk.f32.mxu1 %vm17187_vm1, %v22689_v25  ;;  %16524 = vmatpush3.msra.mxu0 %v13032_v60  ;;  %v21697_v60 = vld [vmem:[%s22376_s8 + $0x20] sm:$0xff] }
 0xa04   : > { %16604 = vmatprep.subr.mxu1 %v22689_v25  ;;  %16478 = vmatmul.mubr.msk.f32.gmra.mxu0 %vm472_vm2, %v9601_v20  ;;  %22709 = vst [vmem:[#allocation30_spill] sm:$0xff] %v21697_v60 }
 0xa05   : > { %16562 = vmatmul.mubr.msk.f32.gmra.mxu1 %vm472_vm2, %v9967_v24  ;;  %16525 = vmatprep.subr.mxu0 %v22689_v25 }
 0xa06   : > { %16605 = vmatpush3.msra.mxu1 %v13077_v33  ;;  %16526 = vmatpush3.msra.mxu0 %v13031_v49  ;;  %v21702_v33 = vld [vmem:[%s22376_s8 + $0xa0] sm:$0xff]  ;;  %v21711_v49 = vld [vmem:[%s22376_s8 + $0x18] sm:$0xff] }
 0xa07   : > { %16606 = vmatprep.subr.mxu1 %v22689_v25  ;;  %16527 = vmatprep.mubr.msk.f32.mxu0 %vm17187_vm1, %v22689_v25  ;;  %22710 = vst [vmem:[#allocation24_spill] sm:$0xff] %v21702_v33  ;;  %22711 = vst [vmem:[#allocation48_spill] sm:$0xff] %v21711_v49 }
 0xa08   : > { %16564 = vmatprep.mubr.msk.f32.mxu1 %vm17187_vm1, %v22689_v25  ;;  %16573 = vmatprep.subr.mxu0 %v22689_v25 }
 0xa09   : > { %16607 = vmatpush3.msra.mxu1 %v13076_v58  ;;  %16528 = vmatmul.mubr.msk.f32.vlgmr.msra.gmra.mxu0 %vm472_vm2, %v9843_v56  ;;  %v21716_v58 = vld [vmem:[%s22376_s8 + $0x98] sm:$0xff] }
 0xa0a   : > { %16565 = vmatmul.mubr.msk.f32.gmra.mxu1 %vm472_vm2, %v9968_v7  ;;  %16574 = vmatpush3.msra.mxu0 %v13064_v27  ;;  %22712 = vst [vmem:[#allocation28_spill] sm:$0xff] %v21716_v58 }
 0xa0b   : > { %16608 = vmatprep.subr.mxu1 %v22689_v25  ;;  %16575 = vmatprep.subr.mxu0 %v22689_v25 }
 0xa0c   : > { %16609 = vmatpush3.msra.mxu1 %v13075_v22  ;;  %16530 = vmatprep.mubr.msk.f32.mxu0 %vm17187_vm1, %v22689_v25  ;;  %v21730_v22 = vld [vmem:[%s22376_s8 + $0x90] sm:$0xff] }
 0xa0d   : > { %16610 = vmatprep.subr.mxu1 %v22689_v25  ;;  %16567 = vmatprep.mubr.msk.f32.mxu1 %vm17187_vm1, %v22689_v25  ;;  %22714 = vst [vmem:[#allocation43_spill] sm:$0xff] %v21730_v22 }
 0xa0e   : > { %16576 = vmatpush3.msra.mxu0 %v13063_v38  ;;  %16611 = vmatpush3.msra.mxu1 %v13074_v26  ;;  %v21739_v38 = vld [vmem:[%s22376_s8 + $0x8] sm:$0xff] }
 0xa0f   : > { %16531 = vmatmul.mubr.msk.f32.gmra.mxu0 %vm472_vm2, %v9966_v54  ;;  %16568 = vmatmul.mubr.msk.f32.gmra.mxu1 %vm472_vm2, %v9969_v0  ;;  %v21688_v54 = vld [vmem:[%s22376_s8 + $0xa8] sm:$0xff]  ;;  %22715 = vst [vmem:[#allocation32_spill] sm:$0xff] %v21739_v38  ;;  %v21756_v0 = vld [vmem:[%s22376_s8 + $0x80] sm:$0xff] }
 0xa10   : > { %16577 = vmatprep.subr.mxu0 %v22689_v25  ;;  %16612 = vmatprep.subr.mxu1 %v22689_v25  ;;  %22708 = vst [vmem:[#allocation44_spill] sm:$0xff] %v21688_v54  ;;  %v21744_v26 = vld [vmem:[%s22376_s8 + $0x88] sm:$0xff]  ;;  %22718 = vst [vmem:[#allocation31_spill] sm:$0xff] %v21756_v0 }
 0xa11   : > { %16578 = vmatpush3.msra.mxu0 %v13062_v39  ;;  %16613 = vmatpush3.msra.mxu1 %v13073_v35  ;;  %22716 = vst [vmem:[#allocation29_spill] sm:$0xff] %v21744_v26  ;;  %v21751_v39 = vld [vmem:[%s22376_s8] sm:$0xff] }
 0xa12   : > { %16533 = vmatprep.mubr.msk.f32.mxu0 %vm17187_vm1, %v22689_v25  ;;  %16614 = vmatprep.subr.mxu1 %v22689_v25  ;;  %22717 = vst [vmem:[#allocation47_spill] sm:$0xff] %v21751_v39 }
 0xa13   : > { %16570 = vmatprep.mubr.msk.f32.mxu1 %vm17187_vm1, %v22689_v25  ;;  %16579 = vmatprep.subr.mxu0 %v22689_v25 }
 0xa14   : > { %16615 = vmatpush3.msra.mxu1 %v13072_v8  ;;  %16534 = vmatmul.mubr.msk.f32.gmra.mxu0 %vm472_vm2, %v9967_v24 }
 0xa15   : > { %16571 = vmatmul.mubr.msk.f32.gmra.mxu1 %vm472_vm2, %v9970_v23  ;;  %16580 = vmatpush3.msra.mxu0 %v13061_v17 }
 0xa16   : > { %16616 = vmatprep.subr.mxu1 %v22689_v25  ;;  %16581 = vmatprep.subr.mxu0 %v22689_v25 }
 0xa17   : > { %16617 = vmatpush3.msra.mxu1 %v13071_v18  ;;  %16582 = vmatpush3.msra.mxu0 %v13060_v45 }
 0xa18   : > { %16618 = vmatprep.subr.mxu1 %v22689_v25  ;;  %16536 = vmatprep.mubr.msk.f32.mxu0 %vm17187_vm1, %v22689_v25 }
 0xa19   : > { %16619 = vmatpush3.msra.mxu1 %v13070_v36  ;;  %16620 = vmatprep.mubr.msk.f32.mxu1 %vm17187_vm1, %v22689_v25 }
 0xa1a   : > { %16537 = vmatmul.mubr.msk.f32.gmra.mxu0 %vm472_vm2, %v9968_v7  ;;  %16583 = vmatprep.subr.mxu0 %v22689_v25  ;;  %v21725_v7 = vld [vmem:[%s22376_s8 + $0x10] sm:$0xff] }
 0xa1b   : > { %16621 = vmatmul.mubr.msk.f32.vlgmr.msra.gmra.mxu1 %vm472_vm2, %v10212_v11  ;;  %16584 = vmatpush3.msra.mxu0 %v13059_v41  ;;  %22713 = vst [vmem:[#allocation46_spill] sm:$0xff] %v21725_v7 }
 0xa1c   : > { %16539 = vmatprep.mubr.msk.f32.mxu0 %vm17187_vm1, %v22689_v25  ;;  %16585 = vmatprep.subr.mxu0 %v22689_v25 }
 0xa1d   : > { %16623 = vmatprep.mubr.msk.f32.mxu1 %vm17187_vm1, %v22689_v25  ;;  %16586 = vmatpush3.msra.mxu0 %v13058_v63 }
 0xa1e   : > { %16670 = vmatprep.subr.mxu1 %v22689_v25  ;;  %16540 = vmatmul.mubr.msk.f32.gmra.mxu0 %vm472_vm2, %v9847_v3 }
 0xa1f   : > { %16624 = vmatmul.mubr.msk.f32.gmra.mxu1 %vm472_vm2, %v10213_v29  ;;  %16587 = vmatprep.subr.mxu0 %v22689_v25 }
 0xa20   : > { %16589 = vmatprep.mubr.msk.f32.mxu0 %vm17187_vm1, %v22689_v25  ;;  %16588 = vmatpush3.msra.mxu0 %v13057_v44 }
 0xa21   : > { %16626 = vmatprep.mubr.msk.f32.mxu1 %vm17187_vm1, %v22689_v25  ;;  %16635 = vmatprep.subr.mxu0 %v22689_v25 }
 0xa22   : > { %16590 = vmatmul.mubr.msk.f32.vlgmr.msra.gmra.mxu0 %vm472_vm2, %v10089_v21  ;;  %16671 = vmatpush3.msra.mxu1 %v21548_v53 }
 0xa23   : > { %16627 = vmatmul.mubr.msk.f32.gmra.mxu1 %vm472_vm2, %v10214_v52  ;;  %16592 = vmatprep.mubr.msk.f32.mxu0 %vm17187_vm1, %v22689_v25 }
 0xa24   : > { %16629 = vmatprep.mubr.msk.f32.mxu1 %vm17187_vm1, %v22689_v25  ;;  %16636 = vmatpush3.msra.mxu0 %v21543_v10 }
 0xa25   : > { %16637 = vmatprep.subr.mxu0 %v22689_v25  ;;  %16672 = vmatprep.subr.mxu1 %v22689_v25 }
 0xa26   : > { %16593 = vmatmul.mubr.msk.f32.gmra.mxu0 %vm472_vm2, %v10090_v13  ;;  %16673 = vmatpush3.msra.mxu1 %v21562_v9 }
 0xa27   : > { %16630 = vmatmul.mubr.msk.f32.gmra.mxu1 %vm472_vm2, %v10215_v61  ;;  %16595 = vmatprep.mubr.msk.f32.mxu0 %vm17187_vm1, %v22689_v25 }
 0xa28   : > { %16632 = vmatprep.mubr.msk.f32.mxu1 %vm17187_vm1, %v22689_v25  ;;  %16638 = vmatpush3.msra.mxu0 %v21557_v55 }
 0xa29   : > { %16639 = vmatprep.subr.mxu0 %v22689_v25  ;;  %16674 = vmatprep.subr.mxu1 %v22689_v25 }
 0xa2a   : > { %16596 = vmatmul.mubr.msk.f32.gmra.mxu0 %vm472_vm2, %v10091_v51  ;;  %16675 = vmatpush3.msra.mxu1 %v21576_v16 }
 0xa2b   : > { %16633 = vmatmul.mubr.msk.f32.gmra.mxu1 %vm472_vm2, %v10216_v12  ;;  %16598 = vmatprep.mubr.msk.f32.mxu0 %vm17187_vm1, %v22689_v25 }
 0xa2c   : > { %16702 = vmatprep.mubr.msk.f32.mxu1 %vm17187_vm1, %v22689_v25  ;;  %16640 = vmatpush3.msra.mxu0 %v21571_v47 }
 0xa2d   : > { %16641 = vmatprep.subr.mxu0 %v22689_v25  ;;  %16676 = vmatprep.subr.mxu1 %v22689_v25 }
 0xa2e   : > { %16599 = vmatmul.mubr.msk.f32.gmra.mxu0 %vm472_vm2, %v10092_v19  ;;  %16677 = vmatpush3.msra.mxu1 %v21590_v57 }
 0xa2f   : > { %16601 = vmatprep.mubr.msk.f32.mxu0 %vm17187_vm1, %v22689_v25  ;;  %16642 = vmatpush3.msra.mxu0 %v21585_v62 }
 0xa30   : > { %16643 = vmatprep.subr.mxu0 %v22689_v25  ;;  %16678 = vmatprep.subr.mxu1 %v22689_v25 }
 0xa31   : > { %16644 = vmatpush3.msra.mxu0 %v21599_v59  ;;  %16679 = vmatpush3.msra.mxu1 %v21604_v46 }
 0xa32   : > { %16602 = vmatmul.mubr.msk.f32.gmra.mxu0 %vm472_vm2, %v10093_v40  ;;  %16645 = vmatprep.subr.mxu0 %v22689_v25 }
 0xa33   : > { %16667 = vmatprep.mubr.msk.f32.mxu0 %vm17187_vm1, %v22689_v25  ;;  %16680 = vmatprep.subr.mxu1 %v22689_v25 }
 0xa34   : > { %16646 = vmatpush3.msra.mxu0 %v21613_v1  ;;  %16681 = vmatpush3.msra.mxu1 %v21618_v6 }
 0xa35   : > { %16647 = vmatprep.subr.mxu0 %v22689_v25  ;;  %16682 = vmatprep.subr.mxu1 %v22689_v25 }
 0xa36   : > { %16648 = vmatpush3.msra.mxu0 %v21627_v2  ;;  %16683 = vmatpush3.msra.mxu1 %v21632_v14 }
 0xa37   : > { %16649 = vmatprep.subr.mxu0 %v22689_v25  ;;  %16684 = vmatprep.subr.mxu1 %v22689_v25 }
 0xa38   : > { %16650 = vmatpush3.msra.mxu0 %v21641_v37  ;;  %16685 = vmatpush3.msra.mxu1 %v21646_v5 }
 0xa39   : > { %16651 = vmatprep.subr.mxu0 %v22689_v25  ;;  %16686 = vmatprep.subr.mxu1 %v22689_v25 }
 0xa3a   : > { %16652 = vmatpush3.msra.mxu0 %v21655_v48  ;;  %16687 = vmatpush3.msra.mxu1 %v21660_v28 }
 0xa3b   : > { %16653 = vmatprep.subr.mxu0 %v22689_v25  ;;  %16688 = vmatprep.subr.mxu1 %v22689_v25 }
 0xa3c   : > { %16654 = vmatpush3.msra.mxu0 %v21669_v42  ;;  %16689 = vmatpush3.msra.mxu1 %v21674_v31 }
 0xa3d   : > { %16655 = vmatprep.subr.mxu0 %v22689_v25  ;;  %16690 = vmatprep.subr.mxu1 %v22689_v25 }
 0xa3e   : > { %16656 = vmatpush3.msra.mxu0 %v21683_v34  ;;  %16691 = vmatpush3.msra.mxu1 %v21688_v54 }
 0xa3f   : > { %16657 = vmatprep.subr.mxu0 %v22689_v25  ;;  %16692 = vmatprep.subr.mxu1 %v22689_v25 }
 0xa40   : > { %16658 = vmatpush3.msra.mxu0 %v21697_v60  ;;  %16693 = vmatpush3.msra.mxu1 %v21702_v33 }
 0xa41   : > { %16659 = vmatprep.subr.mxu0 %v22689_v25  ;;  %16694 = vmatprep.subr.mxu1 %v22689_v25 }
 0xa42   : > { %16660 = vmatpush3.msra.mxu0 %v21711_v49  ;;  %16695 = vmatpush3.msra.mxu1 %v21716_v58 }
 0xa43   : > { %16661 = vmatprep.subr.mxu0 %v22689_v25  ;;  %16696 = vmatprep.subr.mxu1 %v22689_v25 }
 0xa44   : > { %16662 = vmatpush3.msra.mxu0 %v21725_v7  ;;  %16697 = vmatpush3.msra.mxu1 %v21730_v22 }
 0xa45   : > { %16663 = vmatprep.subr.mxu0 %v22689_v25  ;;  %16698 = vmatprep.subr.mxu1 %v22689_v25 }
 0xa46   : > { %16664 = vmatpush3.msra.mxu0 %v21739_v38  ;;  %16699 = vmatpush3.msra.mxu1 %v21744_v26 }
 0xa47   : > { %16665 = vmatprep.subr.mxu0 %v22689_v25  ;;  %16700 = vmatprep.subr.mxu1 %v22689_v25 }
 0xa48   : > { %16666 = vmatpush3.msra.mxu0 %v21751_v39  ;;  %16701 = vmatpush3.msra.mxu1 %v21756_v0 }
 0xa49   : > { %16705 = vmatprep.subr.mxu0 %v22689_v25  ;;  %16740 = vmatprep.subr.mxu1 %v22689_v25 }
 0xa53   : > { %v21536_v32 = vpop.f32.mrf.mxu0 }
 0xa54   : > { %v21538_v15 = vpop.f32.mrf.mxu1 }
 0xa55   : > { %v16377_v50 = vpop.f32.mrf.mxu0 }
 0xa56   : > { %v16439_v43 = vpop.f32.mrf.mxu1 }
 0xa75   : > { %v9355_v20 = vpop.f32.mrf.mxu0 }
 0xa76   : > { %v9578_v24 = vpop.f32.mrf.mxu1 }
 0xa77   : > { %v16380_v27 = vpop.f32.mrf.mxu0 }
 0xa78   : > { %v16442_v56 = vpop.f32.mrf.mxu1 }
 0xa96   : > { %v9360_v35 = vpop.f32.mrf.mxu0 }
 0xa97   : > { %v9583_v8 = vpop.f32.mrf.mxu1 }
 0xa98   : > { %v16383_v23 = vpop.f32.mrf.mxu0 }
 0xa99   : > { %v16445_v17 = vpop.f32.mrf.mxu1 }
 0xa9a   : > { %v9365_v18 = vpop.f32.mrf.mxu0 }
 0xa9b   : > { %v9588_v45 = vpop.f32.mrf.mxu1 }
 0xa9c   : > { %v16386_v36 = vpop.f32.mrf.mxu0 }
 0xa9d   : > { %v16448_v41 = vpop.f32.mrf.mxu1 }
 0xa9e   : > { %v9450_v11 = vpop.f32.mrf.mxu0 }
 0xa9f   : > { %v9814_v63 = vpop.f32.mrf.mxu1  ;;  %v9451_v38 = vadd.f32 %v9450_v11, %v21247_v4 }
 0xaa0   : > { %v16405_v3 = vpop.f32.mrf.mxu0 }
 0xaa1   : > { %v16498_v29 = vpop.f32.mrf.mxu1 }
 0xaa2   : > { %v9455_v44 = vpop.f32.mrf.mxu0 }
 0xaa3   : > { %v9819_v21 = vpop.f32.mrf.mxu1 }
 0xaa4   : > { %v16408_v52 = vpop.f32.mrf.mxu0 }
 0xaa5   : > { %v16501_v13 = vpop.f32.mrf.mxu1 }
 0xaa7   : > { %v9460_v61 = vpop.f32.mrf.mxu0 }
 0xaa8   : > { %v9461_v12 = vadd.f32 %v9460_v61, %v9355_v20  ;;  %v21764_v51 = vpop.f32.mrf.mxu1 }
 0xaa9   : > { %v16411_v19 = vpop.f32.mrf.mxu0 }
 0xaaa   : > { %v16504_v40 = vpop.f32.mrf.mxu1  ;;  %v9594_v50 = vadd.f32 %v9578_v24, %v9461_v12 }
 0xaab   : > { %v9465_v43 = vpop.f32.mrf.mxu0 }
 0xaac   : > { %v9466_v27 = vadd.f32 %v9465_v43, %v9360_v35 }
 0xaad   : > { %v16414_v56 = vpop.f32.mrf.mxu0 }
 0xaae   : > { %v9595_v23 = vadd.f32 %v9583_v8, %v9466_v27 }
 0xaaf   : > { %v9470_v17 = vpop.f32.mrf.mxu0 }
 0xab0   : > { %v9471_v36 = vadd.f32 %v9470_v17, %v9365_v18 }
 0xab1   : > { %v16417_v41 = vpop.f32.mrf.mxu0 }
 0xab2   : > { %v21766_v3 = vadd.f32 %v9588_v45, %v9471_v36 }
 0xab3   : > { %v9691_v29 = vpop.f32.mrf.mxu0 }
 0xab5   : > { %v16467_v0 = vpop.f32.mrf.mxu0 }
 0xab6   : > { %v9829_v13 = vpop.f32.mrf.mxu1 }
 0xab7   : > { %v9696_v52 = vpop.f32.mrf.mxu0 }
 0xab8   : > { %v16507_v20 = vpop.f32.mrf.mxu1 }
 0xab9   : > { %v16470_v39 = vpop.f32.mrf.mxu0 }
 0xabb   : > { %v9701_v61 = vpop.f32.mrf.mxu0  ;;  %v21768_v26 = vpop.f32.mrf.mxu1 }
 0xabc   : > { %v9717_v54 = vadd.f32 %v9701_v61, %v9594_v50 }
 0xabd   : > { %v16473_v19 = vpop.f32.mrf.mxu0  ;;  %v16510_v24 = vpop.f32.mrf.mxu1 }
 0xac0   : > { %v9706_v12 = vpop.f32.mrf.mxu0 }
 0xac1   : > { %v10060_v35 = vpop.f32.mrf.mxu1 }
 0xac2   : > { %v16476_v40 = vpop.f32.mrf.mxu0 }
 0xac3   : > { %v16560_v8 = vpop.f32.mrf.mxu1  ;;  %v9456_v40 = vadd.f32 %v9455_v44, %v21536_v32 }
 0xac4   : > { %v9711_v43 = vpop.f32.mrf.mxu0  ;;  %v9592_v8 = vadd.f32 %v21384_v30, %v9451_v38 }
 0xac5   : > { %v10065_v18 = vpop.f32.mrf.mxu1  ;;  %v9593_v58 = vadd.f32 %v21538_v15, %v9456_v40  ;;  %v9840_v15 = vadd.f32 %v21764_v51, %v9717_v54 }
 0xac6   : > { %v16479_v27 = vpop.f32.mrf.mxu0 }
 0xac7   : > { %v16563_v45 = vpop.f32.mrf.mxu1  ;;  %v9716_v49 = vadd.f32 %v9696_v52, %v9593_v58  ;;  %v13083_v58 = vld [vmem:[%s22372_s4] ss:$0 sm:$0xff] }
 0xac8   : > { %v9715_v45 = vadd.f32 %v9691_v29, %v9592_v8  ;;  %v9718_v29 = vadd.f32 %v9706_v12, %v9595_v23 }
 0xac9   : > { %v9937_v56 = vpop.f32.mrf.mxu0  ;;  %v9839_v34 = vadd.f32 %v9819_v21, %v9716_v49 }
 0xaca   : > { %v10070_v17 = vpop.f32.mrf.mxu1  ;;  %v9838_v33 = vadd.f32 %v9814_v63, %v9715_v45  ;;  %v9841_v21 = vadd.f32 %v9829_v13, %v9718_v29 }
 0xacb   : > { %v16529_v0 = vpop.f32.mrf.mxu0 }
 0xacc   : > { %v16566_v36 = vpop.f32.mrf.mxu1  ;;  %v9961_v4 = vadd.f32 %v9937_v56, %v9838_v33 }
 0xace   : > { %v10084_v30 = vadd.f32 %v10060_v35, %v9961_v4 }
 0xacf   : > { %v9942_v41 = vpop.f32.mrf.mxu0  ;;  %v10075_v39 = vpop.f32.mrf.mxu1 }
 0xad0   : > { %v9962_v44 = vadd.f32 %v9942_v41, %v9839_v34  ;;  %v9719_v34 = vadd.f32 %v9711_v43, %v21766_v3 }
 0xad1   : > { %v16532_v20 = vpop.f32.mrf.mxu0  ;;  %v16569_v22 = vpop.f32.mrf.mxu1 }
 0xad2   : > { %v10085_v50 = vadd.f32 %v10065_v18, %v9962_v44  ;;  %v9842_v45 = vadd.f32 %v21768_v26, %v9719_v34 }
 0xad4   : > { %v9947_v19 = vpop.f32.mrf.mxu0 }
 0xad5   : > { %v21771_v24 = vpop.f32.mrf.mxu1  ;;  %v9963_v63 = vadd.f32 %v9947_v19, %v9840_v15 }
 0xad6   : > { %v16535_v7 = vpop.f32.mrf.mxu0 }
 0xad7   : > { %v16572_v27 = vpop.f32.mrf.mxu1  ;;  %v10086_v41 = vadd.f32 %v10070_v17, %v9963_v63 }
 0xada   : > { %v9952_v0 = vpop.f32.mrf.mxu0 }
 0xadb   : > { %v10306_v36 = vpop.f32.mrf.mxu1  ;;  %v9964_v54 = vadd.f32 %v9952_v0, %v9841_v21  ;;  %v22731_v21 = vld [vmem:[#allocation31_spill] sm:$0xff] }
 0xadc   : > { %v16538_v20 = vpop.f32.mrf.mxu0 }
 0xadd   : > { %v16622_v60 = vpop.f32.mrf.mxu1  ;;  %v10087_v43 = vadd.f32 %v10075_v39, %v9964_v54  ;;  %v13120_v54 = vld [vmem:[%s22373_s5 + $0x60] sm:$0xff] }
 0xade   : > { %v9957_v22 = vpop.f32.mrf.mxu0 }
 0xadf   : > { %v10311_v11 = vpop.f32.mrf.mxu1  ;;  %v9965_v4 = vadd.f32 %v9957_v22, %v9842_v45  ;;  %v13117_v45 = vld [vmem:[%s22373_s5 + $0x48] sm:$0xff] }
 0xae0   : > { %v16541_v31 = vpop.f32.mrf.mxu0 }
 0xae1   : > { %v16625_v32 = vpop.f32.mrf.mxu1 }
 0xae2   : > { %v10183_v7 = vpop.f32.mrf.mxu0 }
 0xae3   : > { %v10316_v38 = vpop.f32.mrf.mxu1  ;;  %v10207_v40 = vadd.f32 %v10183_v7, %v10084_v30  ;;  %v10088_v7 = vadd.f32 %v21771_v24, %v9965_v4  ;;  %v13123_v24 = vld [vmem:[%s22373_s5 + $0x78] sm:$0xff] }
 0xae4   : > { %v16591_v60 = vpop.f32.mrf.mxu0  ;;  %v13145_v4 = vld [vmem:[%s22373_s5 + $0xf8] sm:$0xff] }
 0xae5   : > { %v16628_v33 = vpop.f32.mrf.mxu1  ;;  %v10330_v52 = vadd.f32 %v10306_v36, %v10207_v40 }
 0xae6   : > { %v10188_v49 = vpop.f32.mrf.mxu0 }
 0xae7   : > { %v10321_v31 = vpop.f32.mrf.mxu1  ;;  %v10342_v61 = vadd.f32 %v13083_v58, %v10330_v52  ;;  %v10208_v35 = vadd.f32 %v10188_v49, %v10085_v50 }
 0xae8   : > { %v16594_v23 = vpop.f32.mrf.mxu0 }
 0xae9   : > { %v16631_v12 = vpop.f32.mrf.mxu1  ;;  %v10347_v51 = vmax.f32 %v10342_v61, 0.0  ;;  %v10331_v56 = vadd.f32 %v10311_v11, %v10208_v35  ;;  %v13122_v61 = vld [vmem:[%s22373_s5 + $0x70] sm:$0xff]  ;;  %v13121_v23 = vld [vmem:[%s22373_s5 + $0x68] sm:$0xff] }
 0xaea   : > { %v10193_v8 = vpop.f32.mrf.mxu0  ;;  %v10727_v35 = vld [vmem:[%s22373_s5 + $0x30] sm:$0xff]  ;;  %v10726_v12 = vld [vmem:[%s22373_s5 + $0x28] sm:$0xff] }
 0xaeb   : > { %v10326_v27 = vpop.f32.mrf.mxu1  ;;  %10352 = vst [vmem:[#allocation4] sm:$0xff] %v10347_v51  ;;  %v10343_v19 = vadd.f32 %v13083_v58, %v10331_v56  ;;  %v10209_v18 = vadd.f32 %v10193_v8, %v10086_v41  ;;  %v10725_v51 = vld [vmem:[%s22373_s5 + $0x20] sm:$0xff]  ;;  %v13119_v56 = vld [vmem:[%s22373_s5 + $0x58] sm:$0xff]  ;;  %v13118_v8 = vld [vmem:[%s22373_s5 + $0x50] sm:$0xff] }
 0xaec   : > { %v16597_v36 = vpop.f32.mrf.mxu0  ;;  %v10724_v41 = vld [vmem:[%s22373_s5 + $0x18] sm:$0xff] }
 0xaed   : > { %v16634_v20 = vpop.f32.mrf.mxu1  ;;  %v10348_v3 = vmax.f32 %v10343_v19, 0.0  ;;  %v10332_v13 = vadd.f32 %v10316_v38, %v10209_v18  ;;  %v10722_v19 = vld [vmem:[%s22373_s5 + $0x8] sm:$0xff]  ;;  %v13116_v18 = vld [vmem:[%s22373_s5 + $0x40] sm:$0xff] }
 0xaee   : > { %v10198_v32 = vpop.f32.mrf.mxu0  ;;  %v10721_v36 = vld [vmem:[%s22373_s5] sm:$0xff]  ;;  %v13135_v20 = vld [vmem:[%s22373_s5 + $0xb8] sm:$0xff] }
 0xaef   : > { %10353 = vst [vmem:[#allocation4 + $0x8] sm:$0xff] %v10348_v3  ;;  %v10344_v44 = vadd.f32 %v13083_v58, %v10332_v13  ;;  %v10210_v0 = vadd.f32 %v10198_v32, %v10087_v43 }
 0xaf0   : > { %v16600_v30 = vpop.f32.mrf.mxu0 }
 0xaf1   : > { %v10349_v11 = vmax.f32 %v10344_v44, 0.0  ;;  %v10333_v17 = vadd.f32 %v10321_v31, %v10210_v0 }
 0xaf2   : > { %v10203_v29 = vpop.f32.mrf.mxu0  ;;  %v10357_v22 = vld [vmem:[#allocation4] ss:$2 sm:$0xf]  ;;  %v10358_v63 = vld [vmem:[#allocation4 + $0x1] ss:$2 sm:$0xf] }
 0xaf3   : > { %10354 = vst [vmem:[#allocation4 + $0x10] sm:$0xff] %v10349_v11  ;;  %v10345_v26 = vadd.f32 %v13083_v58, %v10333_v17  ;;  %v10211_v15 = vadd.f32 %v10203_v29, %v10088_v7  ;;  %v10359_v52 = vmax.f32 %v10357_v22, %v10358_v63  ;;  %v13134_v7 = vld [vmem:[%s22373_s5 + $0xb0] sm:$0xff]  ;;  %v13131_v22 = vld [vmem:[%s22373_s5 + $0x98] sm:$0xff] }
 0xaf4   : > { %v16603_v40 = vpop.f32.mrf.mxu0  ;;  %v13141_v63 = vld [vmem:[%s22373_s5 + $0xd8] sm:$0xff] }
 0xaf5   : > { %v10350_v60 = vmax.f32 %v10345_v26, 0.0  ;;  %v10334_v33 = vadd.f32 %v10326_v27, %v10211_v15  ;;  %v10723_v27 = vld [vmem:[%s22373_s5 + $0x10] sm:$0xff]  ;;  %v13133_v15 = vld [vmem:[%s22373_s5 + $0xa8] sm:$0xff] }
 0xaf6   : > { %v13144_v26 = vld [vmem:[%s22373_s5 + $0xf0] sm:$0xff]  ;;  %v13143_v40 = vld [vmem:[%s22373_s5 + $0xe8] sm:$0xff] }
 0xaf7   : > { %10355 = vst [vmem:[#allocation4 + $0x18] sm:$0xff] %v10350_v60  ;;  %v10346_v39 = vadd.f32 %v13083_v58, %v10334_v33  ;;  %v10728_v58 = vld [vmem:[%s22373_s5 + $0x38] sm:$0xff]  ;;  %v13132_v60 = vld [vmem:[%s22373_s5 + $0xa0] sm:$0xff] }
 0xaf8   : > { %v13142_v33 = vld [vmem:[%s22373_s5 + $0xe0] sm:$0xff] }
 0xaf9   : > { %v10351_v38 = vmax.f32 %v10346_v39, 0.0  ;;  %v13130_v39 = vld [vmem:[%s22373_s5 + $0x90] sm:$0xff] }
 0xafa   : > { %v10360_v50 = vld [vmem:[#allocation4 + $0xa] ss:$2 sm:$0xf]  ;;  %v10362_v34 = vld [vmem:[#allocation4 + $0xb] ss:$2 sm:$0xf] }
 0xafb   : > { %10356 = vst [vmem:[#allocation4 + $0x20] sm:$0x3f] %v10351_v38  ;;  %v10361_v49 = vmax.f32 %v10359_v52, %v10360_v50  ;;  %v13140_v38 = vld [vmem:[%s22373_s5 + $0xd0] sm:$0xff]  ;;  %v13129_v52 = vld [vmem:[%s22373_s5 + $0x88] sm:$0xff] }
 0xafc   : > { %v13139_v50 = vld [vmem:[%s22373_s5 + $0xc8] sm:$0xff] }
 0xafd   : > { %v10363_v31 = vmax.f32 %v10361_v49, %v10362_v34  ;;  %v13128_v49 = vld [vmem:[%s22373_s5 + $0x80] sm:$0xff] }
 0xafe   : > { %v13138_v34 = vld [vmem:[%s22373_s5 + $0xc0] sm:$0xff] }
 0xaff   : > { %16668 = vmatmul.mubr.f32.vlgmr.msra.gmra.mxu0 %v10363_v31  ;;  %16703 = vmatmul.mubr.f32.vlgmr.msra.gmra.mxu1 %v10363_v31  ;;  %v13155_v31 = vld [vmem:[%s22373_s5 + $0x138] sm:$0xff] }
 0xb00   : > { %16706 = vmatpush3.msra.mxu0 %v21543_v10  ;;  %16741 = vmatpush3.msra.mxu1 %v21548_v53  ;;  %v22719_v10 = vld [vmem:[#allocation19_spill] sm:$0xff] }
 0xb01   : > { %16707 = vmatprep.subr.mxu0 %v22689_v25  ;;  %16742 = vmatprep.subr.mxu1 %v22689_v25  ;;  %v22720_v53 = vld [vmem:[#allocation27_spill] sm:$0xff] }
 0xb02   : > { %16708 = vmatpush3.msra.mxu0 %v21557_v55  ;;  %16743 = vmatpush3.msra.mxu1 %v21562_v9  ;;  %v22721_v55 = vld [vmem:[#allocation44_spill] sm:$0xff]  ;;  %v10538_v9 = vld [vmem:[#allocation4 + $0x14] ss:$2 sm:$0xf] }
 0xb03   : > { %16709 = vmatprep.subr.mxu0 %v22689_v25  ;;  %16744 = vmatprep.subr.mxu1 %v22689_v25 }
 0xb04   : > { %16710 = vmatpush3.msra.mxu0 %v21571_v47  ;;  %16745 = vmatpush3.msra.mxu1 %v21576_v16  ;;  %v10539_v47 = vld [vmem:[#allocation4 + $0x15] ss:$2 sm:$0xf]  ;;  %v22722_v16 = vld [vmem:[#allocation30_spill] sm:$0xff] }
 0xb05   : > { %16711 = vmatprep.subr.mxu0 %v22689_v25  ;;  %16746 = vmatprep.subr.mxu1 %v22689_v25 }
 0xb06   : > { %16712 = vmatpush3.msra.mxu0 %v21585_v62  ;;  %16747 = vmatpush3.msra.mxu1 %v21590_v57  ;;  %v22723_v62 = vld [vmem:[#allocation24_spill] sm:$0xff]  ;;  %v10541_v57 = vld [vmem:[#allocation4 + $0x1e] ss:$2 sm:$0xf] }
 0xb07   : > { %16713 = vmatprep.subr.mxu0 %v22689_v25  ;;  %16748 = vmatprep.subr.mxu1 %v22689_v25 }
 0xb08   : > { %16714 = vmatpush3.msra.mxu0 %v21599_v59  ;;  %16749 = vmatpush3.msra.mxu1 %v21604_v46  ;;  %v22724_v59 = vld [vmem:[#allocation48_spill] sm:$0xff] }
 0xb09   : > { %16715 = vmatprep.subr.mxu0 %v22689_v25  ;;  %16750 = vmatprep.subr.mxu1 %v22689_v25  ;;  %v22725_v46 = vld [vmem:[#allocation28_spill] sm:$0xff] }
 0xb0a   : > { %16716 = vmatpush3.msra.mxu0 %v21613_v1  ;;  %16751 = vmatpush3.msra.mxu1 %v21618_v6  ;;  %v10540_v1 = vmax.f32 %v10538_v9, %v10539_v47  ;;  %v22726_v6 = vld [vmem:[#allocation46_spill] sm:$0xff]  ;;  %v13152_v47 = vld [vmem:[%s22373_s5 + $0x120] sm:$0xff] }
 0xb0b   : > { %16717 = vmatprep.subr.mxu0 %v22689_v25  ;;  %16752 = vmatprep.subr.mxu1 %v22689_v25  ;;  %v13153_v9 = vld [vmem:[%s22373_s5 + $0x128] sm:$0xff] }
 0xb0c   : > { %16718 = vmatpush3.msra.mxu0 %v21627_v2  ;;  %16753 = vmatpush3.msra.mxu1 %v21632_v14  ;;  %v22727_v2 = vld [vmem:[#allocation43_spill] sm:$0xff]  ;;  %v10542_v14 = vmax.f32 %v10540_v1, %v10541_v57 }
 0xb0d   : > { %16719 = vmatprep.subr.mxu0 %v22689_v25  ;;  %16754 = vmatprep.subr.mxu1 %v22689_v25  ;;  %v13151_v57 = vld [vmem:[%s22373_s5 + $0x118] sm:$0xff] }
 0xb0e   : > { %16720 = vmatpush3.msra.mxu0 %v21641_v37  ;;  %16755 = vmatpush3.msra.mxu1 %v21646_v5  ;;  %v22728_v37 = vld [vmem:[#allocation32_spill] sm:$0xff]  ;;  %v22729_v5 = vld [vmem:[#allocation29_spill] sm:$0xff] }
 0xb0f   : > { %16721 = vmatprep.subr.mxu0 %v22689_v25  ;;  %16756 = vmatprep.subr.mxu1 %v22689_v25 }
 0xb10   : > { %16722 = vmatpush3.msra.mxu0 %v21655_v48  ;;  %16757 = vmatpush3.msra.mxu1 %v21660_v28  ;;  %v10543_v48 = vld [vmem:[#allocation4 + $0x1f] ss:$2 sm:$0xf] }
 0xb11   : > { %16723 = vmatprep.subr.mxu0 %v22689_v25  ;;  %16758 = vmatprep.subr.mxu1 %v22689_v25  ;;  %v22730_v28 = vld [vmem:[#allocation47_spill] sm:$0xff] }
 0xb12   : > { %16724 = vmatpush3.msra.mxu0 %v21669_v42  ;;  %16759 = vmatpush3.msra.mxu1 %v22719_v10  ;;  %v10544_v42 = vmax.f32 %v10542_v14, %v10543_v48  ;;  %v13148_v14 = vld [vmem:[%s22373_s5 + $0x100] sm:$0xff] }
 0xb13   : > { %16725 = vmatprep.subr.mxu0 %v22689_v25  ;;  %16760 = vmatprep.subr.mxu1 %v22689_v25 }
 0xb14   : > { %16726 = vmatpush3.msra.mxu0 %v22720_v53  ;;  %16761 = vmatpush3.msra.mxu1 %v22721_v55  ;;  %v13154_v53 = vld [vmem:[%s22373_s5 + $0x130] sm:$0xff]  ;;  %v13165_v55 = vld [vmem:[%s22373_s5 + $0x178] sm:$0xff] }
 0xb15   : > { %16727 = vmatprep.subr.mxu0 %v22689_v25  ;;  %16762 = vmatprep.subr.mxu1 %v22689_v25 }
 0xb16   : > { %16728 = vmatpush3.msra.mxu0 %v22722_v16  ;;  %16763 = vmatpush3.msra.mxu1 %v22723_v62 }
 0xb17   : > { %16729 = vmatprep.subr.mxu0 %v22689_v25  ;;  %16764 = vmatprep.subr.mxu1 %v22689_v25 }
 0xb18   : > { %16730 = vmatpush3.msra.mxu0 %v22724_v59  ;;  %16765 = vmatpush3.msra.mxu1 %v22725_v46 }
 0xb19   : > { %16731 = vmatprep.subr.mxu0 %v22689_v25  ;;  %16766 = vmatprep.subr.mxu1 %v22689_v25 }
 0xb1a   : > { %16732 = vmatpush3.msra.mxu0 %v22726_v6  ;;  %16767 = vmatpush3.msra.mxu1 %v22727_v2  ;;  %v13150_v6 = vld [vmem:[%s22373_s5 + $0x110] sm:$0xff]  ;;  %v13149_v2 = vld [vmem:[%s22373_s5 + $0x108] sm:$0xff] }
 0xb1b   : > { %16733 = vmatprep.subr.mxu0 %v22689_v25  ;;  %16768 = vmatprep.subr.mxu1 %v22689_v25 }
 0xb1c   : > { %16734 = vmatpush3.msra.mxu0 %v22728_v37  ;;  %16769 = vmatpush3.msra.mxu1 %v22729_v5  ;;  %v13175_v37 = vld [vmem:[%s22373_s5 + $0x1b8] sm:$0xff] }
 0xb1d   : > { %16735 = vmatprep.subr.mxu0 %v22689_v25  ;;  %16770 = vmatprep.subr.mxu1 %v22689_v25 }
 0xb1e   : > { %16736 = vmatpush3.msra.mxu0 %v22730_v28  ;;  %16737 = vmatprep.mubr.msk.f32.mxu0 %vm17187_vm1, %v22689_v25 }
 0xb1f   : > { %16771 = vmatpush3.msra.mxu1 %v22731_v21  ;;  %16772 = vmatprep.mubr.msk.f32.mxu1 %vm17187_vm1, %v22689_v25  ;;  %v13174_v21 = vld [vmem:[%s22373_s5 + $0x1b0] sm:$0xff] }
 0xb20   : > { %16738 = vmatmul.mubr.f32.vlgmr.msra.gmra.mxu0 %v10544_v42  ;;  %16773 = vmatmul.mubr.f32.vlgmr.msra.gmra.mxu1 %v10544_v42 }
 0xb21   : > { %16775 = vmatprep.subr.mxu0 %v13123_v24  ;;  %16794 = vmatprep.subr.mxu1 %v10728_v58 }
 0xb22   : > { %16776 = vmatpush3.msra.mxu0 %v13123_v24  ;;  %16795 = vmatpush3.msra.mxu1 %v10728_v58  ;;  %v13164_v24 = vld [vmem:[%s22373_s5 + $0x170] sm:$0xff] }
 0xb23   : > { %16777 = vmatprep.subr.mxu0 %v13122_v61  ;;  %16796 = vmatprep.subr.mxu1 %v10727_v35 }
 0xb24   : > { %16778 = vmatpush3.msra.mxu0 %v13122_v61  ;;  %16797 = vmatpush3.msra.mxu1 %v10727_v35  ;;  %v13163_v35 = vld [vmem:[%s22373_s5 + $0x168] sm:$0xff] }
 0xb25   : > { %16779 = vmatprep.subr.mxu0 %v13121_v23  ;;  %16798 = vmatprep.subr.mxu1 %v10726_v12 }
 0xb26   : > { %16780 = vmatpush3.msra.mxu0 %v13121_v23  ;;  %16799 = vmatpush3.msra.mxu1 %v10726_v12  ;;  %v13173_v23 = vld [vmem:[%s22373_s5 + $0x1a8] sm:$0xff]  ;;  %v13162_v12 = vld [vmem:[%s22373_s5 + $0x160] sm:$0xff] }
 0xb27   : > { %16781 = vmatprep.subr.mxu0 %v13120_v54  ;;  %16800 = vmatprep.subr.mxu1 %v10725_v51 }
 0xb28   : > { %16782 = vmatpush3.msra.mxu0 %v13120_v54  ;;  %16801 = vmatpush3.msra.mxu1 %v10725_v51  ;;  %v13172_v54 = vld [vmem:[%s22373_s5 + $0x1a0] sm:$0xff]  ;;  %v13161_v51 = vld [vmem:[%s22373_s5 + $0x158] sm:$0xff] }
 0xb29   : > { %16783 = vmatprep.subr.mxu0 %v13119_v56  ;;  %16802 = vmatprep.subr.mxu1 %v10724_v41 }
 0xb2a   : > { %16784 = vmatpush3.msra.mxu0 %v13119_v56  ;;  %16803 = vmatpush3.msra.mxu1 %v10724_v41  ;;  %v13171_v56 = vld [vmem:[%s22373_s5 + $0x198] sm:$0xff]  ;;  %v13160_v41 = vld [vmem:[%s22373_s5 + $0x150] sm:$0xff] }
 0xb2b   : > { %16785 = vmatprep.subr.mxu0 %v13118_v8  ;;  %16804 = vmatprep.subr.mxu1 %v10723_v27 }
 0xb2c   : > { %16786 = vmatpush3.msra.mxu0 %v13118_v8  ;;  %16805 = vmatpush3.msra.mxu1 %v10723_v27  ;;  %v13170_v8 = vld [vmem:[%s22373_s5 + $0x190] sm:$0xff]  ;;  %v13159_v27 = vld [vmem:[%s22373_s5 + $0x148] sm:$0xff] }
 0xb2d   : > { %16787 = vmatprep.subr.mxu0 %v13117_v45  ;;  %16806 = vmatprep.subr.mxu1 %v10722_v19 }
 0xb2e   : > { %16788 = vmatpush3.msra.mxu0 %v13117_v45  ;;  %16807 = vmatpush3.msra.mxu1 %v10722_v19  ;;  %v13169_v45 = vld [vmem:[%s22373_s5 + $0x188] sm:$0xff]  ;;  %v13158_v19 = vld [vmem:[%s22373_s5 + $0x140] sm:$0xff] }
 0xb2f   : > { %16789 = vmatprep.subr.mxu0 %v13116_v18  ;;  %16808 = vmatprep.subr.mxu1 %v10721_v36 }
 0xb30   : > { %16790 = vmatpush3.msra.mxu0 %v13116_v18  ;;  %16809 = vmatpush3.msra.mxu1 %v10721_v36  ;;  %v13168_v18 = vld [vmem:[%s22373_s5 + $0x180] sm:$0xff]  ;;  %v13185_v36 = vld [vmem:[%s22373_s5 + $0x1f8] sm:$0xff] }
 0xb31   : > { %16813 = vmatprep.subr.mxu0 %v13135_v20  ;;  %16832 = vmatprep.subr.mxu1 %v13145_v4 }
 0xbbf   : > { %v10446_v3 = vpop.f32.mrf.mxu0  ;;  %v10532_v13 = vpop.f32.mrf.mxu1 }
 0xbc0   : > { %v10536_v43 = vmax.f32 %v10446_v3, %v10532_v13  ;;  %v13195_v3 = vld [vmem:[%s22373_s5 + $0x238] sm:$0xff]  ;;  %v13184_v13 = vld [vmem:[%s22373_s5 + $0x1f0] sm:$0xff] }
 0xbc1   : > { %v16669_v32 = vpop.f32.mrf.mxu0  ;;  %v16704_v44 = vpop.f32.mrf.mxu1 }
 0xbc2   : > { %10537 = vst.msk [vmem:[#allocation5 + $0x7] sm:$0xf] %vm480_vm3, %v10536_v43  ;;  %v13194_v32 = vld [vmem:[%s22373_s5 + $0x230] sm:$0xff] }
 0xbc9   : > { %v10729_v0 = vld [vmem:[#allocation5 + $0x1] sm:$0xff]  ;;  %v10730_v11 = vld [vmem:[#allocation5 + $0x9] sm:$0x3] }
 0xbca   : > { %v10719_v30 = vld [vmem:[#allocation5] sm:$0xff]  ;;  %16791 = vmatprep.mubr.msk.f32.mxu0 %vm472_vm2, %v10729_v0  ;;  %v10720_v17 = vld [vmem:[#allocation5 + $0x8] sm:$0x3]  ;;  %v10902_v10 = vld [vmem:[#allocation5 + $0xa] sm:$0x3] }
 0xbcb   : > { %16810 = vmatprep.mubr.msk.f32.mxu1 %vm472_vm2, %v10719_v30  ;;  %16792 = vmatmul.mubr.msk.f32.vlgmr.msra.gmra.mxu0 %vm472_vm2, %v10730_v11  ;;  %v10901_v29 = vld [vmem:[#allocation5 + $0x2] sm:$0xff]  ;;  %v13183_v0 = vld [vmem:[%s22373_s5 + $0x1e8] sm:$0xff] }
 0xbcc   : > { %16811 = vmatmul.mubr.msk.f32.vlgmr.msra.gmra.mxu1 %vm472_vm2, %v10720_v17  ;;  %16814 = vmatpush3.msra.mxu0 %v13135_v20  ;;  %v11274_v20 = vld [vmem:[#allocation5 + $0x14] sm:$0x3]  ;;  %v13182_v11 = vld [vmem:[%s22373_s5 + $0x1e0] sm:$0xff] }
 0xbcd   : > { %16829 = vmatprep.mubr.msk.f32.mxu0 %vm472_vm2, %v10901_v29  ;;  %16815 = vmatprep.subr.mxu0 %v13134_v7  ;;  %v13193_v30 = vld [vmem:[%s22373_s5 + $0x228] sm:$0xff]  ;;  %v13192_v17 = vld [vmem:[%s22373_s5 + $0x220] sm:$0xff]  ;;  %v13191_v29 = vld [vmem:[%s22373_s5 + $0x218] sm:$0xff] }
 0xbce   : > { %16833 = vmatpush3.msra.mxu1 %v13145_v4  ;;  %16816 = vmatpush3.msra.mxu0 %v13134_v7  ;;  %v13181_v7 = vld [vmem:[%s22373_s5 + $0x1d8] sm:$0xff] }
 0xbcf   : > { %16834 = vmatprep.subr.mxu1 %v13144_v26  ;;  %16817 = vmatprep.subr.mxu0 %v13133_v15 }
 0xbd0   : > { %16835 = vmatpush3.msra.mxu1 %v13144_v26  ;;  %16818 = vmatpush3.msra.mxu0 %v13133_v15  ;;  %v13180_v26 = vld [vmem:[%s22373_s5 + $0x1d0] sm:$0xff] }
 0xbd1   : > { %16836 = vmatprep.subr.mxu1 %v13143_v40  ;;  %16819 = vmatprep.subr.mxu0 %v13132_v60  ;;  %v13190_v15 = vld [vmem:[%s22373_s5 + $0x210] sm:$0xff] }
 0xbd2   : > { %16837 = vmatpush3.msra.mxu1 %v13143_v40  ;;  %16820 = vmatpush3.msra.mxu0 %v13132_v60  ;;  %v13179_v40 = vld [vmem:[%s22373_s5 + $0x1c8] sm:$0xff] }
 0xbd3   : > { %16838 = vmatprep.subr.mxu1 %v13142_v33  ;;  %16821 = vmatprep.subr.mxu0 %v13131_v22  ;;  %v13189_v60 = vld [vmem:[%s22373_s5 + $0x208] sm:$0xff] }
 0xbd4   : > { %16839 = vmatpush3.msra.mxu1 %v13142_v33  ;;  %16822 = vmatpush3.msra.mxu0 %v13131_v22  ;;  %v13178_v33 = vld [vmem:[%s22373_s5 + $0x1c0] sm:$0xff] }
 0xbd5   : > { %16840 = vmatprep.subr.mxu1 %v13141_v63  ;;  %16823 = vmatprep.subr.mxu0 %v13130_v39  ;;  %v13188_v22 = vld [vmem:[%s22373_s5 + $0x200] sm:$0xff] }
 0xbd6   : > { %16841 = vmatpush3.msra.mxu1 %v13141_v63  ;;  %16824 = vmatpush3.msra.mxu0 %v13130_v39  ;;  %v11367_v63 = vld [vmem:[#allocation5 + $0x15] sm:$0x3] }
 0xbd7   : > { %16842 = vmatprep.subr.mxu1 %v13140_v38  ;;  %16825 = vmatprep.subr.mxu0 %v13129_v52  ;;  %v11460_v39 = vld [vmem:[#allocation5 + $0x16] sm:$0x3] }
 0xbd8   : > { %16843 = vmatpush3.msra.mxu1 %v13140_v38  ;;  %16826 = vmatpush3.msra.mxu0 %v13129_v52  ;;  %v11588_v38 = vld [vmem:[%s22377_s9 + $0x78] sm:$0xff] }
 0xbd9   : > { %16844 = vmatprep.subr.mxu1 %v13139_v50  ;;  %16827 = vmatprep.subr.mxu0 %v13128_v49  ;;  %v13214_v52 = vld [vmem:[%s22377_s9 + $0xf8] sm:$0xff] }
 0xbda   : > { %16845 = vmatpush3.msra.mxu1 %v13139_v50  ;;  %16828 = vmatpush3.msra.mxu0 %v13128_v49  ;;  %v11587_v50 = vld [vmem:[%s22377_s9 + $0x70] sm:$0xff] }
 0xbdb   : > { %16846 = vmatprep.subr.mxu1 %v13138_v34  ;;  %16830 = vmatmul.mubr.msk.f32.vlgmr.msra.gmra.mxu0 %vm472_vm2, %v10902_v10  ;;  %v13213_v49 = vld [vmem:[%s22377_s9 + $0xf0] sm:$0xff]  ;;  %v11585_v10 = vld [vmem:[%s22377_s9 + $0x60] sm:$0xff] }
 0xbdc   : > { %16851 = vmatprep.subr.mxu0 %v13155_v31  ;;  %16847 = vmatpush3.msra.mxu1 %v13138_v34  ;;  %v11586_v34 = vld [vmem:[%s22377_s9 + $0x68] sm:$0xff] }
 0xbdd   : > { %16852 = vmatpush3.msra.mxu0 %v13155_v31  ;;  %16870 = vmatprep.subr.mxu1 %v13165_v55  ;;  %v13212_v31 = vld [vmem:[%s22377_s9 + $0xe8] sm:$0xff] }
 0xbde   : > { %16853 = vmatprep.subr.mxu0 %v13154_v53 }
 0xbdf   : > { %16854 = vmatpush3.msra.mxu0 %v13154_v53  ;;  %v13211_v53 = vld [vmem:[%s22377_s9 + $0xe0] sm:$0xff] }
 0xbe0   : > { %16855 = vmatprep.subr.mxu0 %v13153_v9  ;;  %v10627_v16 = vpop.f32.mrf.mxu0  ;;  %v10713_v62 = vpop.f32.mrf.mxu1 }
 0xbe1   : > { %16856 = vmatpush3.msra.mxu0 %v13153_v9  ;;  %v10717_v59 = vmax.f32 %v10627_v16, %v10713_v62  ;;  %v13210_v9 = vld [vmem:[%s22377_s9 + $0xd8] sm:$0xff]  ;;  %v13209_v16 = vld [vmem:[%s22377_s9 + $0xd0] sm:$0xff]  ;;  %v11582_v62 = vld [vmem:[%s22377_s9 + $0x48] sm:$0xff] }
 0xbe2   : > { %16857 = vmatprep.subr.mxu0 %v13152_v47  ;;  %v16739_v46 = vpop.f32.mrf.mxu0  ;;  %v16774_v1 = vpop.f32.mrf.mxu1 }
 0xbe3   : > { %16858 = vmatpush3.msra.mxu0 %v13152_v47  ;;  %10718 = vst.msk [vmem:[#allocation5 + $0xd] sm:$0xf] %vm480_vm3, %v10717_v59  ;;  %v11583_v47 = vld [vmem:[%s22377_s9 + $0x50] sm:$0xff]  ;;  %v11581_v59 = vld [vmem:[%s22377_s9 + $0x40] sm:$0xff]  ;;  %v11580_v1 = vld [vmem:[%s22377_s9 + $0x38] sm:$0xff] }
 0xbe4   : > { %16859 = vmatprep.subr.mxu0 %v13151_v57  ;;  %v13207_v46 = vld [vmem:[%s22377_s9 + $0xc0] sm:$0xff] }
 0xbe5   : > { %16860 = vmatpush3.msra.mxu0 %v13151_v57  ;;  %v13208_v57 = vld [vmem:[%s22377_s9 + $0xc8] sm:$0xff] }
 0xbe6   : > { %16861 = vmatprep.subr.mxu0 %v13150_v6 }
 0xbe7   : > { %16862 = vmatpush3.msra.mxu0 %v13150_v6  ;;  %v13206_v6 = vld [vmem:[%s22377_s9 + $0xb8] sm:$0xff] }
 0xbe8   : > { %16863 = vmatprep.subr.mxu0 %v13149_v2 }
 0xbe9   : > { %16864 = vmatpush3.msra.mxu0 %v13149_v2  ;;  %v11579_v2 = vld [vmem:[%s22377_s9 + $0x30] sm:$0xff] }
 0xbea   : > { %16865 = vmatprep.subr.mxu0 %v13148_v14  ;;  %v10994_v5 = vld [vmem:[#allocation5 + $0x6] sm:$0xff]  ;;  %v10995_v28 = vld [vmem:[#allocation5 + $0xe] sm:$0x3]  ;;  %v11181_v4 = vld [vmem:[#allocation5 + $0x10] sm:$0x3] }
 0xbeb   : > { %16866 = vmatpush3.msra.mxu0 %v13148_v14  ;;  %v11087_v48 = vld [vmem:[#allocation5 + $0x7] sm:$0xff]  ;;  %16848 = vmatprep.mubr.msk.f32.mxu1 %vm472_vm2, %v10994_v5  ;;  %v11088_v42 = vld [vmem:[#allocation5 + $0xf] sm:$0x3]  ;;  %v13205_v14 = vld [vmem:[%s22377_s9 + $0xb0] sm:$0xff] }
 0xbec   : > { %16867 = vmatprep.mubr.msk.f32.mxu0 %vm472_vm2, %v11087_v48  ;;  %16849 = vmatmul.mubr.msk.f32.vlgmr.msra.gmra.mxu1 %vm472_vm2, %v10995_v28  ;;  %v11180_v58 = vld [vmem:[#allocation5 + $0x8] sm:$0xff]  ;;  %v13204_v5 = vld [vmem:[%s22377_s9 + $0xa8] sm:$0xff] }
 0xbed   : > { %16868 = vmatmul.mubr.msk.f32.vlgmr.msra.gmra.mxu0 %vm472_vm2, %v11088_v42  ;;  %16871 = vmatpush3.msra.mxu1 %v13165_v55  ;;  %v11273_v61 = vld [vmem:[#allocation5 + $0xc] sm:$0xff]  ;;  %v11584_v55 = vld [vmem:[%s22377_s9 + $0x58] sm:$0xff] }
 0xbee   : > { %16889 = vmatprep.subr.mxu0 %v13175_v37  ;;  %16872 = vmatprep.subr.mxu1 %v13164_v24  ;;  %v11366_v43 = vld [vmem:[#allocation5 + $0xd] sm:$0xff]  ;;  %v11576_v42 = vld [vmem:[%s22377_s9 + $0x18] sm:$0xff] }
 0xbef   : > { %16886 = vmatprep.mubr.msk.f32.mxu1 %vm472_vm2, %v11180_v58  ;;  %16890 = vmatpush3.msra.mxu0 %v13175_v37  ;;  %v11459_v44 = vld [vmem:[#allocation5 + $0xe] sm:$0xff]  ;;  %v11575_v58 = vld [vmem:[%s22377_s9 + $0x10] sm:$0xff] }
 0xbf0   : > { %16905 = vmatprep.mubr.msk.f32.mxu0 %vm472_vm2, %v11273_v61  ;;  %16873 = vmatpush3.msra.mxu1 %v13164_v24  ;;  %v11578_v37 = vld [vmem:[%s22377_s9 + $0x28] sm:$0xff]  ;;  %v11577_v48 = vld [vmem:[%s22377_s9 + $0x20] sm:$0xff]  ;;  %v13202_v24 = vld [vmem:[%s22377_s9 + $0x98] sm:$0xff] }
 0xbf1   : > { %16891 = vmatprep.subr.mxu0 %v13174_v21  ;;  %16874 = vmatprep.subr.mxu1 %v13163_v35  ;;  %v13203_v28 = vld [vmem:[%s22377_s9 + $0xa0] sm:$0xff]  ;;  %v11574_v61 = vld [vmem:[%s22377_s9 + $0x8] sm:$0xff] }
 0xbf2   : > { %16892 = vmatpush3.msra.mxu0 %v13174_v21  ;;  %16875 = vmatpush3.msra.mxu1 %v13163_v35  ;;  %v13201_v21 = vld [vmem:[%s22377_s9 + $0x90] sm:$0xff]  ;;  %v13200_v35 = vld [vmem:[%s22377_s9 + $0x88] sm:$0xff] }
 0xbf3   : > { %16893 = vmatprep.subr.mxu0 %v13173_v23  ;;  %16876 = vmatprep.subr.mxu1 %v13162_v12 }
 0xbf4   : > { %16894 = vmatpush3.msra.mxu0 %v13173_v23  ;;  %16877 = vmatpush3.msra.mxu1 %v13162_v12  ;;  %v11573_v23 = vld [vmem:[%s22377_s9] sm:$0xff] }
 0xbf5   : > { %16895 = vmatprep.subr.mxu0 %v13172_v54  ;;  %16878 = vmatprep.subr.mxu1 %v13161_v51  ;;  %v13199_v12 = vld [vmem:[%s22377_s9 + $0x80] sm:$0xff] }
 0xbf6   : > { %16896 = vmatpush3.msra.mxu0 %v13172_v54  ;;  %16879 = vmatpush3.msra.mxu1 %v13161_v51 }
 0xbf7   : > { %16897 = vmatprep.subr.mxu0 %v13171_v56  ;;  %16880 = vmatprep.subr.mxu1 %v13160_v41 }
 0xbf8   : > { %16898 = vmatpush3.msra.mxu0 %v13171_v56  ;;  %16881 = vmatpush3.msra.mxu1 %v13160_v41 }
 0xbf9   : > { %16899 = vmatprep.subr.mxu0 %v13170_v8  ;;  %16882 = vmatprep.subr.mxu1 %v13159_v27 }
 0xbfa   : > { %16900 = vmatpush3.msra.mxu0 %v13170_v8  ;;  %16883 = vmatpush3.msra.mxu1 %v13159_v27 }
 0xbfb   : > { %16901 = vmatprep.subr.mxu0 %v13169_v45  ;;  %16884 = vmatprep.subr.mxu1 %v13158_v19 }
 0xbfc   : > { %16902 = vmatpush3.msra.mxu0 %v13169_v45  ;;  %16885 = vmatpush3.msra.mxu1 %v13158_v19 }
 0xbfd   : > { %16903 = vmatprep.subr.mxu0 %v13168_v18  ;;  %16887 = vmatmul.mubr.msk.f32.vlgmr.msra.gmra.mxu1 %vm472_vm2, %v11181_v4 }
 0xbfe   : > { %16904 = vmatpush3.msra.mxu0 %v13168_v18  ;;  %16908 = vmatprep.subr.mxu1 %v13185_v36 }
 0xbff   : > { %16906 = vmatmul.mubr.msk.f32.vlgmr.msra.gmra.mxu0 %vm472_vm2, %v11274_v20  ;;  %16909 = vmatpush3.msra.mxu1 %v13185_v36 }
 0xc00   : > { %16924 = vmatprep.mubr.msk.f32.mxu1 %vm472_vm2, %v11366_v43  ;;  %16927 = vmatprep.subr.mxu0 %v13195_v3 }
 0xc01   : > { %16910 = vmatprep.subr.mxu1 %v13184_v13  ;;  %16928 = vmatpush3.msra.mxu0 %v13195_v3 }
 0xc02   : > { %16943 = vmatprep.mubr.msk.f32.mxu0 %vm472_vm2, %v11459_v44  ;;  %16911 = vmatpush3.msra.mxu1 %v13184_v13 }
 0xc03   : > { %16929 = vmatprep.subr.mxu0 %v13194_v32  ;;  %16912 = vmatprep.subr.mxu1 %v13183_v0 }
 0xc04   : > { %16930 = vmatpush3.msra.mxu0 %v13194_v32  ;;  %16913 = vmatpush3.msra.mxu1 %v13183_v0 }
 0xc05   : > { %16931 = vmatprep.subr.mxu0 %v13193_v30  ;;  %16914 = vmatprep.subr.mxu1 %v13182_v11 }
 0xc06   : > { %16932 = vmatpush3.msra.mxu0 %v13193_v30  ;;  %16915 = vmatpush3.msra.mxu1 %v13182_v11 }
 0xc07   : > { %16933 = vmatprep.subr.mxu0 %v13192_v17  ;;  %16916 = vmatprep.subr.mxu1 %v13181_v7 }
 0xc08   : > { %16934 = vmatpush3.msra.mxu0 %v13192_v17  ;;  %16917 = vmatpush3.msra.mxu1 %v13181_v7 }
 0xc09   : > { %16935 = vmatprep.subr.mxu0 %v13191_v29  ;;  %16918 = vmatprep.subr.mxu1 %v13180_v26 }
 0xc0a   : > { %16936 = vmatpush3.msra.mxu0 %v13191_v29  ;;  %16919 = vmatpush3.msra.mxu1 %v13180_v26 }
 0xc0b   : > { %16937 = vmatprep.subr.mxu0 %v13190_v15  ;;  %16920 = vmatprep.subr.mxu1 %v13179_v40 }
 0xc0c   : > { %16938 = vmatpush3.msra.mxu0 %v13190_v15  ;;  %16921 = vmatpush3.msra.mxu1 %v13179_v40 }
 0xc0d   : > { %16939 = vmatprep.subr.mxu0 %v13189_v60  ;;  %16922 = vmatprep.subr.mxu1 %v13178_v33 }
 0xc0e   : > { %16940 = vmatpush3.msra.mxu0 %v13189_v60  ;;  %16923 = vmatpush3.msra.mxu1 %v13178_v33 }
 0xc0f   : > { %16941 = vmatprep.subr.mxu0 %v13188_v22  ;;  %16925 = vmatmul.mubr.msk.f32.vlgmr.msra.gmra.mxu1 %vm472_vm2, %v11367_v63  ;;  %v13198_v63 = vld [vmem:[%s22374_s6] ss:$0 sm:$0xff] }
 0xc10   : > { %16942 = vmatpush3.msra.mxu0 %v13188_v22  ;;  %16946 = vmatprep.subr.mxu1 %v22689_v25 }
 0xc11   : > { %16944 = vmatmul.mubr.msk.f32.vlgmr.msra.gmra.mxu0 %vm472_vm2, %v11460_v39  ;;  %16981 = vmatprep.subr.mxu0 %v22689_v25 }
 0xc12   : > { %16978 = vmatprep.mubr.msk.f32.mxu1 %vm17187_vm1, %v22689_v25  ;;  %17013 = vmatprep.mubr.msk.f32.mxu0 %vm17187_vm1, %v22689_v25 }
 0xc13   : > { %16947 = vmatpush3.msra.mxu1 %v11588_v38  ;;  %16982 = vmatpush3.msra.mxu0 %v13214_v52 }
 0xc14   : > { %16948 = vmatprep.subr.mxu1 %v22689_v25  ;;  %16983 = vmatprep.subr.mxu0 %v22689_v25 }
 0xc15   : > { %16949 = vmatpush3.msra.mxu1 %v11587_v50  ;;  %16984 = vmatpush3.msra.mxu0 %v13213_v49 }
 0xc16   : > { %16950 = vmatprep.subr.mxu1 %v22689_v25  ;;  %16985 = vmatprep.subr.mxu0 %v22689_v25 }
 0xc17   : > { %16951 = vmatpush3.msra.mxu1 %v11586_v34  ;;  %16986 = vmatpush3.msra.mxu0 %v13212_v31 }
 0xc18   : > { %16952 = vmatprep.subr.mxu1 %v22689_v25  ;;  %16987 = vmatprep.subr.mxu0 %v22689_v25 }
 0xc19   : > { %16953 = vmatpush3.msra.mxu1 %v11585_v10  ;;  %16988 = vmatpush3.msra.mxu0 %v13211_v53 }
 0xc1a   : > { %16954 = vmatprep.subr.mxu1 %v22689_v25  ;;  %16989 = vmatprep.subr.mxu0 %v22689_v25 }
 0xc1b   : > { %16955 = vmatpush3.msra.mxu1 %v11584_v55  ;;  %16990 = vmatpush3.msra.mxu0 %v13210_v9 }
 0xc1c   : > { %16956 = vmatprep.subr.mxu1 %v22689_v25  ;;  %16991 = vmatprep.subr.mxu0 %v22689_v25 }
 0xc1d   : > { %16957 = vmatpush3.msra.mxu1 %v11583_v47  ;;  %16992 = vmatpush3.msra.mxu0 %v13209_v16 }
 0xc1e   : > { %16958 = vmatprep.subr.mxu1 %v22689_v25  ;;  %16993 = vmatprep.subr.mxu0 %v22689_v25 }
 0xc1f   : > { %16959 = vmatpush3.msra.mxu1 %v11582_v62  ;;  %16994 = vmatpush3.msra.mxu0 %v13208_v57 }
 0xc20   : > { %16960 = vmatprep.subr.mxu1 %v22689_v25  ;;  %16995 = vmatprep.subr.mxu0 %v22689_v25 }
 0xc21   : > { %16961 = vmatpush3.msra.mxu1 %v11581_v59  ;;  %16996 = vmatpush3.msra.mxu0 %v13207_v46  ;;  %v11753_v46 = vld [vmem:[%s22378_s10 + $0x38] sm:$0xff] }
 0xc22   : > { %16962 = vmatprep.subr.mxu1 %v22689_v25  ;;  %16997 = vmatprep.subr.mxu0 %v22689_v25 }
 0xc23   : > { %16963 = vmatpush3.msra.mxu1 %v11580_v1  ;;  %16998 = vmatpush3.msra.mxu0 %v13206_v6  ;;  %v13223_v1 = vld [vmem:[%s22378_s10 + $0x78] sm:$0xff]  ;;  %v11752_v6 = vld [vmem:[%s22378_s10 + $0x30] sm:$0xff] }
 0xc24   : > { %16964 = vmatprep.subr.mxu1 %v22689_v25  ;;  %16999 = vmatprep.subr.mxu0 %v22689_v25 }
 0xc25   : > { %16965 = vmatpush3.msra.mxu1 %v11579_v2  ;;  %17000 = vmatpush3.msra.mxu0 %v13205_v14  ;;  %v13222_v2 = vld [vmem:[%s22378_s10 + $0x70] sm:$0xff]  ;;  %v11751_v14 = vld [vmem:[%s22378_s10 + $0x28] sm:$0xff] }
 0xc26   : > { %16966 = vmatprep.subr.mxu1 %v22689_v25  ;;  %17001 = vmatprep.subr.mxu0 %v22689_v25 }
 0xc27   : > { %16967 = vmatpush3.msra.mxu1 %v11578_v37  ;;  %17002 = vmatpush3.msra.mxu0 %v13204_v5  ;;  %v13221_v37 = vld [vmem:[%s22378_s10 + $0x68] sm:$0xff]  ;;  %v11750_v5 = vld [vmem:[%s22378_s10 + $0x20] sm:$0xff] }
 0xc28   : > { %16968 = vmatprep.subr.mxu1 %v22689_v25  ;;  %17003 = vmatprep.subr.mxu0 %v22689_v25 }
 0xc29   : > { %16969 = vmatpush3.msra.mxu1 %v11577_v48  ;;  %17004 = vmatpush3.msra.mxu0 %v13203_v28  ;;  %v13220_v48 = vld [vmem:[%s22378_s10 + $0x60] sm:$0xff]  ;;  %v11749_v28 = vld [vmem:[%s22378_s10 + $0x18] sm:$0xff] }
 0xc2a   : > { %16970 = vmatprep.subr.mxu1 %v22689_v25  ;;  %17005 = vmatprep.subr.mxu0 %v22689_v25 }
 0xc2b   : > { %16971 = vmatpush3.msra.mxu1 %v11576_v42  ;;  %17006 = vmatpush3.msra.mxu0 %v13202_v24  ;;  %v13219_v42 = vld [vmem:[%s22378_s10 + $0x58] sm:$0xff]  ;;  %v11748_v24 = vld [vmem:[%s22378_s10 + $0x10] sm:$0xff] }
 0xc2c   : > { %16972 = vmatprep.subr.mxu1 %v22689_v25  ;;  %17007 = vmatprep.subr.mxu0 %v22689_v25 }
 0xc2d   : > { %16973 = vmatpush3.msra.mxu1 %v11575_v58  ;;  %17008 = vmatpush3.msra.mxu0 %v13201_v21  ;;  %v11747_v58 = vld [vmem:[%s22378_s10 + $0x8] sm:$0xff]  ;;  %v13218_v21 = vld [vmem:[%s22378_s10 + $0x50] sm:$0xff] }
 0xc2e   : > { %16974 = vmatprep.subr.mxu1 %v22689_v25  ;;  %17009 = vmatprep.subr.mxu0 %v22689_v25 }
 0xc2f   : > { %16975 = vmatpush3.msra.mxu1 %v11574_v61  ;;  %17010 = vmatpush3.msra.mxu0 %v13200_v35  ;;  %v11746_v61 = vld [vmem:[%s22378_s10] sm:$0xff]  ;;  %v13217_v35 = vld [vmem:[%s22378_s10 + $0x48] sm:$0xff] }
 0xc30   : > { %16976 = vmatprep.subr.mxu1 %v22689_v25  ;;  %17011 = vmatprep.subr.mxu0 %v22689_v25 }
 0xc31   : > { %16977 = vmatpush3.msra.mxu1 %v11573_v23  ;;  %17012 = vmatpush3.msra.mxu0 %v13199_v12  ;;  %v13216_v23 = vld [vmem:[%s22378_s10 + $0x40] sm:$0xff] }
 0xc32   : > { %17016 = vmatprep.subr.mxu1 %v22689_v25  ;;  %17035 = vmatprep.subr.mxu0 %v22689_v25 }
 0xc8b   : > { %v16793_v54 = vpop.f32.mrf.mxu0 }
 0xc8c   : > { %v16812_v51 = vpop.f32.mrf.mxu1 }
 0xc8d   : > { %v10811_v56 = vpop.f32.mrf.mxu0  ;;  %v10898_v45 = vadd.f32 %v16812_v51, %v16793_v54 }
 0xc8e   : > { %v10892_v41 = vpop.f32.mrf.mxu1 }
 0xc8f   : > { %v10893_v18 = vadd.f32 %v10892_v41, %v10811_v56 }
 0xc9b   : > { %v16831_v8 = vpop.f32.mrf.mxu0 }
 0xc9c   : > { %v10993_v36 = vadd.f32 %v16831_v8, %v10898_v45  ;;  %v11913_v45 = vld [vmem:[%s22380_s12 + $0x10] sm:$0xff] }
 0xc9d   : > { %v10983_v19 = vpop.f32.mrf.mxu0 }
 0xc9e   : > { %v10992_v3 = vadd.f32 %v10983_v19, %v10893_v18  ;;  %v11912_v19 = vld [vmem:[%s22380_s12 + $0x8] sm:$0xff]  ;;  %v11911_v18 = vld [vmem:[%s22380_s12] sm:$0xff] }
 0xcac   : > { %v16850_v27 = vpop.f32.mrf.mxu1 }
 0xcad   : > { %v16869_v20 = vpop.f32.mrf.mxu0  ;;  %v11086_v13 = vadd.f32 %v16850_v27, %v10993_v36  ;;  %v11914_v27 = vld [vmem:[%s22380_s12 + $0x18] sm:$0xff]  ;;  %v11565_v36 = vld [vmem:[%s22379_s11] sm:$0x1] }
 0xcae   : > { %v11076_v4 = vpop.f32.mrf.mxu1 }
 0xcaf   : > { %v11085_v32 = vadd.f32 %v11076_v4, %v10992_v3  ;;  %v11169_v44 = vpop.f32.mrf.mxu0  ;;  %v11179_v0 = vadd.f32 %v16869_v20, %v11086_v13 }
 0xcb1   : > { %v11178_v17 = vadd.f32 %v11169_v44, %v11085_v32 }
 0xcbd   : > { %v16888_v43 = vpop.f32.mrf.mxu1 }
 0xcbe   : > { %v11272_v7 = vadd.f32 %v16888_v43, %v11179_v0 }
 0xcbf   : > { %v16907_v30 = vpop.f32.mrf.mxu0  ;;  %v11262_v11 = vpop.f32.mrf.mxu1 }
 0xcc0   : > { %v11271_v29 = vadd.f32 %v11262_v11, %v11178_v17  ;;  %v11365_v15 = vadd.f32 %v16907_v30, %v11272_v7 }
 0xcc1   : > { %v11355_v26 = vpop.f32.mrf.mxu0 }
 0xcc2   : > { %v11364_v60 = vadd.f32 %v11355_v26, %v11271_v29 }
 0xccf   : > { %v16926_v40 = vpop.f32.mrf.mxu1 }
 0xcd0   : > { %v11458_v33 = vadd.f32 %v16926_v40, %v11365_v15 }
 0xcd1   : > { %v16945_v22 = vpop.f32.mrf.mxu0  ;;  %v11448_v39 = vpop.f32.mrf.mxu1 }
 0xcd2   : > { %v11551_v38 = vadd.f32 %v16945_v22, %v11458_v33  ;;  %v11457_v52 = vadd.f32 %v11448_v39, %v11364_v60 }
 0xcd3   : > { %v11541_v50 = vpop.f32.mrf.mxu0 }
 0xcd4   : > { %v11560_v49 = vadd.f32 %v13198_v63, %v11551_v38  ;;  %v11550_v34 = vadd.f32 %v11541_v50, %v11457_v52 }
 0xcd6   : > { %v11562_v31 = vmax.f32 %v11560_v49, 0.0  ;;  %v11559_v10 = vadd.f32 %v13198_v63, %v11550_v34 }
 0xcd8   : > { %11564 = vst [vmem:[#allocation6 + $0x8] sm:$0x3] %v11562_v31  ;;  %v11561_v53 = vmax.f32 %v11559_v10, 0.0 }
 0xcda   : > { %11563 = vst [vmem:[#allocation6] sm:$0xff] %v11561_v53 }
 0xce1   : > { %v11566_v55 = vld [vmem:[#allocation6] ss:$2 sm:$0x3]  ;;  %v11567_v9 = vld [vmem:[#allocation6 + $0x1] ss:$2 sm:$0x3] }
 0xce2   : > { %v11568_v47 = vmax.f32 %v11566_v55, %v11567_v9  ;;  %v11569_v16 = vld [vmem:[#allocation6 + $0x6] ss:$2 sm:$0x3]  ;;  %v11571_v57 = vld [vmem:[#allocation6 + $0x7] ss:$2 sm:$0x3] }
 0xce4   : > { %v11570_v62 = vmax.f32 %v11568_v47, %v11569_v16 }
 0xce6   : > { %v11572_v59 = vmax.f32 %v11570_v62, %v11571_v57 }
 0xce8   : > { %16979 = vmatmul.mubr.f32.vlgmr.msra.gmra.mxu1 %v11572_v59  ;;  %17014 = vmatmul.mubr.f32.vlgmr.msra.gmra.mxu0 %v11572_v59 }
 0xce9   : > { %17017 = vmatpush3.msra.mxu1 %v11753_v46  ;;  %17036 = vmatpush3.msra.mxu0 %v13223_v1 }
 0xcea   : > { %17018 = vmatprep.subr.mxu1 %v22689_v25  ;;  %17037 = vmatprep.subr.mxu0 %v22689_v25 }
 0xceb   : > { %17019 = vmatpush3.msra.mxu1 %v11752_v6  ;;  %17038 = vmatpush3.msra.mxu0 %v13222_v2 }
 0xcec   : > { %17020 = vmatprep.subr.mxu1 %v22689_v25  ;;  %17039 = vmatprep.subr.mxu0 %v22689_v25 }
 0xced   : > { %17021 = vmatpush3.msra.mxu1 %v11751_v14  ;;  %17040 = vmatpush3.msra.mxu0 %v13221_v37 }
 0xcee   : > { %17022 = vmatprep.subr.mxu1 %v22689_v25  ;;  %17041 = vmatprep.subr.mxu0 %v22689_v25 }
 0xcef   : > { %17023 = vmatpush3.msra.mxu1 %v11750_v5  ;;  %17042 = vmatpush3.msra.mxu0 %v13220_v48 }
 0xcf0   : > { %17024 = vmatprep.subr.mxu1 %v22689_v25  ;;  %17043 = vmatprep.subr.mxu0 %v22689_v25 }
 0xcf1   : > { %17025 = vmatpush3.msra.mxu1 %v11749_v28  ;;  %17044 = vmatpush3.msra.mxu0 %v13219_v42 }
 0xcf2   : > { %17026 = vmatprep.subr.mxu1 %v22689_v25  ;;  %17045 = vmatprep.subr.mxu0 %v22689_v25 }
 0xcf3   : > { %17027 = vmatpush3.msra.mxu1 %v11748_v24  ;;  %17032 = vmatprep.mubr.msk.f32.mxu1 %vm17187_vm1, %v22689_v25 }
 0xcf4   : > { %17028 = vmatprep.subr.mxu1 %v22689_v25  ;;  %17051 = vmatprep.mubr.msk.f32.mxu0 %vm17187_vm1, %v22689_v25 }
 0xcf5   : > { %17029 = vmatpush3.msra.mxu1 %v11747_v58  ;;  %17046 = vmatpush3.msra.mxu0 %v13218_v21 }
 0xcf6   : > { %17030 = vmatprep.subr.mxu1 %v22689_v25  ;;  %17047 = vmatprep.subr.mxu0 %v22689_v25 }
 0xcf7   : > { %17031 = vmatpush3.msra.mxu1 %v11746_v61  ;;  %17048 = vmatpush3.msra.mxu0 %v13217_v35 }
 0xcf8   : > { %17049 = vmatprep.subr.mxu0 %v22689_v25  ;;  %17054 = vmatprep.subr.mxu1 %v22689_v25 }
 0xcf9   : > { %17050 = vmatpush3.msra.mxu0 %v13216_v23 }
 0xda8   : > { %v11655_v12 = vpop.f32.mrf.mxu1  ;;  %v11741_v54 = vpop.f32.mrf.mxu0 }
 0xda9   : > { %v11745_v51 = vmax.f32 %v11655_v12, %v11741_v54 }
 0xdaa   : > { %v16980_v56 = vpop.f32.mrf.mxu1  ;;  %v17015_v41 = vpop.f32.mrf.mxu0 }
 0xdab   : > { %v11836_v8 = vrot.slane %v11745_v51, 1  ;;  %17033 = vmatmul.mubr.msk.f32.vlgmr.msra.gmra.mxu1 %vm472_vm2, %v11745_v51 }
 0xdac   : > { %17062 = vmatprep.mubr.msk.f32.mxu1 %vm17187_vm1, %v22689_v25  ;;  %17055 = vmatpush3.msra.mxu1 %v11914_v27 }
 0xdad   : > { %17052 = vmatmul.mubr.msk.f32.vlgmr.msra.gmra.mxu0 %vm472_vm2, %v11836_v8  ;;  %17056 = vmatprep.subr.mxu1 %v22689_v25 }
 0xdae   : > { %17057 = vmatpush3.msra.mxu1 %v11913_v45 }
 0xdaf   : > { %17058 = vmatprep.subr.mxu1 %v22689_v25 }
 0xdb0   : > { %17059 = vmatpush3.msra.mxu1 %v11912_v19 }
 0xdb1   : > { %17060 = vmatprep.subr.mxu1 %v22689_v25  ;;  %v11915_v25 = vld [vmem:[%s22381_s13] sm:$0x1] }
 0xdb2   : > { %17061 = vmatpush3.msra.mxu1 %v11911_v18 }
 0xe6b   : > { %v11823_v20 = vpop.f32.mrf.mxu1 }
 0xe6c   : > { %v11827_v4 = vadd.f32 %v11823_v20, %v11565_v36 }
 0xe6d   : > { %v17034_v3 = vpop.f32.mrf.mxu1  ;;  %v11905_v13 = vpop.f32.mrf.mxu0 }
 0xe6e   : > { %v11909_v43 = vadd.f32 %v11905_v13, %v11827_v4 }
 0xe6f   : > { %v17053_v32 = vpop.f32.mrf.mxu0 }
 0xe70   : > { %v11910_v44 = vmax.f32 %v11909_v43, 0.0 }
 0xe72   : > { %17063 = vmatmul.mubr.msk.f32.vlgmr.msra.gmra.mxu1 %vm6189_vm4, %v11910_v44 }
 0xf32   : > { %v11985_v0 = vpop.f32.mrf.mxu1 }
 0xf33   : > { %v11986_v30 = vadd.f32 %v11985_v0, %v11915_v25 }
 0xf34   : > { %v17064_v11 = vpop.f32.mrf.mxu1 }
 0xf35   : > { %13226 = vst.msk [vmem:[%s20439_s21 + $0x1] sm:$0x1] %vm6263_vm5, %v11986_v30 }
 0xf36   : > { %17137 = shalt.err (!%p17134_p3)
}
 0xf37   : > { %s17138_s21 = scalar_lea.hbm %s22322_s22, 32  ;;  %s17142_s15 = scalar_lea.hbm %s22382_s14, 64 }
 0xf38   : > { %p17139_p4 = scmp.ne.s32.totalorder %s22322_s22, %s17138_s21  ;;  %p17143_p9 = scmp.lt.s32.totalorder %s22322_s22, %s22382_s14 }
 0xf39   : > { %p17144_p10 = scmp.lt.s32.totalorder %s17142_s15, %s17138_s21 }
 0xf3a   : > { %p17140_p7 = pnand %p17139_p4, %p17304_p5 }
 0xf3b   : > { %p17145_p11 = por %p17144_p10, %p17143_p9 }
 0xf3c   : > { %p17141_p8 = pneg %p17140_p7 }
 0xf3e   : > { %p17146_p12 = pnand %p17145_p11, %p17141_p8 }
 0xf40   : > { %17149 = shalt.err (!%p17146_p12)
}
 0xf41   : > { %s17189_s20 = smov 16   ;;  %s17190_s28 = smov 1  }
 0xf42   : > { %17066 = dma.vmem_to_hbm [thread:$0]  (%p17304_p5), %s22317_s26, 32, %s22322_s22, %s22328_s19, %s17189_s20, %s17189_s20, %s17190_s28  }
 0xf43 PF: > { %p17072_p13 = scmp.ge.s32.totalorder %s17184_s16, 2  ;;  %s12020_s18 = sand.u32 1, %s17172_s29  }
 0xf44   : > { %s12021_s21 = scalar_lea.sflag [#allocation8], %s12020_s18 }
 0xf45   : > { %p17069_p0 = pnand %p17072_p13, %p17308_p6 }
 0xf47   : > { %p17070_p1 = pneg %p17069_p0 }
 0xf49   : > { %17167 = dma.done.wait (%p17070_p1), %s12021_s21, 32  }
 0xf4a   : > { %17169 = vsyncadd (%p17070_p1), %s12021_s21, 4294967264  ;;  %s22733_s16 = sld [smem:[#allocation11_spill]]  ;;  %s22736_s29 = smov %s17176_s30 }
 0xf4b   : > { %s22734_s27 = sld [smem:[#allocation10_spill]] }
 0xf4c   : > { %s22735_s15 = sld [smem:[#allocation12_spill]] }
 0xf50   : > { %p24_p2 = scmp.ge.s32.totalorder %s22733_s16, 4  }
 0xf51   : > { %s22737_s30 = smov %s22734_s27 }
 0xf52   :  { %26 = sbr.rel (!%p24_p2) target bundleno = 5 (0x5), region = 166 }
 0xf57   :  { %12026 = vsyncpa [#allocation8], 1 }
 0xf58   :  { %12028 = vsyncpa [#allocation8 + $0x1], 1 }

</bundles_post_ra>
